<compile_context>
chip_gen: v6e
topology: v6e:2x2x1
jax: 0.10.0
libtpu: 0.0.40
codegen_flags: <defaults>
</compile_context>

<pallas_src>
import math
from functools import partial

import jax
import jax.numpy as jnp
from jax.experimental import pallas as pl
from jax.experimental.pallas import tpu as pltpu


def _round_up(x, m):
    return (x + m - 1) // m * m


def _pick_tile(dim_pad, cap, step):
    """Largest tile <= cap that divides dim_pad (both are multiples of step)."""
    t = min(cap, dim_pad)
    while dim_pad % t:
        t -= step
    return t


# -----------------------------------------------------------------------------
# Pallas kernel 1: tiled matmul + per-channel affine (+ optional ReLU) epilogue
# -----------------------------------------------------------------------------
def _mm_affine_kernel(x_ref, w_ref, scale_ref, shift_ref, o_ref, acc_ref, *, relu):
    @pl.when(pl.program_id(2) == 0)
    def _():
        acc_ref[...] = jnp.zeros_like(acc_ref)

    acc_ref[...] += jnp.dot(x_ref[...], w_ref[...],
                            preferred_element_type=jnp.float32)

    @pl.when(pl.program_id(2) == pl.num_programs(2) - 1)
    def _():
        y = acc_ref[...] * scale_ref[...] + shift_ref[...]
        if relu:
            y = jnp.maximum(y, 0.0)
        o_ref[...] = y.astype(o_ref.dtype)


def mm_affine(x, w_pad, scale_pad, shift_pad, n_out, *, relu=True,
              out_dtype=jnp.bfloat16, tm=256, tn=256, tk_cap=4096):
    """(M,K) @ (Kp,Np pre-packed bf16) * scale + shift [, ReLU] -> (M, n_out).

    bf16 MXU operands, fp32 VMEM scratch accumulator.  K runs as a single
    full-depth 'arbitrary' grid step whenever Kp <= tk_cap (all conv layers
    here), so there is no K-padding waste and no accumulator revisits.
    """
    M, K = x.shape
    Kp, Np = w_pad.shape
    Mp = _round_up(M, 8)

    tm = _pick_tile(Mp, tm, 8)
    tn = _pick_tile(Np, tn, 128)       # keep 256-wide N where possible (v6e/v7x MXU)
    tk = _pick_tile(Kp, tk_cap, 128)   # full-K tile for every layer at these sizes

    # v7x dual-TC: if the parallel grid collapsed to a single tile, split one
    # parallel axis (prefer N, fall back to M) so both TensorCores get work.
    # These layers are tiny / dispatch-bound, so the half-width MXU feed on
    # v6e is an acceptable trade.
    if Mp // tm == 1 and Np // tn == 1:
        if Np >= 256 and (Np // 2) % 128 == 0:
            tn = Np // 2
        elif Mp >= 16 and (Mp // 2) % 8 == 0:
            tm = Mp // 2

    xp = x.astype(jnp.bfloat16)
    if Mp != M or Kp != K:
        xp = jnp.pad(xp, ((0, Mp - M), (0, Kp - K)))

    out = pl.pallas_call(
        partial(_mm_affine_kernel, relu=relu),
        out_shape=jax.ShapeDtypeStruct((Mp, Np), out_dtype),
        grid_spec=pltpu.PrefetchScalarGridSpec(
            num_scalar_prefetch=0,
            grid=(Mp // tm, Np // tn, Kp // tk),
            in_specs=[
                pl.BlockSpec((tm, tk), lambda i, j, k: (i, k)),
                pl.BlockSpec((tk, tn), lambda i, j, k: (k, j)),
                pl.BlockSpec((1, tn), lambda i, j, k: (0, j)),
                pl.BlockSpec((1, tn), lambda i, j, k: (0, j)),
            ],
            out_specs=pl.BlockSpec((tm, tn), lambda i, j, k: (i, j)),
            scratch_shapes=[pltpu.VMEM((tm, tn), jnp.float32)],
        ),
        compiler_params=pltpu.CompilerParams(
            dimension_semantics=("parallel", "parallel", "arbitrary")),
    )(xp, w_pad, scale_pad, shift_pad)
    return out[:M, :n_out]


# -----------------------------------------------------------------------------
# Pallas kernel 2: CfC recurrence — single call, time loop inside the kernel.
# All operands (8,128)-dense; weights + (T,B,Bb) xproj slab resident in VMEM.
# -----------------------------------------------------------------------------
def _cfc_kernel(xp_ref, h0_ref, whh_ref, wheads_ref, bheads_ref,
                hseq_ref, hN_ref, *, T, Hp):
    def step(t, h):
        # backbone: hoisted x-projection (already includes b_bb) + h-projection
        bb = xp_ref[t] + jnp.dot(h.astype(jnp.bfloat16), whh_ref[...],
                                 preferred_element_type=jnp.float32)
        bb = 1.7159 * jnp.tanh(0.666 * bb)            # LeCun tanh (ncps constant)

        # fused ff1 | ff2 | time_a | time_b heads: one lane-dense (Bp, 4*Hp) matmul
        heads = (jnp.dot(bb.astype(jnp.bfloat16), wheads_ref[...],
                         preferred_element_type=jnp.float32) + bheads_ref[...])
        ff1 = jnp.tanh(heads[:, 0 * Hp:1 * Hp])
        ff2 = jnp.tanh(heads[:, 1 * Hp:2 * Hp])
        t_a = heads[:, 2 * Hp:3 * Hp]
        t_b = heads[:, 3 * Hp:4 * Hp]

        t_interp = jax.nn.sigmoid(t_a + t_b)          # timespans=None -> ts == 1
        h_new = ff1 * (1.0 - t_interp) + t_interp * ff2   # mode="default"

        hseq_ref[t] = h_new                           # per-step hidden output
        return h_new

    hN_ref[...] = jax.lax.fori_loop(0, T, step, h0_ref[...], unroll=True)


def cfc_recurrence(xproj, h0, w_hh, w_heads, b_heads):
    # xproj: (T, Bp, Bbp), h0: (Bp, Hp) -> h_seq: (T, Bp, Hp), hN: (Bp, Hp)
    T, Bp, Bbp = xproj.shape
    Hp = h0.shape[1]
    vmem = pl.BlockSpec(memory_space=pltpu.MemorySpace.VMEM)

    return pl.pallas_call(
        partial(_cfc_kernel, T=T, Hp=Hp),
        in_specs=[vmem] * 5,
        out_specs=(vmem, vmem),
        out_shape=(
            jax.ShapeDtypeStruct((T, Bp, Hp), jnp.float32),
            jax.ShapeDtypeStruct((Bp, Hp), jnp.float32),
        ),
    )(xproj, h0, w_hh, w_heads, b_heads)


# -----------------------------------------------------------------------------
# Glue: im2col (data rearrangement only) and ConvBlock / ConvCfC wrappers
# -----------------------------------------------------------------------------
def im2col(x, k=5, stride=2, pad=2):
    # x: (N, H, W, C) NHWC -> patches (N*OH*OW, k*k*C), flattened as (kh, kw, C)
    N, Hh, Ww, C = x.shape
    xp = jnp.pad(x, ((0, 0), (pad, pad), (pad, pad), (0, 0)))
    OH = (Hh + 2 * pad - k) // stride + 1
    OW = (Ww + 2 * pad - k) // stride + 1
    cols = []
    for i in range(k):
        for j in range(k):
            cols.append(xp[:, i:i + stride * OH:stride, j:j + stride * OW:stride, :])
    patches = jnp.stack(cols, axis=3)                 # (N, OH, OW, k*k, C)
    return patches.reshape(N * OH * OW, k * k * C), OH, OW


def conv_layer(x, layer, k=5, stride=2, pad=2):
    # x: (N, H, W, Cin) NHWC bf16; layer: pre-packed {"w","scale","shift","n"}
    N = x.shape[0]
    patches, OH, OW = im2col(x, k, stride, pad)
    y = mm_affine(patches, layer["w"], layer["scale"], layer["shift"],
                  layer["n"], relu=True, out_dtype=jnp.bfloat16)
    return y.reshape(N, OH, OW, layer["n"])


def conv_block(x_nchw, conv_params):
    # x_nchw: (N, 4, H, W) -> features (N, 256) fp32
    x = jnp.transpose(x_nchw, (0, 2, 3, 1)).astype(jnp.bfloat16)   # NCHW -> NHWC
    for layer in conv_params:
        x = conv_layer(x, layer)
    # Tiny spatial mean; plain jnp (a dedicated pallas_call costs more in
    # launch/DMA overhead than the reduction itself).  Accumulate in fp32.
    return jnp.mean(x.astype(jnp.float32), axis=(1, 2))            # mean over (-1,-2)


def conv_cfc_forward(x, params, hx=None):
    # x: (B, T, 4, H, W) ; returns (out (B, T, n_actions), hx (B, H_hidden))
    B, T = x.shape[0], x.shape[1]
    rp = params["rnn"]
    H, Hp, Bb, Bbp = rp["H"], rp["Hp"], rp["Bb"], rp["Bbp"]
    Bp = _round_up(B, 8)

    xf = x.reshape(B * T, *x.shape[2:])
    feat = conv_block(xf, params["conv"])                         # (B*T, 256) fp32

    # --- hoisted, h-independent backbone input projection: tiny, plain jnp
    xproj = feat @ rp["w_bb_x"] + rp["b_bb"]                      # (B*T, Bb)
    xproj = jnp.transpose(xproj.reshape(B, T, Bb), (1, 0, 2))     # (T, B, Bb)
    xproj = jnp.pad(xproj, ((0, 0), (0, Bp - B), (0, Bbp - Bb)))  # sublane/lane dense

    h0 = jnp.zeros((B, H), jnp.float32) if hx is None else hx.astype(jnp.float32)
    h0p = jnp.pad(h0, ((0, Bp - B), (0, Hp - H)))

    h_seq_p, hN_p = cfc_recurrence(xproj, h0p, rp["w_bb_h"],
                                   rp["w_heads"], rp["b_heads"])
    h_seq = h_seq_p[:, :B, :H]                                    # (T, B, H)
    hN = hN_p[:B, :H]

    # --- hoisted output projection: tiny, plain jnp
    out = jnp.einsum("tbh,ha->tba", h_seq, rp["w_proj"]) + rp["b_proj"]
    out = jnp.transpose(out, (1, 0, 2))                           # batch_first
    return out, hN


# -----------------------------------------------------------------------------
# One-time weight packing (layout transpose, BN fold, padding, bf16 cast, head
# fusion).  Run OUTSIDE the jitted forward.
# -----------------------------------------------------------------------------
def prepare_params(params, eps=1e-5):
    cp, rp = params["conv"], params["rnn"]

    def pack_conv(w_torch, scale, shift):
        Cout, Cin, kh, kw = w_torch.shape
        K, N = kh * kw * Cin, Cout
        Kp, Np = _round_up(K, 128), _round_up(N, 128)
        wm = jnp.transpose(w_torch, (2, 3, 1, 0)).reshape(K, N)
        wm = jnp.pad(wm, ((0, Kp - K), (0, Np - N))).astype(jnp.bfloat16)
        sp = jnp.pad(scale.reshape(1, -1).astype(jnp.float32), ((0, 0), (0, Np - N)))
        bp = jnp.pad(shift.reshape(1, -1).astype(jnp.float32), ((0, 0), (0, Np - N)))
        return {"w": wm, "scale": sp, "shift": bp, "n": N}

    s2 = cp["g2"] / jnp.sqrt(cp["v2"] + eps)
    s4 = cp["g4"] / jnp.sqrt(cp["v4"] + eps)
    conv = [
        pack_conv(cp["w1"], jnp.ones_like(cp["b1"]), cp["b1"]),
        pack_conv(cp["w2"], s2, (cp["b2"] - cp["m2"]) * s2 + cp["beta2"]),
        pack_conv(cp["w3"], jnp.ones_like(cp["b3"]), cp["b3"]),
        pack_conv(cp["w4"], s4, (cp["b4"] - cp["m4"]) * s4 + cp["beta4"]),
    ]

    H = rp["w_bb_h"].shape[0]                 # 64
    Bb = rp["w_bb_x"].shape[1]                # 128
    Hp, Bbp = _round_up(H, 128), _round_up(Bb, 128)

    def pad_head(w, b):                       # (Bb,H)->(Bbp,Hp), (1,H)->(1,Hp)
        return (jnp.pad(w, ((0, Bbp - Bb), (0, Hp - H))),
                jnp.pad(b, ((0, 0), (0, Hp - H))))

    wb = [pad_head(rp["w_" + n], rp["b_" + n]) for n in ("ff1", "ff2", "ta", "tb")]
    w_heads = jnp.concatenate([w for w, _ in wb], axis=1).astype(jnp.bfloat16)  # (Bbp,4Hp)
    b_heads = jnp.concatenate([b for _, b in wb], axis=1).astype(jnp.float32)   # (1,4Hp)
    w_bb_h = jnp.pad(rp["w_bb_h"], ((0, Hp - H), (0, Bbp - Bb))).astype(jnp.bfloat16)

    rnn = {
        "w_bb_x": rp["w_bb_x"].astype(jnp.float32),
        "b_bb": rp["b_bb"].astype(jnp.float32),
        "w_bb_h": w_bb_h, "w_heads": w_heads, "b_heads": b_heads,
        "w_proj": rp["w_proj"].astype(jnp.float32),
        "b_proj": rp["b_proj"].astype(jnp.float32),
        "H": H, "Hp": Hp, "Bb": Bb, "Bbp": Bbp,
    }
    return {"conv": conv, "rnn": rnn}


# -----------------------------------------------------------------------------
# Deterministic synthetic parameters (shapes from the PyTorch __init__)
# -----------------------------------------------------------------------------
def _u(key, shape, fan_in):
    bound = 1.0 / math.sqrt(fan_in)
    return jax.random.uniform(key, shape, jnp.float32, -bound, bound)


def init_params(key, n_actions):
    ks = iter(jax.random.split(key, 64))
    conv = {
        "w1": _u(next(ks), (64, 4, 5, 5), 4 * 25),   "b1": _u(next(ks), (64,), 4 * 25),
        "w2": _u(next(ks), (128, 64, 5, 5), 64 * 25), "b2": _u(next(ks), (128,), 64 * 25),
        "g2": 1.0 + 0.5 * jax.random.normal(next(ks), (128,), jnp.float32),
        "beta2": 0.1 * jax.random.normal(next(ks), (128,), jnp.float32),
        "m2": 0.1 * jax.random.normal(next(ks), (128,), jnp.float32),
        "v2": 1.0 + 0.1 * jax.random.uniform(next(ks), (128,), jnp.float32),
        "w3": _u(next(ks), (128, 128, 5, 5), 128 * 25), "b3": _u(next(ks), (128,), 128 * 25),
        "w4": _u(next(ks), (256, 128, 5, 5), 128 * 25), "b4": _u(next(ks), (256,), 128 * 25),
        "g4": 1.0 + 0.5 * jax.random.normal(next(ks), (256,), jnp.float32),
        "beta4": 0.1 * jax.random.normal(next(ks), (256,), jnp.float32),
        "m4": 0.1 * jax.random.normal(next(ks), (256,), jnp.float32),
        "v4": 1.0 + 0.1 * jax.random.uniform(next(ks), (256,), jnp.float32),
    }
    # CfC(256, 64, proj_size=n_actions), default backbone_units=128
    D, H, Bb, A = 256, 64, 128, n_actions
    rnn = {
        "w_bb_x": _u(next(ks), (D, Bb), D + H),
        "w_bb_h": _u(next(ks), (H, Bb), D + H),
        "b_bb": _u(next(ks), (1, Bb), D + H),
        "w_ff1": _u(next(ks), (Bb, H), Bb), "b_ff1": _u(next(ks), (1, H), Bb),
        "w_ff2": _u(next(ks), (Bb, H), Bb), "b_ff2": _u(next(ks), (1, H), Bb),
        "w_ta": _u(next(ks), (Bb, H), Bb), "b_ta": _u(next(ks), (1, H), Bb),
        "w_tb": _u(next(ks), (Bb, H), Bb), "b_tb": _u(next(ks), (1, H), Bb),
        "w_proj": _u(next(ks), (H, A), H), "b_proj": _u(next(ks), (1, A), H),
    }
    return {"conv": conv, "rnn": rnn}


# -----------------------------------------------------------------------------
if __name__ == "__main__":
    n_actions = 4
    B, T, C, Hs, Ws = 2, 4, 4, 32, 32

    params = init_params(jax.random.PRNGKey(0), n_actions)
    packed = prepare_params(params)          # one-time weight packing (outside jit)
    x = jax.random.normal(jax.random.PRNGKey(0), (B, T, C, Hs, Ws), jnp.float32)

    fwd = jax.jit(partial(conv_cfc_forward, params=packed))
    out, hN = fwd(x)
    out, hN = jax.block_until_ready((out, hN))

    assert out.shape == (B, T, n_actions), out.shape
    assert hN.shape == (B, 64), hN.shape
    assert bool(jnp.all(jnp.isfinite(out))) and bool(jnp.all(jnp.isfinite(hN)))
    print("KERNEL_OK")
</pallas_src>

<mosaic_0001>
module attributes {stable_mosaic.version = 11 : i64} {
  func.func @_mm_affine_kernel(%arg0: i32, %arg1: i32, %arg2: i32, %arg3: memref<256x128xbf16, #tpu.memory_space<vmem>>, %arg4: memref<128x128xbf16, #tpu.memory_space<vmem>>, %arg5: memref<1x128xf32, #tpu.memory_space<vmem>>, %arg6: memref<1x128xf32, #tpu.memory_space<vmem>>, %arg7: memref<256x128xbf16, #tpu.memory_space<vmem>>, %arg8: memref<256x128xf32, #tpu.memory_space<vmem>>) attributes {dimension_semantics = [#tpu.dimension_semantics<parallel>, #tpu.dimension_semantics<parallel>, #tpu.dimension_semantics<arbitrary>], iteration_bounds = array<i64: 8, 1, 1>, scalar_prefetch = 0 : i64, scratch_operands = 1 : i64, tpu.core_type = #tpu.core_type<tc>, window_params = [{transform_indices = @transform_0, window_bounds = array<i64: 256, 128>}, {transform_indices = @transform_1, window_bounds = array<i64: 128, 128>}, {transform_indices = @transform_2, window_bounds = array<i64: 1, 128>}, {transform_indices = @transform_3, window_bounds = array<i64: 1, 128>}, {transform_indices = @transform_4, window_bounds = array<i64: 256, 128>}]} {
    %c0_i32 = arith.constant 0 : i32
    %0 = arith.cmpi eq, %arg2, %c0_i32 : i32
    %1 = arith.extui %0 : i1 to i32
    %c0_i32_0 = arith.constant 0 : i32
    %2 = arith.cmpi ne, %1, %c0_i32_0 : i32
    scf.if %2 {
      %cst_10 = arith.constant 0.000000e+00 : f32
      %12 = vector.broadcast %cst_10 : f32 to vector<256x128xf32>
      %c0_11 = arith.constant 0 : index
      %c0_12 = arith.constant 0 : index
      %13 = vector.load %arg8[%c0_11, %c0_12] : memref<256x128xf32, #tpu.memory_space<vmem>>, vector<256x128xf32>
      tpu.vector_store %arg8[%c0_11, %c0_12], %12 {strides = array<i32>} : memref<256x128xf32, #tpu.memory_space<vmem>>, vector<256x128xf32>,
    } else {
    }
    %c0 = arith.constant 0 : index
    %c0_1 = arith.constant 0 : index
    %3 = vector.load %arg8[%c0, %c0_1] : memref<256x128xf32, #tpu.memory_space<vmem>>, vector<256x128xf32>
    %c0_2 = arith.constant 0 : index
    %c0_3 = arith.constant 0 : index
    %4 = vector.load %arg3[%c0_2, %c0_3] : memref<256x128xbf16, #tpu.memory_space<vmem>>, vector<256x128xbf16>
    %c0_4 = arith.constant 0 : index
    %c0_5 = arith.constant 0 : index
    %5 = vector.load %arg4[%c0_4, %c0_5] : memref<128x128xbf16, #tpu.memory_space<vmem>>, vector<128x128xbf16>
    %cst = arith.constant dense<0.000000e+00> : vector<256x128xf32>
    %6 = tpu.matmul %4, %5, %cst {dimension_numbers = #tpu.dot_dimension_numbers<[1], [0], [0], [1], [0, 0, 1, 1], [], []>} : vector<256x128xbf16>, vector<128x128xbf16>, vector<256x128xf32> -> vector<256x128xf32>
    %7 = arith.addf %3, %6 : vector<256x128xf32>
    %c0_6 = arith.constant 0 : index
    %c0_7 = arith.constant 0 : index
    %8 = vector.load %arg8[%c0_6, %c0_7] : memref<256x128xf32, #tpu.memory_space<vmem>>, vector<256x128xf32>
    tpu.vector_store %arg8[%c0_6, %c0_7], %7 {strides = array<i32>} : memref<256x128xf32, #tpu.memory_space<vmem>>, vector<256x128xf32>,
    %c0_i32_8 = arith.constant 0 : i32
    %9 = arith.cmpi eq, %arg2, %c0_i32_8 : i32
    %10 = arith.extui %9 : i1 to i32
    %c0_i32_9 = arith.constant 0 : i32
    %11 = arith.cmpi ne, %10, %c0_i32_9 : i32
    scf.if %11 {
      %c0_10 = arith.constant 0 : index
      %c0_11 = arith.constant 0 : index
      %12 = vector.load %arg8[%c0_10, %c0_11] : memref<256x128xf32, #tpu.memory_space<vmem>>, vector<256x128xf32>
      %c0_12 = arith.constant 0 : index
      %c0_13 = arith.constant 0 : index
      %13 = vector.load %arg5[%c0_12, %c0_13] : memref<1x128xf32, #tpu.memory_space<vmem>>, vector<1x128xf32>
      %14 = vector.broadcast %13 : vector<1x128xf32> to vector<256x128xf32>
      %15 = arith.mulf %12, %14 : vector<256x128xf32>
      %c0_14 = arith.constant 0 : index
      %c0_15 = arith.constant 0 : index
      %16 = vector.load %arg6[%c0_14, %c0_15] : memref<1x128xf32, #tpu.memory_space<vmem>>, vector<1x128xf32>
      %17 = vector.broadcast %16 : vector<1x128xf32> to vector<256x128xf32>
      %18 = arith.addf %15, %17 : vector<256x128xf32>
      %cst_16 = arith.constant 0.000000e+00 : f32
      %19 = vector.broadcast %cst_16 : f32 to vector<256x128xf32>
      %20 = arith.maximumf %18, %19 : vector<256x128xf32>
      %21 = arith.truncf %20 : vector<256x128xf32> to vector<256x128xbf16>
      %c0_17 = arith.constant 0 : index
      %c0_18 = arith.constant 0 : index
      %22 = vector.load %arg7[%c0_17, %c0_18] : memref<256x128xbf16, #tpu.memory_space<vmem>>, vector<256x128xbf16>
      tpu.vector_store %arg7[%c0_17, %c0_18], %21 {strides = array<i32>} : memref<256x128xbf16, #tpu.memory_space<vmem>>, vector<256x128xbf16>,
    } else {
    }
    return
  }
  func.func @transform_0(%arg0: i32, %arg1: i32, %arg2: i32) -> (i32, i32) {
    %c0_i32 = arith.constant 0 : i32
    return %arg0, %arg2 : i32, i32
  }
  func.func @transform_1(%arg0: i32, %arg1: i32, %arg2: i32) -> (i32, i32) {
    %c0_i32 = arith.constant 0 : i32
    return %arg2, %arg1 : i32, i32
  }
  func.func @transform_2(%arg0: i32, %arg1: i32, %arg2: i32) -> (i32, i32) {
    %c0_i32 = arith.constant 0 : i32
    %c0_i32_0 = arith.constant 0 : i32
    return %c0_i32, %arg1 : i32, i32
  }
  func.func @transform_3(%arg0: i32, %arg1: i32, %arg2: i32) -> (i32, i32) {
    %c0_i32 = arith.constant 0 : i32
    %c0_i32_0 = arith.constant 0 : i32
    return %c0_i32, %arg1 : i32, i32
  }
  func.func @transform_4(%arg0: i32, %arg1: i32, %arg2: i32) -> (i32, i32) {
    %c0_i32 = arith.constant 0 : i32
    return %arg0, %arg1 : i32, i32
  }
}

module attributes {stable_mosaic.version = 11 : i64} {
  func.func @_mm_affine_kernel(%arg0: i32, %arg1: i32, %arg2: i32, %arg3: memref<256x1664xbf16, #tpu.memory_space<vmem>>, %arg4: memref<1664x128xbf16, #tpu.memory_space<vmem>>, %arg5: memref<1x128xf32, #tpu.memory_space<vmem>>, %arg6: memref<1x128xf32, #tpu.memory_space<vmem>>, %arg7: memref<256x128xbf16, #tpu.memory_space<vmem>>, %arg8: memref<256x128xf32, #tpu.memory_space<vmem>>) attributes {dimension_semantics = [#tpu.dimension_semantics<parallel>, #tpu.dimension_semantics<parallel>, #tpu.dimension_semantics<arbitrary>], iteration_bounds = array<i64: 2, 1, 1>, scalar_prefetch = 0 : i64, scratch_operands = 1 : i64, tpu.core_type = #tpu.core_type<tc>, window_params = [{transform_indices = @transform_0, window_bounds = array<i64: 256, 1664>}, {transform_indices = @transform_1, window_bounds = array<i64: 1664, 128>}, {transform_indices = @transform_2, window_bounds = array<i64: 1, 128>}, {transform_indices = @transform_3, window_bounds = array<i64: 1, 128>}, {transform_indices = @transform_4, window_bounds = array<i64: 256, 128>}]} {
    %c0_i32 = arith.constant 0 : i32
    %0 = arith.cmpi eq, %arg2, %c0_i32 : i32
    %1 = arith.extui %0 : i1 to i32
    %c0_i32_0 = arith.constant 0 : i32
    %2 = arith.cmpi ne, %1, %c0_i32_0 : i32
    scf.if %2 {
      %cst_10 = arith.constant 0.000000e+00 : f32
      %12 = vector.broadcast %cst_10 : f32 to vector<256x128xf32>
      %c0_11 = arith.constant 0 : index
      %c0_12 = arith.constant 0 : index
      %13 = vector.load %arg8[%c0_11, %c0_12] : memref<256x128xf32, #tpu.memory_space<vmem>>, vector<256x128xf32>
      tpu.vector_store %arg8[%c0_11, %c0_12], %12 {strides = array<i32>} : memref<256x128xf32, #tpu.memory_space<vmem>>, vector<256x128xf32>,
    } else {
    }
    %c0 = arith.constant 0 : index
    %c0_1 = arith.constant 0 : index
    %3 = vector.load %arg8[%c0, %c0_1] : memref<256x128xf32, #tpu.memory_space<vmem>>, vector<256x128xf32>
    %c0_2 = arith.constant 0 : index
    %c0_3 = arith.constant 0 : index
    %4 = vector.load %arg3[%c0_2, %c0_3] : memref<256x1664xbf16, #tpu.memory_space<vmem>>, vector<256x1664xbf16>
    %c0_4 = arith.constant 0 : index
    %c0_5 = arith.constant 0 : index
    %5 = vector.load %arg4[%c0_4, %c0_5] : memref<1664x128xbf16, #tpu.memory_space<vmem>>, vector<1664x128xbf16>
    %cst = arith.constant dense<0.000000e+00> : vector<256x128xf32>
    %6 = tpu.matmul %4, %5, %cst {dimension_numbers = #tpu.dot_dimension_numbers<[1], [0], [0], [1], [0, 0, 1, 1], [], []>} : vector<256x1664xbf16>, vector<1664x128xbf16>, vector<256x128xf32> -> vector<256x128xf32>
    %7 = arith.addf %3, %6 : vector<256x128xf32>
    %c0_6 = arith.constant 0 : index
    %c0_7 = arith.constant 0 : index
    %8 = vector.load %arg8[%c0_6, %c0_7] : memref<256x128xf32, #tpu.memory_space<vmem>>, vector<256x128xf32>
    tpu.vector_store %arg8[%c0_6, %c0_7], %7 {strides = array<i32>} : memref<256x128xf32, #tpu.memory_space<vmem>>, vector<256x128xf32>,
    %c0_i32_8 = arith.constant 0 : i32
    %9 = arith.cmpi eq, %arg2, %c0_i32_8 : i32
    %10 = arith.extui %9 : i1 to i32
    %c0_i32_9 = arith.constant 0 : i32
    %11 = arith.cmpi ne, %10, %c0_i32_9 : i32
    scf.if %11 {
      %c0_10 = arith.constant 0 : index
      %c0_11 = arith.constant 0 : index
      %12 = vector.load %arg8[%c0_10, %c0_11] : memref<256x128xf32, #tpu.memory_space<vmem>>, vector<256x128xf32>
      %c0_12 = arith.constant 0 : index
      %c0_13 = arith.constant 0 : index
      %13 = vector.load %arg5[%c0_12, %c0_13] : memref<1x128xf32, #tpu.memory_space<vmem>>, vector<1x128xf32>
      %14 = vector.broadcast %13 : vector<1x128xf32> to vector<256x128xf32>
      %15 = arith.mulf %12, %14 : vector<256x128xf32>
      %c0_14 = arith.constant 0 : index
      %c0_15 = arith.constant 0 : index
      %16 = vector.load %arg6[%c0_14, %c0_15] : memref<1x128xf32, #tpu.memory_space<vmem>>, vector<1x128xf32>
      %17 = vector.broadcast %16 : vector<1x128xf32> to vector<256x128xf32>
      %18 = arith.addf %15, %17 : vector<256x128xf32>
      %cst_16 = arith.constant 0.000000e+00 : f32
      %19 = vector.broadcast %cst_16 : f32 to vector<256x128xf32>
      %20 = arith.maximumf %18, %19 : vector<256x128xf32>
      %21 = arith.truncf %20 : vector<256x128xf32> to vector<256x128xbf16>
      %c0_17 = arith.constant 0 : index
      %c0_18 = arith.constant 0 : index
      %22 = vector.load %arg7[%c0_17, %c0_18] : memref<256x128xbf16, #tpu.memory_space<vmem>>, vector<256x128xbf16>
      tpu.vector_store %arg7[%c0_17, %c0_18], %21 {strides = array<i32>} : memref<256x128xbf16, #tpu.memory_space<vmem>>, vector<256x128xbf16>,
    } else {
    }
    return
  }
  func.func @transform_0(%arg0: i32, %arg1: i32, %arg2: i32) -> (i32, i32) {
    %c0_i32 = arith.constant 0 : i32
    return %arg0, %arg2 : i32, i32
  }
  func.func @transform_1(%arg0: i32, %arg1: i32, %arg2: i32) -> (i32, i32) {
    %c0_i32 = arith.constant 0 : i32
    return %arg2, %arg1 : i32, i32
  }
  func.func @transform_2(%arg0: i32, %arg1: i32, %arg2: i32) -> (i32, i32) {
    %c0_i32 = arith.constant 0 : i32
    %c0_i32_0 = arith.constant 0 : i32
    return %c0_i32, %arg1 : i32, i32
  }
  func.func @transform_3(%arg0: i32, %arg1: i32, %arg2: i32) -> (i32, i32) {
    %c0_i32 = arith.constant 0 : i32
    %c0_i32_0 = arith.constant 0 : i32
    return %c0_i32, %arg1 : i32, i32
  }
  func.func @transform_4(%arg0: i32, %arg1: i32, %arg2: i32) -> (i32, i32) {
    %c0_i32 = arith.constant 0 : i32
    return %arg0, %arg1 : i32, i32
  }
}

module attributes {stable_mosaic.version = 11 : i64} {
  func.func @_mm_affine_kernel(%arg0: i32, %arg1: i32, %arg2: i32, %arg3: memref<64x3200xbf16, #tpu.memory_space<vmem>>, %arg4: memref<3200x128xbf16, #tpu.memory_space<vmem>>, %arg5: memref<1x128xf32, #tpu.memory_space<vmem>>, %arg6: memref<1x128xf32, #tpu.memory_space<vmem>>, %arg7: memref<64x128xbf16, #tpu.memory_space<vmem>>, %arg8: memref<64x128xf32, #tpu.memory_space<vmem>>) attributes {dimension_semantics = [#tpu.dimension_semantics<parallel>, #tpu.dimension_semantics<parallel>, #tpu.dimension_semantics<arbitrary>], iteration_bounds = array<i64: 2, 1, 1>, scalar_prefetch = 0 : i64, scratch_operands = 1 : i64, tpu.core_type = #tpu.core_type<tc>, window_params = [{transform_indices = @transform_0, window_bounds = array<i64: 64, 3200>}, {transform_indices = @transform_1, window_bounds = array<i64: 3200, 128>}, {transform_indices = @transform_2, window_bounds = array<i64: 1, 128>}, {transform_indices = @transform_3, window_bounds = array<i64: 1, 128>}, {transform_indices = @transform_4, window_bounds = array<i64: 64, 128>}]} {
    %c0_i32 = arith.constant 0 : i32
    %0 = arith.cmpi eq, %arg2, %c0_i32 : i32
    %1 = arith.extui %0 : i1 to i32
    %c0_i32_0 = arith.constant 0 : i32
    %2 = arith.cmpi ne, %1, %c0_i32_0 : i32
    scf.if %2 {
      %cst_10 = arith.constant 0.000000e+00 : f32
      %12 = vector.broadcast %cst_10 : f32 to vector<64x128xf32>
      %c0_11 = arith.constant 0 : index
      %c0_12 = arith.constant 0 : index
      %13 = vector.load %arg8[%c0_11, %c0_12] : memref<64x128xf32, #tpu.memory_space<vmem>>, vector<64x128xf32>
      tpu.vector_store %arg8[%c0_11, %c0_12], %12 {strides = array<i32>} : memref<64x128xf32, #tpu.memory_space<vmem>>, vector<64x128xf32>,
    } else {
    }
    %c0 = arith.constant 0 : index
    %c0_1 = arith.constant 0 : index
    %3 = vector.load %arg8[%c0, %c0_1] : memref<64x128xf32, #tpu.memory_space<vmem>>, vector<64x128xf32>
    %c0_2 = arith.constant 0 : index
    %c0_3 = arith.constant 0 : index
    %4 = vector.load %arg3[%c0_2, %c0_3] : memref<64x3200xbf16, #tpu.memory_space<vmem>>, vector<64x3200xbf16>
    %c0_4 = arith.constant 0 : index
    %c0_5 = arith.constant 0 : index
    %5 = vector.load %arg4[%c0_4, %c0_5] : memref<3200x128xbf16, #tpu.memory_space<vmem>>, vector<3200x128xbf16>
    %cst = arith.constant dense<0.000000e+00> : vector<64x128xf32>
    %6 = tpu.matmul %4, %5, %cst {dimension_numbers = #tpu.dot_dimension_numbers<[1], [0], [0], [1], [0, 0, 1, 1], [], []>} : vector<64x3200xbf16>, vector<3200x128xbf16>, vector<64x128xf32> -> vector<64x128xf32>
    %7 = arith.addf %3, %6 : vector<64x128xf32>
    %c0_6 = arith.constant 0 : index
    %c0_7 = arith.constant 0 : index
    %8 = vector.load %arg8[%c0_6, %c0_7] : memref<64x128xf32, #tpu.memory_space<vmem>>, vector<64x128xf32>
    tpu.vector_store %arg8[%c0_6, %c0_7], %7 {strides = array<i32>} : memref<64x128xf32, #tpu.memory_space<vmem>>, vector<64x128xf32>,
    %c0_i32_8 = arith.constant 0 : i32
    %9 = arith.cmpi eq, %arg2, %c0_i32_8 : i32
    %10 = arith.extui %9 : i1 to i32
    %c0_i32_9 = arith.constant 0 : i32
    %11 = arith.cmpi ne, %10, %c0_i32_9 : i32
    scf.if %11 {
      %c0_10 = arith.constant 0 : index
      %c0_11 = arith.constant 0 : index
      %12 = vector.load %arg8[%c0_10, %c0_11] : memref<64x128xf32, #tpu.memory_space<vmem>>, vector<64x128xf32>
      %c0_12 = arith.constant 0 : index
      %c0_13 = arith.constant 0 : index
      %13 = vector.load %arg5[%c0_12, %c0_13] : memref<1x128xf32, #tpu.memory_space<vmem>>, vector<1x128xf32>
      %14 = vector.broadcast %13 : vector<1x128xf32> to vector<64x128xf32>
      %15 = arith.mulf %12, %14 : vector<64x128xf32>
      %c0_14 = arith.constant 0 : index
      %c0_15 = arith.constant 0 : index
      %16 = vector.load %arg6[%c0_14, %c0_15] : memref<1x128xf32, #tpu.memory_space<vmem>>, vector<1x128xf32>
      %17 = vector.broadcast %16 : vector<1x128xf32> to vector<64x128xf32>
      %18 = arith.addf %15, %17 : vector<64x128xf32>
      %cst_16 = arith.constant 0.000000e+00 : f32
      %19 = vector.broadcast %cst_16 : f32 to vector<64x128xf32>
      %20 = arith.maximumf %18, %19 : vector<64x128xf32>
      %21 = arith.truncf %20 : vector<64x128xf32> to vector<64x128xbf16>
      %c0_17 = arith.constant 0 : index
      %c0_18 = arith.constant 0 : index
      %22 = vector.load %arg7[%c0_17, %c0_18] : memref<64x128xbf16, #tpu.memory_space<vmem>>, vector<64x128xbf16>
      tpu.vector_store %arg7[%c0_17, %c0_18], %21 {strides = array<i32>} : memref<64x128xbf16, #tpu.memory_space<vmem>>, vector<64x128xbf16>,
    } else {
    }
    return
  }
  func.func @transform_0(%arg0: i32, %arg1: i32, %arg2: i32) -> (i32, i32) {
    %c0_i32 = arith.constant 0 : i32
    return %arg0, %arg2 : i32, i32
  }
  func.func @transform_1(%arg0: i32, %arg1: i32, %arg2: i32) -> (i32, i32) {
    %c0_i32 = arith.constant 0 : i32
    return %arg2, %arg1 : i32, i32
  }
  func.func @transform_2(%arg0: i32, %arg1: i32, %arg2: i32) -> (i32, i32) {
    %c0_i32 = arith.constant 0 : i32
    %c0_i32_0 = arith.constant 0 : i32
    return %c0_i32, %arg1 : i32, i32
  }
  func.func @transform_3(%arg0: i32, %arg1: i32, %arg2: i32) -> (i32, i32) {
    %c0_i32 = arith.constant 0 : i32
    %c0_i32_0 = arith.constant 0 : i32
    return %c0_i32, %arg1 : i32, i32
  }
  func.func @transform_4(%arg0: i32, %arg1: i32, %arg2: i32) -> (i32, i32) {
    %c0_i32 = arith.constant 0 : i32
    return %arg0, %arg1 : i32, i32
  }
}

module attributes {stable_mosaic.version = 11 : i64} {
  func.func @_mm_affine_kernel(%arg0: i32, %arg1: i32, %arg2: i32, %arg3: memref<32x3200xbf16, #tpu.memory_space<vmem>>, %arg4: memref<3200x128xbf16, #tpu.memory_space<vmem>>, %arg5: memref<1x128xf32, #tpu.memory_space<vmem>>, %arg6: memref<1x128xf32, #tpu.memory_space<vmem>>, %arg7: memref<32x128xbf16, #tpu.memory_space<vmem>>, %arg8: memref<32x128xf32, #tpu.memory_space<vmem>>) attributes {dimension_semantics = [#tpu.dimension_semantics<parallel>, #tpu.dimension_semantics<parallel>, #tpu.dimension_semantics<arbitrary>], iteration_bounds = array<i64: 1, 2, 1>, scalar_prefetch = 0 : i64, scratch_operands = 1 : i64, tpu.core_type = #tpu.core_type<tc>, window_params = [{transform_indices = @transform_0, window_bounds = array<i64: 32, 3200>}, {transform_indices = @transform_1, window_bounds = array<i64: 3200, 128>}, {transform_indices = @transform_2, window_bounds = array<i64: 1, 128>}, {transform_indices = @transform_3, window_bounds = array<i64: 1, 128>}, {transform_indices = @transform_4, window_bounds = array<i64: 32, 128>}]} {
    %c0_i32 = arith.constant 0 : i32
    %0 = arith.cmpi eq, %arg2, %c0_i32 : i32
    %1 = arith.extui %0 : i1 to i32
    %c0_i32_0 = arith.constant 0 : i32
    %2 = arith.cmpi ne, %1, %c0_i32_0 : i32
    scf.if %2 {
      %cst_10 = arith.constant 0.000000e+00 : f32
      %12 = vector.broadcast %cst_10 : f32 to vector<32x128xf32>
      %c0_11 = arith.constant 0 : index
      %c0_12 = arith.constant 0 : index
      %13 = vector.load %arg8[%c0_11, %c0_12] : memref<32x128xf32, #tpu.memory_space<vmem>>, vector<32x128xf32>
      tpu.vector_store %arg8[%c0_11, %c0_12], %12 {strides = array<i32>} : memref<32x128xf32, #tpu.memory_space<vmem>>, vector<32x128xf32>,
    } else {
    }
    %c0 = arith.constant 0 : index
    %c0_1 = arith.constant 0 : index
    %3 = vector.load %arg8[%c0, %c0_1] : memref<32x128xf32, #tpu.memory_space<vmem>>, vector<32x128xf32>
    %c0_2 = arith.constant 0 : index
    %c0_3 = arith.constant 0 : index
    %4 = vector.load %arg3[%c0_2, %c0_3] : memref<32x3200xbf16, #tpu.memory_space<vmem>>, vector<32x3200xbf16>
    %c0_4 = arith.constant 0 : index
    %c0_5 = arith.constant 0 : index
    %5 = vector.load %arg4[%c0_4, %c0_5] : memref<3200x128xbf16, #tpu.memory_space<vmem>>, vector<3200x128xbf16>
    %cst = arith.constant dense<0.000000e+00> : vector<32x128xf32>
    %6 = tpu.matmul %4, %5, %cst {dimension_numbers = #tpu.dot_dimension_numbers<[1], [0], [0], [1], [0, 0, 1, 1], [], []>} : vector<32x3200xbf16>, vector<3200x128xbf16>, vector<32x128xf32> -> vector<32x128xf32>
    %7 = arith.addf %3, %6 : vector<32x128xf32>
    %c0_6 = arith.constant 0 : index
    %c0_7 = arith.constant 0 : index
    %8 = vector.load %arg8[%c0_6, %c0_7] : memref<32x128xf32, #tpu.memory_space<vmem>>, vector<32x128xf32>
    tpu.vector_store %arg8[%c0_6, %c0_7], %7 {strides = array<i32>} : memref<32x128xf32, #tpu.memory_space<vmem>>, vector<32x128xf32>,
    %c0_i32_8 = arith.constant 0 : i32
    %9 = arith.cmpi eq, %arg2, %c0_i32_8 : i32
    %10 = arith.extui %9 : i1 to i32
    %c0_i32_9 = arith.constant 0 : i32
    %11 = arith.cmpi ne, %10, %c0_i32_9 : i32
    scf.if %11 {
      %c0_10 = arith.constant 0 : index
      %c0_11 = arith.constant 0 : index
      %12 = vector.load %arg8[%c0_10, %c0_11] : memref<32x128xf32, #tpu.memory_space<vmem>>, vector<32x128xf32>
      %c0_12 = arith.constant 0 : index
      %c0_13 = arith.constant 0 : index
      %13 = vector.load %arg5[%c0_12, %c0_13] : memref<1x128xf32, #tpu.memory_space<vmem>>, vector<1x128xf32>
      %14 = vector.broadcast %13 : vector<1x128xf32> to vector<32x128xf32>
      %15 = arith.mulf %12, %14 : vector<32x128xf32>
      %c0_14 = arith.constant 0 : index
      %c0_15 = arith.constant 0 : index
      %16 = vector.load %arg6[%c0_14, %c0_15] : memref<1x128xf32, #tpu.memory_space<vmem>>, vector<1x128xf32>
      %17 = vector.broadcast %16 : vector<1x128xf32> to vector<32x128xf32>
      %18 = arith.addf %15, %17 : vector<32x128xf32>
      %cst_16 = arith.constant 0.000000e+00 : f32
      %19 = vector.broadcast %cst_16 : f32 to vector<32x128xf32>
      %20 = arith.maximumf %18, %19 : vector<32x128xf32>
      %21 = arith.truncf %20 : vector<32x128xf32> to vector<32x128xbf16>
      %c0_17 = arith.constant 0 : index
      %c0_18 = arith.constant 0 : index
      %22 = vector.load %arg7[%c0_17, %c0_18] : memref<32x128xbf16, #tpu.memory_space<vmem>>, vector<32x128xbf16>
      tpu.vector_store %arg7[%c0_17, %c0_18], %21 {strides = array<i32>} : memref<32x128xbf16, #tpu.memory_space<vmem>>, vector<32x128xbf16>,
    } else {
    }
    return
  }
  func.func @transform_0(%arg0: i32, %arg1: i32, %arg2: i32) -> (i32, i32) {
    %c0_i32 = arith.constant 0 : i32
    return %arg0, %arg2 : i32, i32
  }
  func.func @transform_1(%arg0: i32, %arg1: i32, %arg2: i32) -> (i32, i32) {
    %c0_i32 = arith.constant 0 : i32
    return %arg2, %arg1 : i32, i32
  }
  func.func @transform_2(%arg0: i32, %arg1: i32, %arg2: i32) -> (i32, i32) {
    %c0_i32 = arith.constant 0 : i32
    %c0_i32_0 = arith.constant 0 : i32
    return %c0_i32, %arg1 : i32, i32
  }
  func.func @transform_3(%arg0: i32, %arg1: i32, %arg2: i32) -> (i32, i32) {
    %c0_i32 = arith.constant 0 : i32
    %c0_i32_0 = arith.constant 0 : i32
    return %c0_i32, %arg1 : i32, i32
  }
  func.func @transform_4(%arg0: i32, %arg1: i32, %arg2: i32) -> (i32, i32) {
    %c0_i32 = arith.constant 0 : i32
    return %arg0, %arg1 : i32, i32
  }
}

module attributes {stable_mosaic.version = 11 : i64} {
  func.func @_cfc_kernel(%arg0: memref<4x8x128xf32, #tpu.memory_space<vmem>>, %arg1: memref<8x128xf32, #tpu.memory_space<vmem>>, %arg2: memref<128x128xbf16, #tpu.memory_space<vmem>>, %arg3: memref<128x512xbf16, #tpu.memory_space<vmem>>, %arg4: memref<1x512xf32, #tpu.memory_space<vmem>>, %arg5: memref<4x8x128xf32, #tpu.memory_space<vmem>>, %arg6: memref<8x128xf32, #tpu.memory_space<vmem>>) attributes {dimension_semantics = [], scalar_prefetch = 0 : i64, scratch_operands = 0 : i64, tpu.core_type = #tpu.core_type<tc>} {
    %c0 = arith.constant 0 : index
    %c0_0 = arith.constant 0 : index
    %0 = vector.load %arg1[%c0, %c0_0] : memref<8x128xf32, #tpu.memory_space<vmem>>, vector<8x128xf32>
    %c0_i32 = arith.constant 0 : i32
    %1 = arith.index_cast %c0_i32 : i32 to index
    %c0_1 = arith.constant 0 : index
    %c0_2 = arith.constant 0 : index
    %2 = vector.load %arg0[%1, %c0_1, %c0_2] : memref<4x8x128xf32, #tpu.memory_space<vmem>>, vector<1x8x128xf32>
    %3 = vector.shape_cast %2 : vector<1x8x128xf32> to vector<8x128xf32>
    %4 = arith.truncf %0 : vector<8x128xf32> to vector<8x128xbf16>
    %c0_3 = arith.constant 0 : index
    %c0_4 = arith.constant 0 : index
    %5 = vector.load %arg2[%c0_3, %c0_4] : memref<128x128xbf16, #tpu.memory_space<vmem>>, vector<128x128xbf16>
    %cst = arith.constant dense<0.000000e+00> : vector<8x128xf32>
    %6 = tpu.matmul %4, %5, %cst {dimension_numbers = #tpu.dot_dimension_numbers<[1], [0], [0], [1], [0, 0, 1, 1], [], []>} : vector<8x128xbf16>, vector<128x128xbf16>, vector<8x128xf32> -> vector<8x128xf32>
    %7 = arith.addf %3, %6 : vector<8x128xf32>
    %cst_5 = arith.constant 6.660000e-01 : f32
    %8 = vector.broadcast %cst_5 : f32 to vector<8x128xf32>
    %9 = arith.mulf %8, %7 : vector<8x128xf32>
    %10 = math.tanh %9 : vector<8x128xf32>
    %cst_6 = arith.constant 1.715900e+00 : f32
    %11 = vector.broadcast %cst_6 : f32 to vector<8x128xf32>
    %12 = arith.mulf %11, %10 : vector<8x128xf32>
    %13 = arith.truncf %12 : vector<8x128xf32> to vector<8x128xbf16>
    %c0_7 = arith.constant 0 : index
    %c0_8 = arith.constant 0 : index
    %14 = vector.load %arg3[%c0_7, %c0_8] : memref<128x512xbf16, #tpu.memory_space<vmem>>, vector<128x512xbf16>
    %cst_9 = arith.constant dense<0.000000e+00> : vector<8x512xf32>
    %15 = tpu.matmul %13, %14, %cst_9 {dimension_numbers = #tpu.dot_dimension_numbers<[1], [0], [0], [1], [0, 0, 1, 1], [], []>} : vector<8x128xbf16>, vector<128x512xbf16>, vector<8x512xf32> -> vector<8x512xf32>
    %c0_10 = arith.constant 0 : index
    %c0_11 = arith.constant 0 : index
    %16 = vector.load %arg4[%c0_10, %c0_11] : memref<1x512xf32, #tpu.memory_space<vmem>>, vector<1x512xf32>
    %17 = vector.broadcast %16 : vector<1x512xf32> to vector<8x512xf32>
    %18 = arith.addf %15, %17 : vector<8x512xf32>
    %19 = vector.extract_strided_slice %18 {offsets = [0, 0], sizes = [8, 128], strides = [1, 1]} : vector<8x512xf32> to vector<8x128xf32>
    %20 = math.tanh %19 : vector<8x128xf32>
    %21 = vector.extract_strided_slice %18 {offsets = [0, 128], sizes = [8, 128], strides = [1, 1]} : vector<8x512xf32> to vector<8x128xf32>
    %22 = math.tanh %21 : vector<8x128xf32>
    %23 = vector.extract_strided_slice %18 {offsets = [0, 256], sizes = [8, 128], strides = [1, 1]} : vector<8x512xf32> to vector<8x128xf32>
    %24 = vector.extract_strided_slice %18 {offsets = [0, 384], sizes = [8, 128], strides = [1, 1]} : vector<8x512xf32> to vector<8x128xf32>
    %25 = arith.addf %23, %24 : vector<8x128xf32>
    %26 = arith.negf %25 : vector<8x128xf32>
    %27 = math.exp %26 : vector<8x128xf32>
    %cst_12 = arith.constant 1.000000e+00 : f32
    %28 = vector.broadcast %cst_12 : f32 to vector<8x128xf32>
    %29 = arith.addf %28, %27 : vector<8x128xf32>
    %30 = arith.divf %28, %29 : vector<8x128xf32>
    %cst_13 = arith.constant 1.000000e+00 : f32
    %31 = vector.broadcast %cst_13 : f32 to vector<8x128xf32>
    %32 = arith.subf %31, %30 : vector<8x128xf32>
    %33 = arith.mulf %20, %32 : vector<8x128xf32>
    %34 = arith.mulf %30, %22 : vector<8x128xf32>
    %35 = arith.addf %33, %34 : vector<8x128xf32>
    %36 = arith.index_cast %c0_i32 : i32 to index
    %c0_14 = arith.constant 0 : index
    %c0_15 = arith.constant 0 : index
    %37 = vector.load %arg5[%36, %c0_14, %c0_15] : memref<4x8x128xf32, #tpu.memory_space<vmem>>, vector<1x8x128xf32>
    %38 = vector.shape_cast %37 : vector<1x8x128xf32> to vector<8x128xf32>
    %39 = vector.shape_cast %35 : vector<8x128xf32> to vector<1x8x128xf32>
    tpu.vector_store %arg5[%36, %c0_14, %c0_15], %39 {strides = array<i32>} : memref<4x8x128xf32, #tpu.memory_space<vmem>>, vector<1x8x128xf32>,
    %c1_i32 = arith.constant 1 : i32
    %40 = arith.index_cast %c1_i32 : i32 to index
    %c0_16 = arith.constant 0 : index
    %c0_17 = arith.constant 0 : index
    %41 = vector.load %arg0[%40, %c0_16, %c0_17] : memref<4x8x128xf32, #tpu.memory_space<vmem>>, vector<1x8x128xf32>
    %42 = vector.shape_cast %41 : vector<1x8x128xf32> to vector<8x128xf32>
    %43 = arith.truncf %35 : vector<8x128xf32> to vector<8x128xbf16>
    %c0_18 = arith.constant 0 : index
    %c0_19 = arith.constant 0 : index
    %44 = vector.load %arg2[%c0_18, %c0_19] : memref<128x128xbf16, #tpu.memory_space<vmem>>, vector<128x128xbf16>
    %cst_20 = arith.constant dense<0.000000e+00> : vector<8x128xf32>
    %45 = tpu.matmul %43, %44, %cst_20 {dimension_numbers = #tpu.dot_dimension_numbers<[1], [0], [0], [1], [0, 0, 1, 1], [], []>} : vector<8x128xbf16>, vector<128x128xbf16>, vector<8x128xf32> -> vector<8x128xf32>
    %46 = arith.addf %42, %45 : vector<8x128xf32>
    %cst_21 = arith.constant 6.660000e-01 : f32
    %47 = vector.broadcast %cst_21 : f32 to vector<8x128xf32>
    %48 = arith.mulf %47, %46 : vector<8x128xf32>
    %49 = math.tanh %48 : vector<8x128xf32>
    %cst_22 = arith.constant 1.715900e+00 : f32
    %50 = vector.broadcast %cst_22 : f32 to vector<8x128xf32>
    %51 = arith.mulf %50, %49 : vector<8x128xf32>
    %52 = arith.truncf %51 : vector<8x128xf32> to vector<8x128xbf16>
    %c0_23 = arith.constant 0 : index
    %c0_24 = arith.constant 0 : index
    %53 = vector.load %arg3[%c0_23, %c0_24] : memref<128x512xbf16, #tpu.memory_space<vmem>>, vector<128x512xbf16>
    %cst_25 = arith.constant dense<0.000000e+00> : vector<8x512xf32>
    %54 = tpu.matmul %52, %53, %cst_25 {dimension_numbers = #tpu.dot_dimension_numbers<[1], [0], [0], [1], [0, 0, 1, 1], [], []>} : vector<8x128xbf16>, vector<128x512xbf16>, vector<8x512xf32> -> vector<8x512xf32>
    %c0_26 = arith.constant 0 : index
    %c0_27 = arith.constant 0 : index
    %55 = vector.load %arg4[%c0_26, %c0_27] : memref<1x512xf32, #tpu.memory_space<vmem>>, vector<1x512xf32>
    %56 = vector.broadcast %55 : vector<1x512xf32> to vector<8x512xf32>
    %57 = arith.addf %54, %56 : vector<8x512xf32>
    %58 = vector.extract_strided_slice %57 {offsets = [0, 0], sizes = [8, 128], strides = [1, 1]} : vector<8x512xf32> to vector<8x128xf32>
    %59 = math.tanh %58 : vector<8x128xf32>
    %60 = vector.extract_strided_slice %57 {offsets = [0, 128], sizes = [8, 128], strides = [1, 1]} : vector<8x512xf32> to vector<8x128xf32>
    %61 = math.tanh %60 : vector<8x128xf32>
    %62 = vector.extract_strided_slice %57 {offsets = [0, 256], sizes = [8, 128], strides = [1, 1]} : vector<8x512xf32> to vector<8x128xf32>
    %63 = vector.extract_strided_slice %57 {offsets = [0, 384], sizes = [8, 128], strides = [1, 1]} : vector<8x512xf32> to vector<8x128xf32>
    %64 = arith.addf %62, %63 : vector<8x128xf32>
    %65 = arith.negf %64 : vector<8x128xf32>
    %66 = math.exp %65 : vector<8x128xf32>
    %cst_28 = arith.constant 1.000000e+00 : f32
    %67 = vector.broadcast %cst_28 : f32 to vector<8x128xf32>
    %68 = arith.addf %67, %66 : vector<8x128xf32>
    %69 = arith.divf %67, %68 : vector<8x128xf32>
    %cst_29 = arith.constant 1.000000e+00 : f32
    %70 = vector.broadcast %cst_29 : f32 to vector<8x128xf32>
    %71 = arith.subf %70, %69 : vector<8x128xf32>
    %72 = arith.mulf %59, %71 : vector<8x128xf32>
    %73 = arith.mulf %69, %61 : vector<8x128xf32>
    %74 = arith.addf %72, %73 : vector<8x128xf32>
    %75 = arith.index_cast %c1_i32 : i32 to index
    %c0_30 = arith.constant 0 : index
    %c0_31 = arith.constant 0 : index
    %76 = vector.load %arg5[%75, %c0_30, %c0_31] : memref<4x8x128xf32, #tpu.memory_space<vmem>>, vector<1x8x128xf32>
    %77 = vector.shape_cast %76 : vector<1x8x128xf32> to vector<8x128xf32>
    %78 = vector.shape_cast %74 : vector<8x128xf32> to vector<1x8x128xf32>
    tpu.vector_store %arg5[%75, %c0_30, %c0_31], %78 {strides = array<i32>} : memref<4x8x128xf32, #tpu.memory_space<vmem>>, vector<1x8x128xf32>,
    %c2_i32 = arith.constant 2 : i32
    %79 = arith.index_cast %c2_i32 : i32 to index
    %c0_32 = arith.constant 0 : index
    %c0_33 = arith.constant 0 : index
    %80 = vector.load %arg0[%79, %c0_32, %c0_33] : memref<4x8x128xf32, #tpu.memory_space<vmem>>, vector<1x8x128xf32>
    %81 = vector.shape_cast %80 : vector<1x8x128xf32> to vector<8x128xf32>
    %82 = arith.truncf %74 : vector<8x128xf32> to vector<8x128xbf16>
    %c0_34 = arith.constant 0 : index
    %c0_35 = arith.constant 0 : index
    %83 = vector.load %arg2[%c0_34, %c0_35] : memref<128x128xbf16, #tpu.memory_space<vmem>>, vector<128x128xbf16>
    %cst_36 = arith.constant dense<0.000000e+00> : vector<8x128xf32>
    %84 = tpu.matmul %82, %83, %cst_36 {dimension_numbers = #tpu.dot_dimension_numbers<[1], [0], [0], [1], [0, 0, 1, 1], [], []>} : vector<8x128xbf16>, vector<128x128xbf16>, vector<8x128xf32> -> vector<8x128xf32>
    %85 = arith.addf %81, %84 : vector<8x128xf32>
    %cst_37 = arith.constant 6.660000e-01 : f32
    %86 = vector.broadcast %cst_37 : f32 to vector<8x128xf32>
    %87 = arith.mulf %86, %85 : vector<8x128xf32>
    %88 = math.tanh %87 : vector<8x128xf32>
    %cst_38 = arith.constant 1.715900e+00 : f32
    %89 = vector.broadcast %cst_38 : f32 to vector<8x128xf32>
    %90 = arith.mulf %89, %88 : vector<8x128xf32>
    %91 = arith.truncf %90 : vector<8x128xf32> to vector<8x128xbf16>
    %c0_39 = arith.constant 0 : index
    %c0_40 = arith.constant 0 : index
    %92 = vector.load %arg3[%c0_39, %c0_40] : memref<128x512xbf16, #tpu.memory_space<vmem>>, vector<128x512xbf16>
    %cst_41 = arith.constant dense<0.000000e+00> : vector<8x512xf32>
    %93 = tpu.matmul %91, %92, %cst_41 {dimension_numbers = #tpu.dot_dimension_numbers<[1], [0], [0], [1], [0, 0, 1, 1], [], []>} : vector<8x128xbf16>, vector<128x512xbf16>, vector<8x512xf32> -> vector<8x512xf32>
    %c0_42 = arith.constant 0 : index
    %c0_43 = arith.constant 0 : index
    %94 = vector.load %arg4[%c0_42, %c0_43] : memref<1x512xf32, #tpu.memory_space<vmem>>, vector<1x512xf32>
    %95 = vector.broadcast %94 : vector<1x512xf32> to vector<8x512xf32>
    %96 = arith.addf %93, %95 : vector<8x512xf32>
    %97 = vector.extract_strided_slice %96 {offsets = [0, 0], sizes = [8, 128], strides = [1, 1]} : vector<8x512xf32> to vector<8x128xf32>
    %98 = math.tanh %97 : vector<8x128xf32>
    %99 = vector.extract_strided_slice %96 {offsets = [0, 128], sizes = [8, 128], strides = [1, 1]} : vector<8x512xf32> to vector<8x128xf32>
    %100 = math.tanh %99 : vector<8x128xf32>
    %101 = vector.extract_strided_slice %96 {offsets = [0, 256], sizes = [8, 128], strides = [1, 1]} : vector<8x512xf32> to vector<8x128xf32>
    %102 = vector.extract_strided_slice %96 {offsets = [0, 384], sizes = [8, 128], strides = [1, 1]} : vector<8x512xf32> to vector<8x128xf32>
    %103 = arith.addf %101, %102 : vector<8x128xf32>
    %104 = arith.negf %103 : vector<8x128xf32>
    %105 = math.exp %104 : vector<8x128xf32>
    %cst_44 = arith.constant 1.000000e+00 : f32
    %106 = vector.broadcast %cst_44 : f32 to vector<8x128xf32>
    %107 = arith.addf %106, %105 : vector<8x128xf32>
    %108 = arith.divf %106, %107 : vector<8x128xf32>
    %cst_45 = arith.constant 1.000000e+00 : f32
    %109 = vector.broadcast %cst_45 : f32 to vector<8x128xf32>
    %110 = arith.subf %109, %108 : vector<8x128xf32>
    %111 = arith.mulf %98, %110 : vector<8x128xf32>
    %112 = arith.mulf %108, %100 : vector<8x128xf32>
    %113 = arith.addf %111, %112 : vector<8x128xf32>
    %114 = arith.index_cast %c2_i32 : i32 to index
    %c0_46 = arith.constant 0 : index
    %c0_47 = arith.constant 0 : index
    %115 = vector.load %arg5[%114, %c0_46, %c0_47] : memref<4x8x128xf32, #tpu.memory_space<vmem>>, vector<1x8x128xf32>
    %116 = vector.shape_cast %115 : vector<1x8x128xf32> to vector<8x128xf32>
    %117 = vector.shape_cast %113 : vector<8x128xf32> to vector<1x8x128xf32>
    tpu.vector_store %arg5[%114, %c0_46, %c0_47], %117 {strides = array<i32>} : memref<4x8x128xf32, #tpu.memory_space<vmem>>, vector<1x8x128xf32>,
    %c3_i32 = arith.constant 3 : i32
    %118 = arith.index_cast %c3_i32 : i32 to index
    %c0_48 = arith.constant 0 : index
    %c0_49 = arith.constant 0 : index
    %119 = vector.load %arg0[%118, %c0_48, %c0_49] : memref<4x8x128xf32, #tpu.memory_space<vmem>>, vector<1x8x128xf32>
    %120 = vector.shape_cast %119 : vector<1x8x128xf32> to vector<8x128xf32>
    %121 = arith.truncf %113 : vector<8x128xf32> to vector<8x128xbf16>
    %c0_50 = arith.constant 0 : index
    %c0_51 = arith.constant 0 : index
    %122 = vector.load %arg2[%c0_50, %c0_51] : memref<128x128xbf16, #tpu.memory_space<vmem>>, vector<128x128xbf16>
    %cst_52 = arith.constant dense<0.000000e+00> : vector<8x128xf32>
    %123 = tpu.matmul %121, %122, %cst_52 {dimension_numbers = #tpu.dot_dimension_numbers<[1], [0], [0], [1], [0, 0, 1, 1], [], []>} : vector<8x128xbf16>, vector<128x128xbf16>, vector<8x128xf32> -> vector<8x128xf32>
    %124 = arith.addf %120, %123 : vector<8x128xf32>
    %cst_53 = arith.constant 6.660000e-01 : f32
    %125 = vector.broadcast %cst_53 : f32 to vector<8x128xf32>
    %126 = arith.mulf %125, %124 : vector<8x128xf32>
    %127 = math.tanh %126 : vector<8x128xf32>
    %cst_54 = arith.constant 1.715900e+00 : f32
    %128 = vector.broadcast %cst_54 : f32 to vector<8x128xf32>
    %129 = arith.mulf %128, %127 : vector<8x128xf32>
    %130 = arith.truncf %129 : vector<8x128xf32> to vector<8x128xbf16>
    %c0_55 = arith.constant 0 : index
    %c0_56 = arith.constant 0 : index
    %131 = vector.load %arg3[%c0_55, %c0_56] : memref<128x512xbf16, #tpu.memory_space<vmem>>, vector<128x512xbf16>
    %cst_57 = arith.constant dense<0.000000e+00> : vector<8x512xf32>
    %132 = tpu.matmul %130, %131, %cst_57 {dimension_numbers = #tpu.dot_dimension_numbers<[1], [0], [0], [1], [0, 0, 1, 1], [], []>} : vector<8x128xbf16>, vector<128x512xbf16>, vector<8x512xf32> -> vector<8x512xf32>
    %c0_58 = arith.constant 0 : index
    %c0_59 = arith.constant 0 : index
    %133 = vector.load %arg4[%c0_58, %c0_59] : memref<1x512xf32, #tpu.memory_space<vmem>>, vector<1x512xf32>
    %134 = vector.broadcast %133 : vector<1x512xf32> to vector<8x512xf32>
    %135 = arith.addf %132, %134 : vector<8x512xf32>
    %136 = vector.extract_strided_slice %135 {offsets = [0, 0], sizes = [8, 128], strides = [1, 1]} : vector<8x512xf32> to vector<8x128xf32>
    %137 = math.tanh %136 : vector<8x128xf32>
    %138 = vector.extract_strided_slice %135 {offsets = [0, 128], sizes = [8, 128], strides = [1, 1]} : vector<8x512xf32> to vector<8x128xf32>
    %139 = math.tanh %138 : vector<8x128xf32>
    %140 = vector.extract_strided_slice %135 {offsets = [0, 256], sizes = [8, 128], strides = [1, 1]} : vector<8x512xf32> to vector<8x128xf32>
    %141 = vector.extract_strided_slice %135 {offsets = [0, 384], sizes = [8, 128], strides = [1, 1]} : vector<8x512xf32> to vector<8x128xf32>
    %142 = arith.addf %140, %141 : vector<8x128xf32>
    %143 = arith.negf %142 : vector<8x128xf32>
    %144 = math.exp %143 : vector<8x128xf32>
    %cst_60 = arith.constant 1.000000e+00 : f32
    %145 = vector.broadcast %cst_60 : f32 to vector<8x128xf32>
    %146 = arith.addf %145, %144 : vector<8x128xf32>
    %147 = arith.divf %145, %146 : vector<8x128xf32>
    %cst_61 = arith.constant 1.000000e+00 : f32
    %148 = vector.broadcast %cst_61 : f32 to vector<8x128xf32>
    %149 = arith.subf %148, %147 : vector<8x128xf32>
    %150 = arith.mulf %137, %149 : vector<8x128xf32>
    %151 = arith.mulf %147, %139 : vector<8x128xf32>
    %152 = arith.addf %150, %151 : vector<8x128xf32>
    %153 = arith.index_cast %c3_i32 : i32 to index
    %c0_62 = arith.constant 0 : index
    %c0_63 = arith.constant 0 : index
    %154 = vector.load %arg5[%153, %c0_62, %c0_63] : memref<4x8x128xf32, #tpu.memory_space<vmem>>, vector<1x8x128xf32>
    %155 = vector.shape_cast %154 : vector<1x8x128xf32> to vector<8x128xf32>
    %156 = vector.shape_cast %152 : vector<8x128xf32> to vector<1x8x128xf32>
    tpu.vector_store %arg5[%153, %c0_62, %c0_63], %156 {strides = array<i32>} : memref<4x8x128xf32, #tpu.memory_space<vmem>>, vector<1x8x128xf32>,
    %c4_i32 = arith.constant 4 : i32
    %c0_64 = arith.constant 0 : index
    %c0_65 = arith.constant 0 : index
    %157 = vector.load %arg6[%c0_64, %c0_65] : memref<8x128xf32, #tpu.memory_space<vmem>>, vector<8x128xf32>
    tpu.vector_store %arg6[%c0_64, %c0_65], %152 {strides = array<i32>} : memref<8x128xf32, #tpu.memory_space<vmem>>, vector<8x128xf32>,
    return
  }
}

</mosaic_0001>

<bundles_post_ra>
// kernel: conv_cfc_forward.5
= control target key start
LH: loop header
LB: loop body
LE: loop exit
PB: predicated region body
PF: predicated region fallthrough
CT: control target
= control target key end

     0   :  { %s1598_s15 = smov 0   ;;  %s1600_s16 = smov 0   ;;  %s1772_s0 = inlined_call_operand.vmem [shape: bf16[2048,128], index: 0, kind: input, shape index: {}]   ;;  %s1773_s1 = inlined_call_operand.vmem [shape: bf16[128,128], index: 1, kind: input, shape index: {}]   ;;  %s1774_s2 = inlined_call_operand.vmem [shape: f32[1,128], index: 2, kind: input, shape index: {}]   ;;  %s1775_s3 = inlined_call_operand.vmem [shape: f32[1,128], index: 3, kind: input, shape index: {}]   ;;  %s1776_s4 = inlined_call_operand.vmem [shape: bf16[2048,128], index: 4, kind: output, shape index: {}]  }
   0x1   :  { %s1602_s17 = smov 0  }
   0x2 LB: > { %s33_s18 = sadd.s32 1, %s1567_s16  ;;  %p1221_p0 = scmp.ge.s32.totalorder %s1571_s17, 1  ;;  %s1571_s17 = sphi %s1602_s17, %s14_s17   ;;  %s1567_s16 = sphi %s1600_s16, %s1778_s16   ;;  %s1563_s15 = sphi %s1598_s15, %s1777_s15  }
   0x3   : > { %p35_p1 = scmp.ge.s32.totalorder %s33_s18, 8  ;;  %p221_p2 = scmp.lt.s32.totalorder %s1571_s17, 9 }
   0x5   : > { %s1780_s18 = smov (%p35_p1, %s33_s18), 0  ;;  %p222_p3 = pnand %p1221_p0, %p221_p2 }
   0x6   : > { %s1222_s21 = sshll.u32 (!%p222_p3), %s1563_s15, 5 }
   0x7   : > { %225 = sbr.rel (%p222_p3) target bundleno = 277 (0x115), region = 36  ;;  %p268_p4 = scmp.lt.s32.totalorder (!%p222_p3), %s1222_s21, 255 }
   0xc   : > { %v1525_v0 = vld [vmem:[%s1773_s1 + $0x38] sm:$0xff]   ;;  %v1526_v1 = vld [vmem:[%s1773_s1 + $0x30] sm:$0xff]   ;;  %s1782_s21 = smov (!%p268_p4, %s1222_s21), 255  ;;  %v1527_v2 = vld [vmem:[%s1773_s1 + $0x28] sm:$0xff]  }
   0xd   : > { %1437 = vmatprep.subr.bf16.mxu0 %v1525_v0  ;;  %1485 = vmatprep.subr.bf16.mxu1 %v1525_v0  ;;  %s1223_s26 = sshll.u32 %s1782_s21, 2  ;;  %v1528_v3 = vld [vmem:[%s1773_s1 + $0x20] sm:$0xff]   ;;  %v1529_v6 = vld [vmem:[%s1773_s1 + $0x18] sm:$0xff]   ;;  %v1530_v7 = vld [vmem:[%s1773_s1 + $0x10] sm:$0xff]  }
   0xe   : > { %1438 = vmatpush3.bf16.msra.mxu0 %v1525_v0  ;;  %1493 = vmatpush3.bf16.msra.mxu1 %v1525_v0  ;;  %s1633_s29 = scalar_lea.vmem %s1772_s0, %s1223_s26  ;;  %v1531_v8 = vld [vmem:[%s1773_s1 + $0x8] sm:$0xff]   ;;  %v1532_v9 = vld [vmem:[%s1773_s1] sm:$0xff]   ;;  %s1699_s24 = scalar_lea.vmem %s1776_s4, %s1223_s26 }
   0xf   : > { %1439 = vmatprep.subr.bf16.mxu0 %v1526_v1  ;;  %1486 = vmatprep.subr.bf16.mxu1 %v1526_v1  ;;  %v1533_v4 = vld [vmem:[%s1633_s29] sm:$0xff]   ;;  %v1535_v10 = vld [vmem:[%s1633_s29 + $0x8] sm:$0xff]   ;;  %v1537_v12 = vld [vmem:[%s1633_s29 + $0x10] sm:$0xff]  }
  0x10   : > { %v1534_v5 = vld [vmem:[%s1633_s29 + $0x40] sm:$0xff]   ;;  %1453 = vmatprep.mubr.bf16.mxu0 %v1533_v4  ;;  %v1536_v11 = vld [vmem:[%s1633_s29 + $0x48] sm:$0xff]   ;;  %v1538_v13 = vld [vmem:[%s1633_s29 + $0x50] sm:$0xff]  }
  0x11   : > { %1469 = vmatprep.mubr.bf16.mxu1 %v1534_v5  ;;  %v1539_v14 = vld [vmem:[%s1633_s29 + $0x18] sm:$0xff]   ;;  %v1541_v16 = vld [vmem:[%s1633_s29 + $0x20] sm:$0xff]   ;;  %v1543_v18 = vld [vmem:[%s1633_s29 + $0x28] sm:$0xff]  }
  0x12   : > { %1440 = vmatpush3.bf16.msra.mxu0 %v1526_v1  ;;  %1494 = vmatpush3.bf16.msra.mxu1 %v1526_v1  ;;  %v1540_v15 = vld [vmem:[%s1633_s29 + $0x58] sm:$0xff]   ;;  %v1542_v17 = vld [vmem:[%s1633_s29 + $0x60] sm:$0xff]   ;;  %v1544_v19 = vld [vmem:[%s1633_s29 + $0x68] sm:$0xff]  }
  0x13   : > { %1441 = vmatprep.subr.bf16.mxu0 %v1527_v2  ;;  %1487 = vmatprep.subr.bf16.mxu1 %v1527_v2  ;;  %v1545_v20 = vld [vmem:[%s1633_s29 + $0x30] sm:$0xff]   ;;  %v1547_v22 = vld [vmem:[%s1633_s29 + $0x38] sm:$0xff]   ;;  %v1669_v24 = vld [vmem:[%s1774_s2] ss:$0 sm:$0xff] }
  0x14   : > { %v1546_v21 = vld [vmem:[%s1633_s29 + $0x70] sm:$0xff]   ;;  %v1548_v23 = vld [vmem:[%s1633_s29 + $0x78] sm:$0xff]   ;;  %v1676_v29 = vld [vmem:[%s1775_s3] ss:$0 sm:$0xff] }
  0x16   : > { %1442 = vmatpush3.bf16.msra.mxu0 %v1527_v2  ;;  %1495 = vmatpush3.bf16.msra.mxu1 %v1527_v2 }
  0x17   : > { %1443 = vmatprep.subr.bf16.mxu0 %v1528_v3  ;;  %1488 = vmatprep.subr.bf16.mxu1 %v1528_v3 }
  0x1a   : > { %1444 = vmatpush3.bf16.msra.mxu0 %v1528_v3  ;;  %1496 = vmatpush3.bf16.msra.mxu1 %v1528_v3 }
  0x1b   : > { %1445 = vmatprep.subr.bf16.mxu0 %v1529_v6  ;;  %1489 = vmatprep.subr.bf16.mxu1 %v1529_v6 }
  0x1e   : > { %1446 = vmatpush3.bf16.msra.mxu0 %v1529_v6  ;;  %1497 = vmatpush3.bf16.msra.mxu1 %v1529_v6 }
  0x1f   : > { %1447 = vmatprep.subr.bf16.mxu0 %v1530_v7  ;;  %1490 = vmatprep.subr.bf16.mxu1 %v1530_v7 }
  0x22   : > { %1448 = vmatpush3.bf16.msra.mxu0 %v1530_v7  ;;  %1498 = vmatpush3.bf16.msra.mxu1 %v1530_v7 }
  0x23   : > { %1449 = vmatprep.subr.bf16.mxu0 %v1531_v8  ;;  %1491 = vmatprep.subr.bf16.mxu1 %v1531_v8 }
  0x26   : > { %1450 = vmatpush3.bf16.msra.mxu0 %v1531_v8  ;;  %1499 = vmatpush3.bf16.msra.mxu1 %v1531_v8 }
  0x27   : > { %1451 = vmatprep.subr.bf16.mxu0 %v1532_v9  ;;  %1492 = vmatprep.subr.bf16.mxu1 %v1532_v9 }
  0x2a   : > { %1452 = vmatpush3.bf16.msra.mxu0 %v1532_v9  ;;  %1500 = vmatpush3.bf16.msra.mxu1 %v1532_v9 }
  0x2d   : > { %1454 = vmatmul.mubr.bf16.vlgmr.msra.gmra.mxu0 %v1535_v10  ;;  %1470 = vmatmul.mubr.bf16.vlgmr.msra.gmra.mxu1 %v1536_v11 }
  0x2e   : > { %1457 = vmatprep.mubr.bf16.mxu0 %v1537_v12  ;;  %1473 = vmatprep.mubr.bf16.mxu1 %v1538_v13 }
  0x35   : > { %1458 = vmatmul.mubr.bf16.gmra.mxu0 %v1539_v14  ;;  %1474 = vmatmul.mubr.bf16.gmra.mxu1 %v1540_v15 }
  0x36   : > { %1461 = vmatprep.mubr.bf16.mxu0 %v1541_v16  ;;  %1477 = vmatprep.mubr.bf16.mxu1 %v1542_v17 }
  0x3d   : > { %1462 = vmatmul.mubr.bf16.gmra.mxu0 %v1543_v18  ;;  %1478 = vmatmul.mubr.bf16.gmra.mxu1 %v1544_v19 }
  0x3e   : > { %1465 = vmatprep.mubr.bf16.mxu0 %v1545_v20  ;;  %1481 = vmatprep.mubr.bf16.mxu1 %v1546_v21 }
  0x45   : > { %1466 = vmatmul.mubr.bf16.gmra.mxu0 %v1547_v22  ;;  %1482 = vmatmul.mubr.bf16.gmra.mxu1 %v1548_v23 }
  0xed   : > { %v1455_v25 = vpop.f32.mrf.mxu0  ;;  %v1471_v26 = vpop.f32.mrf.mxu1 }
  0xee   : > { %v830_v27 = vmul.f32 %v1455_v25, %v1669_v24  ;;  %v846_v28 = vmul.f32 %v1471_v26, %v1669_v24 }
  0xef   : > { %v595_v30 = vpop.f32.mrf.mxu0  ;;  %v659_v31 = vpop.f32.mrf.mxu1 }
  0xf0   : > { %v828_v32 = vmul.f32 %v1669_v24, %v595_v30  ;;  %v844_v33 = vmul.f32 %v1669_v24, %v659_v31  ;;  %v869_v36 = vadd.f32 %v1676_v29, %v830_v27  ;;  %v885_v37 = vadd.f32 %v1676_v29, %v846_v28 }
  0xf1   : > { %v1456_v34 = vpop.f32.mrf.mxu0  ;;  %v1472_v35 = vpop.f32.mrf.mxu1 }
  0xf2   : > { %v831_v38 = vmul.f32 %v1456_v34, %v1669_v24  ;;  %v847_v39 = vmul.f32 %v1472_v35, %v1669_v24  ;;  %v867_v42 = vadd.f32 %v1676_v29, %v828_v32  ;;  %v883_v43 = vadd.f32 %v1676_v29, %v844_v33 }
  0xf3   : > { %v598_v40 = vpop.f32.mrf.mxu0  ;;  %v662_v41 = vpop.f32.mrf.mxu1  ;;  %v901_v50 = vmax.f32 %v869_v36, 0.0  ;;  %v917_v51 = vmax.f32 %v885_v37, 0.0 }
  0xf4   : > { %v829_v44 = vmul.f32 %v1669_v24, %v598_v40  ;;  %v845_v45 = vmul.f32 %v1669_v24, %v662_v41  ;;  %v870_v46 = vadd.f32 %v1676_v29, %v831_v38  ;;  %v886_v47 = vadd.f32 %v1676_v29, %v847_v39 }
  0xf5   : > { %v1459_v48 = vpop.f32.mrf.mxu0  ;;  %v1475_v49 = vpop.f32.mrf.mxu1  ;;  %v899_v60 = vmax.f32 %v867_v42, 0.0  ;;  %v915_v61 = vmax.f32 %v883_v43, 0.0 }
  0xf6   : > { %v868_v52 = vadd.f32 %v1676_v29, %v829_v44  ;;  %v884_v53 = vadd.f32 %v1676_v29, %v845_v45  ;;  %v902_v54 = vmax.f32 %v870_v46, 0.0  ;;  %v918_v55 = vmax.f32 %v886_v47, 0.0 }
  0xf7   : > { %v834_v56 = vmul.f32 %v1459_v48, %v1669_v24  ;;  %v850_v57 = vmul.f32 %v1475_v49, %v1669_v24  ;;  %v611_v58 = vpop.f32.mrf.mxu0  ;;  %v675_v59 = vpop.f32.mrf.mxu1 }
  0xf8   : > { %v900_v62 = vmax.f32 %v868_v52, 0.0  ;;  %v916_v63 = vmax.f32 %v884_v53, 0.0  ;;  %v1326_v0 = vpack.c.bf16 %v902_v54, %v901_v50  ;;  %v1366_v1 = vpack.c.bf16 %v918_v55, %v917_v51 }
  0xf9   : > { %v832_v2 = vmul.f32 %v1669_v24, %v611_v58  ;;  %v848_v3 = vmul.f32 %v1669_v24, %v675_v59  ;;  %v1460_v4 = vpop.f32.mrf.mxu0  ;;  %v1476_v5 = vpop.f32.mrf.mxu1  ;;  %v873_v8 = vadd.f32 %v1676_v29, %v834_v56  ;;  %v889_v9 = vadd.f32 %v1676_v29, %v850_v57 }
  0xfa   : > { %v1321_v6 = vpack.c.bf16 %v900_v62, %v899_v60  ;;  %v1361_v7 = vpack.c.bf16 %v916_v63, %v915_v61  ;;  %1398 = vst [vmem:[%s1699_s24 + $0x8] sm:$0xff] %v1326_v0   ;;  %1406 = vst [vmem:[%s1699_s24 + $0x48] sm:$0xff] %v1366_v1   ;;  %v835_v10 = vmul.f32 %v1460_v4, %v1669_v24 }
  0xfb   : > { %v851_v11 = vmul.f32 %v1476_v5, %v1669_v24  ;;  %v614_v12 = vpop.f32.mrf.mxu0  ;;  %v678_v13 = vpop.f32.mrf.mxu1  ;;  %v871_v14 = vadd.f32 %v1676_v29, %v832_v2  ;;  %v887_v15 = vadd.f32 %v1676_v29, %v848_v3  ;;  %v905_v27 = vmax.f32 %v873_v8, 0.0 }
  0xfc   : > { %1322 = vst [vmem:[%s1699_s24] sm:$0xff] %v1321_v6   ;;  %1405 = vst [vmem:[%s1699_s24 + $0x40] sm:$0xff] %v1361_v7   ;;  %v833_v16 = vmul.f32 %v1669_v24, %v614_v12  ;;  %v849_v17 = vmul.f32 %v1669_v24, %v678_v13  ;;  %v874_v18 = vadd.f32 %v1676_v29, %v835_v10  ;;  %v921_v28 = vmax.f32 %v889_v9, 0.0 }
  0xfd   : > { %v890_v19 = vadd.f32 %v1676_v29, %v851_v11  ;;  %v1463_v20 = vpop.f32.mrf.mxu0  ;;  %v1479_v21 = vpop.f32.mrf.mxu1  ;;  %v903_v34 = vmax.f32 %v871_v14, 0.0  ;;  %v919_v35 = vmax.f32 %v887_v15, 0.0 }
  0xfe   : > { %v872_v22 = vadd.f32 %v1676_v29, %v833_v16  ;;  %v888_v23 = vadd.f32 %v1676_v29, %v849_v17  ;;  %v838_v25 = vmul.f32 %v1463_v20, %v1669_v24  ;;  %v854_v26 = vmul.f32 %v1479_v21, %v1669_v24 }
  0xff   : > { %v906_v30 = vmax.f32 %v874_v18, 0.0  ;;  %v922_v31 = vmax.f32 %v890_v19, 0.0  ;;  %v627_v32 = vpop.f32.mrf.mxu0  ;;  %v691_v33 = vpop.f32.mrf.mxu1 }
 0x100   : > { %v904_v36 = vmax.f32 %v872_v22, 0.0  ;;  %v920_v37 = vmax.f32 %v888_v23, 0.0  ;;  %v836_v40 = vmul.f32 %v1669_v24, %v627_v32  ;;  %v852_v41 = vmul.f32 %v1669_v24, %v691_v33 }
 0x101   : > { %v1336_v38 = vpack.c.bf16 %v906_v30, %v905_v27  ;;  %v1376_v39 = vpack.c.bf16 %v922_v31, %v921_v28  ;;  %v1464_v42 = vpop.f32.mrf.mxu0  ;;  %v1480_v43 = vpop.f32.mrf.mxu1  ;;  %v877_v46 = vadd.f32 %v1676_v29, %v838_v25  ;;  %v893_v47 = vadd.f32 %v1676_v29, %v854_v26 }
 0x102   : > { %v1331_v44 = vpack.c.bf16 %v904_v36, %v903_v34  ;;  %v1371_v45 = vpack.c.bf16 %v920_v37, %v919_v35  ;;  %v839_v48 = vmul.f32 %v1464_v42, %v1669_v24  ;;  %v855_v49 = vmul.f32 %v1480_v43, %v1669_v24 }
 0x103   : > { %1400 = vst [vmem:[%s1699_s24 + $0x18] sm:$0xff] %v1336_v38   ;;  %1408 = vst [vmem:[%s1699_s24 + $0x58] sm:$0xff] %v1376_v39   ;;  %v630_v50 = vpop.f32.mrf.mxu0  ;;  %v694_v51 = vpop.f32.mrf.mxu1  ;;  %v875_v52 = vadd.f32 %v1676_v29, %v836_v40  ;;  %v891_v53 = vadd.f32 %v1676_v29, %v852_v41  ;;  %v909_v60 = vmax.f32 %v877_v46, 0.0  ;;  %v925_v61 = vmax.f32 %v893_v47, 0.0 }
 0x104   : > { %1399 = vst [vmem:[%s1699_s24 + $0x10] sm:$0xff] %v1331_v44   ;;  %1407 = vst [vmem:[%s1699_s24 + $0x50] sm:$0xff] %v1371_v45   ;;  %v837_v54 = vmul.f32 %v1669_v24, %v630_v50  ;;  %v853_v55 = vmul.f32 %v1669_v24, %v694_v51  ;;  %v878_v56 = vadd.f32 %v1676_v29, %v839_v48 }
 0x105   : > { %v894_v57 = vadd.f32 %v1676_v29, %v855_v49  ;;  %v1467_v58 = vpop.f32.mrf.mxu0  ;;  %v1483_v59 = vpop.f32.mrf.mxu1  ;;  %v907_v6 = vmax.f32 %v875_v52, 0.0  ;;  %v923_v7 = vmax.f32 %v891_v53, 0.0 }
 0x106   : > { %v876_v62 = vadd.f32 %v1676_v29, %v837_v54  ;;  %v892_v63 = vadd.f32 %v1676_v29, %v853_v55  ;;  %v910_v0 = vmax.f32 %v878_v56, 0.0  ;;  %v842_v2 = vmul.f32 %v1467_v58, %v1669_v24 }
 0x107   : > { %v926_v1 = vmax.f32 %v894_v57, 0.0  ;;  %v858_v3 = vmul.f32 %v1483_v59, %v1669_v24  ;;  %v643_v4 = vpop.f32.mrf.mxu0  ;;  %v707_v5 = vpop.f32.mrf.mxu1 }
 0x108   : > { %v908_v8 = vmax.f32 %v876_v62, 0.0  ;;  %v924_v9 = vmax.f32 %v892_v63, 0.0  ;;  %v1346_v10 = vpack.c.bf16 %v910_v0, %v909_v60  ;;  %v840_v12 = vmul.f32 %v1669_v24, %v643_v4 }
 0x109   : > { %v1386_v11 = vpack.c.bf16 %v926_v1, %v925_v61  ;;  %v856_v13 = vmul.f32 %v1669_v24, %v707_v5  ;;  %v1468_v14 = vpop.f32.mrf.mxu0  ;;  %v1484_v15 = vpop.f32.mrf.mxu1  ;;  %v881_v18 = vadd.f32 %v1676_v29, %v842_v2  ;;  %v897_v19 = vadd.f32 %v1676_v29, %v858_v3 }
 0x10a   : > { %v1341_v16 = vpack.c.bf16 %v908_v8, %v907_v6  ;;  %v1381_v17 = vpack.c.bf16 %v924_v9, %v923_v7  ;;  %1402 = vst [vmem:[%s1699_s24 + $0x28] sm:$0xff] %v1346_v10   ;;  %v843_v20 = vmul.f32 %v1468_v14, %v1669_v24  ;;  %v859_v21 = vmul.f32 %v1484_v15, %v1669_v24 }
 0x10b   : > { %1410 = vst [vmem:[%s1699_s24 + $0x68] sm:$0xff] %v1386_v11   ;;  %v646_v22 = vpop.f32.mrf.mxu0  ;;  %v710_v23 = vpop.f32.mrf.mxu1  ;;  %v879_v25 = vadd.f32 %v1676_v29, %v840_v12  ;;  %v895_v26 = vadd.f32 %v1676_v29, %v856_v13  ;;  %v913_v34 = vmax.f32 %v881_v18, 0.0  ;;  %v929_v35 = vmax.f32 %v897_v19, 0.0 }
 0x10c   : > { %1401 = vst [vmem:[%s1699_s24 + $0x20] sm:$0xff] %v1341_v16   ;;  %1409 = vst [vmem:[%s1699_s24 + $0x60] sm:$0xff] %v1381_v17   ;;  %v841_v27 = vmul.f32 %v1669_v24, %v646_v22  ;;  %v857_v28 = vmul.f32 %v1669_v24, %v710_v23  ;;  %v882_v30 = vadd.f32 %v1676_v29, %v843_v20 }
 0x10d   : > { %v898_v31 = vadd.f32 %v1676_v29, %v859_v21  ;;  %v911_v38 = vmax.f32 %v879_v25, 0.0  ;;  %v927_v39 = vmax.f32 %v895_v26, 0.0 }
 0x10e   : > { %v880_v32 = vadd.f32 %v1676_v29, %v841_v27  ;;  %v896_v33 = vadd.f32 %v1676_v29, %v857_v28  ;;  %v914_v36 = vmax.f32 %v882_v30, 0.0 }
 0x10f   : > { %v930_v37 = vmax.f32 %v898_v31, 0.0 }
 0x110   : > { %v912_v40 = vmax.f32 %v880_v32, 0.0  ;;  %v928_v24 = vmax.f32 %v896_v33, 0.0  ;;  %v1356_v41 = vpack.c.bf16 %v914_v36, %v913_v34 }
 0x111   : > { %v1396_v42 = vpack.c.bf16 %v930_v37, %v929_v35 }
 0x112   : > { %v1351_v43 = vpack.c.bf16 %v912_v40, %v911_v38  ;;  %v1391_v44 = vpack.c.bf16 %v928_v24, %v927_v39  ;;  %1404 = vst [vmem:[%s1699_s24 + $0x38] sm:$0xff] %v1356_v41  }
 0x113   : > { %1412 = vst [vmem:[%s1699_s24 + $0x78] sm:$0xff] %v1396_v42  }
 0x114   : > { %1403 = vst [vmem:[%s1699_s24 + $0x30] sm:$0xff] %v1351_v43   ;;  %1411 = vst [vmem:[%s1699_s24 + $0x70] sm:$0xff] %v1391_v44  }
 0x115 PF: > { %s14_s17 = sadd.s32 1, %s1571_s17   ;;  %s1777_s15 = smov %s1567_s16 }
 0x116   : > { %p11_p5 = scmp.ge.s32.totalorder %s14_s17, 10   ;;  %s1778_s16 = smov %s1780_s18 }
 0x118   :  { %13 = sbr.rel (!%p11_p5) target bundleno = 2 (0x2), region = 83 }

// kernel: conv_cfc_forward.6
= control target key start
LH: loop header
LB: loop body
LE: loop exit
PB: predicated region body
PF: predicated region fallthrough
CT: control target
= control target key end

     0   :  { %s5840_s15 = smov 0   ;;  %s5842_s16 = smov 0   ;;  %s7104_s0 = inlined_call_operand.vmem [shape: bf16[512,1664], index: 0, kind: input, shape index: {}]   ;;  %s7105_s1 = inlined_call_operand.vmem [shape: bf16[1664,128], index: 1, kind: input, shape index: {}]   ;;  %s7106_s2 = inlined_call_operand.vmem [shape: f32[1,128], index: 2, kind: input, shape index: {}]   ;;  %s7107_s3 = inlined_call_operand.vmem [shape: f32[1,128], index: 3, kind: input, shape index: {}]   ;;  %s7108_s4 = inlined_call_operand.vmem [shape: bf16[512,128], index: 4, kind: output, shape index: {}]  }
   0x1   :  { %s5844_s17 = smov 0  }
   0x2 LB: > { %s33_s18 = sadd.s32 1, %s5809_s16  ;;  %p4118_p0 = scmp.ge.s32.totalorder %s5813_s17, 1  ;;  %s5813_s17 = sphi %s5844_s17, %s14_s17   ;;  %s5809_s16 = sphi %s5842_s16, %s7130_s16   ;;  %s5805_s15 = sphi %s5840_s15, %s7129_s15  }
   0x3   : > { %p35_p1 = scmp.ge.s32.totalorder %s33_s18, 2  ;;  %p224_p2 = scmp.lt.s32.totalorder %s5813_s17, 3 }
   0x5   : > { %s7132_s18 = smov (%p35_p1, %s33_s18), 0  ;;  %p225_p3 = pnand %p4118_p0, %p224_p2 }
   0x7   : > { %228 = sbr.rel (%p225_p3) target bundleno = 667 (0x29b), region = 36 }
   0xc   : > { %v5383_v0 = vld [vmem:[%s7105_s1 + $0x78] sm:$0xff]   ;;  %s4119_s21 = sshll.u32 %s5805_s15, 5  ;;  %v5385_v2 = vld [vmem:[%s7105_s1 + $0x70] sm:$0xff]   ;;  %v5387_v4 = vld [vmem:[%s7105_s1 + $0x68] sm:$0xff]  }
   0xd   : > { %v5384_v1 = vld [vmem:[%s7105_s1 + $0x38] sm:$0xff]   ;;  %4598 = vmatprep.subr.bf16.mxu0 %v5383_v0  ;;  %5342 = vmatprep.subr.bf16.mxu1 %v5383_v0  ;;  %p274_p4 = scmp.lt.s32.totalorder %s4119_s21, 63  ;;  %v5386_v3 = vld [vmem:[%s7105_s1 + $0x30] sm:$0xff]   ;;  %v5388_v5 = vld [vmem:[%s7105_s1 + $0x28] sm:$0xff]  }
   0xe   : > { %4599 = vmatpush3.bf16.msra.mxu0 %v5384_v1  ;;  %5350 = vmatpush3.bf16.msra.mxu1 %v5384_v1  ;;  %v5389_v6 = vld [vmem:[%s7105_s1 + $0x60] sm:$0xff]   ;;  %v5391_v8 = vld [vmem:[%s7105_s1 + $0x58] sm:$0xff]   ;;  %v5393_v10 = vld [vmem:[%s7105_s1 + $0x50] sm:$0xff]  }
   0xf   : > { %4600 = vmatprep.subr.bf16.mxu0 %v5385_v2  ;;  %5343 = vmatprep.subr.bf16.mxu1 %v5385_v2  ;;  %s7134_s21 = smov (!%p274_p4, %s4119_s21), 63  ;;  %v5390_v7 = vld [vmem:[%s7105_s1 + $0x20] sm:$0xff]   ;;  %v5392_v9 = vld [vmem:[%s7105_s1 + $0x18] sm:$0xff]   ;;  %v5394_v13 = vld [vmem:[%s7105_s1 + $0x10] sm:$0xff]  }
  0x10   : > { %s5358_s8 = smul.u32 52, %s7134_s21  ;;  %v5395_v14 = vld [vmem:[%s7105_s1 + $0x48] sm:$0xff]   ;;  %v5397_v16 = vld [vmem:[%s7105_s1 + $0x40] sm:$0xff]   ;;  %v5405_v18 = vld [vmem:[%s7105_s1 + $0xf8] sm:$0xff]   ;;  %s4122_s24 = sshll.u32 %s7134_s21, 2 }
  0x11   : > { %v5396_v15 = vld [vmem:[%s7105_s1 + $0x8] sm:$0xff]   ;;  %v5398_v17 = vld [vmem:[%s7105_s1] sm:$0xff]   ;;  %v5408_v21 = vld [vmem:[%s7105_s1 + $0x178] sm:$0xff]   ;;  %s6958_s26 = scalar_lea.vmem %s7108_s4, %s4122_s24 }
  0x12   : > { %4601 = vmatpush3.bf16.msra.mxu0 %v5386_v3  ;;  %5351 = vmatpush3.bf16.msra.mxu1 %v5386_v3  ;;  %s5891_s15 = scalar_lea.vmem %s7104_s0, %s5358_s8  ;;  %v5406_v22 = vld [vmem:[%s7105_s1 + $0xb8] sm:$0xff]   ;;  %v5407_v23 = vld [vmem:[%s7105_s1 + $0xf0] sm:$0xff]   ;;  %v5417_v31 = vld [vmem:[%s7105_s1 + $0xe8] sm:$0xff]  }
  0x13   : > { %4602 = vmatprep.subr.bf16.mxu0 %v5387_v4  ;;  %5344 = vmatprep.subr.bf16.mxu1 %v5387_v4  ;;  %v5401_v11 = vld [vmem:[%s5891_s15 + $0x4] ss:$52 sps:$4 sm:$0xff]   ;;  %v5399_v19 = vld [vmem:[%s5891_s15] ss:$52 sps:$4 sm:$0xff]   ;;  %v5415_v29 = vld [vmem:[%s5891_s15 + $0x68] ss:$52 sps:$4 sm:$0xff]  }
  0x14   : > { %v5404_v12 = vld [vmem:[%s5891_s15 + $0x4e4] ss:$52 sps:$4 sm:$0xff]   ;;  %2521 = vmatprep.mubr.bf16.mxu0 %v5401_v11  ;;  %v5402_v20 = vld [vmem:[%s5891_s15 + $0x4e0] ss:$52 sps:$4 sm:$0xff]   ;;  %v5416_v30 = vld [vmem:[%s5891_s15 + $0x548] ss:$52 sps:$4 sm:$0xff]  }
  0x15   : > { %2617 = vmatprep.mubr.bf16.mxu1 %v5404_v12  ;;  %v5410_v24 = vld [vmem:[%s7105_s1 + $0x138] sm:$0xff]   ;;  %v5411_v25 = vld [vmem:[%s5891_s15 + $0x6c] ss:$52 sps:$4 sm:$0xff]   ;;  %v5409_v27 = vld [vmem:[%s7105_s1 + $0xb0] sm:$0xff]  }
  0x16   : > { %4603 = vmatpush3.bf16.msra.mxu0 %v5388_v5  ;;  %5352 = vmatpush3.bf16.msra.mxu1 %v5388_v5  ;;  %v5413_v26 = vld [vmem:[%s5891_s15 + $0x54c] ss:$52 sps:$4 sm:$0xff]   ;;  %v5428_v28 = vld [vmem:[%s7105_s1 + $0x170] sm:$0xff]   ;;  %v5427_v40 = vld [vmem:[%s7105_s1 + $0xd8] sm:$0xff]  }
  0x17   : > { %4604 = vmatprep.subr.bf16.mxu0 %v5389_v6  ;;  %5345 = vmatprep.subr.bf16.mxu1 %v5389_v6  ;;  %v5418_v32 = vld [vmem:[%s7105_s1 + $0xa8] sm:$0xff]   ;;  %v5430_v33 = vld [vmem:[%s7105_s1 + $0x130] sm:$0xff]   ;;  %v5419_v34 = vld [vmem:[%s7105_s1 + $0xe0] sm:$0xff]  }
  0x18   : > { %v5421_v35 = vld [vmem:[%s5891_s15 + $0xd4] ss:$52 sps:$4 sm:$0xff]   ;;  %v5420_v37 = vld [vmem:[%s7105_s1 + $0xa0] sm:$0xff]   ;;  %v5429_v41 = vld [vmem:[%s7105_s1 + $0x98] sm:$0xff]  }
  0x19   : > { %v5423_v36 = vld [vmem:[%s5891_s15 + $0x5b4] ss:$52 sps:$4 sm:$0xff]   ;;  %v5425_v38 = vld [vmem:[%s5891_s15 + $0xd0] ss:$52 sps:$4 sm:$0xff]   ;;  %v5437_v49 = vld [vmem:[%s5891_s15 + $0x138] ss:$52 sps:$4 sm:$0xff]  }
  0x1a   : > { %4605 = vmatpush3.bf16.msra.mxu0 %v5390_v7  ;;  %5353 = vmatpush3.bf16.msra.mxu1 %v5390_v7  ;;  %v5426_v39 = vld [vmem:[%s5891_s15 + $0x5b0] ss:$52 sps:$4 sm:$0xff]   ;;  %v5442_v43 = vld [vmem:[%s7105_s1 + $0x168] sm:$0xff]   ;;  %v5450_v59 = vld [vmem:[%s5891_s15 + $0x1a0] ss:$52 sps:$4 sm:$0xff]  }
  0x1b   : > { %4606 = vmatprep.subr.bf16.mxu0 %v5391_v8  ;;  %5346 = vmatprep.subr.bf16.mxu1 %v5391_v8  ;;  %v5431_v42 = vld [vmem:[%s7105_s1 + $0xd0] sm:$0xff]   ;;  %v5444_v46 = vld [vmem:[%s7105_s1 + $0x128] sm:$0xff]   ;;  %v5441_v52 = vld [vmem:[%s7105_s1 + $0xc0] sm:$0xff]  }
  0x1c   : > { %v5433_v44 = vld [vmem:[%s5891_s15 + $0x13c] ss:$52 sps:$4 sm:$0xff]   ;;  %v5439_v48 = vld [vmem:[%s7105_s1 + $0xc8] sm:$0xff]   ;;  %v5445_v53 = vld [vmem:[%s5891_s15 + $0x1a4] ss:$52 sps:$4 sm:$0xff]  }
  0x1d   : > { %v5435_v45 = vld [vmem:[%s5891_s15 + $0x61c] ss:$52 sps:$4 sm:$0xff]   ;;  %v5438_v50 = vld [vmem:[%s5891_s15 + $0x618] ss:$52 sps:$4 sm:$0xff]   ;;  %v5459_v55 = vld [vmem:[%s7105_s1 + $0x160] sm:$0xff]  }
  0x1e   : > { %4607 = vmatpush3.bf16.msra.mxu0 %v5392_v9  ;;  %5354 = vmatpush3.bf16.msra.mxu1 %v5392_v9  ;;  %v5432_v47 = vld [vmem:[%s7105_s1 + $0x90] sm:$0xff]   ;;  %v5440_v51 = vld [vmem:[%s7105_s1 + $0x88] sm:$0xff]   ;;  %v5460_v56 = vld [vmem:[%s7105_s1 + $0x120] sm:$0xff]  }
  0x1f   : > { %4608 = vmatprep.subr.bf16.mxu0 %v5393_v10  ;;  %5347 = vmatprep.subr.bf16.mxu1 %v5393_v10  ;;  %v5449_v54 = vld [vmem:[%s5891_s15 + $0xc] ss:$52 sps:$4 sm:$0xff]   ;;  %v5447_v58 = vld [vmem:[%s5891_s15 + $0x8] ss:$52 sps:$4 sm:$0xff]   ;;  %v5467_v1 = vld [vmem:[%s7105_s1 + $0x1f0] sm:$0xff]  }
  0x20   : > { %v5443_v57 = vld [vmem:[%s7105_s1 + $0x80] sm:$0xff]   ;;  %v5451_v60 = vld [vmem:[%s7105_s1 + $0x1f8] sm:$0xff]   ;;  %v5455_v63 = vld [vmem:[%s5891_s15 + $0x74] ss:$52 sps:$4 sm:$0xff]  }
  0x21   : > { %v5452_v61 = vld [vmem:[%s7105_s1 + $0x1b8] sm:$0xff]   ;;  %v5453_v62 = vld [vmem:[%s5891_s15 + $0x20c] ss:$52 sps:$4 sm:$0xff]   ;;  %v5468_v3 = vld [vmem:[%s7105_s1 + $0x1b0] sm:$0xff]  }
  0x22   : > { %4609 = vmatpush3.bf16.msra.mxu0 %v5394_v13  ;;  %5355 = vmatpush3.bf16.msra.mxu1 %v5394_v13  ;;  %v5469_v0 = vld [vmem:[%s7105_s1 + $0x158] sm:$0xff]   ;;  %v5458_v5 = vld [vmem:[%s5891_s15 + $0x70] ss:$52 sps:$4 sm:$0xff]   ;;  %v5461_v6 = vld [vmem:[%s5891_s15 + $0x274] ss:$52 sps:$4 sm:$0xff]  }
  0x23   : > { %4610 = vmatprep.subr.bf16.mxu0 %v5395_v14  ;;  %5348 = vmatprep.subr.bf16.mxu1 %v5395_v14  ;;  %v5470_v2 = vld [vmem:[%s7105_s1 + $0x118] sm:$0xff]   ;;  %v5483_v8 = vld [vmem:[%s7105_s1 + $0x150] sm:$0xff]   ;;  %v5484_v9 = vld [vmem:[%s7105_s1 + $0x1e8] sm:$0xff]  }
  0x24   : > { %v5457_v4 = vld [vmem:[%s5891_s15 + $0x208] ss:$52 sps:$4 sm:$0xff]   ;;  %v5485_v10 = vld [vmem:[%s7105_s1 + $0x110] sm:$0xff]   ;;  %v5466_v13 = vld [vmem:[%s5891_s15 + $0xd8] ss:$52 sps:$4 sm:$0xff]  }
  0x25   : > { %v5463_v7 = vld [vmem:[%s5891_s15 + $0xdc] ss:$52 sps:$4 sm:$0xff]   ;;  %v5486_v11 = vld [vmem:[%s7105_s1 + $0x1a8] sm:$0xff]  }
  0x26   : > { %4611 = vmatpush3.bf16.msra.mxu0 %v5396_v15  ;;  %5356 = vmatpush3.bf16.msra.mxu1 %v5396_v15  ;;  %v5465_v12 = vld [vmem:[%s5891_s15 + $0x270] ss:$52 sps:$4 sm:$0xff]   ;;  %v5493_v15 = vld [vmem:[%s7105_s1 + $0x148] sm:$0xff]  }
  0x27   : > { %4612 = vmatprep.subr.bf16.mxu0 %v5397_v16  ;;  %5349 = vmatprep.subr.bf16.mxu1 %v5397_v16  ;;  %v5471_v14 = vld [vmem:[%s5891_s15 + $0x2dc] ss:$52 sps:$4 sm:$0xff]   ;;  %v5494_v16 = vld [vmem:[%s7105_s1 + $0x108] sm:$0xff]  }
  0x2a   : > { %4613 = vmatpush3.bf16.msra.mxu0 %v5398_v17  ;;  %5357 = vmatpush3.bf16.msra.mxu1 %v5398_v17  ;;  %v5473_v17 = vld [vmem:[%s5891_s15 + $0x144] ss:$52 sps:$4 sm:$0xff]  }
  0x2b   : > { %4710 = vmatprep.subr.bf16.mxu1 %v5405_v18  ;;  %4822 = vmatprep.subr.bf16.mxu0 %v5408_v21  ;;  %v5501_v18 = vld [vmem:[%s7105_s1 + $0x1e0] sm:$0xff]  }
  0x2c   : > { %v5476_v21 = vld [vmem:[%s5891_s15 + $0x140] ss:$52 sps:$4 sm:$0xff]  }
  0x2d   : > { %2522 = vmatmul.mubr.bf16.vlgmr.msra.gmra.mxu0 %v5399_v19  ;;  %2618 = vmatmul.mubr.bf16.vlgmr.msra.gmra.mxu1 %v5402_v20  ;;  %v5502_v19 = vld [vmem:[%s7105_s1 + $0x1a0] sm:$0xff]   ;;  %v5475_v20 = vld [vmem:[%s5891_s15 + $0x2d8] ss:$52 sps:$4 sm:$0xff]  }
  0x2e   : > { %4711 = vmatpush3.bf16.msra.mxu1 %v5406_v22  ;;  %4823 = vmatpush3.bf16.msra.mxu0 %v5410_v24  ;;  %v5477_v22 = vld [vmem:[%s5891_s15 + $0x344] ss:$52 sps:$4 sm:$0xff]  }
  0x2f   : > { %4712 = vmatprep.subr.bf16.mxu1 %v5407_v23  ;;  %2529 = vmatprep.mubr.bf16.mxu0 %v5411_v25  ;;  %v5479_v23 = vld [vmem:[%s5891_s15 + $0x1ac] ss:$52 sps:$4 sm:$0xff]  }
  0x30   : > { %2625 = vmatprep.mubr.bf16.mxu1 %v5413_v26  ;;  %4824 = vmatprep.subr.bf16.mxu0 %v5428_v28  ;;  %v5509_v24 = vld [vmem:[%s7105_s1 + $0x140] sm:$0xff]   ;;  %v5517_v26 = vld [vmem:[%s7105_s1 + $0x1d8] sm:$0xff]  }
  0x31   : > { %v5510_v25 = vld [vmem:[%s7105_s1 + $0x100] sm:$0xff]   ;;  %v5482_v28 = vld [vmem:[%s5891_s15 + $0x1a8] ss:$52 sps:$4 sm:$0xff]  }
  0x32   : > { %4713 = vmatpush3.bf16.msra.mxu1 %v5409_v27  ;;  %4825 = vmatpush3.bf16.msra.mxu0 %v5430_v33  ;;  %v5481_v27 = vld [vmem:[%s5891_s15 + $0x340] ss:$52 sps:$4 sm:$0xff]   ;;  %v5491_v33 = vld [vmem:[%s5891_s15 + $0x3a8] ss:$52 sps:$4 sm:$0xff]  }
  0x33   : > { %4714 = vmatprep.subr.bf16.mxu1 %v5417_v31  ;;  %4826 = vmatprep.subr.bf16.mxu0 %v5442_v43  ;;  %v5487_v31 = vld [vmem:[%s5891_s15 + $0x3ac] ss:$52 sps:$4 sm:$0xff]  }
  0x34   : > { %v5549_v43 = vld [vmem:[%s7105_s1 + $0x1c8] sm:$0xff]  }
  0x35   : > { %2530 = vmatmul.mubr.bf16.gmra.mxu0 %v5415_v29  ;;  %2626 = vmatmul.mubr.bf16.gmra.mxu1 %v5416_v30  ;;  %v5518_v29 = vld [vmem:[%s7105_s1 + $0x198] sm:$0xff]  }
  0x36   : > { %4715 = vmatpush3.bf16.msra.mxu1 %v5418_v32  ;;  %2537 = vmatprep.mubr.bf16.mxu0 %v5421_v35  ;;  %v5519_v30 = vld [vmem:[%s7105_s1 + $0x278] sm:$0xff]   ;;  %v5489_v32 = vld [vmem:[%s5891_s15 + $0x214] ss:$52 sps:$4 sm:$0xff]  }
  0x37   : > { %4716 = vmatprep.subr.bf16.mxu1 %v5419_v34  ;;  %2633 = vmatprep.mubr.bf16.mxu1 %v5423_v36  ;;  %v5492_v34 = vld [vmem:[%s5891_s15 + $0x210] ss:$52 sps:$4 sm:$0xff]  }
  0x38   : > { %4827 = vmatpush3.bf16.msra.mxu0 %v5444_v46  ;;  %v5533_v35 = vld [vmem:[%s7105_s1 + $0x1d0] sm:$0xff]  }
  0x39   : > { %4828 = vmatprep.subr.bf16.mxu0 %v5459_v55  ;;  %v5534_v36 = vld [vmem:[%s7105_s1 + $0x190] sm:$0xff]  }
  0x3a   : > { %4717 = vmatpush3.bf16.msra.mxu1 %v5420_v37  ;;  %v5495_v37 = vld [vmem:[%s5891_s15 + $0x414] ss:$52 sps:$4 sm:$0xff]   ;;  %v5523_v55 = vld [vmem:[%s5891_s15 + $0x7c] ss:$52 sps:$4 sm:$0xff]  }
  0x3b   : > { %4718 = vmatprep.subr.bf16.mxu1 %v5427_v40  ;;  %v5500_v40 = vld [vmem:[%s5891_s15 + $0x278] ss:$52 sps:$4 sm:$0xff]   ;;  %v5508_v46 = vld [vmem:[%s5891_s15 + $0x2e0] ss:$52 sps:$4 sm:$0xff]  }
  0x3c   : > { %4829 = vmatpush3.bf16.msra.mxu0 %v5460_v56  ;;  %v5535_v56 = vld [vmem:[%s7105_s1 + $0x270] sm:$0xff]  }
  0x3d   : > { %2538 = vmatmul.mubr.bf16.gmra.mxu0 %v5425_v38  ;;  %2634 = vmatmul.mubr.bf16.gmra.mxu1 %v5426_v39  ;;  %v5497_v38 = vld [vmem:[%s5891_s15 + $0x27c] ss:$52 sps:$4 sm:$0xff]  }
  0x3e   : > { %4719 = vmatpush3.bf16.msra.mxu1 %v5429_v41  ;;  %2545 = vmatprep.mubr.bf16.mxu0 %v5433_v44  ;;  %v5499_v39 = vld [vmem:[%s5891_s15 + $0x410] ss:$52 sps:$4 sm:$0xff]   ;;  %v5550_v44 = vld [vmem:[%s7105_s1 + $0x188] sm:$0xff]  }
  0x3f   : > { %4720 = vmatprep.subr.bf16.mxu1 %v5431_v42  ;;  %2641 = vmatprep.mubr.bf16.mxu1 %v5435_v45  ;;  %v5503_v41 = vld [vmem:[%s5891_s15 + $0x47c] ss:$52 sps:$4 sm:$0xff]   ;;  %v5505_v42 = vld [vmem:[%s5891_s15 + $0x2e4] ss:$52 sps:$4 sm:$0xff]  }
  0x40   : > { %4830 = vmatprep.subr.bf16.mxu0 %v5469_v0  ;;  %v5507_v45 = vld [vmem:[%s5891_s15 + $0x478] ss:$52 sps:$4 sm:$0xff]  }
  0x41   : > { %4831 = vmatpush3.bf16.msra.mxu0 %v5470_v2  ;;  %v5552_v0 = vld [vmem:[%s7105_s1 + $0x228] sm:$0xff]  }
  0x42   : > { %4721 = vmatpush3.bf16.msra.mxu1 %v5432_v47  ;;  %4832 = vmatprep.subr.bf16.mxu0 %v5483_v8  ;;  %v5511_v47 = vld [vmem:[%s5891_s15 + $0x34c] ss:$52 sps:$4 sm:$0xff]   ;;  %v5584_v8 = vld [vmem:[%s7105_s1 + $0x218] sm:$0xff]  }
  0x43   : > { %4722 = vmatprep.subr.bf16.mxu1 %v5439_v48  ;;  %v5515_v48 = vld [vmem:[%s5891_s15 + $0x14] ss:$52 sps:$4 sm:$0xff]   ;;  %v5531_v2 = vld [vmem:[%s5891_s15 + $0x418] ss:$52 sps:$4 sm:$0xff]  }
  0x45   : > { %2546 = vmatmul.mubr.bf16.gmra.mxu0 %v5437_v49  ;;  %2642 = vmatmul.mubr.bf16.gmra.mxu1 %v5438_v50  ;;  %v5565_v49 = vld [vmem:[%s7105_s1 + $0x1c0] sm:$0xff]  }
  0x46   : > { %4723 = vmatpush3.bf16.msra.mxu1 %v5440_v51  ;;  %2553 = vmatprep.mubr.bf16.mxu0 %v5445_v53  ;;  %v5566_v50 = vld [vmem:[%s7105_s1 + $0x180] sm:$0xff]   ;;  %v5520_v53 = vld [vmem:[%s7105_s1 + $0x238] sm:$0xff]  }
  0x47   : > { %4724 = vmatprep.subr.bf16.mxu1 %v5441_v52  ;;  %2682 = vmatprep.mubr.bf16.mxu1 %v5449_v54  ;;  %v5513_v51 = vld [vmem:[%s5891_s15 + $0x10] ss:$52 sps:$4 sm:$0xff]   ;;  %v5516_v52 = vld [vmem:[%s5891_s15 + $0x348] ss:$52 sps:$4 sm:$0xff]  }
  0x48   : > { %4833 = vmatpush3.bf16.msra.mxu0 %v5485_v10  ;;  %v5521_v54 = vld [vmem:[%s5891_s15 + $0x3b4] ss:$52 sps:$4 sm:$0xff]  }
  0x49   : > { %4834 = vmatprep.subr.bf16.mxu0 %v5493_v15  ;;  %v5541_v10 = vld [vmem:[%s5891_s15 + $0x480] ss:$52 sps:$4 sm:$0xff]  }
  0x4a   : > { %4725 = vmatpush3.bf16.msra.mxu1 %v5443_v57  ;;  %v5581_v57 = vld [vmem:[%s7105_s1 + $0x2f8] sm:$0xff]   ;;  %v5545_v15 = vld [vmem:[%s5891_s15 + $0x1b4] ss:$52 sps:$4 sm:$0xff]  }
  0x4b   : > { %4934 = vmatprep.subr.bf16.mxu1 %v5451_v60  ;;  %v5525_v60 = vld [vmem:[%s5891_s15 + $0x3b0] ss:$52 sps:$4 sm:$0xff]  }
  0x4c   : > { %4835 = vmatpush3.bf16.msra.mxu0 %v5494_v16  ;;  %v5616_v16 = vld [vmem:[%s7105_s1 + $0x208] sm:$0xff]  }
  0x4d   : > { %2554 = vmatmul.mubr.bf16.gmra.mxu0 %v5450_v59  ;;  %2683 = vmatmul.mubr.bf16.vlgmr.msra.gmra.mxu1 %v5447_v58  ;;  %v5536_v58 = vld [vmem:[%s7105_s1 + $0x230] sm:$0xff]   ;;  %v5551_v59 = vld [vmem:[%s7105_s1 + $0x268] sm:$0xff]  }
  0x4e   : > { %4935 = vmatpush3.bf16.msra.mxu1 %v5452_v61  ;;  %2561 = vmatprep.mubr.bf16.mxu0 %v5453_v62  ;;  %v5526_v61 = vld [vmem:[%s5891_s15 + $0x78] ss:$52 sps:$4 sm:$0xff]   ;;  %v5527_v62 = vld [vmem:[%s5891_s15 + $0x41c] ss:$52 sps:$4 sm:$0xff]  }
  0x4f   : > { %2690 = vmatprep.mubr.bf16.mxu1 %v5455_v63  ;;  %4936 = vmatprep.subr.bf16.mxu1 %v5467_v1  ;;  %v5529_v63 = vld [vmem:[%s5891_s15 + $0xe4] ss:$52 sps:$4 sm:$0xff]  }
  0x50   : > { %4836 = vmatprep.subr.bf16.mxu0 %v5509_v24  ;;  %v5567_v1 = vld [vmem:[%s7105_s1 + $0x260] sm:$0xff]   ;;  %v5558_v24 = vld [vmem:[%s5891_s15 + $0x218] ss:$52 sps:$4 sm:$0xff]  }
  0x51   : > { %4837 = vmatpush3.bf16.msra.mxu0 %v5510_v25  ;;  %v5559_v25 = vld [vmem:[%s5891_s15 + $0x5bc] ss:$52 sps:$4 sm:$0xff]  }
  0x52   : > { %4937 = vmatpush3.bf16.msra.mxu1 %v5468_v3  ;;  %5046 = vmatprep.subr.bf16.mxu0 %v5519_v30  ;;  %v5568_v3 = vld [vmem:[%s7105_s1 + $0x220] sm:$0xff]  }
  0x53   : > { %4938 = vmatprep.subr.bf16.mxu1 %v5484_v9  ;;  %v5599_v9 = vld [vmem:[%s7105_s1 + $0x250] sm:$0xff]   ;;  %v5569_v30 = vld [vmem:[%s5891_s15 + $0x624] ss:$52 sps:$4 sm:$0xff]  }
  0x55   : > { %2562 = vmatmul.mubr.bf16.gmra.mxu0 %v5457_v4  ;;  %2691 = vmatmul.mubr.bf16.gmra.mxu1 %v5458_v5  ;;  %v5583_v4 = vld [vmem:[%s7105_s1 + $0x258] sm:$0xff]   ;;  %v5532_v5 = vld [vmem:[%s5891_s15 + $0xe0] ss:$52 sps:$4 sm:$0xff]  }
  0x56   : > { %2569 = vmatprep.mubr.bf16.mxu0 %v5461_v6  ;;  %2698 = vmatprep.mubr.bf16.mxu1 %v5463_v7  ;;  %v5537_v6 = vld [vmem:[%s5891_s15 + $0x484] ss:$52 sps:$4 sm:$0xff]   ;;  %v5539_v7 = vld [vmem:[%s5891_s15 + $0x14c] ss:$52 sps:$4 sm:$0xff]  }
  0x57   : > { %4939 = vmatpush3.bf16.msra.mxu1 %v5486_v11  ;;  %v5542_v11 = vld [vmem:[%s5891_s15 + $0x148] ss:$52 sps:$4 sm:$0xff]  }
  0x58   : > { %4940 = vmatprep.subr.bf16.mxu1 %v5501_v18  ;;  %v5548_v18 = vld [vmem:[%s5891_s15 + $0x1b0] ss:$52 sps:$4 sm:$0xff]  }
  0x5b   : > { %4941 = vmatpush3.bf16.msra.mxu1 %v5502_v19  ;;  %v5553_v19 = vld [vmem:[%s5891_s15 + $0x554] ss:$52 sps:$4 sm:$0xff]  }
  0x5c   : > { %4942 = vmatprep.subr.bf16.mxu1 %v5517_v26  ;;  %v5561_v26 = vld [vmem:[%s5891_s15 + $0x284] ss:$52 sps:$4 sm:$0xff]  }
  0x5d   : > { %2570 = vmatmul.mubr.bf16.gmra.mxu0 %v5465_v12  ;;  %2699 = vmatmul.mubr.bf16.gmra.mxu1 %v5466_v13  ;;  %v5600_v12 = vld [vmem:[%s7105_s1 + $0x210] sm:$0xff]   ;;  %v5615_v13 = vld [vmem:[%s7105_s1 + $0x248] sm:$0xff]  }
  0x5e   : > { %2577 = vmatprep.mubr.bf16.mxu0 %v5471_v14  ;;  %2706 = vmatprep.mubr.bf16.mxu1 %v5473_v17  ;;  %v5543_v14 = vld [vmem:[%s5891_s15 + $0x4ec] ss:$52 sps:$4 sm:$0xff]   ;;  %v5547_v17 = vld [vmem:[%s5891_s15 + $0x4e8] ss:$52 sps:$4 sm:$0xff]  }
  0x5f   : > { %4943 = vmatpush3.bf16.msra.mxu1 %v5518_v29  ;;  %v5564_v29 = vld [vmem:[%s5891_s15 + $0x280] ss:$52 sps:$4 sm:$0xff]  }
  0x60   : > { %4944 = vmatprep.subr.bf16.mxu1 %v5533_v35  ;;  %v5579_v35 = vld [vmem:[%s5891_s15 + $0x1c] ss:$52 sps:$4 sm:$0xff]  }
  0x63   : > { %4945 = vmatpush3.bf16.msra.mxu1 %v5534_v36  ;;  %v5577_v36 = vld [vmem:[%s5891_s15 + $0x18] ss:$52 sps:$4 sm:$0xff]  }
  0x64   : > { %4946 = vmatprep.subr.bf16.mxu1 %v5549_v43  ;;  %v5613_v43 = vld [vmem:[%s7105_s1 + $0x2e8] sm:$0xff]  }
  0x65   : > { %2578 = vmatmul.mubr.bf16.gmra.mxu0 %v5475_v20  ;;  %2707 = vmatmul.mubr.bf16.gmra.mxu1 %v5476_v21  ;;  %v5555_v20 = vld [vmem:[%s5891_s15 + $0x21c] ss:$52 sps:$4 sm:$0xff]   ;;  %v5631_v21 = vld [vmem:[%s7105_s1 + $0x240] sm:$0xff]  }
  0x66   : > { %2585 = vmatprep.mubr.bf16.mxu0 %v5477_v22  ;;  %2714 = vmatprep.mubr.bf16.mxu1 %v5479_v23  ;;  %v5632_v22 = vld [vmem:[%s7105_s1 + $0x200] sm:$0xff]  }
  0x67   : > { %4947 = vmatpush3.bf16.msra.mxu1 %v5550_v44  ;;  %v5557_v23 = vld [vmem:[%s5891_s15 + $0x550] ss:$52 sps:$4 sm:$0xff]   ;;  %v5589_v44 = vld [vmem:[%s5891_s15 + $0x3b8] ss:$52 sps:$4 sm:$0xff]  }
  0x68   : > { %4948 = vmatprep.subr.bf16.mxu1 %v5565_v49  ;;  %v5629_v49 = vld [vmem:[%s7105_s1 + $0x2e0] sm:$0xff]  }
  0x6b   : > { %4949 = vmatpush3.bf16.msra.mxu1 %v5566_v50  ;;  %v5630_v50 = vld [vmem:[%s7105_s1 + $0x2a0] sm:$0xff]  }
  0x6c   : > { %5158 = vmatprep.subr.bf16.mxu1 %v5581_v57  ;;  %v5660_v57 = vld [vmem:[%s7105_s1 + $0x2d0] sm:$0xff]  }
  0x6d   : > { %2586 = vmatmul.mubr.bf16.gmra.mxu0 %v5481_v27  ;;  %2715 = vmatmul.mubr.bf16.gmra.mxu1 %v5482_v28  ;;  %v6186_v27 = vld [vmem:[%s7105_s1 + $0x338] sm:$0xff]  }
  0x6e   : > { %2593 = vmatprep.mubr.bf16.mxu0 %v5487_v31  ;;  %2722 = vmatprep.mubr.bf16.mxu1 %v5489_v32  ;;  %v5563_v28 = vld [vmem:[%s5891_s15 + $0x5b8] ss:$52 sps:$4 sm:$0xff]   ;;  %v5573_v32 = vld [vmem:[%s5891_s15 + $0x620] ss:$52 sps:$4 sm:$0xff]  }
  0x6f   : > { %v5571_v31 = vld [vmem:[%s5891_s15 + $0x2ec] ss:$52 sps:$4 sm:$0xff]  }
  0x75   : > { %2594 = vmatmul.mubr.bf16.gmra.mxu0 %v5491_v33  ;;  %2723 = vmatmul.mubr.bf16.gmra.mxu1 %v5492_v34  ;;  %v5574_v33 = vld [vmem:[%s5891_s15 + $0x2e8] ss:$52 sps:$4 sm:$0xff]  }
  0x76   : > { %2601 = vmatprep.mubr.bf16.mxu0 %v5495_v37  ;;  %2730 = vmatprep.mubr.bf16.mxu1 %v5497_v38  ;;  %v5575_v34 = vld [vmem:[%s5891_s15 + $0x354] ss:$52 sps:$4 sm:$0xff]   ;;  %v5580_v37 = vld [vmem:[%s5891_s15 + $0x350] ss:$52 sps:$4 sm:$0xff]   ;;  %v5582_v38 = vld [vmem:[%s7105_s1 + $0x2b8] sm:$0xff]  }
  0x7d   : > { %2602 = vmatmul.mubr.bf16.gmra.mxu0 %v5499_v39  ;;  %2731 = vmatmul.mubr.bf16.gmra.mxu1 %v5500_v40  ;;  %v5585_v39 = vld [vmem:[%s5891_s15 + $0x3bc] ss:$52 sps:$4 sm:$0xff]   ;;  %v5587_v40 = vld [vmem:[%s5891_s15 + $0x84] ss:$52 sps:$4 sm:$0xff]  }
  0x7e   : > { %2609 = vmatprep.mubr.bf16.mxu0 %v5503_v41  ;;  %2738 = vmatprep.mubr.bf16.mxu1 %v5505_v42  ;;  %v5597_v41 = vld [vmem:[%s7105_s1 + $0x2f0] sm:$0xff]  }
  0x7f   : > { %v5598_v42 = vld [vmem:[%s7105_s1 + $0x2b0] sm:$0xff]  }
  0x85   : > { %2610 = vmatmul.mubr.bf16.gmra.mxu0 %v5507_v45  ;;  %2739 = vmatmul.mubr.bf16.gmra.mxu1 %v5508_v46  ;;  %v5590_v45 = vld [vmem:[%s5891_s15 + $0x80] ss:$52 sps:$4 sm:$0xff]   ;;  %v5591_v46 = vld [vmem:[%s5891_s15 + $0x424] ss:$52 sps:$4 sm:$0xff]  }
  0x86   : > { %2746 = vmatprep.mubr.bf16.mxu1 %v5511_v47  ;;  %2843 = vmatprep.mubr.bf16.mxu0 %v5515_v48  ;;  %v5593_v47 = vld [vmem:[%s5891_s15 + $0xec] ss:$52 sps:$4 sm:$0xff]  }
  0x87   : > { %v5614_v48 = vld [vmem:[%s7105_s1 + $0x2a8] sm:$0xff]  }
  0x8d   : > { %2747 = vmatmul.mubr.bf16.gmra.mxu1 %v5516_v52  ;;  %2844 = vmatmul.mubr.bf16.vlgmr.msra.gmra.mxu0 %v5513_v51  ;;  %v5645_v51 = vld [vmem:[%s7105_s1 + $0x2d8] sm:$0xff]   ;;  %v5595_v52 = vld [vmem:[%s5891_s15 + $0x420] ss:$52 sps:$4 sm:$0xff]  }
  0x8e   : > { %5047 = vmatpush3.bf16.msra.mxu0 %v5520_v53  ;;  %2754 = vmatprep.mubr.bf16.mxu1 %v5521_v54  ;;  %v5596_v53 = vld [vmem:[%s5891_s15 + $0xe8] ss:$52 sps:$4 sm:$0xff]   ;;  %v5601_v54 = vld [vmem:[%s5891_s15 + $0x48c] ss:$52 sps:$4 sm:$0xff]  }
  0x8f   : > { %2851 = vmatprep.mubr.bf16.mxu0 %v5523_v55  ;;  %5048 = vmatprep.subr.bf16.mxu0 %v5535_v56  ;;  %v5603_v55 = vld [vmem:[%s5891_s15 + $0x154] ss:$52 sps:$4 sm:$0xff]   ;;  %v5646_v56 = vld [vmem:[%s7105_s1 + $0x298] sm:$0xff]  }
  0x92   : > { %5049 = vmatpush3.bf16.msra.mxu0 %v5536_v58  ;;  %v5661_v58 = vld [vmem:[%s7105_s1 + $0x290] sm:$0xff]  }
  0x93   : > { %5050 = vmatprep.subr.bf16.mxu0 %v5551_v59  ;;  %v5675_v59 = vld [vmem:[%s7105_s1 + $0x2c8] sm:$0xff]  }
  0x95   : > { %2755 = vmatmul.mubr.bf16.gmra.mxu1 %v5525_v60  ;;  %2852 = vmatmul.mubr.bf16.gmra.mxu0 %v5526_v61  ;;  %v5605_v60 = vld [vmem:[%s5891_s15 + $0x488] ss:$52 sps:$4 sm:$0xff]   ;;  %v5606_v61 = vld [vmem:[%s5891_s15 + $0x150] ss:$52 sps:$4 sm:$0xff]  }
  0x96   : > { %2762 = vmatprep.mubr.bf16.mxu1 %v5527_v62  ;;  %2859 = vmatprep.mubr.bf16.mxu0 %v5529_v63  ;;  %v5607_v62 = vld [vmem:[%s5891_s15 + $0x4f4] ss:$52 sps:$4 sm:$0xff]   ;;  %v5609_v63 = vld [vmem:[%s5891_s15 + $0x1bc] ss:$52 sps:$4 sm:$0xff]  }
  0x97   : > { %5051 = vmatpush3.bf16.msra.mxu0 %v5552_v0  ;;  %v5676_v0 = vld [vmem:[%s7105_s1 + $0x288] sm:$0xff]  }
  0x98   : > { %5052 = vmatprep.subr.bf16.mxu0 %v5567_v1  ;;  %v5690_v1 = vld [vmem:[%s7105_s1 + $0x2c0] sm:$0xff]  }
  0x9b   : > { %5053 = vmatpush3.bf16.msra.mxu0 %v5568_v3  ;;  %v5611_v3 = vld [vmem:[%s5891_s15 + $0x4f0] ss:$52 sps:$4 sm:$0xff]  }
  0x9c   : > { %5054 = vmatprep.subr.bf16.mxu0 %v5583_v4  ;;  %v5612_v4 = vld [vmem:[%s5891_s15 + $0x1b8] ss:$52 sps:$4 sm:$0xff]  }
  0x9d   : > { %2763 = vmatmul.mubr.bf16.gmra.mxu1 %v5531_v2  ;;  %2860 = vmatmul.mubr.bf16.gmra.mxu0 %v5532_v5  ;;  %v5691_v2 = vld [vmem:[%s7105_s1 + $0x280] sm:$0xff]   ;;  %v5617_v5 = vld [vmem:[%s5891_s15 + $0x55c] ss:$52 sps:$4 sm:$0xff]  }
  0x9e   : > { %2770 = vmatprep.mubr.bf16.mxu1 %v5537_v6  ;;  %2867 = vmatprep.mubr.bf16.mxu0 %v5539_v7  ;;  %v5619_v6 = vld [vmem:[%s5891_s15 + $0x224] ss:$52 sps:$4 sm:$0xff]  }
  0x9f   : > { %5055 = vmatpush3.bf16.msra.mxu0 %v5584_v8 }
  0xa0   : > { %5056 = vmatprep.subr.bf16.mxu0 %v5599_v9 }
  0xa3   : > { %5057 = vmatpush3.bf16.msra.mxu0 %v5600_v12  ;;  %v5622_v12 = vld [vmem:[%s5891_s15 + $0x220] ss:$52 sps:$4 sm:$0xff]  }
  0xa4   : > { %5058 = vmatprep.subr.bf16.mxu0 %v5615_v13 }
  0xa5   : > { %2771 = vmatmul.mubr.bf16.gmra.mxu1 %v5541_v10  ;;  %2868 = vmatmul.mubr.bf16.gmra.mxu0 %v5542_v11  ;;  %v5621_v11 = vld [vmem:[%s5891_s15 + $0x558] ss:$52 sps:$4 sm:$0xff]  }
  0xa6   : > { %2778 = vmatprep.mubr.bf16.mxu1 %v5543_v14  ;;  %2875 = vmatprep.mubr.bf16.mxu0 %v5545_v15 }
  0xa7   : > { %5059 = vmatpush3.bf16.msra.mxu0 %v5616_v16 }
  0xa8   : > { %5060 = vmatprep.subr.bf16.mxu0 %v5631_v21 }
  0xab   : > { %5061 = vmatpush3.bf16.msra.mxu0 %v5632_v22 }
  0xac   : > { %5294 = vmatprep.subr.bf16.mxu0 %v6186_v27 }
  0xad   : > { %2779 = vmatmul.mubr.bf16.gmra.mxu1 %v5547_v17  ;;  %2876 = vmatmul.mubr.bf16.gmra.mxu0 %v5548_v18  ;;  %v5623_v17 = vld [vmem:[%s5891_s15 + $0x5c4] ss:$52 sps:$4 sm:$0xff]   ;;  %v5625_v18 = vld [vmem:[%s5891_s15 + $0x28c] ss:$52 sps:$4 sm:$0xff]  }
  0xae   : > { %2786 = vmatprep.mubr.bf16.mxu1 %v5553_v19  ;;  %2883 = vmatprep.mubr.bf16.mxu0 %v5555_v20 }
  0xb5   : > { %2787 = vmatmul.mubr.bf16.gmra.mxu1 %v5557_v23  ;;  %2884 = vmatmul.mubr.bf16.gmra.mxu0 %v5558_v24 }
  0xb6   : > { %2794 = vmatprep.mubr.bf16.mxu1 %v5559_v25  ;;  %2891 = vmatprep.mubr.bf16.mxu0 %v5561_v26 }
  0xbd   : > { %2795 = vmatmul.mubr.bf16.gmra.mxu1 %v5563_v28  ;;  %2892 = vmatmul.mubr.bf16.gmra.mxu0 %v5564_v29 }
  0xbe   : > { %2802 = vmatprep.mubr.bf16.mxu1 %v5569_v30  ;;  %2899 = vmatprep.mubr.bf16.mxu0 %v5571_v31 }
  0xc5   : > { %2803 = vmatmul.mubr.bf16.gmra.mxu1 %v5573_v32  ;;  %2900 = vmatmul.mubr.bf16.gmra.mxu0 %v5574_v33  ;;  %v5627_v32 = vld [vmem:[%s5891_s15 + $0x5c0] ss:$52 sps:$4 sm:$0xff]   ;;  %v5628_v33 = vld [vmem:[%s5891_s15 + $0x288] ss:$52 sps:$4 sm:$0xff]  }
  0xc6   : > { %2907 = vmatprep.mubr.bf16.mxu0 %v5575_v34  ;;  %3004 = vmatprep.mubr.bf16.mxu1 %v5579_v35  ;;  %v5633_v34 = vld [vmem:[%s5891_s15 + $0x62c] ss:$52 sps:$4 sm:$0xff]   ;;  %v5635_v35 = vld [vmem:[%s5891_s15 + $0x2f4] ss:$52 sps:$4 sm:$0xff]  }
  0xcd   : > { %2908 = vmatmul.mubr.bf16.gmra.mxu0 %v5580_v37  ;;  %3005 = vmatmul.mubr.bf16.vlgmr.msra.gmra.mxu1 %v5577_v36 }
  0xce   : > { %5159 = vmatpush3.bf16.msra.mxu1 %v5582_v38  ;;  %2915 = vmatprep.mubr.bf16.mxu0 %v5585_v39 }
  0xcf   : > { %3012 = vmatprep.mubr.bf16.mxu1 %v5587_v40  ;;  %5160 = vmatprep.subr.bf16.mxu1 %v5597_v41 }
  0xd2   : > { %5161 = vmatpush3.bf16.msra.mxu1 %v5598_v42 }
  0xd3   : > { %5162 = vmatprep.subr.bf16.mxu1 %v5613_v43 }
  0xd5   : > { %2916 = vmatmul.mubr.bf16.gmra.mxu0 %v5589_v44  ;;  %3013 = vmatmul.mubr.bf16.gmra.mxu1 %v5590_v45 }
  0xd6   : > { %2923 = vmatprep.mubr.bf16.mxu0 %v5591_v46  ;;  %3020 = vmatprep.mubr.bf16.mxu1 %v5593_v47 }
  0xd7   : > { %5163 = vmatpush3.bf16.msra.mxu1 %v5614_v48  ;;  %v5637_v48 = vld [vmem:[%s5891_s15 + $0x628] ss:$52 sps:$4 sm:$0xff]  }
  0xd8   : > { %5164 = vmatprep.subr.bf16.mxu1 %v5629_v49  ;;  %v5638_v49 = vld [vmem:[%s5891_s15 + $0x2f0] ss:$52 sps:$4 sm:$0xff]  }
  0xdb   : > { %5165 = vmatpush3.bf16.msra.mxu1 %v5630_v50  ;;  %v5641_v50 = vld [vmem:[%s5891_s15 + $0x35c] ss:$52 sps:$4 sm:$0xff]  }
  0xdc   : > { %5166 = vmatprep.subr.bf16.mxu1 %v5645_v51  ;;  %v5644_v51 = vld [vmem:[%s5891_s15 + $0x24] ss:$52 sps:$4 sm:$0xff]  }
  0xdd   : > { %2924 = vmatmul.mubr.bf16.gmra.mxu0 %v5595_v52  ;;  %3021 = vmatmul.mubr.bf16.gmra.mxu1 %v5596_v53 }
  0xde   : > { %2931 = vmatprep.mubr.bf16.mxu0 %v5601_v54  ;;  %3028 = vmatprep.mubr.bf16.mxu1 %v5603_v55 }
  0xdf   : > { %5167 = vmatpush3.bf16.msra.mxu1 %v5646_v56 }
  0xe0   : > { %5168 = vmatprep.subr.bf16.mxu1 %v5660_v57 }
  0xe3   : > { %5169 = vmatpush3.bf16.msra.mxu1 %v5661_v58 }
  0xe4   : > { %5170 = vmatprep.subr.bf16.mxu1 %v5675_v59 }
  0xe5   : > { %2932 = vmatmul.mubr.bf16.gmra.mxu0 %v5605_v60  ;;  %3029 = vmatmul.mubr.bf16.gmra.mxu1 %v5606_v61 }
  0xe6   : > { %2939 = vmatprep.mubr.bf16.mxu0 %v5607_v62  ;;  %3036 = vmatprep.mubr.bf16.mxu1 %v5609_v63 }
  0xe7   : > { %5171 = vmatpush3.bf16.msra.mxu1 %v5676_v0  ;;  %v5639_v0 = vld [vmem:[%s5891_s15 + $0x358] ss:$52 sps:$4 sm:$0xff]  }
  0xe8   : > { %5172 = vmatprep.subr.bf16.mxu1 %v5690_v1  ;;  %v5642_v1 = vld [vmem:[%s5891_s15 + $0x20] ss:$52 sps:$4 sm:$0xff]  }
  0xeb   : > { %5173 = vmatpush3.bf16.msra.mxu1 %v5691_v2  ;;  %v5650_v2 = vld [vmem:[%s5891_s15 + $0x3c4] ss:$52 sps:$4 sm:$0xff]  }
  0xed   : > { %v4614_v7 = vpop.f32.mrf.mxu0  ;;  %v4686_v8 = vpop.f32.mrf.mxu1  ;;  %2940 = vmatmul.mubr.bf16.gmra.mxu0 %v5611_v3  ;;  %3037 = vmatmul.mubr.bf16.gmra.mxu1 %v5612_v4 }
  0xee   : > { %2947 = vmatprep.mubr.bf16.mxu0 %v5617_v5  ;;  %3044 = vmatprep.mubr.bf16.mxu1 %v5619_v6  ;;  %v5653_v5 = vld [vmem:[%s5891_s15 + $0x8c] ss:$52 sps:$4 sm:$0xff]   ;;  %v5662_v6 = vld [vmem:[%s7105_s1 + $0x330] sm:$0xff]  }
  0xef   : > { %v4615_v9 = vpop.f32.mrf.mxu0  ;;  %v4687_v10 = vpop.f32.mrf.mxu1 }
  0xf0   : > { %v6264_v13 = vadd.f32 %v4615_v9, %v4614_v7  ;;  %v6266_v14 = vadd.f32 %v4687_v10, %v4686_v8 }
  0xf1   : > { %v4617_v15 = vpop.f32.mrf.mxu0  ;;  %v4689_v16 = vpop.f32.mrf.mxu1 }
  0xf3   : > { %v4618_v19 = vpop.f32.mrf.mxu0  ;;  %v4690_v20 = vpop.f32.mrf.mxu1 }
  0xf4   : > { %v6270_v21 = vadd.f32 %v4618_v19, %v4617_v15  ;;  %v6272_v22 = vadd.f32 %v4690_v20, %v4689_v16  ;;  %v5677_v15 = vld [vmem:[%s7105_s1 + $0x328] sm:$0xff]   ;;  %v5648_v20 = vld [vmem:[%s5891_s15 + $0x3c0] ss:$52 sps:$4 sm:$0xff]  }
  0xf5   : > { %v4620_v23 = vpop.f32.mrf.mxu0  ;;  %v4692_v24 = vpop.f32.mrf.mxu1  ;;  %2948 = vmatmul.mubr.bf16.gmra.mxu0 %v5621_v11  ;;  %3045 = vmatmul.mubr.bf16.gmra.mxu1 %v5622_v12 }
  0xf6   : > { %2955 = vmatprep.mubr.bf16.mxu0 %v5623_v17  ;;  %3052 = vmatprep.mubr.bf16.mxu1 %v5625_v18 }
  0xf7   : > { %v4621_v25 = vpop.f32.mrf.mxu0  ;;  %v4693_v26 = vpop.f32.mrf.mxu1 }
  0xf8   : > { %v6274_v28 = vadd.f32 %v4621_v25, %v4620_v23  ;;  %v6276_v29 = vadd.f32 %v4693_v26, %v4692_v24  ;;  %v5651_v23 = vld [vmem:[%s5891_s15 + $0x88] ss:$52 sps:$4 sm:$0xff]  }
  0xf9   : > { %v4623_v30 = vpop.f32.mrf.mxu0  ;;  %v4695_v31 = vpop.f32.mrf.mxu1  ;;  %v5659_v25 = vld [vmem:[%s5891_s15 + $0xf4] ss:$52 sps:$4 sm:$0xff]  }
  0xfb   : > { %v4624_v36 = vpop.f32.mrf.mxu0  ;;  %v4696_v37 = vpop.f32.mrf.mxu1 }
  0xfc   : > { %v6282_v38 = vadd.f32 %v4624_v36, %v4623_v30  ;;  %v6284_v39 = vadd.f32 %v4696_v37, %v4695_v31 }
  0xfd   : > { %v4626_v40 = vpop.f32.mrf.mxu0  ;;  %v4698_v41 = vpop.f32.mrf.mxu1  ;;  %2956 = vmatmul.mubr.bf16.gmra.mxu0 %v5627_v32  ;;  %3053 = vmatmul.mubr.bf16.gmra.mxu1 %v5628_v33  ;;  %v5692_v33 = vld [vmem:[%s7105_s1 + $0x320] sm:$0xff]  }
  0xfe   : > { %2963 = vmatprep.mubr.bf16.mxu0 %v5633_v34  ;;  %3060 = vmatprep.mubr.bf16.mxu1 %v5635_v35 }
  0xff   : > { %v4627_v42 = vpop.f32.mrf.mxu0  ;;  %v4699_v43 = vpop.f32.mrf.mxu1 }
 0x100   : > { %v6286_v44 = vadd.f32 %v4627_v42, %v4626_v40  ;;  %v6288_v45 = vadd.f32 %v4699_v43, %v4698_v41  ;;  %v5705_v42 = vld [vmem:[%s7105_s1 + $0x318] sm:$0xff]  }
 0x101   : > { %v4629_v46 = vpop.f32.mrf.mxu0  ;;  %v4701_v47 = vpop.f32.mrf.mxu1 }
 0x103   : > { %v4630_v52 = vpop.f32.mrf.mxu0  ;;  %v4702_v53 = vpop.f32.mrf.mxu1 }
 0x104   : > { %v6294_v54 = vadd.f32 %v4630_v52, %v4629_v46  ;;  %v6296_v55 = vadd.f32 %v4702_v53, %v4701_v47  ;;  %v5654_v47 = vld [vmem:[%s5891_s15 + $0x428] ss:$52 sps:$4 sm:$0xff]  }
 0x105   : > { %v4632_v56 = vpop.f32.mrf.mxu0  ;;  %v4704_v57 = vpop.f32.mrf.mxu1  ;;  %2964 = vmatmul.mubr.bf16.gmra.mxu0 %v5637_v48  ;;  %3061 = vmatmul.mubr.bf16.gmra.mxu1 %v5638_v49  ;;  %v5657_v48 = vld [vmem:[%s5891_s15 + $0xf0] ss:$52 sps:$4 sm:$0xff]   ;;  %v5665_v49 = vld [vmem:[%s5891_s15 + $0x494] ss:$52 sps:$4 sm:$0xff]  }
 0x106   : > { %3068 = vmatprep.mubr.bf16.mxu1 %v5641_v50  ;;  %3165 = vmatprep.mubr.bf16.mxu0 %v5644_v51  ;;  %v5668_v50 = vld [vmem:[%s5891_s15 + $0x15c] ss:$52 sps:$4 sm:$0xff]  }
 0x107   : > { %v4633_v58 = vpop.f32.mrf.mxu0  ;;  %v4705_v59 = vpop.f32.mrf.mxu1 }
 0x108   : > { %v6298_v60 = vadd.f32 %v4633_v58, %v4632_v56  ;;  %v6300_v61 = vadd.f32 %v4705_v59, %v4704_v57  ;;  %v5718_v57 = vld [vmem:[%s7105_s1 + $0x310] sm:$0xff]  }
 0x109   : > { %v4635_v62 = vpop.f32.mrf.mxu0  ;;  %v4707_v63 = vpop.f32.mrf.mxu1 }
 0x10b   : > { %v4636_v3 = vpop.f32.mrf.mxu0  ;;  %v4708_v4 = vpop.f32.mrf.mxu1 }
 0x10c   : > { %v6309_v7 = vadd.f32 %v4636_v3, %v4635_v62  ;;  %v6311_v8 = vadd.f32 %v4708_v4, %v4707_v63 }
 0x10d   : > { %v4638_v9 = vpop.f32.mrf.mxu0  ;;  %v4726_v10 = vpop.f32.mrf.mxu1  ;;  %3069 = vmatmul.mubr.bf16.gmra.mxu1 %v5639_v0  ;;  %3166 = vmatmul.mubr.bf16.vlgmr.msra.gmra.mxu0 %v5642_v1 }
 0x10e   : > { %5295 = vmatpush3.bf16.msra.mxu0 %v6186_v27  ;;  %3076 = vmatprep.mubr.bf16.mxu1 %v5650_v2  ;;  %v5656_v27 = vld [vmem:[%s5891_s15 + $0x42c] ss:$52 sps:$4 sm:$0xff]  }
 0x10f   : > { %v4639_v11 = vpop.f32.mrf.mxu0  ;;  %v4727_v12 = vpop.f32.mrf.mxu1  ;;  %3173 = vmatprep.mubr.bf16.mxu0 %v5653_v5  ;;  %5296 = vmatprep.subr.bf16.mxu0 %v5662_v6  ;;  %v5731_v2 = vld [vmem:[%s7105_s1 + $0x308] sm:$0xff]   ;;  %v5663_v5 = vld [vmem:[%s5891_s15 + $0x490] ss:$52 sps:$4 sm:$0xff]  }
 0x110   : > { %v6317_v16 = vadd.f32 %v4639_v11, %v4638_v9  ;;  %v4728_v17 = vadd.f32 %v4727_v12, %v4726_v10  ;;  %v5671_v9 = vld [vmem:[%s5891_s15 + $0x4fc] ss:$52 sps:$4 sm:$0xff]   ;;  %v5674_v10 = vld [vmem:[%s5891_s15 + $0x1c4] ss:$52 sps:$4 sm:$0xff]  }
 0x111   : > { %v4641_v18 = vpop.f32.mrf.mxu0  ;;  %v4729_v19 = vpop.f32.mrf.mxu1 }
 0x112   : > { %v6322_v24 = vadd.f32 %v4728_v17, %v6264_v13  ;;  %5297 = vmatpush3.bf16.msra.mxu0 %v5662_v6  ;;  %v5666_v6 = vld [vmem:[%s5891_s15 + $0x158] ss:$52 sps:$4 sm:$0xff]  }
 0x113   : > { %v4642_v26 = vpop.f32.mrf.mxu0  ;;  %v4730_v30 = vpop.f32.mrf.mxu1  ;;  %5298 = vmatprep.subr.bf16.mxu0 %v5677_v15 }
 0x114   : > { %v6326_v31 = vadd.f32 %v4642_v26, %v4641_v18  ;;  %v4731_v32 = vadd.f32 %v4730_v30, %v4729_v19  ;;  %v5744_v18 = vld [vmem:[%s7105_s1 + $0x300] sm:$0xff]  }
 0x115   : > { %v4644_v34 = vpop.f32.mrf.mxu0  ;;  %v4732_v35 = vpop.f32.mrf.mxu1  ;;  %3077 = vmatmul.mubr.bf16.gmra.mxu1 %v5648_v20  ;;  %3174 = vmatmul.mubr.bf16.gmra.mxu0 %v5651_v23 }
 0x116   : > { %v6332_v13 = vadd.f32 %v4731_v32, %v6270_v21  ;;  %3084 = vmatprep.mubr.bf16.mxu1 %v5656_v27  ;;  %3181 = vmatprep.mubr.bf16.mxu0 %v5659_v25 }
 0x117   : > { %v4645_v36 = vpop.f32.mrf.mxu0  ;;  %v4733_v37 = vpop.f32.mrf.mxu1  ;;  %5299 = vmatpush3.bf16.msra.mxu0 %v5677_v15 }
 0x118   : > { %v6334_v40 = vadd.f32 %v4645_v36, %v4644_v34  ;;  %v4734_v41 = vadd.f32 %v4733_v37, %v4732_v35  ;;  %5300 = vmatprep.subr.bf16.mxu0 %v5692_v33  ;;  %v5672_v34 = vld [vmem:[%s5891_s15 + $0x1c0] ss:$52 sps:$4 sm:$0xff]   ;;  %v5680_v36 = vld [vmem:[%s5891_s15 + $0x564] ss:$52 sps:$4 sm:$0xff]  }
 0x119   : > { %v4647_v43 = vpop.f32.mrf.mxu0  ;;  %v4735_v46 = vpop.f32.mrf.mxu1  ;;  %v5683_v37 = vld [vmem:[%s5891_s15 + $0x22c] ss:$52 sps:$4 sm:$0xff]  }
 0x11a   : > { %v6342_v21 = vadd.f32 %v4734_v41, %v6274_v28 }
 0x11b   : > { %v4648_v51 = vpop.f32.mrf.mxu0  ;;  %v4736_v52 = vpop.f32.mrf.mxu1  ;;  %5301 = vmatpush3.bf16.msra.mxu0 %v5692_v33  ;;  %v5669_v33 = vld [vmem:[%s5891_s15 + $0x4f8] ss:$52 sps:$4 sm:$0xff]  }
 0x11c   : > { %v6346_v53 = vadd.f32 %v4648_v51, %v4647_v43  ;;  %v4737_v56 = vadd.f32 %v4736_v52, %v4735_v46  ;;  %5302 = vmatprep.subr.bf16.mxu0 %v5705_v42 }
 0x11d   : > { %v4650_v58 = vpop.f32.mrf.mxu0  ;;  %v4738_v59 = vpop.f32.mrf.mxu1  ;;  %3085 = vmatmul.mubr.bf16.gmra.mxu1 %v5654_v47  ;;  %3182 = vmatmul.mubr.bf16.gmra.mxu0 %v5657_v48 }
 0x11e   : > { %v6352_v28 = vadd.f32 %v4737_v56, %v6282_v38  ;;  %3092 = vmatprep.mubr.bf16.mxu1 %v5665_v49  ;;  %3189 = vmatprep.mubr.bf16.mxu0 %v5668_v50 }
 0x11f   : > { %v4651_v62 = vpop.f32.mrf.mxu0  ;;  %v4739_v63 = vpop.f32.mrf.mxu1  ;;  %5303 = vmatpush3.bf16.msra.mxu0 %v5705_v42 }
 0x120   : > { %v6354_v0 = vadd.f32 %v4651_v62, %v4650_v58  ;;  %v4740_v1 = vadd.f32 %v4739_v63, %v4738_v59  ;;  %5304 = vmatprep.subr.bf16.mxu0 %v5718_v57  ;;  %v5681_v58 = vld [vmem:[%s5891_s15 + $0x228] ss:$52 sps:$4 sm:$0xff]   ;;  %v5686_v62 = vld [vmem:[%s5891_s15 + $0x5cc] ss:$52 sps:$4 sm:$0xff]  }
 0x121   : > { %v4653_v3 = vpop.f32.mrf.mxu0  ;;  %v4741_v4 = vpop.f32.mrf.mxu1  ;;  %v5689_v63 = vld [vmem:[%s5891_s15 + $0x294] ss:$52 sps:$4 sm:$0xff]  }
 0x122   : > { %v6362_v38 = vadd.f32 %v4740_v1, %v6286_v44 }
 0x123   : > { %v4654_v11 = vpop.f32.mrf.mxu0  ;;  %v4742_v12 = vpop.f32.mrf.mxu1  ;;  %5305 = vmatpush3.bf16.msra.mxu0 %v5718_v57  ;;  %v5678_v57 = vld [vmem:[%s5891_s15 + $0x560] ss:$52 sps:$4 sm:$0xff]  }
 0x124   : > { %v6366_v15 = vadd.f32 %v4654_v11, %v4653_v3  ;;  %v4743_v17 = vadd.f32 %v4742_v12, %v4741_v4  ;;  %5306 = vmatprep.subr.bf16.mxu0 %v5731_v2 }
 0x125   : > { %v4656_v19 = vpop.f32.mrf.mxu0  ;;  %v4744_v20 = vpop.f32.mrf.mxu1  ;;  %3093 = vmatmul.mubr.bf16.gmra.mxu1 %v5663_v5  ;;  %3190 = vmatmul.mubr.bf16.gmra.mxu0 %v5666_v6 }
 0x126   : > { %v6372_v44 = vadd.f32 %v4743_v17, %v6294_v54  ;;  %3100 = vmatprep.mubr.bf16.mxu1 %v5671_v9  ;;  %3197 = vmatprep.mubr.bf16.mxu0 %v5674_v10 }
 0x127   : > { %v4657_v23 = vpop.f32.mrf.mxu0  ;;  %v4745_v27 = vpop.f32.mrf.mxu1  ;;  %5307 = vmatpush3.bf16.msra.mxu0 %v5731_v2 }
 0x128   : > { %v6374_v25 = vadd.f32 %v4657_v23, %v4656_v19  ;;  %v4746_v26 = vadd.f32 %v4745_v27, %v4744_v20  ;;  %5308 = vmatprep.subr.bf16.mxu0 %v5744_v18  ;;  %v5687_v19 = vld [vmem:[%s5891_s15 + $0x290] ss:$52 sps:$4 sm:$0xff]   ;;  %v5695_v23 = vld [vmem:[%s5891_s15 + $0x634] ss:$52 sps:$4 sm:$0xff]  }
 0x129   : > { %v4659_v30 = vpop.f32.mrf.mxu0  ;;  %v4747_v32 = vpop.f32.mrf.mxu1  ;;  %v5698_v27 = vld [vmem:[%s5891_s15 + $0x2fc] ss:$52 sps:$4 sm:$0xff]  }
 0x12a   : > { %v6379_v35 = vadd.f32 %v4746_v26, %v6298_v60 }
 0x12b   : > { %v4660_v54 = vpop.f32.mrf.mxu0  ;;  %v4748_v41 = vpop.f32.mrf.mxu1  ;;  %5309 = vmatpush3.bf16.msra.mxu0 %v5744_v18  ;;  %v5684_v18 = vld [vmem:[%s5891_s15 + $0x5c8] ss:$52 sps:$4 sm:$0xff]  }
 0x12c   : > { %v6383_v42 = vadd.f32 %v4660_v54, %v4659_v30  ;;  %v4749_v43 = vadd.f32 %v4748_v41, %v4747_v32 }
 0x12d   : > { %v4662_v46 = vpop.f32.mrf.mxu0  ;;  %v4750_v47 = vpop.f32.mrf.mxu1  ;;  %3101 = vmatmul.mubr.bf16.gmra.mxu1 %v5669_v33  ;;  %3198 = vmatmul.mubr.bf16.gmra.mxu0 %v5672_v34 }
 0x12e   : > { %v6386_v48 = vadd.f32 %v4749_v43, %v6309_v7  ;;  %3108 = vmatprep.mubr.bf16.mxu1 %v5680_v36  ;;  %3205 = vmatprep.mubr.bf16.mxu0 %v5683_v37 }
 0x12f   : > { %v4663_v60 = vpop.f32.mrf.mxu0  ;;  %v4751_v49 = vpop.f32.mrf.mxu1 }
 0x130   : > { %v6388_v50 = vadd.f32 %v4663_v60, %v4662_v46  ;;  %v4752_v51 = vadd.f32 %v4751_v49, %v4750_v47  ;;  %v5693_v47 = vld [vmem:[%s5891_s15 + $0x630] ss:$52 sps:$4 sm:$0xff]   ;;  %v5696_v60 = vld [vmem:[%s5891_s15 + $0x2f8] ss:$52 sps:$4 sm:$0xff]  }
 0x131   : > { %v4665_v52 = vpop.f32.mrf.mxu0  ;;  %v4753_v56 = vpop.f32.mrf.mxu1 }
 0x132   : > { %v6393_v59 = vadd.f32 %v4752_v51, %v6317_v16  ;;  %v5701_v51 = vld [vmem:[%s5891_s15 + $0x364] ss:$52 sps:$4 sm:$0xff]  }
 0x133   : > { %v4666_v1 = vpop.f32.mrf.mxu0  ;;  %v4754_v2 = vpop.f32.mrf.mxu1 }
 0x134   : > { %v6397_v7 = vadd.f32 %v4666_v1, %v4665_v52  ;;  %v4755_v3 = vadd.f32 %v4754_v2, %v4753_v56  ;;  %v5704_v52 = vld [vmem:[%s5891_s15 + $0x2c] ss:$52 sps:$4 sm:$0xff]  }
 0x135   : > { %v4668_v4 = vpop.f32.mrf.mxu0  ;;  %v4756_v5 = vpop.f32.mrf.mxu1  ;;  %3109 = vmatmul.mubr.bf16.gmra.mxu1 %v5678_v57  ;;  %3206 = vmatmul.mubr.bf16.gmra.mxu0 %v5681_v58 }
 0x136   : > { %v6400_v6 = vadd.f32 %v4755_v3, %v6326_v31  ;;  %3116 = vmatprep.mubr.bf16.mxu1 %v5686_v62  ;;  %3213 = vmatprep.mubr.bf16.mxu0 %v5689_v63 }
 0x137   : > { %v4669_v16 = vpop.f32.mrf.mxu0  ;;  %v4757_v9 = vpop.f32.mrf.mxu1 }
 0x138   : > { %v6402_v10 = vadd.f32 %v4669_v16, %v4668_v4  ;;  %v4758_v11 = vadd.f32 %v4757_v9, %v4756_v5  ;;  %v5699_v9 = vld [vmem:[%s5891_s15 + $0x360] ss:$52 sps:$4 sm:$0xff]  }
 0x139   : > { %v4671_v12 = vpop.f32.mrf.mxu0  ;;  %v4759_v17 = vpop.f32.mrf.mxu1 }
 0x13a   : > { %v6407_v20 = vadd.f32 %v4758_v11, %v6334_v40  ;;  %v5702_v11 = vld [vmem:[%s5891_s15 + $0x28] ss:$52 sps:$4 sm:$0xff]  }
 0x13b   : > { %v4672_v26 = vpop.f32.mrf.mxu0  ;;  %v4760_v30 = vpop.f32.mrf.mxu1 }
 0x13c   : > { %v6411_v31 = vadd.f32 %v4672_v26, %v4671_v12  ;;  %v4761_v32 = vadd.f32 %v4760_v30, %v4759_v17  ;;  %v5708_v17 = vld [vmem:[%s5891_s15 + $0x3cc] ss:$52 sps:$4 sm:$0xff]  }
 0x13d   : > { %v4674_v33 = vpop.f32.mrf.mxu0  ;;  %v4762_v34 = vpop.f32.mrf.mxu1  ;;  %3117 = vmatmul.mubr.bf16.gmra.mxu1 %v5684_v18  ;;  %3214 = vmatmul.mubr.bf16.gmra.mxu0 %v5687_v19  ;;  %v5711_v18 = vld [vmem:[%s5891_s15 + $0x94] ss:$52 sps:$4 sm:$0xff]  }
 0x13e   : > { %v6414_v36 = vadd.f32 %v4761_v32, %v6346_v53  ;;  %3124 = vmatprep.mubr.bf16.mxu1 %v5695_v23  ;;  %3221 = vmatprep.mubr.bf16.mxu0 %v5698_v27 }
 0x13f   : > { %v4675_v40 = vpop.f32.mrf.mxu0  ;;  %v4763_v37 = vpop.f32.mrf.mxu1 }
 0x140   : > { %v6416_v54 = vadd.f32 %v4675_v40, %v4674_v33  ;;  %v4764_v41 = vadd.f32 %v4763_v37, %v4762_v34 }
 0x141   : > { %v4677_v43 = vpop.f32.mrf.mxu0  ;;  %v4765_v46 = vpop.f32.mrf.mxu1 }
 0x142   : > { %v6421_v49 = vadd.f32 %v4764_v41, %v6354_v0 }
 0x143   : > { %v4678_v56 = vpop.f32.mrf.mxu0  ;;  %v4766_v57 = vpop.f32.mrf.mxu1 }
 0x144   : > { %v6425_v53 = vadd.f32 %v4678_v56, %v4677_v43  ;;  %v4767_v58 = vadd.f32 %v4766_v57, %v4765_v46  ;;  %v5706_v43 = vld [vmem:[%s5891_s15 + $0x3c8] ss:$52 sps:$4 sm:$0xff]   ;;  %v5709_v46 = vld [vmem:[%s5891_s15 + $0x90] ss:$52 sps:$4 sm:$0xff]  }
 0x145   : > { %v4680_v62 = vpop.f32.mrf.mxu0  ;;  %v4768_v63 = vpop.f32.mrf.mxu1  ;;  %3125 = vmatmul.mubr.bf16.gmra.mxu1 %v5693_v47  ;;  %3222 = vmatmul.mubr.bf16.gmra.mxu0 %v5696_v60 }
 0x146   : > { %v6428_v1 = vadd.f32 %v4767_v58, %v6366_v15  ;;  %3229 = vmatprep.mubr.bf16.mxu0 %v5701_v51  ;;  %3326 = vmatprep.mubr.bf16.mxu1 %v5704_v52  ;;  %v5714_v51 = vld [vmem:[%s5891_s15 + $0x434] ss:$52 sps:$4 sm:$0xff]   ;;  %v5717_v52 = vld [vmem:[%s5891_s15 + $0xfc] ss:$52 sps:$4 sm:$0xff]  }
 0x147   : > { %v4681_v0 = vpop.f32.mrf.mxu0  ;;  %v4769_v2 = vpop.f32.mrf.mxu1 }
 0x148   : > { %v6430_v3 = vadd.f32 %v4681_v0, %v4680_v62  ;;  %v4770_v4 = vadd.f32 %v4769_v2, %v4768_v63 }
 0x149   : > { %v4683_v5 = vpop.f32.mrf.mxu0  ;;  %v4771_v16 = vpop.f32.mrf.mxu1 }
 0x14a   : > { %v6435_v12 = vadd.f32 %v4770_v4, %v6374_v25 }
 0x14b   : > { %v4684_v19 = vpop.f32.mrf.mxu0  ;;  %v4772_v23 = vpop.f32.mrf.mxu1 }
 0x14c   : > { %v6439_v15 = vadd.f32 %v4684_v19, %v4683_v5  ;;  %v4773_v27 = vadd.f32 %v4772_v23, %v4771_v16  ;;  %v5724_v23 = vld [vmem:[%s5891_s15 + $0x164] ss:$52 sps:$4 sm:$0xff]  }
 0x14d   : > { %v4774_v26 = vpop.f32.mrf.mxu1  ;;  %v4838_v30 = vpop.f32.mrf.mxu0  ;;  %3230 = vmatmul.mubr.bf16.gmra.mxu0 %v5699_v9  ;;  %3327 = vmatmul.mubr.bf16.vlgmr.msra.gmra.mxu1 %v5702_v11  ;;  %v5712_v11 = vld [vmem:[%s5891_s15 + $0x430] ss:$52 sps:$4 sm:$0xff]  }
 0x14e   : > { %v6442_v32 = vadd.f32 %v4773_v27, %v6383_v42  ;;  %3237 = vmatprep.mubr.bf16.mxu0 %v5708_v17  ;;  %3334 = vmatprep.mubr.bf16.mxu1 %v5711_v18  ;;  %v5715_v17 = vld [vmem:[%s5891_s15 + $0xf8] ss:$52 sps:$4 sm:$0xff]  }
 0x14f   : > { %v4775_v25 = vpop.f32.mrf.mxu1  ;;  %v4839_v33 = vpop.f32.mrf.mxu0 }
 0x150   : > { %v4776_v34 = vadd.f32 %v4775_v25, %v4774_v26  ;;  %v4840_v40 = vadd.f32 %v4839_v33, %v4838_v30 }
 0x151   : > { %v4777_v37 = vpop.f32.mrf.mxu1  ;;  %v4841_v41 = vpop.f32.mrf.mxu0 }
 0x152   : > { %v6447_v47 = vadd.f32 %v4776_v34, %v6388_v50  ;;  %v6450_v60 = vadd.f32 %v4840_v40, %v6322_v24 }
 0x153   : > { %v4778_v42 = vpop.f32.mrf.mxu1  ;;  %v4842_v56 = vpop.f32.mrf.mxu0 }
 0x154   : > { %v4779_v57 = vadd.f32 %v4778_v42, %v4777_v37  ;;  %v4843_v58 = vadd.f32 %v4842_v56, %v4841_v41 }
 0x155   : > { %v4780_v62 = vpop.f32.mrf.mxu1  ;;  %v4844_v63 = vpop.f32.mrf.mxu0  ;;  %3238 = vmatmul.mubr.bf16.gmra.mxu0 %v5706_v43  ;;  %3335 = vmatmul.mubr.bf16.gmra.mxu1 %v5709_v46 }
 0x156   : > { %v6455_v50 = vadd.f32 %v4779_v57, %v6397_v7  ;;  %v6458_v24 = vadd.f32 %v4843_v58, %v6332_v13  ;;  %3245 = vmatprep.mubr.bf16.mxu0 %v5714_v51  ;;  %3342 = vmatprep.mubr.bf16.mxu1 %v5717_v52  ;;  %v5721_v7 = vld [vmem:[%s5891_s15 + $0x49c] ss:$52 sps:$4 sm:$0xff]   ;;  %v5719_v51 = vld [vmem:[%s5891_s15 + $0x498] ss:$52 sps:$4 sm:$0xff]   ;;  %v5722_v52 = vld [vmem:[%s5891_s15 + $0x160] ss:$52 sps:$4 sm:$0xff]  }
 0x157   : > { %v4781_v0 = vpop.f32.mrf.mxu1  ;;  %v4845_v2 = vpop.f32.mrf.mxu0  ;;  %v5730_v57 = vld [vmem:[%s5891_s15 + $0x1cc] ss:$52 sps:$4 sm:$0xff]  }
 0x158   : > { %v4782_v4 = vadd.f32 %v4781_v0, %v4780_v62  ;;  %v4846_v5 = vadd.f32 %v4845_v2, %v4844_v63 }
 0x159   : > { %v4783_v16 = vpop.f32.mrf.mxu1  ;;  %v4847_v9 = vpop.f32.mrf.mxu0 }
 0x15a   : > { %v6463_v18 = vadd.f32 %v4782_v4, %v6402_v10  ;;  %v6466_v19 = vadd.f32 %v4846_v5, %v6342_v21 }
 0x15b   : > { %v4784_v13 = vpop.f32.mrf.mxu1  ;;  %v4848_v27 = vpop.f32.mrf.mxu0 }
 0x15c   : > { %v4785_v26 = vadd.f32 %v4784_v13, %v4783_v16  ;;  %v4849_v30 = vadd.f32 %v4848_v27, %v4847_v9 }
 0x15d   : > { %v4786_v25 = vpop.f32.mrf.mxu1  ;;  %v4850_v33 = vpop.f32.mrf.mxu0  ;;  %3246 = vmatmul.mubr.bf16.gmra.mxu0 %v5712_v11  ;;  %3343 = vmatmul.mubr.bf16.gmra.mxu1 %v5715_v17 }
 0x15e   : > { %v6471_v10 = vadd.f32 %v4785_v26, %v6411_v31  ;;  %v6474_v21 = vadd.f32 %v4849_v30, %v6352_v28  ;;  %3253 = vmatprep.mubr.bf16.mxu0 %v5721_v7  ;;  %3350 = vmatprep.mubr.bf16.mxu1 %v5724_v23  ;;  %v5727_v31 = vld [vmem:[%s5891_s15 + $0x504] ss:$52 sps:$4 sm:$0xff]   ;;  %v5725_v7 = vld [vmem:[%s5891_s15 + $0x500] ss:$52 sps:$4 sm:$0xff]   ;;  %v5728_v23 = vld [vmem:[%s5891_s15 + $0x1c8] ss:$52 sps:$4 sm:$0xff]  }
 0x15f   : > { %v4787_v34 = vpop.f32.mrf.mxu1  ;;  %v4851_v40 = vpop.f32.mrf.mxu0  ;;  %v5737_v26 = vld [vmem:[%s5891_s15 + $0x234] ss:$52 sps:$4 sm:$0xff]  }
 0x160   : > { %v4788_v37 = vadd.f32 %v4787_v34, %v4786_v25  ;;  %v4852_v41 = vadd.f32 %v4851_v40, %v4850_v33 }
 0x161   : > { %v4789_v43 = vpop.f32.mrf.mxu1  ;;  %v4853_v46 = vpop.f32.mrf.mxu0 }
 0x162   : > { %v6479_v42 = vadd.f32 %v4788_v37, %v6416_v54  ;;  %v6482_v56 = vadd.f32 %v4852_v41, %v6362_v38 }
 0x163   : > { %v4790_v28 = vpop.f32.mrf.mxu1  ;;  %v4854_v58 = vpop.f32.mrf.mxu0 }
 0x164   : > { %v4791_v62 = vadd.f32 %v4790_v28, %v4789_v43  ;;  %v4855_v63 = vadd.f32 %v4854_v58, %v4853_v46 }
 0x165   : > { %v4792_v0 = vpop.f32.mrf.mxu1  ;;  %v4856_v2 = vpop.f32.mrf.mxu0  ;;  %3254 = vmatmul.mubr.bf16.gmra.mxu0 %v5719_v51  ;;  %3351 = vmatmul.mubr.bf16.gmra.mxu1 %v5722_v52 }
 0x166   : > { %v6487_v54 = vadd.f32 %v4791_v62, %v6425_v53  ;;  %v6490_v38 = vadd.f32 %v4855_v63, %v6372_v44  ;;  %3261 = vmatprep.mubr.bf16.mxu0 %v5727_v31  ;;  %3358 = vmatprep.mubr.bf16.mxu1 %v5730_v57  ;;  %v5734_v53 = vld [vmem:[%s5891_s15 + $0x56c] ss:$52 sps:$4 sm:$0xff]   ;;  %v5732_v31 = vld [vmem:[%s5891_s15 + $0x568] ss:$52 sps:$4 sm:$0xff]   ;;  %v5735_v57 = vld [vmem:[%s5891_s15 + $0x230] ss:$52 sps:$4 sm:$0xff]  }
 0x167   : > { %v4793_v4 = vpop.f32.mrf.mxu1  ;;  %v4857_v5 = vpop.f32.mrf.mxu0  ;;  %v5743_v62 = vld [vmem:[%s5891_s15 + $0x29c] ss:$52 sps:$4 sm:$0xff]  }
 0x168   : > { %v4794_v16 = vadd.f32 %v4793_v4, %v4792_v0  ;;  %v4858_v9 = vadd.f32 %v4857_v5, %v4856_v2 }
 0x169   : > { %v4795_v11 = vpop.f32.mrf.mxu1  ;;  %v4859_v17 = vpop.f32.mrf.mxu0 }
 0x16a   : > { %v6495_v13 = vadd.f32 %v4794_v16, %v6430_v3  ;;  %v6498_v27 = vadd.f32 %v4858_v9, %v6379_v35 }
 0x16b   : > { %v4796_v44 = vpop.f32.mrf.mxu1  ;;  %v4860_v30 = vpop.f32.mrf.mxu0 }
 0x16c   : > { %v4797_v25 = vadd.f32 %v4796_v44, %v4795_v11  ;;  %v4861_v33 = vadd.f32 %v4860_v30, %v4859_v17 }
 0x16d   : > { %v4798_v34 = vpop.f32.mrf.mxu1  ;;  %v4862_v40 = vpop.f32.mrf.mxu0  ;;  %3262 = vmatmul.mubr.bf16.gmra.mxu0 %v5725_v7  ;;  %3359 = vmatmul.mubr.bf16.gmra.mxu1 %v5728_v23 }
 0x16e   : > { %v6503_v3 = vadd.f32 %v4797_v25, %v6439_v15  ;;  %v6506_v35 = vadd.f32 %v4861_v33, %v6386_v48  ;;  %3269 = vmatprep.mubr.bf16.mxu0 %v5734_v53  ;;  %3366 = vmatprep.mubr.bf16.mxu1 %v5737_v26  ;;  %v5740_v15 = vld [vmem:[%s5891_s15 + $0x5d4] ss:$52 sps:$4 sm:$0xff]   ;;  %v5738_v53 = vld [vmem:[%s5891_s15 + $0x5d0] ss:$52 sps:$4 sm:$0xff]   ;;  %v5741_v26 = vld [vmem:[%s5891_s15 + $0x298] ss:$52 sps:$4 sm:$0xff]  }
 0x16f   : > { %v4799_v37 = vpop.f32.mrf.mxu1  ;;  %v4863_v41 = vpop.f32.mrf.mxu0  ;;  %v5750_v25 = vld [vmem:[%s5891_s15 + $0x304] ss:$52 sps:$4 sm:$0xff]  }
 0x170   : > { %v4800_v43 = vadd.f32 %v4799_v37, %v4798_v34  ;;  %v4864_v46 = vadd.f32 %v4863_v41, %v4862_v40 }
 0x171   : > { %v4801_v51 = vpop.f32.mrf.mxu1  ;;  %v4865_v52 = vpop.f32.mrf.mxu0 }
 0x172   : > { %v6511_v28 = vadd.f32 %v4800_v43, %v6266_v14  ;;  %v6514_v58 = vadd.f32 %v4864_v46, %v6393_v59 }
 0x173   : > { %v4802_v48 = vpop.f32.mrf.mxu1  ;;  %v4866_v63 = vpop.f32.mrf.mxu0 }
 0x174   : > { %v4803_v0 = vadd.f32 %v4802_v48, %v4801_v51  ;;  %v4867_v2 = vadd.f32 %v4866_v63, %v4865_v52 }
 0x175   : > { %v4804_v4 = vpop.f32.mrf.mxu1  ;;  %v4868_v5 = vpop.f32.mrf.mxu0  ;;  %3270 = vmatmul.mubr.bf16.gmra.mxu0 %v5732_v31  ;;  %3367 = vmatmul.mubr.bf16.gmra.mxu1 %v5735_v57 }
 0x176   : > { %v6519_v14 = vadd.f32 %v4803_v0, %v6272_v22  ;;  %v6522_v59 = vadd.f32 %v4867_v2, %v6400_v6  ;;  %3277 = vmatprep.mubr.bf16.mxu0 %v5740_v15  ;;  %3374 = vmatprep.mubr.bf16.mxu1 %v5743_v62  ;;  %v5747_v22 = vld [vmem:[%s5891_s15 + $0x63c] ss:$52 sps:$4 sm:$0xff]   ;;  %v5745_v15 = vld [vmem:[%s5891_s15 + $0x638] ss:$52 sps:$4 sm:$0xff]   ;;  %v5748_v62 = vld [vmem:[%s5891_s15 + $0x300] ss:$52 sps:$4 sm:$0xff]  }
 0x177   : > { %v4805_v16 = vpop.f32.mrf.mxu1  ;;  %v4869_v9 = vpop.f32.mrf.mxu0  ;;  %v5754_v0 = vld [vmem:[%s5891_s15 + $0x30] ss:$52 sps:$4 sm:$0xff]  }
 0x178   : > { %v4806_v11 = vadd.f32 %v4805_v16, %v4804_v4  ;;  %v4870_v17 = vadd.f32 %v4869_v9, %v4868_v5 }
 0x179   : > { %v4807_v7 = vpop.f32.mrf.mxu1  ;;  %v4871_v23 = vpop.f32.mrf.mxu0 }
 0x17a   : > { %v6527_v44 = vadd.f32 %v4806_v11, %v6276_v29  ;;  %v6530_v30 = vadd.f32 %v4870_v17, %v6407_v20 }
 0x17b   : > { %v4808_v6 = vpop.f32.mrf.mxu1  ;;  %v4872_v33 = vpop.f32.mrf.mxu0 }
 0x17c   : > { %v4809_v34 = vadd.f32 %v4808_v6, %v4807_v7  ;;  %v4873_v40 = vadd.f32 %v4872_v33, %v4871_v23 }
 0x17d   : > { %v4810_v37 = vpop.f32.mrf.mxu1  ;;  %v4874_v41 = vpop.f32.mrf.mxu0  ;;  %3278 = vmatmul.mubr.bf16.gmra.mxu0 %v5738_v53  ;;  %3375 = vmatmul.mubr.bf16.gmra.mxu1 %v5741_v26 }
 0x17e   : > { %v6535_v29 = vadd.f32 %v4809_v34, %v6284_v39  ;;  %v6538_v20 = vadd.f32 %v4873_v40, %v6414_v36  ;;  %3285 = vmatprep.mubr.bf16.mxu0 %v5747_v22  ;;  %3382 = vmatprep.mubr.bf16.mxu1 %v5750_v25  ;;  %v5753_v39 = vld [vmem:[%s5891_s15 + $0x36c] ss:$52 sps:$4 sm:$0xff]   ;;  %v5751_v22 = vld [vmem:[%s5891_s15 + $0x368] ss:$52 sps:$4 sm:$0xff]  }
 0x17f   : > { %v4811_v43 = vpop.f32.mrf.mxu1  ;;  %v4875_v46 = vpop.f32.mrf.mxu0  ;;  %v5755_v25 = vld [vmem:[%s5891_s15 + $0x98] ss:$52 sps:$4 sm:$0xff]   ;;  %v5759_v34 = vld [vmem:[%s5891_s15 + $0x100] ss:$52 sps:$4 sm:$0xff]  }
 0x180   : > { %v4812_v51 = vadd.f32 %v4811_v43, %v4810_v37  ;;  %v4876_v52 = vadd.f32 %v4875_v46, %v4874_v41 }
 0x181   : > { %v4813_v31 = vpop.f32.mrf.mxu1  ;;  %v4877_v57 = vpop.f32.mrf.mxu0 }
 0x182   : > { %v6543_v48 = vadd.f32 %v4812_v51, %v6288_v45  ;;  %v6546_v63 = vadd.f32 %v4876_v52, %v6421_v49 }
 0x183   : > { %v4814_v36 = vpop.f32.mrf.mxu1  ;;  %v4878_v2 = vpop.f32.mrf.mxu0 }
 0x184   : > { %v4815_v4 = vadd.f32 %v4814_v36, %v4813_v31  ;;  %v4879_v5 = vadd.f32 %v4878_v2, %v4877_v57 }
 0x185   : > { %v4816_v16 = vpop.f32.mrf.mxu1  ;;  %v4880_v9 = vpop.f32.mrf.mxu0  ;;  %3286 = vmatmul.mubr.bf16.gmra.mxu0 %v5745_v15  ;;  %3383 = vmatmul.mubr.bf16.gmra.mxu1 %v5748_v62 }
 0x186   : > { %v6551_v45 = vadd.f32 %v4815_v4, %v6296_v55  ;;  %v6554_v49 = vadd.f32 %v4879_v5, %v6428_v1  ;;  %3390 = vmatprep.mubr.bf16.mxu1 %v5753_v39  ;;  %5310 = vmatprep.mubr.bf16.mxu0 %v5754_v0  ;;  %v5758_v55 = vld [vmem:[%s5891_s15 + $0x3d4] ss:$52 sps:$4 sm:$0xff]   ;;  %v5756_v39 = vld [vmem:[%s5891_s15 + $0x3d0] ss:$52 sps:$4 sm:$0xff]  }
 0x187   : > { %v4817_v11 = vpop.f32.mrf.mxu1  ;;  %v4881_v17 = vpop.f32.mrf.mxu0  ;;  %v5760_v0 = vld [vmem:[%s5891_s15 + $0x168] ss:$52 sps:$4 sm:$0xff]   ;;  %v5764_v4 = vld [vmem:[%s5891_s15 + $0x1d0] ss:$52 sps:$4 sm:$0xff]  }
 0x188   : > { %v4818_v7 = vadd.f32 %v4817_v11, %v4816_v16  ;;  %v4882_v23 = vadd.f32 %v4881_v17, %v4880_v9 }
 0x189   : > { %v4819_v53 = vpop.f32.mrf.mxu1  ;;  %v4883_v26 = vpop.f32.mrf.mxu0 }
 0x18a   : > { %v6559_v6 = vadd.f32 %v4818_v7, %v6300_v61  ;;  %v6562_v33 = vadd.f32 %v4882_v23, %v6435_v12 }
 0x18b   : > { %v4820_v1 = vpop.f32.mrf.mxu1  ;;  %v4884_v40 = vpop.f32.mrf.mxu0 }
 0x18c   : > { %v4821_v37 = vadd.f32 %v4820_v1, %v4819_v53  ;;  %v4885_v41 = vadd.f32 %v4884_v40, %v4883_v26 }
 0x18d   : > { %v4886_v43 = vpop.f32.mrf.mxu0  ;;  %v4950_v46 = vpop.f32.mrf.mxu1  ;;  %3391 = vmatmul.mubr.bf16.gmra.mxu1 %v5751_v22  ;;  %5311 = vmatmul.mubr.bf16.vlgmr.msra.gmra.mxu0 %v5755_v25 }
 0x18e   : > { %v6567_v61 = vadd.f32 %v4821_v37, %v6311_v8  ;;  %v6570_v12 = vadd.f32 %v4885_v41, %v6442_v32  ;;  %3398 = vmatprep.mubr.bf16.mxu1 %v5758_v55  ;;  %5314 = vmatprep.mubr.bf16.mxu0 %v5759_v34  ;;  %v5763_v8 = vld [vmem:[%s5891_s15 + $0x43c] ss:$52 sps:$4 sm:$0xff]   ;;  %v5761_v55 = vld [vmem:[%s5891_s15 + $0x438] ss:$52 sps:$4 sm:$0xff]   ;;  %v5769_v37 = vld [vmem:[%s5891_s15 + $0x2a0] ss:$52 sps:$4 sm:$0xff]  }
 0x18f   : > { %v4887_v51 = vpop.f32.mrf.mxu0  ;;  %v4951_v52 = vpop.f32.mrf.mxu1  ;;  %v5765_v34 = vld [vmem:[%s5891_s15 + $0x238] ss:$52 sps:$4 sm:$0xff]  }
 0x190   : > { %v4888_v31 = vadd.f32 %v4887_v51, %v4886_v43  ;;  %v4952_v57 = vadd.f32 %v4951_v52, %v4950_v46 }
 0x191   : > { %v4889_v15 = vpop.f32.mrf.mxu0  ;;  %v4953_v62 = vpop.f32.mrf.mxu1 }
 0x192   : > { %v6575_v36 = vadd.f32 %v4888_v31, %v6447_v47  ;;  %v6578_v2 = vadd.f32 %v4952_v57, %v6450_v60 }
 0x193   : > { %v4890_v32 = vpop.f32.mrf.mxu0  ;;  %v4954_v5 = vpop.f32.mrf.mxu1 }
 0x194   : > { %v4891_v16 = vadd.f32 %v4890_v32, %v4889_v15  ;;  %v4955_v9 = vadd.f32 %v4954_v5, %v4953_v62 }
 0x195   : > { %v4892_v11 = vpop.f32.mrf.mxu0  ;;  %v4956_v17 = vpop.f32.mrf.mxu1  ;;  %3399 = vmatmul.mubr.bf16.gmra.mxu1 %v5756_v39  ;;  %5315 = vmatmul.mubr.bf16.gmra.mxu0 %v5760_v0 }
 0x196   : > { %v6583_v47 = vadd.f32 %v4891_v16, %v6455_v50  ;;  %v6586_v60 = vadd.f32 %v4955_v9, %v6458_v24  ;;  %3406 = vmatprep.mubr.bf16.mxu1 %v5763_v8  ;;  %5318 = vmatprep.mubr.bf16.mxu0 %v5764_v4  ;;  %v5768_v50 = vld [vmem:[%s5891_s15 + $0x4a4] ss:$52 sps:$4 sm:$0xff]   ;;  %v5766_v8 = vld [vmem:[%s5891_s15 + $0x4a0] ss:$52 sps:$4 sm:$0xff]   ;;  %v5770_v4 = vld [vmem:[%s5891_s15 + $0x308] ss:$52 sps:$4 sm:$0xff]  }
 0x197   : > { %v4893_v7 = vpop.f32.mrf.mxu0  ;;  %v4957_v23 = vpop.f32.mrf.mxu1  ;;  %v5774_v16 = vld [vmem:[%s5891_s15 + $0x370] ss:$52 sps:$4 sm:$0xff]  }
 0x198   : > { %v4894_v53 = vadd.f32 %v4893_v7, %v4892_v11  ;;  %v4958_v26 = vadd.f32 %v4957_v23, %v4956_v17 }
 0x199   : > { %v4895_v22 = vpop.f32.mrf.mxu0  ;;  %v4959_v25 = vpop.f32.mrf.mxu1 }
 0x19a   : > { %v6591_v1 = vadd.f32 %v4894_v53, %v6463_v18  ;;  %v6594_v40 = vadd.f32 %v4958_v26, %v6466_v19 }
 0x19b   : > { %v4896_v24 = vpop.f32.mrf.mxu0  ;;  %v4960_v41 = vpop.f32.mrf.mxu1 }
 0x19c   : > { %v4897_v43 = vadd.f32 %v4896_v24, %v4895_v22  ;;  %v4961_v46 = vadd.f32 %v4960_v41, %v4959_v25 }
 0x19d   : > { %v4898_v51 = vpop.f32.mrf.mxu0  ;;  %v4962_v52 = vpop.f32.mrf.mxu1  ;;  %3407 = vmatmul.mubr.bf16.gmra.mxu1 %v5761_v55  ;;  %5319 = vmatmul.mubr.bf16.gmra.mxu0 %v5765_v34 }
 0x19e   : > { %v6599_v18 = vadd.f32 %v4897_v43, %v6471_v10  ;;  %v6602_v19 = vadd.f32 %v4961_v46, %v6474_v21  ;;  %3414 = vmatprep.mubr.bf16.mxu1 %v5768_v50  ;;  %5322 = vmatprep.mubr.bf16.mxu0 %v5769_v37  ;;  %v5773_v10 = vld [vmem:[%s5891_s15 + $0x50c] ss:$52 sps:$4 sm:$0xff]   ;;  %v5771_v50 = vld [vmem:[%s5891_s15 + $0x508] ss:$52 sps:$4 sm:$0xff]  }
 0x19f   : > { %v4899_v31 = vpop.f32.mrf.mxu0  ;;  %v4963_v57 = vpop.f32.mrf.mxu1  ;;  %v5775_v37 = vld [vmem:[%s5891_s15 + $0x3d8] ss:$52 sps:$4 sm:$0xff]   ;;  %v5779_v43 = vld [vmem:[%s5891_s15 + $0x440] ss:$52 sps:$4 sm:$0xff]  }
 0x1a0   : > { %v4900_v15 = vadd.f32 %v4899_v31, %v4898_v51  ;;  %v4964_v62 = vadd.f32 %v4963_v57, %v4962_v52 }
 0x1a1   : > { %v4901_v39 = vpop.f32.mrf.mxu0  ;;  %v4965_v0 = vpop.f32.mrf.mxu1 }
 0x1a2   : > { %v6607_v32 = vadd.f32 %v4900_v15, %v6479_v42  ;;  %v6610_v5 = vadd.f32 %v4964_v62, %v6482_v56 }
 0x1a3   : > { %v4902_v21 = vpop.f32.mrf.mxu0  ;;  %v4966_v9 = vpop.f32.mrf.mxu1 }
 0x1a4   : > { %v4903_v11 = vadd.f32 %v4902_v21, %v4901_v39  ;;  %v4967_v17 = vadd.f32 %v4966_v9, %v4965_v0 }
 0x1a5   : > { %v4904_v7 = vpop.f32.mrf.mxu0  ;;  %v4968_v23 = vpop.f32.mrf.mxu1  ;;  %3415 = vmatmul.mubr.bf16.gmra.mxu1 %v5766_v8  ;;  %5323 = vmatmul.mubr.bf16.gmra.mxu0 %v5770_v4 }
 0x1a6   : > { %v6615_v42 = vadd.f32 %v4903_v11, %v6487_v54  ;;  %v6618_v56 = vadd.f32 %v4967_v17, %v6490_v38  ;;  %3422 = vmatprep.mubr.bf16.mxu1 %v5773_v10  ;;  %5326 = vmatprep.mubr.bf16.mxu0 %v5774_v16  ;;  %v5778_v54 = vld [vmem:[%s5891_s15 + $0x574] ss:$52 sps:$4 sm:$0xff]   ;;  %v5776_v10 = vld [vmem:[%s5891_s15 + $0x570] ss:$52 sps:$4 sm:$0xff]  }
 0x1a7   : > { %v4905_v53 = vpop.f32.mrf.mxu0  ;;  %v4969_v26 = vpop.f32.mrf.mxu1  ;;  %v5780_v16 = vld [vmem:[%s5891_s15 + $0x4a8] ss:$52 sps:$4 sm:$0xff]   ;;  %v5784_v11 = vld [vmem:[%s5891_s15 + $0x510] ss:$52 sps:$4 sm:$0xff]  }
 0x1a8   : > { %v4906_v22 = vadd.f32 %v4905_v53, %v4904_v7  ;;  %v4970_v25 = vadd.f32 %v4969_v26, %v4968_v23 }
 0x1a9   : > { %v4907_v55 = vpop.f32.mrf.mxu0  ;;  %v4971_v34 = vpop.f32.mrf.mxu1 }
 0x1aa   : > { %v6623_v24 = vadd.f32 %v4906_v22, %v6495_v13  ;;  %v6626_v41 = vadd.f32 %v4970_v25, %v6498_v27 }
 0x1ab   : > { %v4908_v38 = vpop.f32.mrf.mxu0  ;;  %v4972_v46 = vpop.f32.mrf.mxu1 }
 0x1ac   : > { %v4909_v51 = vadd.f32 %v4908_v38, %v4907_v55  ;;  %v4973_v52 = vadd.f32 %v4972_v46, %v4971_v34 }
 0x1ad   : > { %v4910_v31 = vpop.f32.mrf.mxu0  ;;  %v4974_v57 = vpop.f32.mrf.mxu1  ;;  %3423 = vmatmul.mubr.bf16.gmra.mxu1 %v5771_v50  ;;  %5327 = vmatmul.mubr.bf16.gmra.mxu0 %v5775_v37 }
 0x1ae   : > { %v6631_v13 = vadd.f32 %v4909_v51, %v6503_v3  ;;  %v6634_v27 = vadd.f32 %v4973_v52, %v6506_v35  ;;  %3430 = vmatprep.mubr.bf16.mxu1 %v5778_v54  ;;  %5330 = vmatprep.mubr.bf16.mxu0 %v5779_v43  ;;  %v5783_v3 = vld [vmem:[%s5891_s15 + $0x5dc] ss:$52 sps:$4 sm:$0xff]   ;;  %v5781_v54 = vld [vmem:[%s5891_s15 + $0x5d8] ss:$52 sps:$4 sm:$0xff]   ;;  %v5789_v51 = vld [vmem:[%s5891_s15 + $0x5e0] ss:$52 sps:$4 sm:$0xff]  }
 0x1af   : > { %v4911_v15 = vpop.f32.mrf.mxu0  ;;  %v4975_v62 = vpop.f32.mrf.mxu1  ;;  %v5785_v43 = vld [vmem:[%s5891_s15 + $0x578] ss:$52 sps:$4 sm:$0xff]  }
 0x1b0   : > { %v4912_v39 = vadd.f32 %v4911_v15, %v4910_v31  ;;  %v4976_v0 = vadd.f32 %v4975_v62, %v4974_v57 }
 0x1b1   : > { %v4913_v8 = vpop.f32.mrf.mxu0  ;;  %v4977_v4 = vpop.f32.mrf.mxu1 }
 0x1b2   : > { %v6639_v21 = vadd.f32 %v4912_v39, %v6511_v28  ;;  %v6642_v9 = vadd.f32 %v4976_v0, %v6514_v58 }
 0x1b3   : > { %v4914_v35 = vpop.f32.mrf.mxu0  ;;  %v4978_v17 = vpop.f32.mrf.mxu1 }
 0x1b4   : > { %v4915_v7 = vadd.f32 %v4914_v35, %v4913_v8  ;;  %v4979_v23 = vadd.f32 %v4978_v17, %v4977_v4 }
 0x1b5   : > { %v4916_v53 = vpop.f32.mrf.mxu0  ;;  %v4980_v26 = vpop.f32.mrf.mxu1  ;;  %3431 = vmatmul.mubr.bf16.gmra.mxu1 %v5776_v10  ;;  %5331 = vmatmul.mubr.bf16.gmra.mxu0 %v5780_v16 }
 0x1b6   : > { %v6647_v28 = vadd.f32 %v4915_v7, %v6519_v14  ;;  %v6650_v58 = vadd.f32 %v4979_v23, %v6522_v59  ;;  %3438 = vmatprep.mubr.bf16.mxu1 %v5783_v3  ;;  %5334 = vmatprep.mubr.bf16.mxu0 %v5784_v11  ;;  %v5788_v14 = vld [vmem:[%s5891_s15 + $0x644] ss:$52 sps:$4 sm:$0xff]   ;;  %v5786_v3 = vld [vmem:[%s5891_s15 + $0x640] ss:$52 sps:$4 sm:$0xff]   ;;  %v5790_v11 = vld [vmem:[%s5891_s15 + $0x648] ss:$52 sps:$4 sm:$0xff]  }
 0x1b7   : > { %v4917_v22 = vpop.f32.mrf.mxu0  ;;  %v4981_v25 = vpop.f32.mrf.mxu1 }
 0x1b8   : > { %v4918_v55 = vadd.f32 %v4917_v22, %v4916_v53  ;;  %v4982_v34 = vadd.f32 %v4981_v25, %v4980_v26 }
 0x1b9   : > { %v4919_v50 = vpop.f32.mrf.mxu0  ;;  %v4983_v37 = vpop.f32.mrf.mxu1 }
 0x1ba   : > { %v6655_v38 = vadd.f32 %v4918_v55, %v6527_v44  ;;  %v6658_v46 = vadd.f32 %v4982_v34, %v6530_v30 }
 0x1bb   : > { %v4920_v59 = vpop.f32.mrf.mxu0  ;;  %v4984_v52 = vpop.f32.mrf.mxu1 }
 0x1bc   : > { %v4921_v31 = vadd.f32 %v4920_v59, %v4919_v50  ;;  %v4985_v57 = vadd.f32 %v4984_v52, %v4983_v37 }
 0x1bd   : > { %v4922_v15 = vpop.f32.mrf.mxu0  ;;  %v4986_v62 = vpop.f32.mrf.mxu1  ;;  %3439 = vmatmul.mubr.bf16.gmra.mxu1 %v5781_v54  ;;  %5335 = vmatmul.mubr.bf16.gmra.mxu0 %v5785_v43 }
 0x1be   : > { %v6663_v39 = vadd.f32 %v4921_v31, %v6535_v29  ;;  %v6666_v44 = vadd.f32 %v4985_v57, %v6538_v20  ;;  %3446 = vmatprep.mubr.bf16.mxu1 %v5788_v14  ;;  %5338 = vmatprep.mubr.bf16.mxu0 %v5789_v51 }
 0x1bf   : > { %v4923_v30 = vpop.f32.mrf.mxu0  ;;  %v4987_v0 = vpop.f32.mrf.mxu1 }
 0x1c0   : > { %v4924_v8 = vadd.f32 %v4923_v30, %v4922_v15  ;;  %v4988_v4 = vadd.f32 %v4987_v0, %v4986_v62 }
 0x1c1   : > { %v4925_v10 = vpop.f32.mrf.mxu0  ;;  %v4989_v16 = vpop.f32.mrf.mxu1 }
 0x1c2   : > { %v6671_v35 = vadd.f32 %v4924_v8, %v6543_v48  ;;  %v6674_v17 = vadd.f32 %v4988_v4, %v6546_v63 }
 0x1c3   : > { %v4926_v29 = vpop.f32.mrf.mxu0  ;;  %v4990_v7 = vpop.f32.mrf.mxu1 }
 0x1c4   : > { %v4927_v20 = vadd.f32 %v4926_v29, %v4925_v10  ;;  %v4991_v23 = vadd.f32 %v4990_v7, %v4989_v16 }
 0x1c5   : > { %v4928_v53 = vpop.f32.mrf.mxu0  ;;  %v4992_v26 = vpop.f32.mrf.mxu1  ;;  %3447 = vmatmul.mubr.bf16.gmra.mxu1 %v5786_v3  ;;  %5339 = vmatmul.mubr.bf16.gmra.mxu0 %v5790_v11 }
 0x1c6   : > { %v6677_v22 = vadd.f32 %v4927_v20, %v6551_v45  ;;  %v6680_v25 = vadd.f32 %v4991_v23, %v6554_v49 }
 0x1c7   : > { %v4929_v55 = vpop.f32.mrf.mxu0  ;;  %v4993_v48 = vpop.f32.mrf.mxu1 }
 0x1c8   : > { %v4930_v34 = vadd.f32 %v4929_v55, %v4928_v53  ;;  %v4994_v50 = vadd.f32 %v4993_v48, %v4992_v26 }
 0x1c9   : > { %v4931_v63 = vpop.f32.mrf.mxu0  ;;  %v4995_v37 = vpop.f32.mrf.mxu1 }
 0x1ca   : > { %v6683_v54 = vadd.f32 %v4930_v34, %v6559_v6  ;;  %v6686_v43 = vadd.f32 %v4994_v50, %v6562_v33 }
 0x1cb   : > { %v4932_v14 = vpop.f32.mrf.mxu0  ;;  %v4996_v51 = vpop.f32.mrf.mxu1 }
 0x1cc   : > { %v4933_v59 = vadd.f32 %v4932_v14, %v4931_v63  ;;  %v4997_v45 = vadd.f32 %v4996_v51, %v4995_v37 }
 0x1cd   : > { %v4998_v52 = vpop.f32.mrf.mxu1  ;;  %v5062_v31 = vpop.f32.mrf.mxu0 }
 0x1ce   : > { %v6689_v49 = vadd.f32 %v4933_v59, %v6567_v61  ;;  %v6692_v57 = vadd.f32 %v4997_v45, %v6570_v12 }
 0x1cf   : > { %v4999_v15 = vpop.f32.mrf.mxu1  ;;  %v5063_v62 = vpop.f32.mrf.mxu0 }
 0x1d0   : > { %v5000_v30 = vadd.f32 %v4999_v15, %v4998_v52  ;;  %v5064_v6 = vadd.f32 %v5063_v62, %v5062_v31 }
 0x1d1   : > { %v5001_v0 = vpop.f32.mrf.mxu1  ;;  %v5065_v8 = vpop.f32.mrf.mxu0 }
 0x1d2   : > { %v6695_v33 = vadd.f32 %v5000_v30, %v6575_v36  ;;  %v6698_v4 = vadd.f32 %v5064_v6, %v6578_v2 }
 0x1d3   : > { %v5002_v10 = vpop.f32.mrf.mxu1  ;;  %v5066_v16 = vpop.f32.mrf.mxu0 }
 0x1d4   : > { %v5003_v3 = vadd.f32 %v5002_v10, %v5001_v0  ;;  %v5067_v61 = vadd.f32 %v5066_v16, %v5065_v8 }
 0x1d5   : > { %v5004_v11 = vpop.f32.mrf.mxu1  ;;  %v5068_v29 = vpop.f32.mrf.mxu0 }
 0x1d6   : > { %v6701_v12 = vadd.f32 %v5003_v3, %v6583_v47  ;;  %v6704_v7 = vadd.f32 %v5067_v61, %v6586_v60 }
 0x1d7   : > { %v5005_v20 = vpop.f32.mrf.mxu1  ;;  %v5069_v23 = vpop.f32.mrf.mxu0 }
 0x1d8   : > { %v5006_v53 = vadd.f32 %v5005_v20, %v5004_v11  ;;  %v5070_v36 = vadd.f32 %v5069_v23, %v5068_v29 }
 0x1d9   : > { %v5007_v26 = vpop.f32.mrf.mxu1  ;;  %v5071_v55 = vpop.f32.mrf.mxu0 }
 0x1da   : > { %v6707_v2 = vadd.f32 %v5006_v53, %v6591_v1  ;;  %v6710_v48 = vadd.f32 %v5070_v36, %v6594_v40 }
 0x1db   : > { %v5008_v34 = vpop.f32.mrf.mxu1  ;;  %v5072_v50 = vpop.f32.mrf.mxu0 }
 0x1dc   : > { %v5009_v63 = vadd.f32 %v5008_v34, %v5007_v26  ;;  %v5073_v47 = vadd.f32 %v5072_v50, %v5071_v55 }
 0x1dd   : > { %v5010_v37 = vpop.f32.mrf.mxu1  ;;  %v5074_v14 = vpop.f32.mrf.mxu0 }
 0x1de   : > { %v6713_v60 = vadd.f32 %v5009_v63, %v6599_v18  ;;  %v6716_v51 = vadd.f32 %v5073_v47, %v6602_v19 }
 0x1df   : > { %v5011_v59 = vpop.f32.mrf.mxu1  ;;  %v5075_v45 = vpop.f32.mrf.mxu0 }
 0x1e0   : > { %v5012_v52 = vadd.f32 %v5011_v59, %v5010_v37  ;;  %v5076_v1 = vadd.f32 %v5075_v45, %v5074_v14 }
 0x1e1   : > { %v5013_v31 = vpop.f32.mrf.mxu1  ;;  %v5077_v15 = vpop.f32.mrf.mxu0 }
 0x1e2   : > { %v6719_v40 = vadd.f32 %v5012_v52, %v6607_v32  ;;  %v6722_v62 = vadd.f32 %v5076_v1, %v6610_v5 }
 0x1e3   : > { %v5014_v30 = vpop.f32.mrf.mxu1  ;;  %v5078_v6 = vpop.f32.mrf.mxu0 }
 0x1e4   : > { %v5015_v0 = vadd.f32 %v5014_v30, %v5013_v31  ;;  %v5079_v18 = vadd.f32 %v5078_v6, %v5077_v15 }
 0x1e5   : > { %v5016_v8 = vpop.f32.mrf.mxu1  ;;  %v5080_v10 = vpop.f32.mrf.mxu0 }
 0x1e6   : > { %v6725_v19 = vadd.f32 %v5015_v0, %v6615_v42  ;;  %v6728_v16 = vadd.f32 %v5079_v18, %v6618_v56 }
 0x1e7   : > { %v5017_v3 = vpop.f32.mrf.mxu1  ;;  %v5081_v61 = vpop.f32.mrf.mxu0 }
 0x1e8   : > { %v5018_v11 = vadd.f32 %v5017_v3, %v5016_v8  ;;  %v5082_v32 = vadd.f32 %v5081_v61, %v5080_v10 }
 0x1e9   : > { %v5019_v29 = vpop.f32.mrf.mxu1  ;;  %v5083_v20 = vpop.f32.mrf.mxu0 }
 0x1ea   : > { %v6731_v5 = vadd.f32 %v5018_v11, %v6623_v24  ;;  %v6734_v23 = vadd.f32 %v5082_v32, %v6626_v41 }
 0x1eb   : > { %v5020_v53 = vpop.f32.mrf.mxu1  ;;  %v5084_v36 = vpop.f32.mrf.mxu0 }
 0x1ec   : > { %v5021_v26 = vadd.f32 %v5020_v53, %v5019_v29  ;;  %v5085_v42 = vadd.f32 %v5084_v36, %v5083_v20 }
 0x1ed   : > { %v5022_v55 = vpop.f32.mrf.mxu1  ;;  %v5086_v34 = vpop.f32.mrf.mxu0 }
 0x1ee   : > { %v6737_v56 = vadd.f32 %v5021_v26, %v6631_v13  ;;  %v6740_v50 = vadd.f32 %v5085_v42, %v6634_v27 }
 0x1ef   : > { %v5023_v63 = vpop.f32.mrf.mxu1  ;;  %v5087_v47 = vpop.f32.mrf.mxu0 }
 0x1f0   : > { %v5024_v37 = vadd.f32 %v5023_v63, %v5022_v55  ;;  %v5088_v24 = vadd.f32 %v5087_v47, %v5086_v34 }
 0x1f1   : > { %v5025_v14 = vpop.f32.mrf.mxu1  ;;  %v5089_v59 = vpop.f32.mrf.mxu0 }
 0x1f2   : > { %v6743_v41 = vadd.f32 %v5024_v37, %v6639_v21  ;;  %v6746_v45 = vadd.f32 %v5088_v24, %v6642_v9 }
 0x1f3   : > { %v5026_v52 = vpop.f32.mrf.mxu1  ;;  %v5090_v1 = vpop.f32.mrf.mxu0 }
 0x1f4   : > { %v5027_v31 = vadd.f32 %v5026_v52, %v5025_v14  ;;  %v5091_v13 = vadd.f32 %v5090_v1, %v5089_v59 }
 0x1f5   : > { %v5028_v15 = vpop.f32.mrf.mxu1  ;;  %v5092_v30 = vpop.f32.mrf.mxu0 }
 0x1f6   : > { %v6749_v27 = vadd.f32 %v5027_v31, %v6647_v28  ;;  %v6752_v6 = vadd.f32 %v5091_v13, %v6650_v58 }
 0x1f7   : > { %v5029_v0 = vpop.f32.mrf.mxu1  ;;  %v5093_v18 = vpop.f32.mrf.mxu0 }
 0x1f8   : > { %v5030_v8 = vadd.f32 %v5029_v0, %v5028_v15  ;;  %v5094_v21 = vadd.f32 %v5093_v18, %v5092_v30 }
 0x1f9   : > { %v5031_v10 = vpop.f32.mrf.mxu1  ;;  %v5095_v3 = vpop.f32.mrf.mxu0 }
 0x1fa   : > { %v6755_v9 = vadd.f32 %v5030_v8, %v6655_v38  ;;  %v6758_v61 = vadd.f32 %v5094_v21, %v6658_v46 }
 0x1fb   : > { %v5032_v11 = vpop.f32.mrf.mxu1  ;;  %v5096_v32 = vpop.f32.mrf.mxu0 }
 0x1fc   : > { %v5033_v29 = vadd.f32 %v5032_v11, %v5031_v10  ;;  %v5097_v28 = vadd.f32 %v5096_v32, %v5095_v3 }
 0x1fd   : > { %v5034_v20 = vpop.f32.mrf.mxu1  ;;  %v5098_v53 = vpop.f32.mrf.mxu0 }
 0x1fe   : > { %v6761_v58 = vadd.f32 %v5033_v29, %v6663_v39  ;;  %v6764_v36 = vadd.f32 %v5097_v28, %v6666_v44 }
 0x1ff   : > { %v5035_v26 = vpop.f32.mrf.mxu1  ;;  %v5099_v42 = vpop.f32.mrf.mxu0 }
 0x200   : > { %v5036_v55 = vadd.f32 %v5035_v26, %v5034_v20  ;;  %v5100_v38 = vadd.f32 %v5099_v42, %v5098_v53 }
 0x201   : > { %v5037_v34 = vpop.f32.mrf.mxu1  ;;  %v5101_v63 = vpop.f32.mrf.mxu0 }
 0x202   : > { %v6767_v46 = vadd.f32 %v5036_v55, %v6671_v35  ;;  %v6770_v47 = vadd.f32 %v5100_v38, %v6674_v17 }
 0x203   : > { %v5038_v37 = vpop.f32.mrf.mxu1  ;;  %v5102_v24 = vpop.f32.mrf.mxu0 }
 0x204   : > { %v5039_v14 = vadd.f32 %v5038_v37, %v5037_v34  ;;  %v5103_v39 = vadd.f32 %v5102_v24, %v5101_v63 }
 0x205   : > { %v5040_v59 = vpop.f32.mrf.mxu1  ;;  %v5104_v52 = vpop.f32.mrf.mxu0 }
 0x206   : > { %v6773_v44 = vadd.f32 %v5039_v14, %v6677_v22  ;;  %v6776_v1 = vadd.f32 %v5103_v39, %v6680_v25 }
 0x207   : > { %v5041_v31 = vpop.f32.mrf.mxu1  ;;  %v5105_v13 = vpop.f32.mrf.mxu0 }
 0x208   : > { %v5042_v15 = vadd.f32 %v5041_v31, %v5040_v59  ;;  %v5106_v35 = vadd.f32 %v5105_v13, %v5104_v52 }
 0x209   : > { %v5043_v30 = vpop.f32.mrf.mxu1  ;;  %v5107_v0 = vpop.f32.mrf.mxu0 }
 0x20a   : > { %v6779_v17 = vadd.f32 %v5042_v15, %v6683_v54  ;;  %v6782_v18 = vadd.f32 %v5106_v35, %v6686_v43 }
 0x20b   : > { %v5044_v8 = vpop.f32.mrf.mxu1  ;;  %v5108_v21 = vpop.f32.mrf.mxu0 }
 0x20c   : > { %v5045_v10 = vadd.f32 %v5044_v8, %v5043_v30  ;;  %v5109_v22 = vadd.f32 %v5108_v21, %v5107_v0 }
 0x20d   : > { %v5110_v3 = vpop.f32.mrf.mxu0  ;;  %v5174_v11 = vpop.f32.mrf.mxu1 }
 0x20e   : > { %v6785_v25 = vadd.f32 %v5045_v10, %v6689_v49  ;;  %v6788_v32 = vadd.f32 %v5109_v22, %v6692_v57 }
 0x20f   : > { %v5111_v29 = vpop.f32.mrf.mxu0  ;;  %v5175_v28 = vpop.f32.mrf.mxu1 }
 0x210   : > { %v5112_v20 = vadd.f32 %v5111_v29, %v5110_v3  ;;  %v5176_v54 = vadd.f32 %v5175_v28, %v5174_v11 }
 0x211   : > { %v5113_v53 = vpop.f32.mrf.mxu0  ;;  %v6790_v26 = vpop.f32.mrf.mxu1 }
 0x212   : > { %v6793_v43 = vadd.f32 %v5112_v20, %v6695_v33  ;;  %v6796_v42 = vadd.f32 %v5176_v54, %v6698_v4 }
 0x213   : > { %v5114_v55 = vpop.f32.mrf.mxu0  ;;  %v6798_v38 = vpop.f32.mrf.mxu1 }
 0x214   : > { %v5115_v49 = vadd.f32 %v5114_v55, %v5113_v53 }
 0x215   : > { %v5116_v34 = vpop.f32.mrf.mxu0  ;;  %v6800_v57 = vpop.f32.mrf.mxu1 }
 0x216   : > { %v6803_v63 = vadd.f32 %v5115_v49, %v6701_v12 }
 0x217   : > { %v5117_v37 = vpop.f32.mrf.mxu0  ;;  %v6805_v24 = vpop.f32.mrf.mxu1 }
 0x218   : > { %v5118_v14 = vadd.f32 %v5117_v37, %v5116_v34 }
 0x219   : > { %v5119_v39 = vpop.f32.mrf.mxu0  ;;  %v6807_v33 = vpop.f32.mrf.mxu1 }
 0x21a   : > { %v6810_v4 = vadd.f32 %v5118_v14, %v6707_v2 }
 0x21b   : > { %v5120_v59 = vpop.f32.mrf.mxu0  ;;  %v6812_v52 = vpop.f32.mrf.mxu1 }
 0x21c   : > { %v5121_v31 = vadd.f32 %v5120_v59, %v5119_v39 }
 0x21d   : > { %v5122_v13 = vpop.f32.mrf.mxu0  ;;  %v6814_v15 = vpop.f32.mrf.mxu1 }
 0x21e   : > { %v6817_v12 = vadd.f32 %v5121_v31, %v6713_v60 }
 0x21f   : > { %v5123_v35 = vpop.f32.mrf.mxu0  ;;  %v6819_v30 = vpop.f32.mrf.mxu1 }
 0x220   : > { %v5124_v0 = vadd.f32 %v5123_v35, %v5122_v13 }
 0x221   : > { %v5125_v8 = vpop.f32.mrf.mxu0  ;;  %v6821_v21 = vpop.f32.mrf.mxu1 }
 0x222   : > { %v6824_v2 = vadd.f32 %v5124_v0, %v6719_v40 }
 0x223   : > { %v5126_v10 = vpop.f32.mrf.mxu0  ;;  %v6826_v22 = vpop.f32.mrf.mxu1 }
 0x224   : > { %7109 = vst [vmem:[#allocation3_spill] sm:$0xff] %v6824_v2  ;;  %v5127_v3 = vadd.f32 %v5126_v10, %v5125_v8 }
 0x225   : > { %v5128_v11 = vpop.f32.mrf.mxu0  ;;  %v6828_v29 = vpop.f32.mrf.mxu1 }
 0x226   : > { %v6831_v60 = vadd.f32 %v5127_v3, %v6725_v19 }
 0x227   : > { %v5129_v28 = vpop.f32.mrf.mxu0  ;;  %v6833_v20 = vpop.f32.mrf.mxu1 }
 0x228   : > { %7110 = vst [vmem:[#allocation4_spill] sm:$0xff] %v6831_v60  ;;  %v5130_v54 = vadd.f32 %v5129_v28, %v5128_v11 }
 0x229   : > { %v5131_v53 = vpop.f32.mrf.mxu0  ;;  %v6835_v55 = vpop.f32.mrf.mxu1 }
 0x22a   : > { %v6838_v40 = vadd.f32 %v5130_v54, %v6731_v5 }
 0x22b   : > { %v5132_v49 = vpop.f32.mrf.mxu0  ;;  %v6840_v34 = vpop.f32.mrf.mxu1 }
 0x22c   : > { %7111 = vst [vmem:[#allocation5_spill] sm:$0xff] %v6838_v40  ;;  %v5133_v37 = vadd.f32 %v5132_v49, %v5131_v53 }
 0x22d   : > { %v5134_v14 = vpop.f32.mrf.mxu0  ;;  %v6842_v39 = vpop.f32.mrf.mxu1 }
 0x22e   : > { %v6845_v19 = vadd.f32 %v5133_v37, %v6737_v56 }
 0x22f   : > { %v5135_v59 = vpop.f32.mrf.mxu0  ;;  %v6847_v31 = vpop.f32.mrf.mxu1 }
 0x230   : > { %7112 = vst [vmem:[#allocation6_spill] sm:$0xff] %v6845_v19  ;;  %v5136_v13 = vadd.f32 %v5135_v59, %v5134_v14 }
 0x231   : > { %v5137_v35 = vpop.f32.mrf.mxu0  ;;  %v6849_v0 = vpop.f32.mrf.mxu1 }
 0x232   : > { %v6852_v5 = vadd.f32 %v5136_v13, %v6743_v41 }
 0x233   : > { %v5138_v8 = vpop.f32.mrf.mxu0  ;;  %v6854_v10 = vpop.f32.mrf.mxu1 }
 0x234   : > { %7113 = vst [vmem:[#allocation7_spill] sm:$0xff] %v6852_v5  ;;  %v5139_v3 = vadd.f32 %v5138_v8, %v5137_v35 }
 0x235   : > { %v5140_v11 = vpop.f32.mrf.mxu0  ;;  %v6856_v28 = vpop.f32.mrf.mxu1 }
 0x236   : > { %v6859_v56 = vadd.f32 %v5139_v3, %v6749_v27 }
 0x237   : > { %v5141_v54 = vpop.f32.mrf.mxu0  ;;  %v6861_v53 = vpop.f32.mrf.mxu1 }
 0x238   : > { %7114 = vst [vmem:[#allocation8_spill] sm:$0xff] %v6859_v56  ;;  %v5142_v49 = vadd.f32 %v5141_v54, %v5140_v11 }
 0x239   : > { %v5143_v37 = vpop.f32.mrf.mxu0  ;;  %v6863_v14 = vpop.f32.mrf.mxu1 }
 0x23a   : > { %v6866_v41 = vadd.f32 %v5142_v49, %v6755_v9 }
 0x23b   : > { %v5144_v59 = vpop.f32.mrf.mxu0  ;;  %v6868_v13 = vpop.f32.mrf.mxu1 }
 0x23c   : > { %7115 = vst [vmem:[#allocation9_spill] sm:$0xff] %v6866_v41  ;;  %v5145_v35 = vadd.f32 %v5144_v59, %v5143_v37 }
 0x23d   : > { %v5146_v8 = vpop.f32.mrf.mxu0  ;;  %v6870_v5 = vpop.f32.mrf.mxu1 }
 0x23e   : > { %v6873_v27 = vadd.f32 %v5145_v35, %v6761_v58 }
 0x23f   : > { %v5147_v3 = vpop.f32.mrf.mxu0  ;;  %v6875_v56 = vpop.f32.mrf.mxu1 }
 0x240   : > { %7116 = vst [vmem:[#allocation10_spill] sm:$0xff] %v6873_v27  ;;  %v5148_v11 = vadd.f32 %v5147_v3, %v5146_v8  ;;  %v5182_v8 = vadd.f32 %v6805_v24, %v6800_v57  ;;  %v6908_v57 = vld [vmem:[%s7106_s2] ss:$0 sm:$0xff] }
 0x241   : > { %v5149_v54 = vpop.f32.mrf.mxu0  ;;  %v6877_v60 = vpop.f32.mrf.mxu1 }
 0x242   : > { %v6880_v9 = vadd.f32 %v5148_v11, %v6767_v46 }
 0x243   : > { %v5150_v49 = vpop.f32.mrf.mxu0  ;;  %v6882_v41 = vpop.f32.mrf.mxu1 }
 0x244   : > { %7117 = vst [vmem:[#allocation11_spill] sm:$0xff] %v6880_v9  ;;  %v5151_v37 = vadd.f32 %v5150_v49, %v5149_v54 }
 0x245   : > { %v5152_v59 = vpop.f32.mrf.mxu0  ;;  %v6884_v19 = vpop.f32.mrf.mxu1 }
 0x246   : > { %v6887_v58 = vadd.f32 %v5151_v37, %v6773_v44  ;;  %v5185_v44 = vadd.f32 %v6812_v52, %v6807_v33 }
 0x247   : > { %v5153_v35 = vpop.f32.mrf.mxu0  ;;  %v6889_v27 = vpop.f32.mrf.mxu1 }
 0x248   : > { %7118 = vst [vmem:[#allocation12_spill] sm:$0xff] %v6887_v58  ;;  %v5154_v3 = vadd.f32 %v5153_v35, %v5152_v59  ;;  %v3337_v58 = vadd.f32 %v5182_v8, %v6710_v48  ;;  %v5179_v59 = vadd.f32 %v6798_v38, %v6790_v26  ;;  %v5194_v48 = vadd.f32 %v6833_v20, %v6828_v29 }
 0x249   : > { %v5155_v2 = vpop.f32.mrf.mxu0  ;;  %v6893_v46 = vpop.f32.mrf.mxu1  ;;  %v3340_v8 = vadd.f32 %v5185_v44, %v6716_v51  ;;  %v5188_v38 = vadd.f32 %v6819_v30, %v6814_v15  ;;  %v5197_v29 = vadd.f32 %v6840_v34, %v6835_v55  ;;  %v5191_v30 = vadd.f32 %v6826_v22, %v6821_v21 }
 0x24a   : > { %v6896_v11 = vadd.f32 %v5154_v3, %v6779_v17  ;;  %v3332_v51 = vadd.f32 %v5179_v59, %v6704_v7  ;;  %v5206_v59 = vadd.f32 %v6861_v53, %v6856_v28 }
 0x24b   : > { %v5156_v54 = vpop.f32.mrf.mxu0  ;;  %v6898_v49 = vpop.f32.mrf.mxu1  ;;  %v3345_v7 = vadd.f32 %v5188_v38, %v6722_v62  ;;  %v5200_v38 = vadd.f32 %v6847_v31, %v6842_v39 }
 0x24c   : > { %v5157_v37 = vadd.f32 %v5156_v54, %v5155_v2  ;;  %v3369_v31 = vadd.f32 %v5206_v59, %v6758_v61 }
 0x24d   : > { %v6903_v9 = vpop.f32.mrf.mxu1  ;;  %v5312_v40 = vpop.f32.mrf.mxu0 }
 0x24e   : > { %v6911_v17 = vadd.f32 %v5157_v37, %v6785_v25  ;;  %v3498_v24 = vadd.f32 %v5312_v40, %v3337_v58  ;;  %v6925_v25 = vld [vmem:[%s7107_s3] ss:$0 sm:$0xff]  ;;  %v3353_v37 = vadd.f32 %v5194_v48, %v6734_v23 }
 0x24f   : > { %v6915_v35 = vpop.f32.mrf.mxu1  ;;  %v3489_v33 = vpop.f32.mrf.mxu0 }
 0x250   : > { %v3724_v52 = vmul.f32 %v6908_v57, %v3498_v24  ;;  %v3490_v2 = vadd.f32 %v3489_v33, %v6796_v42 }
 0x251   : > { %v6927_v40 = vpop.f32.mrf.mxu1  ;;  %v5313_v26 = vpop.f32.mrf.mxu0 }
 0x252   : > { %v3501_v58 = vadd.f32 %v5313_v26, %v3340_v8  ;;  %v3722_v42 = vmul.f32 %v6908_v57, %v3490_v2  ;;  %v3763_v54 = vadd.f32 %v6925_v25, %v3724_v52  ;;  %v3356_v8 = vadd.f32 %v5197_v29, %v6740_v50 }
 0x253   : > { %v6934_v20 = vpop.f32.mrf.mxu1  ;;  %v3492_v3 = vpop.f32.mrf.mxu0 }
 0x254   : > { %v3725_v44 = vmul.f32 %v6908_v57, %v3501_v58  ;;  %v3493_v24 = vadd.f32 %v3492_v3, %v3332_v51  ;;  %v3761_v52 = vadd.f32 %v6925_v25, %v3722_v42  ;;  %v3795_v26 = vmax.f32 %v3763_v54, 0.0 }
 0x255   : > { %v6940_v33 = vpop.f32.mrf.mxu1  ;;  %v5316_v15 = vpop.f32.mrf.mxu0  ;;  %v3348_v42 = vadd.f32 %v5191_v30, %v6728_v16  ;;  %v5209_v51 = vadd.f32 %v6868_v13, %v6863_v14  ;;  %v5203_v13 = vadd.f32 %v6854_v10, %v6849_v0 }
 0x256   : > { %v3764_v55 = vadd.f32 %v6925_v25, %v3725_v44  ;;  %v3514_v34 = vadd.f32 %v5316_v15, %v3353_v37  ;;  %v3723_v23 = vmul.f32 %v6908_v57, %v3493_v24  ;;  %v3793_v3 = vmax.f32 %v3761_v52, 0.0 }
 0x257   : > { %v6951_v48 = vpop.f32.mrf.mxu1  ;;  %v3505_v2 = vpop.f32.mrf.mxu0  ;;  %v3361_v52 = vadd.f32 %v5200_v38, %v6746_v45  ;;  %v3364_v38 = vadd.f32 %v5203_v13, %v6752_v6 }
 0x258   : > { %v3796_v21 = vmax.f32 %v3764_v55, 0.0  ;;  %v3728_v22 = vmul.f32 %v6908_v57, %v3514_v34  ;;  %v3506_v58 = vadd.f32 %v3505_v2, %v3345_v7  ;;  %v3762_v62 = vadd.f32 %v6925_v25, %v3723_v23 }
 0x259   : > { %v6961_v28 = vpop.f32.mrf.mxu1  ;;  %v5317_v53 = vpop.f32.mrf.mxu0  ;;  %v5218_v23 = vadd.f32 %v6889_v27, %v6884_v19  ;;  %v5212_v27 = vadd.f32 %v6875_v56, %v6870_v5 }
 0x25a   : > { %v4511_v50 = vpack.c.bf16 %v3796_v21, %v3795_v26  ;;  %v3517_v29 = vadd.f32 %v5317_v53, %v3356_v8  ;;  %v3794_v54 = vmax.f32 %v3762_v62, 0.0  ;;  %v3726_v44 = vmul.f32 %v6908_v57, %v3506_v58 }
 0x25b   : > { %v6969_v37 = vpop.f32.mrf.mxu1  ;;  %v3508_v24 = vpop.f32.mrf.mxu0  ;;  %v3767_v15 = vadd.f32 %v6925_v25, %v3728_v22  ;;  %v3372_v26 = vadd.f32 %v5209_v51, %v6764_v36  ;;  %v5221_v36 = vadd.f32 %v6898_v49, %v6893_v46  ;;  %v3385_v56 = vadd.f32 %v5218_v23, %v6782_v18 }
 0x25c   : > { %4583 = vst [vmem:[%s6958_s26 + $0x8] sm:$0xff] %v4511_v50   ;;  %v3729_v39 = vmul.f32 %v6908_v57, %v3517_v29  ;;  %v4506_v55 = vpack.c.bf16 %v3794_v54, %v3793_v3  ;;  %v3509_v16 = vadd.f32 %v3508_v24, %v3348_v42  ;;  %v3765_v2 = vadd.f32 %v6925_v25, %v3726_v44 }
 0x25d   : > { %v6975_v30 = vpop.f32.mrf.mxu1  ;;  %v5320_v14 = vpop.f32.mrf.mxu0  ;;  %v3799_v21 = vmax.f32 %v3767_v15, 0.0  ;;  %v5215_v46 = vadd.f32 %v6882_v41, %v6877_v60 }
 0x25e   : > { %v3768_v34 = vadd.f32 %v6925_v25, %v3729_v39  ;;  %v3530_v7 = vadd.f32 %v5320_v14, %v3369_v31  ;;  %4507 = vst [vmem:[%s6958_s26] sm:$0xff] %v4506_v55   ;;  %v3727_v61 = vmul.f32 %v6908_v57, %v3509_v16  ;;  %v3797_v50 = vmax.f32 %v3765_v2, 0.0 }
 0x25f   : > { %v6986_v59 = vpop.f32.mrf.mxu1  ;;  %v3521_v8 = vpop.f32.mrf.mxu0  ;;  %v3377_v31 = vadd.f32 %v5212_v27, %v6770_v47  ;;  %v5230_v55 = vadd.f32 %v6951_v48, %v6940_v33  ;;  %v5224_v33 = vadd.f32 %v6915_v35, %v6903_v9 }
 0x260   : > { %v3800_v0 = vmax.f32 %v3768_v34, 0.0  ;;  %v3732_v10 = vmul.f32 %v6908_v57, %v3530_v7  ;;  %v3522_v22 = vadd.f32 %v3521_v8, %v3361_v52  ;;  %v3766_v45 = vadd.f32 %v6925_v25, %v3727_v61 }
 0x261   : > { %v6991_v58 = vpop.f32.mrf.mxu1  ;;  %v5321_v19 = vpop.f32.mrf.mxu0  ;;  %v3388_v34 = vadd.f32 %v5221_v36, %v6788_v32  ;;  %v3380_v8 = vadd.f32 %v5215_v46, %v6776_v1  ;;  %v5233_v32 = vadd.f32 %v6969_v37, %v6961_v28  ;;  %v3401_v9 = vadd.f32 %v5230_v55, %v6810_v4 }
 0x262   : > { %v4521_v62 = vpack.c.bf16 %v3800_v0, %v3799_v21  ;;  %v3533_v53 = vadd.f32 %v5321_v19, %v3372_v26  ;;  %v3798_v29 = vmax.f32 %v3766_v45, 0.0  ;;  %v3730_v42 = vmul.f32 %v6908_v57, %v3522_v22 }
 0x263   : > { %v6999_v51 = vpop.f32.mrf.mxu1  ;;  %v3524_v3 = vpop.f32.mrf.mxu0  ;;  %v3771_v54 = vadd.f32 %v6925_v25, %v3732_v10  ;;  %v5227_v1 = vadd.f32 %v6934_v20, %v6927_v40 }
 0x264   : > { %4585 = vst [vmem:[%s6958_s26 + $0x18] sm:$0xff] %v4521_v62   ;;  %v3733_v5 = vmul.f32 %v6908_v57, %v3533_v53  ;;  %v4516_v44 = vpack.c.bf16 %v3798_v29, %v3797_v50  ;;  %v3525_v6 = vadd.f32 %v3524_v3, %v3364_v38  ;;  %v3769_v16 = vadd.f32 %v6925_v25, %v3730_v42 }
 0x265   : > { %v5240_v24 = vpop.f32.mrf.mxu1  ;;  %v5324_v15 = vpop.f32.mrf.mxu0  ;;  %v3803_v7 = vmax.f32 %v3771_v54, 0.0  ;;  %v3393_v38 = vadd.f32 %v5224_v33, %v6793_v43  ;;  %v3404_v3 = vadd.f32 %v5233_v32, %v6817_v12  ;;  %v7121_v32 = vld [vmem:[#allocation6_spill] sm:$0xff] }
 0x266   : > { %v3772_v49 = vadd.f32 %v6925_v25, %v3733_v5  ;;  %v3546_v39 = vadd.f32 %v5324_v15, %v3385_v56  ;;  %4584 = vst [vmem:[%s6958_s26 + $0x10] sm:$0xff] %v4516_v44   ;;  %v3731_v18 = vmul.f32 %v6908_v57, %v3525_v6  ;;  %v3801_v26 = vmax.f32 %v3769_v16, 0.0 }
 0x267   : > { %v5241_v14 = vpop.f32.mrf.mxu1  ;;  %v3537_v13 = vpop.f32.mrf.mxu0  ;;  %v3396_v6 = vadd.f32 %v5227_v1, %v6803_v63 }
 0x268   : > { %v3804_v52 = vmax.f32 %v3772_v49, 0.0  ;;  %v3736_v60 = vmul.f32 %v6908_v57, %v3546_v39  ;;  %v3538_v41 = vadd.f32 %v3537_v13, %v3377_v31  ;;  %v3770_v47 = vadd.f32 %v6925_v25, %v3731_v18  ;;  %v7119_v13 = vld [vmem:[#allocation5_spill] sm:$0xff] }
 0x269   : > { %v5243_v23 = vpop.f32.mrf.mxu1  ;;  %v5325_v2 = vpop.f32.mrf.mxu0  ;;  %v5242_v36 = vadd.f32 %v5241_v14, %v5240_v24  ;;  %v5236_v24 = vadd.f32 %v6986_v59, %v6975_v30 }
 0x26a   : > { %v4531_v48 = vpack.c.bf16 %v3804_v52, %v3803_v7  ;;  %v3549_v61 = vadd.f32 %v5325_v2, %v3388_v34  ;;  %v3802_v21 = vmax.f32 %v3770_v47, 0.0  ;;  %v3734_v0 = vmul.f32 %v6908_v57, %v3538_v41  ;;  %v7120_v47 = vld [vmem:[#allocation3_spill] sm:$0xff] }
 0x26b   : > { %v5244_v10 = vpop.f32.mrf.mxu1  ;;  %v3540_v22 = vpop.f32.mrf.mxu0  ;;  %v3775_v45 = vadd.f32 %v6925_v25, %v3736_v60  ;;  %v3417_v63 = vadd.f32 %v5242_v36, %v7119_v13  ;;  %v5239_v52 = vadd.f32 %v6999_v51, %v6991_v58 }
 0x26c   : > { %4587 = vst [vmem:[%s6958_s26 + $0x28] sm:$0xff] %v4531_v48   ;;  %v3737_v19 = vmul.f32 %v6908_v57, %v3549_v61  ;;  %v4526_v35 = vpack.c.bf16 %v3802_v21, %v3801_v26  ;;  %v3541_v27 = vadd.f32 %v3540_v22, %v3380_v8  ;;  %v3773_v50 = vadd.f32 %v6925_v25, %v3734_v0 }
 0x26d   : > { %v5246_v28 = vpop.f32.mrf.mxu1  ;;  %v5328_v37 = vpop.f32.mrf.mxu0  ;;  %v3807_v40 = vmax.f32 %v3775_v45, 0.0  ;;  %v5245_v46 = vadd.f32 %v5244_v10, %v5243_v23  ;;  %v3409_v23 = vadd.f32 %v5236_v24, %v7120_v47  ;;  %v7126_v47 = vld [vmem:[#allocation8_spill] sm:$0xff] }
 0x26e   : > { %v3776_v62 = vadd.f32 %v6925_v25, %v3737_v19  ;;  %v3562_v53 = vadd.f32 %v5328_v37, %v3401_v9  ;;  %4586 = vst [vmem:[%s6958_s26 + $0x20] sm:$0xff] %v4526_v35   ;;  %v3735_v29 = vmul.f32 %v6908_v57, %v3541_v27  ;;  %v3805_v39 = vmax.f32 %v3773_v50, 0.0  ;;  %v7122_v35 = vld [vmem:[#allocation4_spill] sm:$0xff] }
 0x26f   : > { %v5247_v42 = vpop.f32.mrf.mxu1  ;;  %v3553_v4 = vpop.f32.mrf.mxu0  ;;  %v3420_v26 = vadd.f32 %v5245_v46, %v7121_v32  ;;  %v3412_v27 = vadd.f32 %v5239_v52, %v7122_v35 }
 0x270   : > { %v3808_v20 = vmax.f32 %v3776_v62, 0.0  ;;  %v3740_v54 = vmul.f32 %v6908_v57, %v3562_v53  ;;  %v3554_v5 = vadd.f32 %v3553_v4, %v3393_v38  ;;  %v3774_v56 = vadd.f32 %v6925_v25, %v3735_v29 }
 0x271   : > { %v5249_v44 = vpop.f32.mrf.mxu1  ;;  %v5329_v43 = vpop.f32.mrf.mxu0  ;;  %v5248_v19 = vadd.f32 %v5247_v42, %v5246_v28 }
 0x272   : > { %v4541_v15 = vpack.c.bf16 %v3808_v20, %v3807_v40  ;;  %v3565_v49 = vadd.f32 %v5329_v43, %v3404_v3  ;;  %v3806_v12 = vmax.f32 %v3774_v56, 0.0  ;;  %v3779_v31 = vadd.f32 %v6925_v25, %v3740_v54  ;;  %v7123_v3 = vld [vmem:[#allocation9_spill] sm:$0xff]  ;;  %v7124_v43 = vld [vmem:[#allocation7_spill] sm:$0xff] }
 0x273   : > { %v3738_v55 = vmul.f32 %v6908_v57, %v3554_v5  ;;  %v5250_v16 = vpop.f32.mrf.mxu1  ;;  %v3556_v18 = vpop.f32.mrf.mxu0 }
 0x274   : > { %4589 = vst [vmem:[%s6958_s26 + $0x38] sm:$0xff] %v4541_v15   ;;  %v3741_v14 = vmul.f32 %v6908_v57, %v3565_v49  ;;  %v4536_v34 = vpack.c.bf16 %v3806_v12, %v3805_v39  ;;  %v3557_v7 = vadd.f32 %v3556_v18, %v3396_v6  ;;  %v3811_v2 = vmax.f32 %v3779_v31, 0.0 }
 0x275   : > { %v5252_v30 = vpop.f32.mrf.mxu1  ;;  %v5332_v59 = vpop.f32.mrf.mxu0  ;;  %v3777_v33 = vadd.f32 %v6925_v25, %v3738_v55  ;;  %v3425_v6 = vadd.f32 %v5248_v19, %v7124_v43  ;;  %v5251_v24 = vadd.f32 %v5250_v16, %v5249_v44 }
 0x276   : > { %v3780_v60 = vadd.f32 %v6925_v25, %v3741_v14  ;;  %v3578_v41 = vadd.f32 %v5332_v59, %v3417_v63  ;;  %4588 = vst [vmem:[%s6958_s26 + $0x30] sm:$0xff] %v4536_v34   ;;  %v3739_v48 = vmul.f32 %v6908_v57, %v3557_v7  ;;  %v7125_v14 = vld [vmem:[#allocation10_spill] sm:$0xff] }
 0x277   : > { %v5253_v61 = vpop.f32.mrf.mxu1  ;;  %v3569_v8 = vpop.f32.mrf.mxu0  ;;  %v3809_v37 = vmax.f32 %v3777_v33, 0.0 }
 0x278   : > { %v3812_v21 = vmax.f32 %v3780_v60, 0.0  ;;  %v3744_v0 = vmul.f32 %v6908_v57, %v3578_v41  ;;  %v5254_v58 = vadd.f32 %v5253_v61, %v5252_v30  ;;  %v3570_v51 = vadd.f32 %v3569_v8, %v3409_v23 }
 0x279   : > { %v3778_v10 = vadd.f32 %v6925_v25, %v3739_v48  ;;  %v5255_v22 = vpop.f32.mrf.mxu1  ;;  %v5333_v45 = vpop.f32.mrf.mxu0  ;;  %v3428_v23 = vadd.f32 %v5251_v24, %v7126_v47 }
 0x27a   : > { %v4551_v9 = vpack.c.bf16 %v3812_v21, %v3811_v2  ;;  %v3581_v1 = vadd.f32 %v5333_v45, %v3420_v26  ;;  %v3783_v53 = vadd.f32 %v6925_v25, %v3744_v0  ;;  %v3742_v38 = vmul.f32 %v6908_v57, %v3570_v51 }
 0x27b   : > { %v3810_v62 = vmax.f32 %v3778_v10, 0.0  ;;  %v5256_v36 = vpop.f32.mrf.mxu1  ;;  %v3572_v50 = vpop.f32.mrf.mxu0  ;;  %v3433_v40 = vadd.f32 %v5254_v58, %v7123_v3  ;;  %v7127_v58 = vld [vmem:[#allocation11_spill] sm:$0xff] }
 0x27c   : > { %4591 = vst [vmem:[%s6958_s26 + $0x48] sm:$0xff] %v4551_v9   ;;  %v3745_v29 = vmul.f32 %v6908_v57, %v3581_v1  ;;  %v5257_v4 = vadd.f32 %v5256_v36, %v5255_v22  ;;  %v3573_v42 = vadd.f32 %v3572_v50, %v3412_v27  ;;  %v3815_v15 = vmax.f32 %v3783_v53, 0.0 }
 0x27d   : > { %v4546_v28 = vpack.c.bf16 %v3810_v62, %v3809_v37  ;;  %v5258_v20 = vpop.f32.mrf.mxu1  ;;  %v5336_v54 = vpop.f32.mrf.mxu0  ;;  %v3781_v46 = vadd.f32 %v6925_v25, %v3742_v38 }
 0x27e   : > { %v3784_v5 = vadd.f32 %v6925_v25, %v3745_v29  ;;  %v3594_v56 = vadd.f32 %v5336_v54, %v3433_v40  ;;  %v3743_v49 = vmul.f32 %v6908_v57, %v3573_v42  ;;  %v3436_v13 = vadd.f32 %v5257_v4, %v7125_v14  ;;  %v7128_v29 = vld [vmem:[#allocation12_spill] sm:$0xff] }
 0x27f   : > { %4590 = vst [vmem:[%s6958_s26 + $0x40] sm:$0xff] %v4546_v28   ;;  %v5259_v39 = vpop.f32.mrf.mxu1  ;;  %v3585_v12 = vpop.f32.mrf.mxu0  ;;  %v3813_v59 = vmax.f32 %v3781_v46, 0.0 }
 0x280   : > { %v3816_v31 = vmax.f32 %v3784_v5, 0.0  ;;  %v3748_v55 = vmul.f32 %v6908_v57, %v3594_v56  ;;  %v3586_v18 = vadd.f32 %v3585_v12, %v3425_v6  ;;  %v3782_v63 = vadd.f32 %v6925_v25, %v3743_v49 }
 0x281   : > { %v5261_v34 = vpop.f32.mrf.mxu1  ;;  %v5337_v7 = vpop.f32.mrf.mxu0  ;;  %v5260_v16 = vadd.f32 %v5259_v39, %v5258_v20 }
 0x282   : > { %v4561_v44 = vpack.c.bf16 %v3816_v31, %v3815_v15  ;;  %v3597_v30 = vadd.f32 %v5337_v7, %v3436_v13  ;;  %v3814_v52 = vmax.f32 %v3782_v63, 0.0  ;;  %v3746_v60 = vmul.f32 %v6908_v57, %v3586_v18 }
 0x283   : > { %v5262_v41 = vpop.f32.mrf.mxu1  ;;  %v3588_v2 = vpop.f32.mrf.mxu0  ;;  %v3787_v33 = vadd.f32 %v6925_v25, %v3748_v55  ;;  %v3441_v51 = vadd.f32 %v5260_v16, %v7127_v58 }
 0x284   : > { %4593 = vst [vmem:[%s6958_s26 + $0x58] sm:$0xff] %v4561_v44   ;;  %v3749_v48 = vmul.f32 %v6908_v57, %v3597_v30  ;;  %v4556_v61 = vpack.c.bf16 %v3814_v52, %v3813_v59  ;;  %v3589_v8 = vadd.f32 %v3588_v2, %v3428_v23  ;;  %v5263_v0 = vadd.f32 %v5262_v41, %v5261_v34 }
 0x285   : > { %v5264_v32 = vpop.f32.mrf.mxu1  ;;  %v5340_v26 = vpop.f32.mrf.mxu0  ;;  %v3785_v10 = vadd.f32 %v6925_v25, %v3746_v60  ;;  %v3819_v9 = vmax.f32 %v3787_v33, 0.0 }
 0x286   : > { %v3788_v21 = vadd.f32 %v6925_v25, %v3749_v48  ;;  %4592 = vst [vmem:[%s6958_s26 + $0x50] sm:$0xff] %v4556_v61   ;;  %v3747_v22 = vmul.f32 %v6908_v57, %v3589_v8  ;;  %v3444_v4 = vadd.f32 %v5263_v0, %v7128_v29 }
 0x287   : > { %v5265_v45 = vpop.f32.mrf.mxu1  ;;  %v3601_v19 = vpop.f32.mrf.mxu0  ;;  %v3817_v3 = vmax.f32 %v3785_v10, 0.0 }
 0x288   : > { %v3820_v1 = vmax.f32 %v3788_v21, 0.0  ;;  %v5266_v35 = vadd.f32 %v5265_v45, %v5264_v32  ;;  %v3602_v27 = vadd.f32 %v3601_v19, %v3441_v51  ;;  %v3786_v37 = vadd.f32 %v6925_v25, %v3747_v22 }
 0x289   : > { %v5267_v62 = vpop.f32.mrf.mxu1  ;;  %v5341_v53 = vpop.f32.mrf.mxu0 }
 0x28a   : > { %v4571_v38 = vpack.c.bf16 %v3820_v1, %v3819_v9  ;;  %v3449_v36 = vadd.f32 %v5266_v35, %v6896_v11  ;;  %v3750_v50 = vmul.f32 %v6908_v57, %v3602_v27  ;;  %v3818_v40 = vmax.f32 %v3786_v37, 0.0 }
 0x28b   : > { %v5268_v28 = vpop.f32.mrf.mxu1  ;;  %v3604_v42 = vpop.f32.mrf.mxu0 }
 0x28c   : > { %4595 = vst [vmem:[%s6958_s26 + $0x68] sm:$0xff] %v4571_v38   ;;  %v3610_v20 = vadd.f32 %v5340_v26, %v3449_v36  ;;  %v5269_v54 = vadd.f32 %v5268_v28, %v5267_v62  ;;  %v3605_v5 = vadd.f32 %v3604_v42, %v3444_v4  ;;  %v4566_v56 = vpack.c.bf16 %v3818_v40, %v3817_v3 }
 0x28d   : > { %v3789_v6 = vadd.f32 %v6925_v25, %v3750_v50 }
 0x28e   : > { %v3752_v43 = vmul.f32 %v6908_v57, %v3610_v20  ;;  %v3452_v11 = vadd.f32 %v5269_v54, %v6911_v17  ;;  %v3751_v24 = vmul.f32 %v6908_v57, %v3605_v5  ;;  %4594 = vst [vmem:[%s6958_s26 + $0x60] sm:$0xff] %v4566_v56  }
 0x28f   : > { %v3821_v39 = vmax.f32 %v3789_v6, 0.0 }
 0x290   : > { %v3613_v15 = vadd.f32 %v5341_v53, %v3452_v11  ;;  %v3790_v46 = vadd.f32 %v6925_v25, %v3751_v24  ;;  %v3791_v49 = vadd.f32 %v6925_v25, %v3752_v43 }
 0x292   : > { %v3753_v12 = vmul.f32 %v6908_v57, %v3613_v15  ;;  %v3822_v31 = vmax.f32 %v3790_v46, 0.0  ;;  %v3823_v14 = vmax.f32 %v3791_v49, 0.0 }
 0x294   : > { %v3792_v55 = vadd.f32 %v6925_v25, %v3753_v12  ;;  %v4576_v18 = vpack.c.bf16 %v3822_v31, %v3821_v39 }
 0x296   : > { %v3824_v13 = vmax.f32 %v3792_v55, 0.0  ;;  %4596 = vst [vmem:[%s6958_s26 + $0x70] sm:$0xff] %v4576_v18  }
 0x298   : > { %v4581_v63 = vpack.c.bf16 %v3824_v13, %v3823_v14 }
 0x29a   : > { %4597 = vst [vmem:[%s6958_s26 + $0x78] sm:$0xff] %v4581_v63  }
 0x29b PF: > { %s14_s17 = sadd.s32 1, %s5813_s17   ;;  %s7129_s15 = smov %s5809_s16 }
 0x29c   : > { %p11_p5 = scmp.ge.s32.totalorder %s14_s17, 4   ;;  %s7130_s16 = smov %s7132_s18 }
 0x29e   :  { %13 = sbr.rel (!%p11_p5) target bundleno = 2 (0x2), region = 83 }

// kernel: conv_cfc_forward.7
= control target key start
LH: loop header
LB: loop body
LE: loop exit
PB: predicated region body
PF: predicated region fallthrough
CT: control target
= control target key end

     0   :  { %s4922_s15 = smov 0   ;;  %s4924_s16 = smov 0   ;;  %s5817_s0 = inlined_call_operand.vmem [shape: bf16[128,3200], index: 0, kind: input, shape index: {}]   ;;  %s5818_s1 = inlined_call_operand.vmem [shape: bf16[3200,128], index: 1, kind: input, shape index: {}]   ;;  %s5819_s2 = inlined_call_operand.vmem [shape: f32[1,128], index: 2, kind: input, shape index: {}]   ;;  %s5820_s3 = inlined_call_operand.vmem [shape: f32[1,128], index: 3, kind: input, shape index: {}]   ;;  %s5821_s4 = inlined_call_operand.vmem [shape: bf16[128,128], index: 4, kind: output, shape index: {}]  }
   0x1   :  { %s4926_s17 = smov 0  }
   0x2 LB: > { %s33_s18 = sadd.s32 1, %s4891_s16  ;;  %p3620_p0 = scmp.ge.s32.totalorder %s4895_s17, 1  ;;  %s4895_s17 = sphi %s4926_s17, %s14_s17   ;;  %s4891_s16 = sphi %s4924_s16, %s5845_s16   ;;  %s4887_s15 = sphi %s4922_s15, %s5844_s15  }
   0x3   : > { %p35_p1 = scmp.ge.s32.totalorder %s33_s18, 2  ;;  %p224_p2 = scmp.lt.s32.totalorder %s4895_s17, 3 }
   0x5   : > { %s5847_s18 = smov (%p35_p1, %s33_s18), 0  ;;  %p225_p3 = pnand %p3620_p0, %p224_p2 }
   0x7   : > { %228 = sbr.rel (%p225_p3) target bundleno = 473 (0x1d9), region = 36 }
   0xc   : > { %v4525_v0 = vld [vmem:[%s5818_s1 + $0x78] sm:$0xff]   ;;  %v4529_v4 = vld [vmem:[%s5818_s1 + $0x70] sm:$0xff]   ;;  %v4533_v8 = vld [vmem:[%s5818_s1 + $0x68] sm:$0xff]   ;;  %s3621_s27 = sshll.u32 %s4887_s15, 3 }
   0xd   : > { %v4526_v1 = vld [vmem:[%s5818_s1 + $0xf8] sm:$0xff]   ;;  %3968 = vmatprep.subr.bf16.mxu0 %v4525_v0  ;;  %v4530_v5 = vld [vmem:[%s5818_s1 + $0xf0] sm:$0xff]   ;;  %v4534_v9 = vld [vmem:[%s5818_s1 + $0xe8] sm:$0xff]   ;;  %p274_p4 = scmp.lt.s32.totalorder %s3621_s27, 15 }
   0xe   : > { %v4527_v2 = vld [vmem:[%s5818_s1 + $0x38] sm:$0xff]   ;;  %4008 = vmatprep.subr.bf16.mxu1 %v4526_v1  ;;  %v4531_v6 = vld [vmem:[%s5818_s1 + $0x30] sm:$0xff]   ;;  %v4535_v10 = vld [vmem:[%s5818_s1 + $0x28] sm:$0xff]  }
   0xf   : > { %v4528_v3 = vld [vmem:[%s5818_s1 + $0xb8] sm:$0xff]   ;;  %3969 = vmatpush3.bf16.msra.mxu0 %v4527_v2  ;;  %v4532_v7 = vld [vmem:[%s5818_s1 + $0xb0] sm:$0xff]   ;;  %v4536_v11 = vld [vmem:[%s5818_s1 + $0xa8] sm:$0xff]   ;;  %s5849_s27 = smov (!%p274_p4, %s3621_s27), 15 }
  0x10   : > { %4009 = vmatpush3.bf16.msra.mxu1 %v4528_v3  ;;  %3970 = vmatprep.subr.bf16.mxu0 %v4529_v4  ;;  %v4537_v12 = vld [vmem:[%s5818_s1 + $0x60] sm:$0xff]   ;;  %v4541_v16 = vld [vmem:[%s5818_s1 + $0x58] sm:$0xff]   ;;  %v4545_v20 = vld [vmem:[%s5818_s1 + $0x50] sm:$0xff]   ;;  %s4500_s28 = smul.u32 100, %s5849_s27  ;;  %s3624_s24 = sshll.u32 %s5849_s27, 2 }
  0x11   : > { %4010 = vmatprep.subr.bf16.mxu1 %v4530_v5  ;;  %v4538_v13 = vld [vmem:[%s5818_s1 + $0xe0] sm:$0xff]   ;;  %v4542_v17 = vld [vmem:[%s5818_s1 + $0xd8] sm:$0xff]   ;;  %v4546_v21 = vld [vmem:[%s5818_s1 + $0xd0] sm:$0xff]  }
  0x12   : > { %v4539_v14 = vld [vmem:[%s5818_s1 + $0x20] sm:$0xff]   ;;  %v4543_v18 = vld [vmem:[%s5818_s1 + $0x18] sm:$0xff]   ;;  %v4547_v22 = vld [vmem:[%s5818_s1 + $0x10] sm:$0xff]   ;;  %s5039_s12 = scalar_lea.vmem %s5817_s0, %s4500_s28  ;;  %s306_s28 = scalar_lea.vmem %s5821_s4, %s3624_s24 }
  0x13   : > { %3971 = vmatpush3.bf16.msra.mxu0 %v4531_v6  ;;  %v4540_v15 = vld [vmem:[%s5818_s1 + $0xa0] sm:$0xff]   ;;  %v4544_v19 = vld [vmem:[%s5818_s1 + $0x98] sm:$0xff]   ;;  %v4548_v23 = vld [vmem:[%s5818_s1 + $0x90] sm:$0xff]  }
  0x14   : > { %4011 = vmatpush3.bf16.msra.mxu1 %v4532_v7  ;;  %3972 = vmatprep.subr.bf16.mxu0 %v4533_v8  ;;  %v4549_v24 = vld [vmem:[%s5818_s1 + $0x48] sm:$0xff]   ;;  %v4553_v28 = vld [vmem:[%s5818_s1 + $0x40] sm:$0xff]   ;;  %v4563_v36 = vld [vmem:[%s5818_s1 + $0x178] sm:$0xff]  }
  0x15   : > { %4012 = vmatprep.subr.bf16.mxu1 %v4534_v9  ;;  %v4550_v25 = vld [vmem:[%s5818_s1 + $0xc8] sm:$0xff]   ;;  %v4554_v29 = vld [vmem:[%s5818_s1 + $0xc0] sm:$0xff]   ;;  %v4564_v37 = vld [vmem:[%s5818_s1 + $0x1f8] sm:$0xff]  }
  0x16   : > { %v4551_v26 = vld [vmem:[%s5818_s1 + $0x8] sm:$0xff]   ;;  %v4555_v30 = vld [vmem:[%s5818_s1] sm:$0xff]   ;;  %v4565_v38 = vld [vmem:[%s5818_s1 + $0x138] sm:$0xff]  }
  0x17   : > { %3973 = vmatpush3.bf16.msra.mxu0 %v4535_v10  ;;  %v4552_v27 = vld [vmem:[%s5818_s1 + $0x88] sm:$0xff]   ;;  %v4556_v31 = vld [vmem:[%s5818_s1 + $0x80] sm:$0xff]   ;;  %v4566_v39 = vld [vmem:[%s5818_s1 + $0x1b8] sm:$0xff]  }
  0x18   : > { %4013 = vmatpush3.bf16.msra.mxu1 %v4536_v11  ;;  %3974 = vmatprep.subr.bf16.mxu0 %v4537_v12  ;;  %v4557_v32 = vld [vmem:[%s5039_s12] ss:$100 sps:$4 sm:$0xff]   ;;  %v4560_v34 = vld [vmem:[%s5039_s12 + $0x8] ss:$100 sps:$4 sm:$0xff]   ;;  %v4567_v40 = vld [vmem:[%s5818_s1 + $0x170] sm:$0xff]  }
  0x19   : > { %4014 = vmatprep.subr.bf16.mxu1 %v4538_v13  ;;  %v4559_v33 = vld [vmem:[%s5039_s12 + $0x4] ss:$100 sps:$4 sm:$0xff]   ;;  %v4562_v35 = vld [vmem:[%s5039_s12 + $0xc] ss:$100 sps:$4 sm:$0xff]   ;;  %v4573_v45 = vld [vmem:[%s5039_s12 + $0xd4] ss:$100 sps:$4 sm:$0xff]  }
  0x1a   : > { %2569 = vmatprep.mubr.bf16.mxu0 %v4559_v33  ;;  %2634 = vmatprep.mubr.bf16.mxu1 %v4562_v35  ;;  %v4568_v41 = vld [vmem:[%s5818_s1 + $0x1f0] sm:$0xff]   ;;  %v4575_v46 = vld [vmem:[%s5039_s12 + $0xc8] ss:$100 sps:$4 sm:$0xff]   ;;  %v4581_v52 = vld [vmem:[%s5818_s1 + $0x160] sm:$0xff]  }
  0x1b   : > { %3975 = vmatpush3.bf16.msra.mxu0 %v4539_v14  ;;  %v4569_v42 = vld [vmem:[%s5818_s1 + $0x130] sm:$0xff]   ;;  %v4577_v48 = vld [vmem:[%s5818_s1 + $0x168] sm:$0xff]   ;;  %v4582_v53 = vld [vmem:[%s5818_s1 + $0x1e0] sm:$0xff]  }
  0x1c   : > { %4015 = vmatpush3.bf16.msra.mxu1 %v4540_v15  ;;  %3976 = vmatprep.subr.bf16.mxu0 %v4541_v16  ;;  %v4570_v43 = vld [vmem:[%s5818_s1 + $0x1b0] sm:$0xff]   ;;  %v4578_v49 = vld [vmem:[%s5818_s1 + $0x1e8] sm:$0xff]   ;;  %v4583_v54 = vld [vmem:[%s5818_s1 + $0x120] sm:$0xff]  }
  0x1d   : > { %4016 = vmatprep.subr.bf16.mxu1 %v4542_v17  ;;  %v4571_v44 = vld [vmem:[%s5039_s12 + $0xcc] ss:$100 sps:$4 sm:$0xff]   ;;  %v4584_v55 = vld [vmem:[%s5818_s1 + $0x1a0] sm:$0xff]   ;;  %v4585_v56 = vld [vmem:[%s5039_s12 + $0x194] ss:$100 sps:$4 sm:$0xff]  }
  0x1e   : > { %v4576_v47 = vld [vmem:[%s5039_s12 + $0xd0] ss:$100 sps:$4 sm:$0xff]   ;;  %v4579_v50 = vld [vmem:[%s5818_s1 + $0x128] sm:$0xff]   ;;  %v4587_v57 = vld [vmem:[%s5039_s12 + $0x19c] ss:$100 sps:$4 sm:$0xff]  }
  0x1f   : > { %3977 = vmatpush3.bf16.msra.mxu0 %v4543_v18  ;;  %v4580_v51 = vld [vmem:[%s5818_s1 + $0x1a8] sm:$0xff]   ;;  %v4589_v58 = vld [vmem:[%s5039_s12 + $0x190] ss:$100 sps:$4 sm:$0xff]   ;;  %v4590_v59 = vld [vmem:[%s5039_s12 + $0x198] ss:$100 sps:$4 sm:$0xff]  }
  0x20   : > { %4017 = vmatpush3.bf16.msra.mxu1 %v4544_v19  ;;  %3978 = vmatprep.subr.bf16.mxu0 %v4545_v20  ;;  %v4591_v60 = vld [vmem:[%s5818_s1 + $0x158] sm:$0xff]   ;;  %v4595_v0 = vld [vmem:[%s5818_s1 + $0x150] sm:$0xff]   ;;  %v4601_v5 = vld [vmem:[%s5039_s12 + $0x264] ss:$100 sps:$4 sm:$0xff]  }
  0x21   : > { %4018 = vmatprep.subr.bf16.mxu1 %v4546_v21  ;;  %v4592_v61 = vld [vmem:[%s5818_s1 + $0x1d8] sm:$0xff]   ;;  %v4596_v1 = vld [vmem:[%s5818_s1 + $0x1d0] sm:$0xff]   ;;  %v4604_v7 = vld [vmem:[%s5039_s12 + $0x260] ss:$100 sps:$4 sm:$0xff]  }
  0x22   : > { %v4593_v62 = vld [vmem:[%s5818_s1 + $0x118] sm:$0xff]   ;;  %v4597_v2 = vld [vmem:[%s5818_s1 + $0x110] sm:$0xff]   ;;  %v4605_v8 = vld [vmem:[%s5818_s1 + $0x148] sm:$0xff]  }
  0x23   : > { %3979 = vmatpush3.bf16.msra.mxu0 %v4547_v22  ;;  %v4594_v63 = vld [vmem:[%s5818_s1 + $0x198] sm:$0xff]   ;;  %v4598_v3 = vld [vmem:[%s5818_s1 + $0x190] sm:$0xff]   ;;  %v4606_v9 = vld [vmem:[%s5818_s1 + $0x1c8] sm:$0xff]  }
  0x24   : > { %4019 = vmatpush3.bf16.msra.mxu1 %v4548_v23  ;;  %3980 = vmatprep.subr.bf16.mxu0 %v4549_v24  ;;  %v4599_v4 = vld [vmem:[%s5039_s12 + $0x25c] ss:$100 sps:$4 sm:$0xff]   ;;  %v4607_v10 = vld [vmem:[%s5818_s1 + $0x108] sm:$0xff]   ;;  %v4613_v16 = vld [vmem:[%s5039_s12 + $0x10] ss:$100 sps:$4 sm:$0xff]  }
  0x25   : > { %4020 = vmatprep.subr.bf16.mxu1 %v4550_v25  ;;  %v4603_v6 = vld [vmem:[%s5039_s12 + $0x258] ss:$100 sps:$4 sm:$0xff]   ;;  %v4608_v11 = vld [vmem:[%s5818_s1 + $0x188] sm:$0xff]   ;;  %v4609_v12 = vld [vmem:[%s5818_s1 + $0x140] sm:$0xff]  }
  0x26   : > { %v4610_v13 = vld [vmem:[%s5818_s1 + $0x1c0] sm:$0xff]   ;;  %v4615_v17 = vld [vmem:[%s5039_s12 + $0x14] ss:$100 sps:$4 sm:$0xff]   ;;  %v4634_v33 = vld [vmem:[%s5818_s1 + $0x2e8] sm:$0xff]  }
  0x27   : > { %3981 = vmatpush3.bf16.msra.mxu0 %v4551_v26  ;;  %v4611_v14 = vld [vmem:[%s5818_s1 + $0x100] sm:$0xff]   ;;  %v4616_v18 = vld [vmem:[%s5039_s12 + $0x18] ss:$100 sps:$4 sm:$0xff]   ;;  %v4623_v24 = vld [vmem:[%s5818_s1 + $0x270] sm:$0xff]  }
  0x28   : > { %4021 = vmatpush3.bf16.msra.mxu1 %v4552_v27  ;;  %3982 = vmatprep.subr.bf16.mxu0 %v4553_v28  ;;  %v4612_v15 = vld [vmem:[%s5818_s1 + $0x180] sm:$0xff]   ;;  %v4619_v20 = vld [vmem:[%s5818_s1 + $0x278] sm:$0xff]   ;;  %v4624_v25 = vld [vmem:[%s5818_s1 + $0x2f0] sm:$0xff]  }
  0x29   : > { %4022 = vmatprep.subr.bf16.mxu1 %v4554_v29  ;;  %v4618_v19 = vld [vmem:[%s5039_s12 + $0x1c] ss:$100 sps:$4 sm:$0xff]   ;;  %v4625_v26 = vld [vmem:[%s5818_s1 + $0x230] sm:$0xff]   ;;  %v4629_v29 = vld [vmem:[%s5039_s12 + $0xe4] ss:$100 sps:$4 sm:$0xff]  }
  0x2a   : > { %v4620_v21 = vld [vmem:[%s5818_s1 + $0x2f8] sm:$0xff]   ;;  %v4626_v27 = vld [vmem:[%s5818_s1 + $0x2b0] sm:$0xff]   ;;  %v4636_v35 = vld [vmem:[%s5818_s1 + $0x2a8] sm:$0xff]  }
  0x2b   : > { %3983 = vmatpush3.bf16.msra.mxu0 %v4555_v30  ;;  %v4621_v22 = vld [vmem:[%s5818_s1 + $0x238] sm:$0xff]  }
  0x2c   : > { %4023 = vmatpush3.bf16.msra.mxu1 %v4556_v31  ;;  %4048 = vmatprep.subr.bf16.mxu0 %v4563_v36  ;;  %v4622_v23 = vld [vmem:[%s5818_s1 + $0x2b8] sm:$0xff]   ;;  %v4632_v31 = vld [vmem:[%s5039_s12 + $0xe0] ss:$100 sps:$4 sm:$0xff]  }
  0x2d   : > { %4088 = vmatprep.subr.bf16.mxu1 %v4564_v37  ;;  %v4627_v28 = vld [vmem:[%s5039_s12 + $0xdc] ss:$100 sps:$4 sm:$0xff]  }
  0x2e   : > { %2570 = vmatmul.mubr.bf16.vlgmr.msra.gmra.mxu0 %v4557_v32  ;;  %v4631_v30 = vld [vmem:[%s5039_s12 + $0xd8] ss:$100 sps:$4 sm:$0xff]   ;;  %v4633_v32 = vld [vmem:[%s5818_s1 + $0x268] sm:$0xff]   ;;  %v4637_v36 = vld [vmem:[%s5818_s1 + $0x260] sm:$0xff]  }
  0x2f   : > { %2635 = vmatmul.mubr.bf16.vlgmr.msra.gmra.mxu1 %v4560_v34  ;;  %4049 = vmatpush3.bf16.msra.mxu0 %v4565_v38  ;;  %v4635_v34 = vld [vmem:[%s5818_s1 + $0x228] sm:$0xff]   ;;  %v4638_v37 = vld [vmem:[%s5818_s1 + $0x2e0] sm:$0xff]  }
  0x30   : > { %4089 = vmatpush3.bf16.msra.mxu1 %v4566_v39  ;;  %4050 = vmatprep.subr.bf16.mxu0 %v4567_v40  ;;  %v4639_v38 = vld [vmem:[%s5818_s1 + $0x220] sm:$0xff]  }
  0x31   : > { %4090 = vmatprep.subr.bf16.mxu1 %v4568_v41  ;;  %2577 = vmatprep.mubr.bf16.mxu0 %v4571_v44  ;;  %v4640_v39 = vld [vmem:[%s5818_s1 + $0x2a0] sm:$0xff]   ;;  %v4643_v41 = vld [vmem:[%s5039_s12 + $0x1ac] ss:$100 sps:$4 sm:$0xff]   ;;  %v4647_v44 = vld [vmem:[%s5818_s1 + $0x258] sm:$0xff]  }
  0x32   : > { %2642 = vmatprep.mubr.bf16.mxu1 %v4573_v45  ;;  %v4641_v40 = vld [vmem:[%s5039_s12 + $0x1a4] ss:$100 sps:$4 sm:$0xff]   ;;  %v4648_v45 = vld [vmem:[%s5818_s1 + $0x2d8] sm:$0xff]  }
  0x33   : > { %4051 = vmatpush3.bf16.msra.mxu0 %v4569_v42  ;;  %v4645_v42 = vld [vmem:[%s5039_s12 + $0x1a0] ss:$100 sps:$4 sm:$0xff]  }
  0x34   : > { %4091 = vmatpush3.bf16.msra.mxu1 %v4570_v43  ;;  %4052 = vmatprep.subr.bf16.mxu0 %v4577_v48  ;;  %v4646_v43 = vld [vmem:[%s5039_s12 + $0x1a8] ss:$100 sps:$4 sm:$0xff]   ;;  %v4651_v48 = vld [vmem:[%s5818_s1 + $0x250] sm:$0xff]  }
  0x35   : > { %4092 = vmatprep.subr.bf16.mxu1 %v4578_v49  ;;  %v4652_v49 = vld [vmem:[%s5818_s1 + $0x2d0] sm:$0xff]  }
  0x36   : > { %2578 = vmatmul.mubr.bf16.gmra.mxu0 %v4575_v46  ;;  %v4649_v46 = vld [vmem:[%s5818_s1 + $0x218] sm:$0xff]  }
  0x37   : > { %2643 = vmatmul.mubr.bf16.gmra.mxu1 %v4576_v47  ;;  %4053 = vmatpush3.bf16.msra.mxu0 %v4579_v50  ;;  %v4650_v47 = vld [vmem:[%s5818_s1 + $0x298] sm:$0xff]   ;;  %v4653_v50 = vld [vmem:[%s5818_s1 + $0x210] sm:$0xff]  }
  0x38   : > { %4093 = vmatpush3.bf16.msra.mxu1 %v4580_v51  ;;  %4054 = vmatprep.subr.bf16.mxu0 %v4581_v52  ;;  %v4654_v51 = vld [vmem:[%s5818_s1 + $0x290] sm:$0xff]  }
  0x39   : > { %4094 = vmatprep.subr.bf16.mxu1 %v4582_v53  ;;  %2585 = vmatprep.mubr.bf16.mxu0 %v4585_v56  ;;  %v4655_v52 = vld [vmem:[%s5039_s12 + $0x26c] ss:$100 sps:$4 sm:$0xff]   ;;  %v4657_v53 = vld [vmem:[%s5039_s12 + $0x274] ss:$100 sps:$4 sm:$0xff]  }
  0x3a   : > { %2650 = vmatprep.mubr.bf16.mxu1 %v4587_v57  ;;  %v4661_v56 = vld [vmem:[%s5818_s1 + $0x248] sm:$0xff]  }
  0x3b   : > { %4055 = vmatpush3.bf16.msra.mxu0 %v4583_v54  ;;  %v4659_v54 = vld [vmem:[%s5039_s12 + $0x268] ss:$100 sps:$4 sm:$0xff]  }
  0x3c   : > { %4095 = vmatpush3.bf16.msra.mxu1 %v4584_v55  ;;  %4056 = vmatprep.subr.bf16.mxu0 %v4591_v60  ;;  %v4660_v55 = vld [vmem:[%s5039_s12 + $0x270] ss:$100 sps:$4 sm:$0xff]   ;;  %v4662_v57 = vld [vmem:[%s5818_s1 + $0x2c8] sm:$0xff]   ;;  %v4665_v60 = vld [vmem:[%s5818_s1 + $0x240] sm:$0xff]  }
  0x3d   : > { %4096 = vmatprep.subr.bf16.mxu1 %v4592_v61  ;;  %v4666_v61 = vld [vmem:[%s5818_s1 + $0x2c0] sm:$0xff]  }
  0x3e   : > { %2586 = vmatmul.mubr.bf16.gmra.mxu0 %v4589_v58  ;;  %v4663_v58 = vld [vmem:[%s5818_s1 + $0x208] sm:$0xff]  }
  0x3f   : > { %2651 = vmatmul.mubr.bf16.gmra.mxu1 %v4590_v59  ;;  %4057 = vmatpush3.bf16.msra.mxu0 %v4593_v62  ;;  %v4664_v59 = vld [vmem:[%s5818_s1 + $0x288] sm:$0xff]   ;;  %v4667_v62 = vld [vmem:[%s5818_s1 + $0x200] sm:$0xff]  }
  0x40   : > { %4097 = vmatpush3.bf16.msra.mxu1 %v4594_v63  ;;  %4058 = vmatprep.subr.bf16.mxu0 %v4595_v0  ;;  %v4668_v63 = vld [vmem:[%s5818_s1 + $0x280] sm:$0xff]  }
  0x41   : > { %4098 = vmatprep.subr.bf16.mxu1 %v4596_v1  ;;  %2593 = vmatprep.mubr.bf16.mxu0 %v4599_v4  ;;  %v4669_v0 = vld [vmem:[%s5039_s12 + $0x20] ss:$100 sps:$4 sm:$0xff]   ;;  %v4675_v4 = vld [vmem:[%s5818_s1 + $0x378] sm:$0xff]  }
  0x42   : > { %2658 = vmatprep.mubr.bf16.mxu1 %v4601_v5  ;;  %v4671_v1 = vld [vmem:[%s5039_s12 + $0x24] ss:$100 sps:$4 sm:$0xff]   ;;  %v4676_v5 = vld [vmem:[%s5818_s1 + $0x3f8] sm:$0xff]  }
  0x43   : > { %4059 = vmatpush3.bf16.msra.mxu0 %v4597_v2  ;;  %v4672_v2 = vld [vmem:[%s5039_s12 + $0x28] ss:$100 sps:$4 sm:$0xff]  }
  0x44   : > { %4099 = vmatpush3.bf16.msra.mxu1 %v4598_v3  ;;  %4060 = vmatprep.subr.bf16.mxu0 %v4605_v8  ;;  %v4674_v3 = vld [vmem:[%s5039_s12 + $0x2c] ss:$100 sps:$4 sm:$0xff]  }
  0x45   : > { %4100 = vmatprep.subr.bf16.mxu1 %v4606_v9  ;;  %v4679_v8 = vld [vmem:[%s5818_s1 + $0x370] sm:$0xff]  }
  0x46   : > { %2594 = vmatmul.mubr.bf16.gmra.mxu0 %v4603_v6  ;;  %v4677_v6 = vld [vmem:[%s5818_s1 + $0x338] sm:$0xff]   ;;  %v4680_v9 = vld [vmem:[%s5818_s1 + $0x3f0] sm:$0xff]  }
  0x47   : > { %2659 = vmatmul.mubr.bf16.gmra.mxu1 %v4604_v7  ;;  %4061 = vmatpush3.bf16.msra.mxu0 %v4607_v10  ;;  %v4678_v7 = vld [vmem:[%s5818_s1 + $0x3b8] sm:$0xff]   ;;  %v4681_v10 = vld [vmem:[%s5818_s1 + $0x330] sm:$0xff]  }
  0x48   : > { %4101 = vmatpush3.bf16.msra.mxu1 %v4608_v11  ;;  %4062 = vmatprep.subr.bf16.mxu0 %v4609_v12  ;;  %v4682_v11 = vld [vmem:[%s5818_s1 + $0x3b0] sm:$0xff]  }
  0x49   : > { %4102 = vmatprep.subr.bf16.mxu1 %v4610_v13  ;;  %2699 = vmatprep.mubr.bf16.mxu0 %v4615_v17  ;;  %v4683_v12 = vld [vmem:[%s5039_s12 + $0xec] ss:$100 sps:$4 sm:$0xff]   ;;  %v4685_v13 = vld [vmem:[%s5039_s12 + $0xf4] ss:$100 sps:$4 sm:$0xff]  }
  0x4a   : > { %2764 = vmatprep.mubr.bf16.mxu1 %v4618_v19  ;;  %v4690_v17 = vld [vmem:[%s5818_s1 + $0x3e8] sm:$0xff]  }
  0x4b   : > { %4063 = vmatpush3.bf16.msra.mxu0 %v4611_v14  ;;  %v4687_v14 = vld [vmem:[%s5039_s12 + $0xe8] ss:$100 sps:$4 sm:$0xff]  }
  0x4c   : > { %4103 = vmatpush3.bf16.msra.mxu1 %v4612_v15  ;;  %4128 = vmatprep.subr.bf16.mxu0 %v4619_v20  ;;  %v4688_v15 = vld [vmem:[%s5039_s12 + $0xf0] ss:$100 sps:$4 sm:$0xff]   ;;  %v4692_v19 = vld [vmem:[%s5818_s1 + $0x3a8] sm:$0xff]   ;;  %v4693_v20 = vld [vmem:[%s5818_s1 + $0x360] sm:$0xff]  }
  0x4d   : > { %4168 = vmatprep.subr.bf16.mxu1 %v4620_v21  ;;  %v4694_v21 = vld [vmem:[%s5818_s1 + $0x3e0] sm:$0xff]  }
  0x4e   : > { %2700 = vmatmul.mubr.bf16.vlgmr.msra.gmra.mxu0 %v4613_v16  ;;  %v4689_v16 = vld [vmem:[%s5818_s1 + $0x368] sm:$0xff]  }
  0x4f   : > { %2765 = vmatmul.mubr.bf16.vlgmr.msra.gmra.mxu1 %v4616_v18  ;;  %4129 = vmatpush3.bf16.msra.mxu0 %v4621_v22  ;;  %v4691_v18 = vld [vmem:[%s5818_s1 + $0x328] sm:$0xff]   ;;  %v4695_v22 = vld [vmem:[%s5818_s1 + $0x320] sm:$0xff]  }
  0x50   : > { %4169 = vmatpush3.bf16.msra.mxu1 %v4622_v23  ;;  %4130 = vmatprep.subr.bf16.mxu0 %v4623_v24  ;;  %v4696_v23 = vld [vmem:[%s5818_s1 + $0x3a0] sm:$0xff]   ;;  %v4697_v24 = vld [vmem:[%s5039_s12 + $0x1b4] ss:$100 sps:$4 sm:$0xff]  }
  0x51   : > { %4170 = vmatprep.subr.bf16.mxu1 %v4624_v25  ;;  %2707 = vmatprep.mubr.bf16.mxu0 %v4627_v28  ;;  %v4699_v25 = vld [vmem:[%s5039_s12 + $0x1bc] ss:$100 sps:$4 sm:$0xff]  }
  0x52   : > { %2772 = vmatprep.mubr.bf16.mxu1 %v4629_v29  ;;  %v4703_v28 = vld [vmem:[%s5818_s1 + $0x358] sm:$0xff]  }
  0x53   : > { %4131 = vmatpush3.bf16.msra.mxu0 %v4625_v26  ;;  %v4701_v26 = vld [vmem:[%s5039_s12 + $0x1b0] ss:$100 sps:$4 sm:$0xff]   ;;  %v4704_v29 = vld [vmem:[%s5818_s1 + $0x3d8] sm:$0xff]  }
  0x54   : > { %4171 = vmatpush3.bf16.msra.mxu1 %v4626_v27  ;;  %4132 = vmatprep.subr.bf16.mxu0 %v4633_v32  ;;  %v4702_v27 = vld [vmem:[%s5039_s12 + $0x1b8] ss:$100 sps:$4 sm:$0xff]   ;;  %v4707_v32 = vld [vmem:[%s5818_s1 + $0x350] sm:$0xff]  }
  0x55   : > { %4172 = vmatprep.subr.bf16.mxu1 %v4634_v33  ;;  %v4708_v33 = vld [vmem:[%s5818_s1 + $0x3d0] sm:$0xff]  }
  0x56   : > { %2708 = vmatmul.mubr.bf16.gmra.mxu0 %v4631_v30  ;;  %v4705_v30 = vld [vmem:[%s5818_s1 + $0x318] sm:$0xff]  }
  0x57   : > { %2773 = vmatmul.mubr.bf16.gmra.mxu1 %v4632_v31  ;;  %4133 = vmatpush3.bf16.msra.mxu0 %v4635_v34  ;;  %v4706_v31 = vld [vmem:[%s5818_s1 + $0x398] sm:$0xff]   ;;  %v4709_v34 = vld [vmem:[%s5818_s1 + $0x310] sm:$0xff]  }
  0x58   : > { %4173 = vmatpush3.bf16.msra.mxu1 %v4636_v35  ;;  %4134 = vmatprep.subr.bf16.mxu0 %v4637_v36  ;;  %v4710_v35 = vld [vmem:[%s5818_s1 + $0x390] sm:$0xff]   ;;  %v4711_v36 = vld [vmem:[%s5039_s12 + $0x27c] ss:$100 sps:$4 sm:$0xff]  }
  0x59   : > { %4174 = vmatprep.subr.bf16.mxu1 %v4638_v37  ;;  %2715 = vmatprep.mubr.bf16.mxu0 %v4641_v40  ;;  %v4713_v37 = vld [vmem:[%s5039_s12 + $0x284] ss:$100 sps:$4 sm:$0xff]  }
  0x5a   : > { %2780 = vmatprep.mubr.bf16.mxu1 %v4643_v41  ;;  %v4717_v40 = vld [vmem:[%s5818_s1 + $0x348] sm:$0xff]  }
  0x5b   : > { %4135 = vmatpush3.bf16.msra.mxu0 %v4639_v38  ;;  %v4715_v38 = vld [vmem:[%s5039_s12 + $0x278] ss:$100 sps:$4 sm:$0xff]   ;;  %v4718_v41 = vld [vmem:[%s5818_s1 + $0x3c8] sm:$0xff]  }
  0x5c   : > { %4175 = vmatpush3.bf16.msra.mxu1 %v4640_v39  ;;  %4136 = vmatprep.subr.bf16.mxu0 %v4647_v44  ;;  %v4716_v39 = vld [vmem:[%s5039_s12 + $0x280] ss:$100 sps:$4 sm:$0xff]  }
  0x5d   : > { %4176 = vmatprep.subr.bf16.mxu1 %v4648_v45  ;;  %v4721_v44 = vld [vmem:[%s5818_s1 + $0x340] sm:$0xff]  }
  0x5e   : > { %2716 = vmatmul.mubr.bf16.gmra.mxu0 %v4645_v42  ;;  %v4719_v42 = vld [vmem:[%s5818_s1 + $0x308] sm:$0xff]   ;;  %v4722_v45 = vld [vmem:[%s5818_s1 + $0x3c0] sm:$0xff]  }
  0x5f   : > { %2781 = vmatmul.mubr.bf16.gmra.mxu1 %v4646_v43  ;;  %4137 = vmatpush3.bf16.msra.mxu0 %v4649_v46  ;;  %v4720_v43 = vld [vmem:[%s5818_s1 + $0x388] sm:$0xff]   ;;  %v4723_v46 = vld [vmem:[%s5818_s1 + $0x300] sm:$0xff]  }
  0x60   : > { %4177 = vmatpush3.bf16.msra.mxu1 %v4650_v47  ;;  %4138 = vmatprep.subr.bf16.mxu0 %v4651_v48  ;;  %v4724_v47 = vld [vmem:[%s5818_s1 + $0x380] sm:$0xff]   ;;  %v4725_v48 = vld [vmem:[%s5039_s12 + $0x30] ss:$100 sps:$4 sm:$0xff]  }
  0x61   : > { %4178 = vmatprep.subr.bf16.mxu1 %v4652_v49  ;;  %2723 = vmatprep.mubr.bf16.mxu0 %v4655_v52  ;;  %v4727_v49 = vld [vmem:[%s5039_s12 + $0x34] ss:$100 sps:$4 sm:$0xff]  }
  0x62   : > { %2788 = vmatprep.mubr.bf16.mxu1 %v4657_v53  ;;  %v4731_v52 = vld [vmem:[%s5818_s1 + $0x478] sm:$0xff]  }
  0x63   : > { %4139 = vmatpush3.bf16.msra.mxu0 %v4653_v50  ;;  %v4728_v50 = vld [vmem:[%s5039_s12 + $0x38] ss:$100 sps:$4 sm:$0xff]  }
  0x64   : > { %4179 = vmatpush3.bf16.msra.mxu1 %v4654_v51  ;;  %4140 = vmatprep.subr.bf16.mxu0 %v4661_v56  ;;  %v4730_v51 = vld [vmem:[%s5039_s12 + $0x3c] ss:$100 sps:$4 sm:$0xff]   ;;  %v4735_v56 = vld [vmem:[%s5818_s1 + $0x470] sm:$0xff]  }
  0x65   : > { %4180 = vmatprep.subr.bf16.mxu1 %v4662_v57  ;;  %v4732_v53 = vld [vmem:[%s5818_s1 + $0x4f8] sm:$0xff]   ;;  %v4736_v57 = vld [vmem:[%s5818_s1 + $0x4f0] sm:$0xff]  }
  0x66   : > { %2724 = vmatmul.mubr.bf16.gmra.mxu0 %v4659_v54  ;;  %v4733_v54 = vld [vmem:[%s5818_s1 + $0x438] sm:$0xff]  }
  0x67   : > { %2789 = vmatmul.mubr.bf16.gmra.mxu1 %v4660_v55  ;;  %4141 = vmatpush3.bf16.msra.mxu0 %v4663_v58  ;;  %v4734_v55 = vld [vmem:[%s5818_s1 + $0x4b8] sm:$0xff]   ;;  %v4737_v58 = vld [vmem:[%s5818_s1 + $0x430] sm:$0xff]  }
  0x68   : > { %4181 = vmatpush3.bf16.msra.mxu1 %v4664_v59  ;;  %4142 = vmatprep.subr.bf16.mxu0 %v4665_v60  ;;  %v4738_v59 = vld [vmem:[%s5818_s1 + $0x4b0] sm:$0xff]   ;;  %v4739_v60 = vld [vmem:[%s5039_s12 + $0xfc] ss:$100 sps:$4 sm:$0xff]  }
  0x69   : > { %4182 = vmatprep.subr.bf16.mxu1 %v4666_v61  ;;  %2829 = vmatprep.mubr.bf16.mxu0 %v4671_v1  ;;  %v4741_v61 = vld [vmem:[%s5039_s12 + $0x104] ss:$100 sps:$4 sm:$0xff]  }
  0x6a   : > { %2894 = vmatprep.mubr.bf16.mxu1 %v4674_v3  ;;  %v4746_v1 = vld [vmem:[%s5818_s1 + $0x4e8] sm:$0xff]  }
  0x6b   : > { %4143 = vmatpush3.bf16.msra.mxu0 %v4667_v62  ;;  %v4743_v62 = vld [vmem:[%s5039_s12 + $0xf8] ss:$100 sps:$4 sm:$0xff]   ;;  %v4748_v3 = vld [vmem:[%s5818_s1 + $0x4a8] sm:$0xff]  }
  0x6c   : > { %4183 = vmatpush3.bf16.msra.mxu1 %v4668_v63  ;;  %4208 = vmatprep.subr.bf16.mxu0 %v4675_v4  ;;  %v4744_v63 = vld [vmem:[%s5039_s12 + $0x100] ss:$100 sps:$4 sm:$0xff]  }
  0x6d   : > { %4248 = vmatprep.subr.bf16.mxu1 %v4676_v5  ;;  %v4749_v4 = vld [vmem:[%s5818_s1 + $0x460] sm:$0xff]  }
  0x6e   : > { %2830 = vmatmul.mubr.bf16.vlgmr.msra.gmra.mxu0 %v4669_v0  ;;  %v4745_v0 = vld [vmem:[%s5818_s1 + $0x468] sm:$0xff]   ;;  %v4750_v5 = vld [vmem:[%s5818_s1 + $0x4e0] sm:$0xff]  }
  0x6f   : > { %2895 = vmatmul.mubr.bf16.vlgmr.msra.gmra.mxu1 %v4672_v2  ;;  %4209 = vmatpush3.bf16.msra.mxu0 %v4677_v6  ;;  %v4747_v2 = vld [vmem:[%s5818_s1 + $0x428] sm:$0xff]   ;;  %v4751_v6 = vld [vmem:[%s5818_s1 + $0x420] sm:$0xff]  }
  0x70   : > { %4249 = vmatpush3.bf16.msra.mxu1 %v4678_v7  ;;  %4210 = vmatprep.subr.bf16.mxu0 %v4679_v8  ;;  %v4752_v7 = vld [vmem:[%s5818_s1 + $0x4a0] sm:$0xff]  }
  0x71   : > { %4250 = vmatprep.subr.bf16.mxu1 %v4680_v9  ;;  %2837 = vmatprep.mubr.bf16.mxu0 %v4683_v12  ;;  %v4753_v8 = vld [vmem:[%s5039_s12 + $0x1c4] ss:$100 sps:$4 sm:$0xff]   ;;  %v4755_v9 = vld [vmem:[%s5039_s12 + $0x1cc] ss:$100 sps:$4 sm:$0xff]   ;;  %v4759_v12 = vld [vmem:[%s5818_s1 + $0x458] sm:$0xff]  }
  0x72   : > { %2902 = vmatprep.mubr.bf16.mxu1 %v4685_v13  ;;  %v4760_v13 = vld [vmem:[%s5818_s1 + $0x4d8] sm:$0xff]  }
  0x73   : > { %4211 = vmatpush3.bf16.msra.mxu0 %v4681_v10  ;;  %v4757_v10 = vld [vmem:[%s5039_s12 + $0x1c0] ss:$100 sps:$4 sm:$0xff]  }
  0x74   : > { %4251 = vmatpush3.bf16.msra.mxu1 %v4682_v11  ;;  %4212 = vmatprep.subr.bf16.mxu0 %v4689_v16  ;;  %v4758_v11 = vld [vmem:[%s5039_s12 + $0x1c8] ss:$100 sps:$4 sm:$0xff]   ;;  %v4763_v16 = vld [vmem:[%s5818_s1 + $0x450] sm:$0xff]  }
  0x75   : > { %4252 = vmatprep.subr.bf16.mxu1 %v4690_v17  ;;  %v4764_v17 = vld [vmem:[%s5818_s1 + $0x4d0] sm:$0xff]  }
  0x76   : > { %2838 = vmatmul.mubr.bf16.gmra.mxu0 %v4687_v14  ;;  %v4761_v14 = vld [vmem:[%s5818_s1 + $0x418] sm:$0xff]  }
  0x77   : > { %2903 = vmatmul.mubr.bf16.gmra.mxu1 %v4688_v15  ;;  %4213 = vmatpush3.bf16.msra.mxu0 %v4691_v18  ;;  %v4762_v15 = vld [vmem:[%s5818_s1 + $0x498] sm:$0xff]   ;;  %v4765_v18 = vld [vmem:[%s5818_s1 + $0x410] sm:$0xff]  }
  0x78   : > { %4253 = vmatpush3.bf16.msra.mxu1 %v4692_v19  ;;  %4214 = vmatprep.subr.bf16.mxu0 %v4693_v20  ;;  %v4766_v19 = vld [vmem:[%s5818_s1 + $0x490] sm:$0xff]  }
  0x79   : > { %4254 = vmatprep.subr.bf16.mxu1 %v4694_v21  ;;  %2845 = vmatprep.mubr.bf16.mxu0 %v4697_v24  ;;  %v4767_v20 = vld [vmem:[%s5039_s12 + $0x28c] ss:$100 sps:$4 sm:$0xff]   ;;  %v4769_v21 = vld [vmem:[%s5039_s12 + $0x294] ss:$100 sps:$4 sm:$0xff]  }
  0x7a   : > { %2910 = vmatprep.mubr.bf16.mxu1 %v4699_v25  ;;  %v4773_v24 = vld [vmem:[%s5818_s1 + $0x448] sm:$0xff]  }
  0x7b   : > { %4215 = vmatpush3.bf16.msra.mxu0 %v4695_v22  ;;  %v4771_v22 = vld [vmem:[%s5039_s12 + $0x288] ss:$100 sps:$4 sm:$0xff]  }
  0x7c   : > { %4255 = vmatpush3.bf16.msra.mxu1 %v4696_v23  ;;  %4216 = vmatprep.subr.bf16.mxu0 %v4703_v28  ;;  %v4772_v23 = vld [vmem:[%s5039_s12 + $0x290] ss:$100 sps:$4 sm:$0xff]   ;;  %v4774_v25 = vld [vmem:[%s5818_s1 + $0x4c8] sm:$0xff]   ;;  %v4777_v28 = vld [vmem:[%s5818_s1 + $0x440] sm:$0xff]  }
  0x7d   : > { %4256 = vmatprep.subr.bf16.mxu1 %v4704_v29  ;;  %v4778_v29 = vld [vmem:[%s5818_s1 + $0x4c0] sm:$0xff]  }
  0x7e   : > { %2846 = vmatmul.mubr.bf16.gmra.mxu0 %v4701_v26  ;;  %v4775_v26 = vld [vmem:[%s5818_s1 + $0x408] sm:$0xff]  }
  0x7f   : > { %2911 = vmatmul.mubr.bf16.gmra.mxu1 %v4702_v27  ;;  %4217 = vmatpush3.bf16.msra.mxu0 %v4705_v30  ;;  %v4776_v27 = vld [vmem:[%s5818_s1 + $0x488] sm:$0xff]   ;;  %v4779_v30 = vld [vmem:[%s5818_s1 + $0x400] sm:$0xff]  }
  0x80   : > { %4257 = vmatpush3.bf16.msra.mxu1 %v4706_v31  ;;  %4218 = vmatprep.subr.bf16.mxu0 %v4707_v32  ;;  %v4780_v31 = vld [vmem:[%s5818_s1 + $0x480] sm:$0xff]  }
  0x81   : > { %4258 = vmatprep.subr.bf16.mxu1 %v4708_v33  ;;  %2853 = vmatprep.mubr.bf16.mxu0 %v4711_v36  ;;  %v4781_v32 = vld [vmem:[%s5039_s12 + $0x40] ss:$100 sps:$4 sm:$0xff]   ;;  %v4787_v36 = vld [vmem:[%s5818_s1 + $0x578] sm:$0xff]  }
  0x82   : > { %2918 = vmatprep.mubr.bf16.mxu1 %v4713_v37  ;;  %v4783_v33 = vld [vmem:[%s5039_s12 + $0x44] ss:$100 sps:$4 sm:$0xff]   ;;  %v4788_v37 = vld [vmem:[%s5818_s1 + $0x5f8] sm:$0xff]  }
  0x83   : > { %4219 = vmatpush3.bf16.msra.mxu0 %v4709_v34  ;;  %v4784_v34 = vld [vmem:[%s5039_s12 + $0x48] ss:$100 sps:$4 sm:$0xff]  }
  0x84   : > { %4259 = vmatpush3.bf16.msra.mxu1 %v4710_v35  ;;  %4220 = vmatprep.subr.bf16.mxu0 %v4717_v40  ;;  %v4786_v35 = vld [vmem:[%s5039_s12 + $0x4c] ss:$100 sps:$4 sm:$0xff]  }
  0x85   : > { %4260 = vmatprep.subr.bf16.mxu1 %v4718_v41  ;;  %v4791_v40 = vld [vmem:[%s5818_s1 + $0x570] sm:$0xff]  }
  0x86   : > { %2854 = vmatmul.mubr.bf16.gmra.mxu0 %v4715_v38  ;;  %v4789_v38 = vld [vmem:[%s5818_s1 + $0x538] sm:$0xff]   ;;  %v4792_v41 = vld [vmem:[%s5818_s1 + $0x5f0] sm:$0xff]  }
  0x87   : > { %2919 = vmatmul.mubr.bf16.gmra.mxu1 %v4716_v39  ;;  %4221 = vmatpush3.bf16.msra.mxu0 %v4719_v42  ;;  %v4790_v39 = vld [vmem:[%s5818_s1 + $0x5b8] sm:$0xff]   ;;  %v4793_v42 = vld [vmem:[%s5818_s1 + $0x530] sm:$0xff]  }
  0x88   : > { %4261 = vmatpush3.bf16.msra.mxu1 %v4720_v43  ;;  %4222 = vmatprep.subr.bf16.mxu0 %v4721_v44  ;;  %v4794_v43 = vld [vmem:[%s5818_s1 + $0x5b0] sm:$0xff]  }
  0x89   : > { %4262 = vmatprep.subr.bf16.mxu1 %v4722_v45  ;;  %2959 = vmatprep.mubr.bf16.mxu0 %v4727_v49  ;;  %v4795_v44 = vld [vmem:[%s5039_s12 + $0x10c] ss:$100 sps:$4 sm:$0xff]   ;;  %v4797_v45 = vld [vmem:[%s5039_s12 + $0x114] ss:$100 sps:$4 sm:$0xff]  }
  0x8a   : > { %3024 = vmatprep.mubr.bf16.mxu1 %v4730_v51  ;;  %v4802_v49 = vld [vmem:[%s5818_s1 + $0x5e8] sm:$0xff]  }
  0x8b   : > { %4223 = vmatpush3.bf16.msra.mxu0 %v4723_v46  ;;  %v4799_v46 = vld [vmem:[%s5039_s12 + $0x108] ss:$100 sps:$4 sm:$0xff]  }
  0x8c   : > { %4263 = vmatpush3.bf16.msra.mxu1 %v4724_v47  ;;  %4288 = vmatprep.subr.bf16.mxu0 %v4731_v52  ;;  %v4800_v47 = vld [vmem:[%s5039_s12 + $0x110] ss:$100 sps:$4 sm:$0xff]   ;;  %v4804_v51 = vld [vmem:[%s5818_s1 + $0x5a8] sm:$0xff]   ;;  %v4805_v52 = vld [vmem:[%s5818_s1 + $0x560] sm:$0xff]  }
  0x8d   : > { %4328 = vmatprep.subr.bf16.mxu1 %v4732_v53  ;;  %v4806_v53 = vld [vmem:[%s5818_s1 + $0x5e0] sm:$0xff]  }
  0x8e   : > { %2960 = vmatmul.mubr.bf16.vlgmr.msra.gmra.mxu0 %v4725_v48  ;;  %v4801_v48 = vld [vmem:[%s5818_s1 + $0x568] sm:$0xff]  }
  0x8f   : > { %3025 = vmatmul.mubr.bf16.vlgmr.msra.gmra.mxu1 %v4728_v50  ;;  %4289 = vmatpush3.bf16.msra.mxu0 %v4733_v54  ;;  %v4803_v50 = vld [vmem:[%s5818_s1 + $0x528] sm:$0xff]   ;;  %v4807_v54 = vld [vmem:[%s5818_s1 + $0x520] sm:$0xff]  }
  0x90   : > { %4329 = vmatpush3.bf16.msra.mxu1 %v4734_v55  ;;  %4290 = vmatprep.subr.bf16.mxu0 %v4735_v56  ;;  %v4808_v55 = vld [vmem:[%s5818_s1 + $0x5a0] sm:$0xff]   ;;  %v4809_v56 = vld [vmem:[%s5039_s12 + $0x1d4] ss:$100 sps:$4 sm:$0xff]  }
  0x91   : > { %4330 = vmatprep.subr.bf16.mxu1 %v4736_v57  ;;  %2967 = vmatprep.mubr.bf16.mxu0 %v4739_v60  ;;  %v4811_v57 = vld [vmem:[%s5039_s12 + $0x1dc] ss:$100 sps:$4 sm:$0xff]  }
  0x92   : > { %3032 = vmatprep.mubr.bf16.mxu1 %v4741_v61  ;;  %v4815_v60 = vld [vmem:[%s5818_s1 + $0x558] sm:$0xff]  }
  0x93   : > { %4291 = vmatpush3.bf16.msra.mxu0 %v4737_v58  ;;  %v4813_v58 = vld [vmem:[%s5039_s12 + $0x1d0] ss:$100 sps:$4 sm:$0xff]   ;;  %v4816_v61 = vld [vmem:[%s5818_s1 + $0x5d8] sm:$0xff]  }
  0x94   : > { %4331 = vmatpush3.bf16.msra.mxu1 %v4738_v59  ;;  %4292 = vmatprep.subr.bf16.mxu0 %v4745_v0  ;;  %v4814_v59 = vld [vmem:[%s5039_s12 + $0x1d8] ss:$100 sps:$4 sm:$0xff]  }
  0x95   : > { %4332 = vmatprep.subr.bf16.mxu1 %v4746_v1  ;;  %v4818_v1 = vld [vmem:[%s5818_s1 + $0x598] sm:$0xff]  }
  0x96   : > { %2968 = vmatmul.mubr.bf16.gmra.mxu0 %v4743_v62 }
  0x97   : > { %3033 = vmatmul.mubr.bf16.gmra.mxu1 %v4744_v63  ;;  %4293 = vmatpush3.bf16.msra.mxu0 %v4747_v2  ;;  %v4817_v63 = vld [vmem:[%s5818_s1 + $0x518] sm:$0xff]  }
  0x98   : > { %4333 = vmatpush3.bf16.msra.mxu1 %v4748_v3  ;;  %4294 = vmatprep.subr.bf16.mxu0 %v4749_v4  ;;  %v4819_v3 = vld [vmem:[%s5818_s1 + $0x550] sm:$0xff]  }
  0x99   : > { %4334 = vmatprep.subr.bf16.mxu1 %v4750_v5  ;;  %2975 = vmatprep.mubr.bf16.mxu0 %v4753_v8 }
  0x9a   : > { %3040 = vmatprep.mubr.bf16.mxu1 %v4755_v9  ;;  %v4821_v9 = vld [vmem:[%s5818_s1 + $0x510] sm:$0xff]  }
  0x9b   : > { %4295 = vmatpush3.bf16.msra.mxu0 %v4751_v6  ;;  %v4820_v6 = vld [vmem:[%s5818_s1 + $0x5d0] sm:$0xff]  }
  0x9c   : > { %4335 = vmatpush3.bf16.msra.mxu1 %v4752_v7  ;;  %4296 = vmatprep.subr.bf16.mxu0 %v4759_v12 }
  0x9d   : > { %4336 = vmatprep.subr.bf16.mxu1 %v4760_v13 }
  0x9e   : > { %2976 = vmatmul.mubr.bf16.gmra.mxu0 %v4757_v10 }
  0x9f   : > { %3041 = vmatmul.mubr.bf16.gmra.mxu1 %v4758_v11  ;;  %4297 = vmatpush3.bf16.msra.mxu0 %v4761_v14  ;;  %v4822_v11 = vld [vmem:[%s5818_s1 + $0x590] sm:$0xff]   ;;  %v4823_v14 = vld [vmem:[%s5039_s12 + $0x29c] ss:$100 sps:$4 sm:$0xff]  }
  0xa0   : > { %4337 = vmatpush3.bf16.msra.mxu1 %v4762_v15  ;;  %4298 = vmatprep.subr.bf16.mxu0 %v4763_v16 }
  0xa1   : > { %4338 = vmatprep.subr.bf16.mxu1 %v4764_v17  ;;  %2983 = vmatprep.mubr.bf16.mxu0 %v4767_v20  ;;  %v4825_v17 = vld [vmem:[%s5039_s12 + $0x2a4] ss:$100 sps:$4 sm:$0xff]  }
  0xa2   : > { %3048 = vmatprep.mubr.bf16.mxu1 %v4769_v21  ;;  %v4828_v20 = vld [vmem:[%s5039_s12 + $0x2a0] ss:$100 sps:$4 sm:$0xff]   ;;  %v4829_v21 = vld [vmem:[%s5818_s1 + $0x548] sm:$0xff]  }
  0xa3   : > { %4299 = vmatpush3.bf16.msra.mxu0 %v4765_v18  ;;  %v4827_v18 = vld [vmem:[%s5039_s12 + $0x298] ss:$100 sps:$4 sm:$0xff]  }
  0xa4   : > { %4339 = vmatpush3.bf16.msra.mxu1 %v4766_v19  ;;  %4300 = vmatprep.subr.bf16.mxu0 %v4773_v24  ;;  %v4830_v24 = vld [vmem:[%s5818_s1 + $0x5c8] sm:$0xff]  }
  0xa5   : > { %4340 = vmatprep.subr.bf16.mxu1 %v4774_v25 }
  0xa6   : > { %2984 = vmatmul.mubr.bf16.gmra.mxu0 %v4771_v22 }
  0xa7   : > { %3049 = vmatmul.mubr.bf16.gmra.mxu1 %v4772_v23  ;;  %4301 = vmatpush3.bf16.msra.mxu0 %v4775_v26  ;;  %v4831_v26 = vld [vmem:[%s5818_s1 + $0x508] sm:$0xff]  }
  0xa8   : > { %4341 = vmatpush3.bf16.msra.mxu1 %v4776_v27  ;;  %4302 = vmatprep.subr.bf16.mxu0 %v4777_v28  ;;  %v4832_v28 = vld [vmem:[%s5818_s1 + $0x588] sm:$0xff]  }
  0xa9   : > { %4342 = vmatprep.subr.bf16.mxu1 %v4778_v29  ;;  %3089 = vmatprep.mubr.bf16.mxu0 %v4783_v33 }
  0xaa   : > { %3154 = vmatprep.mubr.bf16.mxu1 %v4786_v35 }
  0xab   : > { %4303 = vmatpush3.bf16.msra.mxu0 %v4779_v30 }
  0xac   : > { %4343 = vmatpush3.bf16.msra.mxu1 %v4780_v31  ;;  %4368 = vmatprep.subr.bf16.mxu0 %v4787_v36  ;;  %v4833_v31 = vld [vmem:[%s5818_s1 + $0x540] sm:$0xff]  }
  0xad   : > { %4408 = vmatprep.subr.bf16.mxu1 %v4788_v37  ;;  %v4835_v36 = vld [vmem:[%s5818_s1 + $0x500] sm:$0xff]  }
  0xae   : > { %3090 = vmatmul.mubr.bf16.vlgmr.msra.gmra.mxu0 %v4781_v32 }
  0xaf   : > { %3155 = vmatmul.mubr.bf16.vlgmr.msra.gmra.mxu1 %v4784_v34  ;;  %4369 = vmatpush3.bf16.msra.mxu0 %v4789_v38  ;;  %v4834_v34 = vld [vmem:[%s5818_s1 + $0x5c0] sm:$0xff]  }
  0xb0   : > { %4409 = vmatpush3.bf16.msra.mxu1 %v4790_v39  ;;  %4370 = vmatprep.subr.bf16.mxu0 %v4791_v40  ;;  %v4836_v39 = vld [vmem:[%s5818_s1 + $0x580] sm:$0xff]  }
  0xb1   : > { %4410 = vmatprep.subr.bf16.mxu1 %v4792_v41  ;;  %3097 = vmatprep.mubr.bf16.mxu0 %v4795_v44 }
  0xb2   : > { %3162 = vmatprep.mubr.bf16.mxu1 %v4797_v45  ;;  %v4840_v45 = vld [vmem:[%s5039_s12 + $0x58] ss:$100 sps:$4 sm:$0xff]  }
  0xb3   : > { %4371 = vmatpush3.bf16.msra.mxu0 %v4793_v42  ;;  %v4837_v42 = vld [vmem:[%s5039_s12 + $0x50] ss:$100 sps:$4 sm:$0xff]  }
  0xb4   : > { %4411 = vmatpush3.bf16.msra.mxu1 %v4794_v43  ;;  %4372 = vmatprep.subr.bf16.mxu0 %v4801_v48  ;;  %v4839_v43 = vld [vmem:[%s5039_s12 + $0x54] ss:$100 sps:$4 sm:$0xff]  }
  0xb5   : > { %4412 = vmatprep.subr.bf16.mxu1 %v4802_v49  ;;  %v4844_v49 = vld [vmem:[%s5818_s1 + $0x630] sm:$0xff]  }
  0xb6   : > { %3098 = vmatmul.mubr.bf16.gmra.mxu0 %v4799_v46  ;;  %v4842_v46 = vld [vmem:[%s5039_s12 + $0x5c] ss:$100 sps:$4 sm:$0xff]  }
  0xb7   : > { %3163 = vmatmul.mubr.bf16.gmra.mxu1 %v4800_v47  ;;  %4373 = vmatpush3.bf16.msra.mxu0 %v4803_v50  ;;  %v4843_v47 = vld [vmem:[%s5818_s1 + $0x638] sm:$0xff]  }
  0xb8   : > { %4413 = vmatpush3.bf16.msra.mxu1 %v4804_v51  ;;  %4374 = vmatprep.subr.bf16.mxu0 %v4805_v52  ;;  %v4845_v51 = vld [vmem:[%s5039_s12 + $0x11c] ss:$100 sps:$4 sm:$0xff]  }
  0xb9   : > { %4414 = vmatprep.subr.bf16.mxu1 %v4806_v53  ;;  %3105 = vmatprep.mubr.bf16.mxu0 %v4809_v56  ;;  %v4847_v53 = vld [vmem:[%s5039_s12 + $0x124] ss:$100 sps:$4 sm:$0xff]  }
  0xba   : > { %3170 = vmatprep.mubr.bf16.mxu1 %v4811_v57 }
  0xbb   : > { %4375 = vmatpush3.bf16.msra.mxu0 %v4807_v54 }
  0xbc   : > { %4415 = vmatpush3.bf16.msra.mxu1 %v4808_v55  ;;  %4376 = vmatprep.subr.bf16.mxu0 %v4815_v60  ;;  %v4849_v55 = vld [vmem:[%s5039_s12 + $0x118] ss:$100 sps:$4 sm:$0xff]  }
  0xbd   : > { %4416 = vmatprep.subr.bf16.mxu1 %v4816_v61  ;;  %v4850_v61 = vld [vmem:[%s5039_s12 + $0x120] ss:$100 sps:$4 sm:$0xff]  }
  0xbe   : > { %3106 = vmatmul.mubr.bf16.gmra.mxu0 %v4813_v58  ;;  %v4851_v58 = vld [vmem:[%s5818_s1 + $0x628] sm:$0xff]  }
  0xbf   : > { %3171 = vmatmul.mubr.bf16.gmra.mxu1 %v4814_v59  ;;  %4377 = vmatpush3.bf16.msra.mxu0 %v4817_v63  ;;  %v4853_v63 = vld [vmem:[%s5039_s12 + $0x1e4] ss:$100 sps:$4 sm:$0xff]  }
  0xc0   : > { %4417 = vmatpush3.bf16.msra.mxu1 %v4818_v1  ;;  %4378 = vmatprep.subr.bf16.mxu0 %v4819_v3  ;;  %v4855_v3 = vld [vmem:[%s5039_s12 + $0x1ec] ss:$100 sps:$4 sm:$0xff]  }
  0xc1   : > { %4418 = vmatprep.subr.bf16.mxu1 %v4820_v6  ;;  %3113 = vmatprep.mubr.bf16.mxu0 %v4823_v14  ;;  %v4861_v14 = vld [vmem:[%s5039_s12 + $0x2ac] ss:$100 sps:$4 sm:$0xff]  }
  0xc2   : > { %3178 = vmatprep.mubr.bf16.mxu1 %v4825_v17  ;;  %v4863_v17 = vld [vmem:[%s5039_s12 + $0x2b4] ss:$100 sps:$4 sm:$0xff]  }
  0xc3   : > { %4379 = vmatpush3.bf16.msra.mxu0 %v4821_v9 }
  0xc4   : > { %4419 = vmatpush3.bf16.msra.mxu1 %v4822_v11  ;;  %4380 = vmatprep.subr.bf16.mxu0 %v4829_v21  ;;  %v4857_v11 = vld [vmem:[%s5039_s12 + $0x1e0] ss:$100 sps:$4 sm:$0xff]  }
  0xc5   : > { %4420 = vmatprep.subr.bf16.mxu1 %v4830_v24 }
  0xc6   : > { %3114 = vmatmul.mubr.bf16.gmra.mxu0 %v4827_v18 }
  0xc7   : > { %3179 = vmatmul.mubr.bf16.gmra.mxu1 %v4828_v20  ;;  %4381 = vmatpush3.bf16.msra.mxu0 %v4831_v26  ;;  %v4860_v20 = vld [vmem:[%s5818_s1 + $0x610] sm:$0xff]  }
  0xc8   : > { %4421 = vmatpush3.bf16.msra.mxu1 %v4832_v28  ;;  %4382 = vmatprep.subr.bf16.mxu0 %v4833_v31 }
  0xc9   : > { %4422 = vmatprep.subr.bf16.mxu1 %v4834_v34  ;;  %3219 = vmatprep.mubr.bf16.mxu0 %v4839_v43 }
  0xca   : > { %3284 = vmatprep.mubr.bf16.mxu1 %v4842_v46 }
  0xcb   : > { %4383 = vmatpush3.bf16.msra.mxu0 %v4835_v36  ;;  %v4868_v36 = vld [vmem:[%s5818_s1 + $0x600] sm:$0xff]  }
  0xcc   : > { %4423 = vmatpush3.bf16.msra.mxu1 %v4836_v39  ;;  %4460 = vmatprep.subr.bf16.mxu0 %v4843_v47 }
  0xcd   : > { %4484 = vmatprep.subr.bf16.mxu1 %v4843_v47 }
  0xce   : > { %3220 = vmatmul.mubr.bf16.vlgmr.msra.gmra.mxu0 %v4837_v42 }
  0xcf   : > { %3285 = vmatmul.mubr.bf16.vlgmr.msra.gmra.mxu1 %v4840_v45  ;;  %4461 = vmatpush3.bf16.msra.mxu0 %v4843_v47 }
  0xd0   : > { %4492 = vmatpush3.bf16.msra.mxu1 %v4843_v47  ;;  %4462 = vmatprep.subr.bf16.mxu0 %v4844_v49 }
  0xd1   : > { %4485 = vmatprep.subr.bf16.mxu1 %v4844_v49  ;;  %3227 = vmatprep.mubr.bf16.mxu0 %v4845_v51 }
  0xd2   : > { %3292 = vmatprep.mubr.bf16.mxu1 %v4847_v53 }
  0xd3   : > { %4463 = vmatpush3.bf16.msra.mxu0 %v4844_v49 }
  0xd4   : > { %4493 = vmatpush3.bf16.msra.mxu1 %v4844_v49  ;;  %4464 = vmatprep.subr.bf16.mxu0 %v4851_v58 }
  0xd5   : > { %4486 = vmatprep.subr.bf16.mxu1 %v4851_v58 }
  0xd6   : > { %3228 = vmatmul.mubr.bf16.gmra.mxu0 %v4849_v55 }
  0xd7   : > { %3293 = vmatmul.mubr.bf16.gmra.mxu1 %v4850_v61  ;;  %3235 = vmatprep.mubr.bf16.mxu0 %v4853_v63 }
  0xd8   : > { %4465 = vmatpush3.bf16.msra.mxu0 %v4851_v58  ;;  %3300 = vmatprep.mubr.bf16.mxu1 %v4855_v3 }
  0xd9   : > { %4494 = vmatpush3.bf16.msra.mxu1 %v4851_v58 }
  0xde   : > { %3236 = vmatmul.mubr.bf16.gmra.mxu0 %v4857_v11 }
  0xdf   : > { %3243 = vmatprep.mubr.bf16.mxu0 %v4861_v14 }
  0xee   : > { %v3984_v62 = vpop.f32.mrf.mxu0 }
  0xef   : > { %v4024_v0 = vpop.f32.mrf.mxu1 }
  0xf0   : > { %v3985_v2 = vpop.f32.mrf.mxu0 }
  0xf1   : > { %v3986_v4 = vadd.f32 %v3985_v2, %v3984_v62  ;;  %v4025_v5 = vpop.f32.mrf.mxu1  ;;  %v4852_v2 = vld [vmem:[%s5818_s1 + $0x620] sm:$0xff]  }
  0xf2   : > { %v4026_v7 = vadd.f32 %v4025_v5, %v4024_v0  ;;  %v3987_v8 = vpop.f32.mrf.mxu0  ;;  %4466 = vmatprep.subr.bf16.mxu0 %v4852_v2  ;;  %4487 = vmatprep.subr.bf16.mxu1 %v4852_v2 }
  0xf3   : > { %v4027_v10 = vpop.f32.mrf.mxu1  ;;  %4467 = vmatpush3.bf16.msra.mxu0 %v4852_v2  ;;  %4495 = vmatpush3.bf16.msra.mxu1 %v4852_v2 }
  0xf4   : > { %v5579_v12 = vadd.f32 %v4026_v7, %v3986_v4  ;;  %v3988_v13 = vpop.f32.mrf.mxu0 }
  0xf5   : > { %v3989_v15 = vadd.f32 %v3988_v13, %v3987_v8  ;;  %v4028_v16 = vpop.f32.mrf.mxu1  ;;  %v4859_v8 = vld [vmem:[%s5818_s1 + $0x618] sm:$0xff]   ;;  %v4858_v13 = vld [vmem:[%s5039_s12 + $0x1e8] ss:$100 sps:$4 sm:$0xff]  }
  0xf6   : > { %v4029_v19 = vadd.f32 %v4028_v16, %v4027_v10  ;;  %v3990_v23 = vpop.f32.mrf.mxu0  ;;  %4468 = vmatprep.subr.bf16.mxu0 %v4859_v8  ;;  %4488 = vmatprep.subr.bf16.mxu1 %v4859_v8 }
  0xf7   : > { %v4030_v25 = vpop.f32.mrf.mxu1  ;;  %3301 = vmatmul.mubr.bf16.gmra.mxu1 %v4858_v13  ;;  %4469 = vmatpush3.bf16.msra.mxu0 %v4859_v8 }
  0xf8   : > { %v5588_v22 = vadd.f32 %v4029_v19, %v3989_v15  ;;  %v3991_v27 = vpop.f32.mrf.mxu0  ;;  %3308 = vmatprep.mubr.bf16.mxu1 %v4863_v17  ;;  %4496 = vmatpush3.bf16.msra.mxu1 %v4859_v8 }
  0xf9   : > { %v3992_v29 = vadd.f32 %v3991_v27, %v3990_v23  ;;  %v4031_v30 = vpop.f32.mrf.mxu1  ;;  %4470 = vmatprep.subr.bf16.mxu0 %v4860_v20  ;;  %4489 = vmatprep.subr.bf16.mxu1 %v4860_v20 }
  0xfa   : > { %v4032_v32 = vadd.f32 %v4031_v30, %v4030_v25  ;;  %v3993_v33 = vpop.f32.mrf.mxu0  ;;  %v4865_v30 = vld [vmem:[%s5039_s12 + $0x2a8] ss:$100 sps:$4 sm:$0xff]  }
  0xfb   : > { %v4033_v35 = vpop.f32.mrf.mxu1  ;;  %4471 = vmatpush3.bf16.msra.mxu0 %v4860_v20 }
  0xfc   : > { %v5608_v37 = vadd.f32 %v4032_v32, %v3992_v29  ;;  %v3994_v38 = vpop.f32.mrf.mxu0  ;;  %v4867_v29 = vld [vmem:[%s5818_s1 + $0x608] sm:$0xff]   ;;  %v4866_v32 = vld [vmem:[%s5039_s12 + $0x2b0] ss:$100 sps:$4 sm:$0xff]   ;;  %4497 = vmatpush3.bf16.msra.mxu1 %v4860_v20  ;;  %3244 = vmatmul.mubr.bf16.gmra.mxu0 %v4865_v30 }
  0xfd   : > { %v3995_v40 = vadd.f32 %v3994_v38, %v3993_v33  ;;  %v4034_v41 = vpop.f32.mrf.mxu1  ;;  %v4869_v33 = vld [vmem:[%s5039_s12 + $0x60] ss:$100 sps:$4 sm:$0xff]   ;;  %4472 = vmatprep.subr.bf16.mxu0 %v4867_v29  ;;  %4490 = vmatprep.subr.bf16.mxu1 %v4867_v29 }
  0xfe   : > { %v4035_v44 = vadd.f32 %v4034_v41, %v4033_v35  ;;  %v3996_v50 = vpop.f32.mrf.mxu0  ;;  %v4870_v35 = vld [vmem:[%s5039_s12 + $0x1f0] ss:$100 sps:$4 sm:$0xff]   ;;  %4476 = vmatprep.mubr.bf16.mxu0 %v4869_v33 }
  0xff   : > { %v4036_v52 = vpop.f32.mrf.mxu1  ;;  %3309 = vmatmul.mubr.bf16.gmra.mxu1 %v4866_v32  ;;  %4473 = vmatpush3.bf16.msra.mxu0 %v4867_v29 }
 0x100   : > { %v5620_v48 = vadd.f32 %v4035_v44, %v3995_v40  ;;  %v3997_v54 = vpop.f32.mrf.mxu0  ;;  %4480 = vmatprep.mubr.bf16.mxu1 %v4870_v35  ;;  %4498 = vmatpush3.bf16.msra.mxu1 %v4867_v29 }
 0x101   : > { %v3998_v56 = vadd.f32 %v3997_v54, %v3996_v50  ;;  %v4037_v57 = vpop.f32.mrf.mxu1  ;;  %4474 = vmatprep.subr.bf16.mxu0 %v4868_v36  ;;  %4491 = vmatprep.subr.bf16.mxu1 %v4868_v36  ;;  %v4871_v50 = vld [vmem:[%s5039_s12 + $0x128] ss:$100 sps:$4 sm:$0xff]  }
 0x102   : > { %v4038_v59 = vadd.f32 %v4037_v57, %v4036_v52  ;;  %v3999_v60 = vpop.f32.mrf.mxu0  ;;  %v4872_v52 = vld [vmem:[%s5039_s12 + $0x2b8] ss:$100 sps:$4 sm:$0xff]  }
 0x103   : > { %v4039_v62 = vpop.f32.mrf.mxu1  ;;  %4475 = vmatpush3.bf16.msra.mxu0 %v4868_v36 }
 0x104   : > { %v5633_v0 = vadd.f32 %v4038_v59, %v3998_v56  ;;  %v4000_v1 = vpop.f32.mrf.mxu0  ;;  %4499 = vmatpush3.bf16.msra.mxu1 %v4868_v36 }
 0x105   : > { %v4001_v4 = vadd.f32 %v4000_v1, %v3999_v60  ;;  %v4040_v5 = vpop.f32.mrf.mxu1 }
 0x106   : > { %v4041_v6 = vadd.f32 %v4040_v5, %v4039_v62  ;;  %v4002_v9 = vpop.f32.mrf.mxu0  ;;  %4477 = vmatmul.mubr.bf16.vlgmr.msra.gmra.mxu0 %v4871_v50 }
 0x107   : > { %v4042_v10 = vpop.f32.mrf.mxu1  ;;  %4481 = vmatmul.mubr.bf16.vlgmr.msra.gmra.mxu1 %v4872_v52 }
 0x108   : > { %v5639_v7 = vadd.f32 %v4041_v6, %v4001_v4  ;;  %v4003_v15 = vpop.f32.mrf.mxu0 }
 0x109   : > { %v4043_v16 = vpop.f32.mrf.mxu1  ;;  %v4004_v18 = vadd.f32 %v4003_v15, %v4002_v9 }
 0x10a   : > { %v4044_v19 = vadd.f32 %v4043_v16, %v4042_v10  ;;  %v4005_v21 = vpop.f32.mrf.mxu0 }
 0x10b   : > { %v4045_v23 = vpop.f32.mrf.mxu1 }
 0x10c   : > { %v5651_v24 = vadd.f32 %v4044_v19, %v4004_v18  ;;  %v4006_v25 = vpop.f32.mrf.mxu0 }
 0x10d   : > { %v4046_v26 = vpop.f32.mrf.mxu1  ;;  %v4007_v27 = vadd.f32 %v4006_v25, %v4005_v21 }
 0x10e   : > { %v4047_v28 = vadd.f32 %v4046_v26, %v4045_v23  ;;  %v4064_v34 = vpop.f32.mrf.mxu0 }
 0x10f   : > { %v4104_v38 = vpop.f32.mrf.mxu1 }
 0x110   : > { %v5657_v31 = vadd.f32 %v4047_v28, %v4007_v27  ;;  %v4065_v39 = vpop.f32.mrf.mxu0 }
 0x111   : > { %v4066_v40 = vadd.f32 %v4065_v39, %v4064_v34  ;;  %v4105_v41 = vpop.f32.mrf.mxu1 }
 0x112   : > { %v4067_v42 = vpop.f32.mrf.mxu0  ;;  %v4106_v44 = vadd.f32 %v4105_v41, %v4104_v38 }
 0x113   : > { %v2702_v43 = vadd.f32 %v4066_v40, %v5579_v12  ;;  %v4107_v45 = vpop.f32.mrf.mxu1 }
 0x114   : > { %v4068_v46 = vpop.f32.mrf.mxu0 }
 0x115   : > { %v5666_v47 = vadd.f32 %v4106_v44, %v2702_v43  ;;  %v4069_v49 = vadd.f32 %v4068_v46, %v4067_v42  ;;  %v4108_v51 = vpop.f32.mrf.mxu1 }
 0x116   : > { %v4109_v54 = vadd.f32 %v4108_v51, %v4107_v45  ;;  %v4070_v12 = vpop.f32.mrf.mxu0 }
 0x117   : > { %v2705_v53 = vadd.f32 %v4069_v49, %v5588_v22  ;;  %v4110_v56 = vpop.f32.mrf.mxu1 }
 0x118   : > { %v4071_v57 = vpop.f32.mrf.mxu0 }
 0x119   : > { %v5671_v55 = vadd.f32 %v4109_v54, %v2705_v53  ;;  %v4072_v58 = vadd.f32 %v4071_v57, %v4070_v12  ;;  %v4111_v59 = vpop.f32.mrf.mxu1 }
 0x11a   : > { %v4112_v60 = vadd.f32 %v4111_v59, %v4110_v56  ;;  %v4073_v61 = vpop.f32.mrf.mxu0 }
 0x11b   : > { %v2710_v62 = vadd.f32 %v4072_v58, %v5608_v37  ;;  %v4113_v63 = vpop.f32.mrf.mxu1 }
 0x11c   : > { %v4074_v1 = vpop.f32.mrf.mxu0 }
 0x11d   : > { %v2775_v2 = vadd.f32 %v4112_v60, %v2710_v62  ;;  %v4075_v3 = vadd.f32 %v4074_v1, %v4073_v61  ;;  %v4114_v22 = vpop.f32.mrf.mxu1 }
 0x11e   : > { %v4115_v4 = vadd.f32 %v4114_v22, %v4113_v63  ;;  %v4076_v8 = vpop.f32.mrf.mxu0 }
 0x11f   : > { %v2713_v5 = vadd.f32 %v4075_v3, %v5620_v48  ;;  %v4116_v9 = vpop.f32.mrf.mxu1 }
 0x120   : > { %v4077_v10 = vpop.f32.mrf.mxu0 }
 0x121   : > { %v5675_v6 = vadd.f32 %v4115_v4, %v2713_v5  ;;  %v4117_v11 = vpop.f32.mrf.mxu1  ;;  %v4078_v13 = vadd.f32 %v4077_v10, %v4076_v8 }
 0x122   : > { %v4118_v14 = vadd.f32 %v4117_v11, %v4116_v9  ;;  %v4079_v15 = vpop.f32.mrf.mxu0 }
 0x123   : > { %v4119_v16 = vpop.f32.mrf.mxu1  ;;  %v2718_v37 = vadd.f32 %v4078_v13, %v5633_v0 }
 0x124   : > { %v4080_v17 = vpop.f32.mrf.mxu0 }
 0x125   : > { %v4120_v18 = vpop.f32.mrf.mxu1  ;;  %v2783_v19 = vadd.f32 %v4118_v14, %v2718_v37  ;;  %v4081_v20 = vadd.f32 %v4080_v17, %v4079_v15 }
 0x126   : > { %v4121_v21 = vadd.f32 %v4120_v18, %v4119_v16  ;;  %v4082_v48 = vpop.f32.mrf.mxu0 }
 0x127   : > { %v2721_v23 = vadd.f32 %v4081_v20, %v5639_v7  ;;  %v4122_v26 = vpop.f32.mrf.mxu1 }
 0x128   : > { %v4083_v27 = vpop.f32.mrf.mxu0 }
 0x129   : > { %v2786_v25 = vadd.f32 %v4121_v21, %v2721_v23  ;;  %v4084_v28 = vadd.f32 %v4083_v27, %v4082_v48  ;;  %v4123_v29 = vpop.f32.mrf.mxu1 }
 0x12a   : > { %v4124_v30 = vadd.f32 %v4123_v29, %v4122_v26  ;;  %v4085_v32 = vpop.f32.mrf.mxu0 }
 0x12b   : > { %v2726_v33 = vadd.f32 %v4084_v28, %v5651_v24  ;;  %v4125_v34 = vpop.f32.mrf.mxu1 }
 0x12c   : > { %v4086_v35 = vpop.f32.mrf.mxu0 }
 0x12d   : > { %v2791_v0 = vadd.f32 %v4124_v30, %v2726_v33  ;;  %v4087_v36 = vadd.f32 %v4086_v35, %v4085_v32  ;;  %v4126_v38 = vpop.f32.mrf.mxu1 }
 0x12e   : > { %v4127_v39 = vadd.f32 %v4126_v38, %v4125_v34  ;;  %v4144_v7 = vpop.f32.mrf.mxu0 }
 0x12f   : > { %v2729_v40 = vadd.f32 %v4087_v36, %v5657_v31  ;;  %v4184_v42 = vpop.f32.mrf.mxu1 }
 0x130   : > { %v4145_v43 = vpop.f32.mrf.mxu0 }
 0x131   : > { %v5681_v41 = vadd.f32 %v4127_v39, %v2729_v40  ;;  %v4146_v44 = vadd.f32 %v4145_v43, %v4144_v7  ;;  %v4185_v45 = vpop.f32.mrf.mxu1 }
 0x132   : > { %v4186_v46 = vadd.f32 %v4185_v45, %v4184_v42  ;;  %v4147_v49 = vpop.f32.mrf.mxu0 }
 0x133   : > { %v2832_v50 = vadd.f32 %v4146_v44, %v5666_v47  ;;  %v4187_v24 = vpop.f32.mrf.mxu1 }
 0x134   : > { %v4148_v51 = vpop.f32.mrf.mxu0 }
 0x135   : > { %v2897_v52 = vadd.f32 %v4186_v46, %v2832_v50  ;;  %v4149_v53 = vadd.f32 %v4148_v51, %v4147_v49  ;;  %v4188_v54 = vpop.f32.mrf.mxu1 }
 0x136   : > { %v4189_v12 = vadd.f32 %v4188_v54, %v4187_v24  ;;  %v4150_v57 = vpop.f32.mrf.mxu0 }
 0x137   : > { %v2835_v56 = vadd.f32 %v4149_v53, %v5671_v55  ;;  %v4190_v58 = vpop.f32.mrf.mxu1 }
 0x138   : > { %v4151_v59 = vpop.f32.mrf.mxu0 }
 0x139   : > { %v5685_v31 = vadd.f32 %v4189_v12, %v2835_v56  ;;  %v4191_v60 = vpop.f32.mrf.mxu1  ;;  %v4152_v61 = vadd.f32 %v4151_v59, %v4150_v57 }
 0x13a   : > { %v4192_v62 = vadd.f32 %v4191_v60, %v4190_v58  ;;  %v4153_v63 = vpop.f32.mrf.mxu0 }
 0x13b   : > { %v4193_v1 = vpop.f32.mrf.mxu1  ;;  %v2840_v3 = vadd.f32 %v4152_v61, %v2775_v2 }
 0x13c   : > { %v4154_v47 = vpop.f32.mrf.mxu0 }
 0x13d   : > { %v4194_v22 = vpop.f32.mrf.mxu1  ;;  %v2905_v4 = vadd.f32 %v4192_v62, %v2840_v3  ;;  %v4155_v5 = vadd.f32 %v4154_v47, %v4153_v63 }
 0x13e   : > { %v4195_v8 = vadd.f32 %v4194_v22, %v4193_v1  ;;  %v4156_v10 = vpop.f32.mrf.mxu0 }
 0x13f   : > { %v2843_v9 = vadd.f32 %v4155_v5, %v5675_v6  ;;  %v4196_v11 = vpop.f32.mrf.mxu1 }
 0x140   : > { %v4157_v13 = vpop.f32.mrf.mxu0 }
 0x141   : > { %v2908_v55 = vadd.f32 %v4195_v8, %v2843_v9  ;;  %v4158_v14 = vadd.f32 %v4157_v13, %v4156_v10  ;;  %v4197_v15 = vpop.f32.mrf.mxu1 }
 0x142   : > { %v4198_v16 = vadd.f32 %v4197_v15, %v4196_v11  ;;  %v4159_v37 = vpop.f32.mrf.mxu0 }
 0x143   : > { %v2848_v17 = vadd.f32 %v4158_v14, %v2783_v19  ;;  %v4199_v18 = vpop.f32.mrf.mxu1 }
 0x144   : > { %v4160_v20 = vpop.f32.mrf.mxu0 }
 0x145   : > { %v2913_v21 = vadd.f32 %v4198_v16, %v2848_v17  ;;  %v4161_v2 = vadd.f32 %v4160_v20, %v4159_v37  ;;  %v4200_v23 = vpop.f32.mrf.mxu1 }
 0x146   : > { %v4201_v48 = vadd.f32 %v4200_v23, %v4199_v18  ;;  %v4162_v28 = vpop.f32.mrf.mxu0 }
 0x147   : > { %v2851_v26 = vadd.f32 %v4161_v2, %v2786_v25  ;;  %v4202_v6 = vpop.f32.mrf.mxu1 }
 0x148   : > { %v4163_v29 = vpop.f32.mrf.mxu0 }
 0x149   : > { %v5688_v27 = vadd.f32 %v4201_v48, %v2851_v26  ;;  %v4164_v30 = vadd.f32 %v4163_v29, %v4162_v28  ;;  %v4203_v32 = vpop.f32.mrf.mxu1 }
 0x14a   : > { %v4204_v33 = vadd.f32 %v4203_v32, %v4202_v6  ;;  %v4165_v34 = vpop.f32.mrf.mxu0 }
 0x14b   : > { %v2856_v35 = vadd.f32 %v4164_v30, %v2791_v0  ;;  %v4205_v36 = vpop.f32.mrf.mxu1 }
 0x14c   : > { %v4166_v38 = vpop.f32.mrf.mxu0 }
 0x14d   : > { %v2921_v19 = vadd.f32 %v4204_v33, %v2856_v35  ;;  %v4167_v39 = vadd.f32 %v4166_v38, %v4165_v34  ;;  %v4206_v40 = vpop.f32.mrf.mxu1 }
 0x14e   : > { %v4207_v7 = vadd.f32 %v4206_v40, %v4205_v36  ;;  %v4224_v25 = vpop.f32.mrf.mxu0 }
 0x14f   : > { %v2859_v42 = vadd.f32 %v4167_v39, %v5681_v41  ;;  %v4264_v44 = vpop.f32.mrf.mxu1 }
 0x150   : > { %v4225_v45 = vpop.f32.mrf.mxu0 }
 0x151   : > { %v5691_v43 = vadd.f32 %v4207_v7, %v2859_v42  ;;  %v4226_v46 = vadd.f32 %v4225_v45, %v4224_v25  ;;  %v4265_v49 = vpop.f32.mrf.mxu1 }
 0x152   : > { %v4266_v50 = vadd.f32 %v4265_v49, %v4264_v44  ;;  %v4227_v24 = vpop.f32.mrf.mxu0 }
 0x153   : > { %v2962_v51 = vadd.f32 %v4226_v46, %v2897_v52  ;;  %v4267_v53 = vpop.f32.mrf.mxu1 }
 0x154   : > { %v4228_v0 = vpop.f32.mrf.mxu0 }
 0x155   : > { %v5693_v54 = vadd.f32 %v4266_v50, %v2962_v51  ;;  %v4229_v12 = vadd.f32 %v4228_v0, %v4227_v24  ;;  %v4268_v56 = vpop.f32.mrf.mxu1 }
 0x156   : > { %v4269_v57 = vadd.f32 %v4268_v56, %v4267_v53  ;;  %v4230_v41 = vpop.f32.mrf.mxu0 }
 0x157   : > { %v2965_v58 = vadd.f32 %v4229_v12, %v5685_v31  ;;  %v4270_v60 = vpop.f32.mrf.mxu1 }
 0x158   : > { %v4231_v61 = vpop.f32.mrf.mxu0 }
 0x159   : > { %v5696_v59 = vadd.f32 %v4269_v57, %v2965_v58  ;;  %v4232_v62 = vadd.f32 %v4231_v61, %v4230_v41  ;;  %v4271_v63 = vpop.f32.mrf.mxu1 }
 0x15a   : > { %v4272_v1 = vadd.f32 %v4271_v63, %v4270_v60  ;;  %v4233_v3 = vpop.f32.mrf.mxu0 }
 0x15b   : > { %v2970_v47 = vadd.f32 %v4232_v62, %v2905_v4  ;;  %v4273_v52 = vpop.f32.mrf.mxu1 }
 0x15c   : > { %v4234_v22 = vpop.f32.mrf.mxu0 }
 0x15d   : > { %v5698_v5 = vadd.f32 %v4272_v1, %v2970_v47  ;;  %v4235_v8 = vadd.f32 %v4234_v22, %v4233_v3  ;;  %v4274_v9 = vpop.f32.mrf.mxu1 }
 0x15e   : > { %v4275_v10 = vadd.f32 %v4274_v9, %v4273_v52  ;;  %v4236_v31 = vpop.f32.mrf.mxu0 }
 0x15f   : > { %v2973_v11 = vadd.f32 %v4235_v8, %v2908_v55  ;;  %v4276_v14 = vpop.f32.mrf.mxu1 }
 0x160   : > { %v4237_v15 = vpop.f32.mrf.mxu0 }
 0x161   : > { %v5700_v13 = vadd.f32 %v4275_v10, %v2973_v11  ;;  %v4238_v16 = vadd.f32 %v4237_v15, %v4236_v31  ;;  %v4277_v37 = vpop.f32.mrf.mxu1 }
 0x162   : > { %v4278_v17 = vadd.f32 %v4277_v37, %v4276_v14  ;;  %v4239_v18 = vpop.f32.mrf.mxu0 }
 0x163   : > { %v2978_v20 = vadd.f32 %v4238_v16, %v2913_v21  ;;  %v4279_v2 = vpop.f32.mrf.mxu1 }
 0x164   : > { %v4240_v4 = vpop.f32.mrf.mxu0 }
 0x165   : > { %v5702_v23 = vadd.f32 %v4278_v17, %v2978_v20  ;;  %v4241_v48 = vadd.f32 %v4240_v4, %v4239_v18  ;;  %v4280_v26 = vpop.f32.mrf.mxu1 }
 0x166   : > { %v4281_v28 = vadd.f32 %v4280_v26, %v4279_v2  ;;  %v4242_v29 = vpop.f32.mrf.mxu0 }
 0x167   : > { %v2981_v6 = vadd.f32 %v4241_v48, %v5688_v27  ;;  %v4282_v30 = vpop.f32.mrf.mxu1 }
 0x168   : > { %v4243_v32 = vpop.f32.mrf.mxu0 }
 0x169   : > { %v5705_v55 = vadd.f32 %v4281_v28, %v2981_v6  ;;  %v4283_v33 = vpop.f32.mrf.mxu1  ;;  %v4244_v34 = vadd.f32 %v4243_v32, %v4242_v29 }
 0x16a   : > { %v4245_v35 = vpop.f32.mrf.mxu0  ;;  %v4284_v38 = vadd.f32 %v4283_v33, %v4282_v30 }
 0x16b   : > { %v5707_v36 = vpop.f32.mrf.mxu1  ;;  %v2986_v21 = vadd.f32 %v4244_v34, %v2921_v19 }
 0x16c   : > { %v4246_v39 = vpop.f32.mrf.mxu0 }
 0x16d   : > { %v5709_v40 = vadd.f32 %v4284_v38, %v2986_v21  ;;  %v5711_v7 = vpop.f32.mrf.mxu1  ;;  %v4247_v32 = vadd.f32 %v4246_v39, %v4245_v35 }
 0x16e   : > { %v4304_v42 = vpop.f32.mrf.mxu0  ;;  %v4287_v35 = vadd.f32 %v5711_v7, %v5707_v36 }
 0x16f   : > { %v4344_v25 = vpop.f32.mrf.mxu1 }
 0x170   : > { %v4305_v27 = vpop.f32.mrf.mxu0 }
 0x171   : > { %v4345_v44 = vpop.f32.mrf.mxu1  ;;  %v4306_v33 = vadd.f32 %v4305_v27, %v4304_v42 }
 0x172   : > { %v4307_v45 = vpop.f32.mrf.mxu0  ;;  %v4346_v39 = vadd.f32 %v4345_v44, %v4344_v25 }
 0x173   : > { %v5713_v46 = vpop.f32.mrf.mxu1 }
 0x174   : > { %v4308_v49 = vpop.f32.mrf.mxu0 }
 0x175   : > { %v5715_v50 = vpop.f32.mrf.mxu1 }
 0x176   : > { %v4310_v24 = vpop.f32.mrf.mxu0 }
 0x177   : > { %v5717_v51 = vpop.f32.mrf.mxu1 }
 0x178   : > { %v4311_v19 = vpop.f32.mrf.mxu0 }
 0x179   : > { %v5719_v53 = vpop.f32.mrf.mxu1 }
 0x17a   : > { %v4313_v0 = vpop.f32.mrf.mxu0  ;;  %v4352_v36 = vadd.f32 %v5719_v53, %v5717_v51 }
 0x17b   : > { %v5721_v12 = vpop.f32.mrf.mxu1 }
 0x17c   : > { %v4314_v56 = vpop.f32.mrf.mxu0 }
 0x17d   : > { %v5723_v57 = vpop.f32.mrf.mxu1 }
 0x17e   : > { %v4316_v58 = vpop.f32.mrf.mxu0 }
 0x17f   : > { %v5725_v41 = vpop.f32.mrf.mxu1 }
 0x180   : > { %v4317_v60 = vpop.f32.mrf.mxu0 }
 0x181   : > { %v5727_v61 = vpop.f32.mrf.mxu1 }
 0x182   : > { %v4319_v62 = vpop.f32.mrf.mxu0 }
 0x183   : > { %v5729_v63 = vpop.f32.mrf.mxu1 }
 0x184   : > { %v4320_v1 = vpop.f32.mrf.mxu0 }
 0x185   : > { %v5731_v3 = vpop.f32.mrf.mxu1 }
 0x186   : > { %5822 = vst [vmem:[#allocation3_spill] sm:$0xff] %v5731_v3  ;;  %v4322_v47 = vpop.f32.mrf.mxu0  ;;  %v4318_v3 = vadd.f32 %v4317_v60, %v4316_v58 }
 0x187   : > { %v4362_v52 = vpop.f32.mrf.mxu1 }
 0x188   : > { %v4323_v22 = vpop.f32.mrf.mxu0  ;;  %v3108_v7 = vadd.f32 %v4318_v3, %v5702_v23 }
 0x189   : > { %v4363_v8 = vpop.f32.mrf.mxu1 }
 0x18a   : > { %v4325_v9 = vpop.f32.mrf.mxu0  ;;  %v4364_v58 = vadd.f32 %v4363_v8, %v4362_v52 }
 0x18b   : > { %v5733_v10 = vpop.f32.mrf.mxu1 }
 0x18c   : > { %v4326_v11 = vpop.f32.mrf.mxu0 }
 0x18d   : > { %v5735_v31 = vpop.f32.mrf.mxu1 }
 0x18e   : > { %v4384_v14 = vpop.f32.mrf.mxu0 }
 0x18f   : > { %v5737_v15 = vpop.f32.mrf.mxu1 }
 0x190   : > { %5823 = vst [vmem:[#allocation4_spill] sm:$0xff] %v5737_v15  ;;  %v4385_v16 = vpop.f32.mrf.mxu0  ;;  %v3092_v15 = vadd.f32 %v4306_v33, %v5693_v54 }
 0x191   : > { %v5739_v37 = vpop.f32.mrf.mxu1 }
 0x192   : > { %5824 = vst [vmem:[#allocation5_spill] sm:$0xff] %v5739_v37  ;;  %v5741_v17 = vpop.f32.mrf.mxu0 }
 0x193   : > { %5825 = vst [vmem:[#allocation6_spill] sm:$0xff] %v5741_v17  ;;  %v5743_v18 = vpop.f32.mrf.mxu1  ;;  %v4309_v17 = vadd.f32 %v4308_v49, %v4307_v45  ;;  %v4355_v49 = vadd.f32 %v5723_v57, %v5721_v12 }
 0x194   : > { %5826 = vst [vmem:[#allocation7_spill] sm:$0xff] %v5743_v18  ;;  %v5745_v20 = vpop.f32.mrf.mxu0  ;;  %v4312_v18 = vadd.f32 %v4311_v19, %v4310_v24  ;;  %v4327_v24 = vadd.f32 %v4326_v11, %v4325_v9 }
 0x195   : > { %5827 = vst [vmem:[#allocation8_spill] sm:$0xff] %v5745_v20  ;;  %v5747_v2 = vpop.f32.mrf.mxu1  ;;  %v4324_v20 = vadd.f32 %v4323_v22, %v4322_v47  ;;  %v3095_v45 = vadd.f32 %v4309_v17, %v5696_v59  ;;  %v4358_v59 = vadd.f32 %v5727_v61, %v5725_v41  ;;  %v4386_v22 = vadd.f32 %v4385_v16, %v4384_v14 }
 0x196   : > { %5828 = vst [vmem:[#allocation9_spill] sm:$0xff] %v5747_v2  ;;  %v4390_v4 = vpop.f32.mrf.mxu0  ;;  %v2989_v2 = vadd.f32 %v4247_v32, %v5691_v43  ;;  %v3100_v27 = vadd.f32 %v4312_v18, %v5698_v5  ;;  %v3157_v43 = vadd.f32 %v4346_v39, %v3092_v15  ;;  %v4349_v5 = vadd.f32 %v5715_v50, %v5713_v46 }
 0x197   : > { %v5749_v48 = vpop.f32.mrf.mxu1  ;;  %v3173_v15 = vadd.f32 %v4358_v59, %v3108_v7  ;;  %v4367_v46 = vadd.f32 %v5735_v31, %v5733_v10  ;;  %v5838_v32 = vld [vmem:[#allocation4_spill] sm:$0xff] }
 0x198   : > { %5829 = vst [vmem:[#allocation10_spill] sm:$0xff] %v5749_v48  ;;  %v4391_v26 = vpop.f32.mrf.mxu0  ;;  %v4315_v48 = vadd.f32 %v4314_v56, %v4313_v0  ;;  %v3116_v0 = vadd.f32 %v4324_v20, %v5709_v40  ;;  %v3165_v60 = vadd.f32 %v4352_v36, %v3100_v27  ;;  %v3222_v16 = vadd.f32 %v4386_v22, %v3157_v43 }
 0x199   : > { %v5751_v28 = vpop.f32.mrf.mxu1  ;;  %v4392_v25 = vadd.f32 %v4391_v26, %v4390_v4 }
 0x19a   : > { %5830 = vst [vmem:[#allocation11_spill] sm:$0xff] %v5751_v28  ;;  %v4393_v6 = vpop.f32.mrf.mxu0  ;;  %v3103_v54 = vadd.f32 %v4315_v48, %v5700_v13  ;;  %v4321_v13 = vadd.f32 %v4320_v1, %v4319_v62  ;;  %v3181_v23 = vadd.f32 %v4364_v58, %v3116_v0  ;;  %v5833_v1 = vld [vmem:[#allocation3_spill] sm:$0xff] }
 0x19b   : > { %v5753_v29 = vpop.f32.mrf.mxu1  ;;  %v3230_v50 = vadd.f32 %v4392_v25, %v3165_v60  ;;  %v4361_v41 = vadd.f32 %v5833_v1, %v5729_v63  ;;  %v5839_v63 = vld [vmem:[#allocation5_spill] sm:$0xff] }
 0x19c   : > { %5831 = vst [vmem:[#allocation12_spill] sm:$0xff] %v5753_v29  ;;  %v4394_v30 = vpop.f32.mrf.mxu0  ;;  %v3168_v53 = vadd.f32 %v4355_v49, %v3103_v54  ;;  %v3111_v62 = vadd.f32 %v4321_v13, %v5705_v55  ;;  %v5835_v17 = vld [vmem:[#allocation8_spill] sm:$0xff]  ;;  %v4426_v33 = vadd.f32 %v5839_v63, %v5838_v32  ;;  %v3925_v54 = vld [vmem:[%s5819_s2] ss:$0 sm:$0xff] }
 0x19d   : > { %v5755_v34 = vpop.f32.mrf.mxu1  ;;  %v4395_v12 = vadd.f32 %v4394_v30, %v4393_v6  ;;  %v3160_v30 = vadd.f32 %v4349_v5, %v3095_v45 }
 0x19e   : > { %5832 = vst [vmem:[#allocation13_spill] sm:$0xff] %v5755_v34  ;;  %v4396_v21 = vpop.f32.mrf.mxu0  ;;  %v3054_v34 = vadd.f32 %v4287_v35, %v2989_v2  ;;  %v3176_v35 = vadd.f32 %v4361_v41, %v3111_v62  ;;  %v3287_v25 = vadd.f32 %v4426_v33, %v3222_v16 }
 0x19f   : > { %v5836_v20 = vld [vmem:[#allocation10_spill] sm:$0xff] }
 0x1a0   : > { %v4397_v37 = vpop.f32.mrf.mxu0  ;;  %v3119_v47 = vadd.f32 %v4327_v24, %v3054_v34  ;;  %v3233_v34 = vadd.f32 %v4395_v12, %v3168_v53  ;;  %v3926_v53 = vld [vmem:[%s5820_s3] ss:$0 sm:$0xff] }
 0x1a1   : > { %v4398_v3 = vadd.f32 %v4397_v37, %v4396_v21  ;;  %v5834_v37 = vld [vmem:[#allocation6_spill] sm:$0xff]  ;;  %v5837_v2 = vld [vmem:[#allocation11_spill] sm:$0xff] }
 0x1a2   : > { %v4399_v29 = vpop.f32.mrf.mxu0  ;;  %v3184_v14 = vadd.f32 %v4367_v46, %v3119_v47  ;;  %v4389_v18 = vadd.f32 %v5835_v17, %v5834_v37  ;;  %v4432_v4 = vadd.f32 %v5837_v2, %v5836_v20 }
 0x1a3   : > { %v3238_v31 = vadd.f32 %v4398_v3, %v3173_v15 }
 0x1a4   : > { %v4400_v19 = vpop.f32.mrf.mxu0  ;;  %v3295_v21 = vadd.f32 %v4432_v4, %v3230_v50 }
 0x1a5   : > { %v4401_v48 = vadd.f32 %v4400_v19, %v4399_v29  ;;  %v3225_v29 = vadd.f32 %v4389_v18, %v3160_v30  ;;  %v5840_v19 = vld [vmem:[#allocation12_spill] sm:$0xff]  ;;  %v5841_v0 = vld [vmem:[#allocation13_spill] sm:$0xff] }
 0x1a6   : > { %v4435_v36 = vadd.f32 %v5841_v0, %v5840_v19 }
 0x1a8   : > { %v3298_v22 = vadd.f32 %v4435_v36, %v3233_v34 }
 0x1b7   : > { %v5757_v38 = vpop.f32.mrf.mxu1 }
 0x1b9   : > { %v4437_v28 = vpop.f32.mrf.mxu1 }
 0x1ba   : > { %v4438_v39 = vadd.f32 %v4437_v28, %v5757_v38  ;;  %v5842_v28 = vld [vmem:[#allocation7_spill] sm:$0xff]  ;;  %v5843_v38 = vld [vmem:[#allocation9_spill] sm:$0xff] }
 0x1bb   : > { %v5763_v42 = vpop.f32.mrf.mxu1 }
 0x1bc   : > { %v4402_v44 = vpop.f32.mrf.mxu0  ;;  %v3303_v13 = vadd.f32 %v4438_v39, %v3238_v31 }
 0x1bd   : > { %v5768_v56 = vpop.f32.mrf.mxu1 }
 0x1be   : > { %v4403_v51 = vpop.f32.mrf.mxu0 }
 0x1bf   : > { %v4442_v40 = vpop.f32.mrf.mxu1  ;;  %v4404_v9 = vadd.f32 %v4403_v51, %v4402_v44  ;;  %v3241_v44 = vadd.f32 %v4401_v48, %v3176_v35  ;;  %v4441_v51 = vadd.f32 %v5768_v56, %v5763_v42 }
 0x1c0   : > { %v4405_v57 = vpop.f32.mrf.mxu0 }
 0x1c1   : > { %v4443_v11 = vpop.f32.mrf.mxu1  ;;  %v3246_v61 = vadd.f32 %v4404_v9, %v3181_v23  ;;  %v3306_v1 = vadd.f32 %v4441_v51, %v3241_v44 }
 0x1c2   : > { %v4444_v52 = vadd.f32 %v4443_v11, %v4442_v40  ;;  %v4406_v10 = vpop.f32.mrf.mxu0  ;;  %v4429_v40 = vadd.f32 %v5843_v38, %v5842_v28 }
 0x1c3   : > { %v4445_v8 = vpop.f32.mrf.mxu1  ;;  %v4407_v26 = vadd.f32 %v4406_v10, %v4405_v57 }
 0x1c4   : > { %v3311_v55 = vadd.f32 %v4444_v52, %v3246_v61  ;;  %v3290_v50 = vadd.f32 %v4429_v40, %v3225_v29 }
 0x1c5   : > { %v4446_v6 = vpop.f32.mrf.mxu1  ;;  %v3249_v27 = vadd.f32 %v4407_v26, %v3184_v14 }
 0x1c6   : > { %v4447_v24 = vadd.f32 %v4446_v6, %v4445_v8  ;;  %v4478_v43 = vpop.f32.mrf.mxu0 }
 0x1c7   : > { %v3360_v45 = vadd.f32 %v4478_v43, %v3295_v21  ;;  %v4482_v7 = vpop.f32.mrf.mxu1 }
 0x1c8   : > { %v3376_v5 = vadd.f32 %v4482_v7, %v3311_v55  ;;  %v3351_v49 = vpop.f32.mrf.mxu0  ;;  %v3314_v58 = vadd.f32 %v4447_v24, %v3249_v27 }
 0x1c9   : > { %v3418_v60 = vmul.f32 %v3925_v54, %v3360_v45  ;;  %v3352_v59 = vadd.f32 %v3351_v49, %v3287_v25  ;;  %v3367_v47 = vpop.f32.mrf.mxu1 }
 0x1ca   : > { %v3422_v23 = vmul.f32 %v3925_v54, %v3376_v5  ;;  %v3368_v3 = vadd.f32 %v3367_v47, %v3303_v13  ;;  %v4479_v9 = vpop.f32.mrf.mxu0 }
 0x1cb   : > { %v3416_v11 = vmul.f32 %v3925_v54, %v3352_v59  ;;  %v3363_v15 = vadd.f32 %v4479_v9, %v3298_v22  ;;  %v4483_v46 = vpop.f32.mrf.mxu1  ;;  %v3433_v41 = vadd.f32 %v3926_v53, %v3418_v60 }
 0x1cc   : > { %v3420_v12 = vmul.f32 %v3925_v54, %v3368_v3  ;;  %v3379_v57 = vadd.f32 %v4483_v46, %v3314_v58  ;;  %v3354_v62 = vpop.f32.mrf.mxu0  ;;  %v3437_v56 = vadd.f32 %v3926_v53, %v3422_v23 }
 0x1cd   : > { %v3419_v61 = vmul.f32 %v3925_v54, %v3363_v15  ;;  %v3355_v52 = vadd.f32 %v3354_v62, %v3290_v50  ;;  %v3370_v42 = vpop.f32.mrf.mxu1  ;;  %v3431_v16 = vadd.f32 %v3926_v53, %v3416_v11  ;;  %v3441_v4 = vmax.f32 %v3433_v41, 0.0 }
 0x1ce   : > { %v3423_v8 = vmul.f32 %v3925_v54, %v3379_v57  ;;  %v3371_v14 = vadd.f32 %v3370_v42, %v3306_v1  ;;  %v3435_v18 = vadd.f32 %v3926_v53, %v3420_v12  ;;  %v3445_v48 = vmax.f32 %v3437_v56, 0.0 }
 0x1cf   : > { %v3434_v37 = vadd.f32 %v3926_v53, %v3419_v61  ;;  %v3417_v17 = vmul.f32 %v3925_v54, %v3355_v52  ;;  %v3439_v55 = vmax.f32 %v3431_v16, 0.0 }
 0x1d0   : > { %v3438_v20 = vadd.f32 %v3926_v53, %v3423_v8  ;;  %v3421_v2 = vmul.f32 %v3925_v54, %v3371_v14  ;;  %v3443_v63 = vmax.f32 %v3435_v18, 0.0 }
 0x1d1   : > { %v3442_v10 = vmax.f32 %v3434_v37, 0.0  ;;  %v3432_v31 = vadd.f32 %v3926_v53, %v3417_v17 }
 0x1d2   : > { %v3446_v26 = vmax.f32 %v3438_v20, 0.0  ;;  %v3436_v6 = vadd.f32 %v3926_v53, %v3421_v2 }
 0x1d3   : > { %v3953_v30 = vpack.c.bf16 %v3442_v10, %v3441_v4  ;;  %v3440_v32 = vmax.f32 %v3432_v31, 0.0 }
 0x1d4   : > { %v3963_v33 = vpack.c.bf16 %v3446_v26, %v3445_v48  ;;  %v3444_v34 = vmax.f32 %v3436_v6, 0.0 }
 0x1d5   : > { %3965 = vst [vmem:[%s306_s28 + $0x8] sm:$0xff] %v3953_v30   ;;  %v3948_v21 = vpack.c.bf16 %v3440_v32, %v3439_v55 }
 0x1d6   : > { %3967 = vst [vmem:[%s306_s28 + $0x18] sm:$0xff] %v3963_v33   ;;  %v3958_v35 = vpack.c.bf16 %v3444_v34, %v3443_v63 }
 0x1d7   : > { %3949 = vst [vmem:[%s306_s28] sm:$0xff] %v3948_v21  }
 0x1d8   : > { %3966 = vst [vmem:[%s306_s28 + $0x10] sm:$0xff] %v3958_v35  }
 0x1d9 PF: > { %s14_s17 = sadd.s32 1, %s4895_s17   ;;  %s5844_s15 = smov %s4891_s16 }
 0x1da   : > { %p11_p5 = scmp.ge.s32.totalorder %s14_s17, 4   ;;  %s5845_s16 = smov %s5847_s18 }
 0x1dc   :  { %13 = sbr.rel (!%p11_p5) target bundleno = 2 (0x2), region = 83 }

// kernel: conv_cfc_forward.9
= control target key start
LH: loop header
LB: loop body
LE: loop exit
PB: predicated region body
PF: predicated region fallthrough
CT: control target
= control target key end

     0   :  { %v2180_v0 = vmov 0.0   ;;  %vm2181_vm0 = vmmov 0   ;;  %v2182_v37 = vmov 0   ;;  %v169_v62 = vlaneseq  ;;  %s2780_s2 = inlined_call_operand.vmem [shape: bf16[128,128], index: 2, kind: input, shape index: {}]   ;;  %s2781_s3 = inlined_call_operand.vmem [shape: bf16[128,512], index: 3, kind: input, shape index: {}]   ;;  %s2782_s1 = inlined_call_operand.vmem [shape: f32[8,128], index: 1, kind: input, shape index: {}]   ;;  %s2783_s0 = inlined_call_operand.vmem [shape: f32[4,8,128], index: 0, kind: input, shape index: {}]   ;;  %s2784_s4 = inlined_call_operand.vmem [shape: f32[1,512], index: 4, kind: input, shape index: {}]   ;;  %s2785_s5 = inlined_call_operand.vmem [shape: f32[4,8,128], index: 5, kind: output, shape index: {0}]   ;;  %s2786_s6 = inlined_call_operand.vmem [shape: f32[8,128], index: 6, kind: output, shape index: {1}]  }
   0x1   :  { %1929 = vmatprep.subr.bf16.mxu0 %v2180_v0  ;;  %v2012_v1 = vld [vmem:[%s2780_s2 + $0x38] sm:$0xff]   ;;  %1945 = vmatprep.mubr.msk.bf16.mxu0 %vm2181_vm0, %v2180_v0  ;;  %v2013_v2 = vld [vmem:[%s2780_s2 + $0x30] sm:$0xff]   ;;  %v2014_v3 = vld [vmem:[%s2780_s2 + $0x28] sm:$0xff]  }
   0x2   :  { %1930 = vmatpush3.bf16.msra.mxu0 %v2012_v1  ;;  %v2235_v4 = vld [vmem:[%s2781_s3 + $0xe4] ss:$16 sps:$4 sm:$0xff]   ;;  %v2243_v6 = vld [vmem:[%s2781_s3 + $0xe0] ss:$16 sps:$4 sm:$0xff]   ;;  %v2016_v8 = vld [vmem:[%s2780_s2 + $0x18] sm:$0xff]   ;;  %381 = vmatprep.mubr.bf16.mxu1 %v2182_v37  ;;  %v170_v63 = vshrl.u32 %v169_v62, 7 }
   0x3   :  { %1931 = vmatprep.subr.bf16.mxu0 %v2180_v0  ;;  %v2015_v5 = vld [vmem:[%s2780_s2 + $0x20] sm:$0xff]   ;;  %349 = vmatprep.subr.bf16.mxu1 %v2235_v4  ;;  %v2017_v11 = vld [vmem:[%s2780_s2 + $0x10] sm:$0xff]   ;;  %v2018_v12 = vld [vmem:[%s2780_s2 + $0x8] sm:$0xff]  }
   0x4   :  { %v2250_v7 = vld [vmem:[%s2781_s3 + $0xc4] ss:$16 sps:$4 sm:$0xff]   ;;  %350 = vmatpush1.bf16.msra.mxu1 %v2243_v6  ;;  %v2260_v9 = vld [vmem:[%s2781_s3 + $0xc0] ss:$16 sps:$4 sm:$0xff]   ;;  %v2287_v15 = vld [vmem:[%s2781_s3 + $0xec] ss:$16 sps:$4 sm:$0xff]  }
   0x5   :  { %351 = vmatprep.subr.bf16.mxu1 %v2250_v7  ;;  %v2265_v10 = vld [vmem:[%s2781_s3 + $0xa4] ss:$16 sps:$4 sm:$0xff]   ;;  %v2293_v16 = vld [vmem:[%s2781_s3 + $0xe8] ss:$16 sps:$4 sm:$0xff]   ;;  %v2298_v18 = vld [vmem:[%s2781_s3 + $0xcc] ss:$16 sps:$4 sm:$0xff]  }
   0x6   :  { %1932 = vmatpush3.bf16.msra.mxu0 %v2013_v2  ;;  %v2019_v13 = vld [vmem:[%s2780_s2] sm:$0xff]   ;;  %v2304_v19 = vld [vmem:[%s2781_s3 + $0xc8] ss:$16 sps:$4 sm:$0xff]   ;;  %v2309_v20 = vld [vmem:[%s2781_s3 + $0xac] ss:$16 sps:$4 sm:$0xff]   ;;  %v2505_v1 = vsub.s32 2, %v170_v63 }
   0x7   :  { %1933 = vmatprep.subr.bf16.mxu0 %v2180_v0  ;;  %v23_v14 = vld [vmem:[%s2782_s1] sm:$0xff]  ;;  %v2316_v21 = vld [vmem:[%s2781_s3 + $0xa8] ss:$16 sps:$4 sm:$0xff]   ;;  %v2335_v24 = vld [vmem:[%s2781_s3 + $0x8c] ss:$16 sps:$4 sm:$0xff]   ;;  %v2507_v2 = vsub.s32 3, %v170_v63 }
   0x8   :  { %352 = vmatpush1.bf16.msra.mxu1 %v2260_v9  ;;  %v25_v17 = vpack.c.bf16 %v23_v14, %v23_v14  ;;  %v2324_v22 = vld [vmem:[%s2781_s3 + $0xa0] ss:$16 sps:$4 sm:$0xff]   ;;  %v2330_v23 = vld [vmem:[%s2781_s3 + $0x84] ss:$16 sps:$4 sm:$0xff]   ;;  %v2340_v25 = vld [vmem:[%s2781_s3 + $0x88] ss:$16 sps:$4 sm:$0xff]  }
   0x9   :  { %353 = vmatprep.subr.bf16.mxu1 %v2265_v10  ;;  %v2345_v26 = vld [vmem:[%s2781_s3 + $0x80] ss:$16 sps:$4 sm:$0xff]   ;;  %v2354_v27 = vld [vmem:[%s2781_s3 + $0x64] ss:$16 sps:$4 sm:$0xff]   ;;  %v2359_v28 = vld [vmem:[%s2781_s3 + $0x6c] ss:$16 sps:$4 sm:$0xff]  }
   0xa   :  { %1934 = vmatpush3.bf16.msra.mxu0 %v2014_v3  ;;  %v2364_v29 = vld [vmem:[%s2781_s3 + $0x68] ss:$16 sps:$4 sm:$0xff]   ;;  %v2369_v30 = vld [vmem:[%s2781_s3 + $0x60] ss:$16 sps:$4 sm:$0xff]   ;;  %v2374_v31 = vld [vmem:[%s2781_s3 + $0x44] ss:$16 sps:$4 sm:$0xff]  }
   0xb   :  { %1935 = vmatprep.subr.bf16.mxu0 %v2180_v0  ;;  %v2381_v32 = vld [vmem:[%s2781_s3 + $0x4c] ss:$16 sps:$4 sm:$0xff]   ;;  %v2388_v33 = vld [vmem:[%s2781_s3 + $0x48] ss:$16 sps:$4 sm:$0xff]   ;;  %v2393_v34 = vld [vmem:[%s2781_s3 + $0x40] ss:$16 sps:$4 sm:$0xff]  }
   0xc   :  { %354 = vmatpush1.bf16.msra.mxu1 %v2324_v22  ;;  %v2400_v35 = vld [vmem:[%s2781_s3 + $0x24] ss:$16 sps:$4 sm:$0xff]   ;;  %v2405_v36 = vld [vmem:[%s2781_s3 + $0x2c] ss:$16 sps:$4 sm:$0xff]   ;;  %v2414_v38 = vld [vmem:[%s2781_s3 + $0x28] ss:$16 sps:$4 sm:$0xff]  }
   0xd   :  { %355 = vmatprep.subr.bf16.mxu1 %v2330_v23  ;;  %v2419_v39 = vld [vmem:[%s2781_s3 + $0x20] ss:$16 sps:$4 sm:$0xff]   ;;  %v2426_v40 = vld [vmem:[%s2781_s3 + $0x4] ss:$16 sps:$4 sm:$0xff]   ;;  %v2431_v41 = vld [vmem:[%s2781_s3 + $0xc] ss:$16 sps:$4 sm:$0xff]  }
   0xe   :  { %1936 = vmatpush3.bf16.msra.mxu0 %v2015_v5  ;;  %v2438_v42 = vld [vmem:[%s2781_s3 + $0x8] ss:$16 sps:$4 sm:$0xff]   ;;  %v2443_v43 = vld [vmem:[%s2781_s3] ss:$16 sps:$4 sm:$0xff]  }
   0xf   :  { %1937 = vmatprep.subr.bf16.mxu0 %v2180_v0  ;;  %v24_v44 = vld [vmem:[%s2783_s0] sm:$0xff]  ;;  %v2068_v54 = vld [vmem:[%s2780_s2 + $0x38] sm:$0xff]   ;;  %v2069_v55 = vld [vmem:[%s2780_s2 + $0x30] sm:$0xff]  }
  0x10   :  { %356 = vmatpush1.bf16.msra.mxu1 %v2345_v26  ;;  %v2070_v56 = vld [vmem:[%s2780_s2 + $0x28] sm:$0xff]   ;;  %v2071_v57 = vld [vmem:[%s2780_s2 + $0x20] sm:$0xff]   ;;  %v2072_v58 = vld [vmem:[%s2780_s2 + $0x18] sm:$0xff]  }
  0x11   :  { %357 = vmatprep.subr.bf16.mxu1 %v2354_v27  ;;  %v2073_v59 = vld [vmem:[%s2780_s2 + $0x10] sm:$0xff]   ;;  %v2074_v60 = vld [vmem:[%s2780_s2 + $0x8] sm:$0xff]   ;;  %v2075_v61 = vld [vmem:[%s2780_s2] sm:$0xff]  }
  0x12   :  { %1938 = vmatpush3.bf16.msra.mxu0 %v2016_v8  ;;  %v167_v3 = vld [vmem:[%s2784_s4] sm:$0xf] }
  0x13   :  { %1939 = vmatprep.subr.bf16.mxu0 %v2180_v0  ;;  %v180_v5 = vrot.slane %v167_v3, %v2505_v1  ;;  %v184_v8 = vrot.slane %v167_v3, %v2507_v2 }
  0x14   :  { %358 = vmatpush1.bf16.msra.mxu1 %v2369_v30 }
  0x15   :  { %359 = vmatprep.subr.bf16.mxu1 %v2374_v31 }
  0x16   :  { %1940 = vmatpush3.bf16.msra.mxu0 %v2017_v11 }
  0x17   :  { %1941 = vmatprep.subr.bf16.mxu0 %v2180_v0 }
  0x18   :  { %360 = vmatpush1.bf16.msra.mxu1 %v2393_v34 }
  0x19   :  { %361 = vmatprep.subr.bf16.mxu1 %v2400_v35 }
  0x1a   :  { %1942 = vmatpush3.bf16.msra.mxu0 %v2018_v12 }
  0x1b   :  { %1943 = vmatprep.subr.bf16.mxu0 %v2180_v0 }
  0x1c   :  { %362 = vmatpush1.bf16.msra.mxu1 %v2419_v39 }
  0x1d   :  { %363 = vmatprep.subr.bf16.mxu1 %v2426_v40 }
  0x1e   :  { %1944 = vmatpush3.bf16.msra.mxu0 %v2019_v13 }
  0x1f   :  { %390 = vmatprep.subr.bf16.mxu0 %v2287_v15 }
  0x20   :  { %364 = vmatpush1.bf16.msra.mxu1 %v2443_v43 }
  0x21   :  { %1946 = vmatmul.mubr.bf16.vlgmr.msra.gmra.mxu0 %v25_v17  ;;  %1949 = vmatprep.subr.bf16.mxu1 %v2180_v0 }
  0x22   :  { %391 = vmatpush1.bf16.msra.mxu0 %v2293_v16  ;;  %422 = vmatprep.mubr.bf16.mxu0 %v2182_v37 }
  0x23   :  { %392 = vmatprep.subr.bf16.mxu0 %v2298_v18 }
  0x26   :  { %393 = vmatpush1.bf16.msra.mxu0 %v2304_v19 }
  0x27   :  { %394 = vmatprep.subr.bf16.mxu0 %v2309_v20 }
  0x2a   :  { %395 = vmatpush1.bf16.msra.mxu0 %v2316_v21 }
  0x2b   :  { %396 = vmatprep.subr.bf16.mxu0 %v2335_v24 }
  0x2e   :  { %397 = vmatpush1.bf16.msra.mxu0 %v2340_v25 }
  0x2f   :  { %398 = vmatprep.subr.bf16.mxu0 %v2359_v28 }
  0x32   :  { %399 = vmatpush1.bf16.msra.mxu0 %v2364_v29 }
  0x33   :  { %400 = vmatprep.subr.bf16.mxu0 %v2381_v32 }
  0x36   :  { %401 = vmatpush1.bf16.msra.mxu0 %v2388_v33 }
  0x37   :  { %402 = vmatprep.subr.bf16.mxu0 %v2405_v36 }
  0x3a   :  { %403 = vmatpush1.bf16.msra.mxu0 %v2414_v38 }
  0x3b   :  { %404 = vmatprep.subr.bf16.mxu0 %v2431_v41 }
  0x3e   :  { %405 = vmatpush1.bf16.msra.mxu0 %v2438_v42 }
  0x3f   :  { %771 = vmatprep.subr.bf16.mxu0 %v2235_v4 }
  0xe1   :  { %v124_v45 = vpop.f32.mrf.mxu0 }
  0xe2   :  { %v130_v46 = vadd.f32 %v124_v45, %v24_v44 }
  0xe3   :  { %v1947_v47 = vpop.f32.mrf.mxu0 }
  0xe4   :  { %v131_v48 = vmul.f32 0.666, %v130_v46 }
  0xe5   :  { %v127_v49 = vpop.f32.mrf.mxu0 }
  0xe6   :  { %2140 = vtanh.f32 %v131_v48 }
  0xe7   :  { %v1948_v50 = vpop.f32.mrf.mxu0 }
  0xf3   :  { %v2141_v51 = vpop.eup %2140 }
  0xf4   :  { %v133_v52 = vmul.f32 1.7159, %v2141_v51  ;;  %v2514_v51 = vsub.s32 0, %v170_v63 }
  0xf6   :  { %v134_v53 = vpack.c.bf16 %v133_v52, %v133_v52  ;;  %v2516_v52 = vsub.s32 1, %v170_v63 }
  0xf8   :  { %382 = vmatmul.mubr.bf16.vlgmr.msra.gmra.mxu1 %v134_v53  ;;  %423 = vmatmul.mubr.bf16.vlgmr.msra.gmra.mxu0 %v134_v53  ;;  %v172_v53 = vrot.slane %v167_v3, %v2514_v51 }
  0xf9   :  { %1965 = vmatprep.mubr.msk.bf16.mxu1 %vm2181_vm0, %v2180_v0  ;;  %772 = vmatpush1.bf16.msra.mxu0 %v2243_v6 }
  0xfa   :  { %773 = vmatprep.subr.bf16.mxu0 %v2250_v7  ;;  %803 = vmatprep.mubr.bf16.mxu0 %v2182_v37 }
  0xfb   :  { %1950 = vmatpush3.bf16.msra.mxu1 %v2068_v54  ;;  %v176_v54 = vrot.slane %v167_v3, %v2516_v52  ;;  %v1764_v3 = vld [vmem:[%s2783_s0 + $0x8] sm:$0xff] }
  0xfc   :  { %1951 = vmatprep.subr.bf16.mxu1 %v2180_v0 }
  0xfd   :  { %774 = vmatpush1.bf16.msra.mxu0 %v2260_v9 }
  0xfe   :  { %775 = vmatprep.subr.bf16.mxu0 %v2265_v10 }
  0xff   :  { %1952 = vmatpush3.bf16.msra.mxu1 %v2069_v55 }
 0x100   :  { %1953 = vmatprep.subr.bf16.mxu1 %v2180_v0 }
 0x101   :  { %776 = vmatpush1.bf16.msra.mxu0 %v2324_v22 }
 0x102   :  { %777 = vmatprep.subr.bf16.mxu0 %v2330_v23 }
 0x103   :  { %1954 = vmatpush3.bf16.msra.mxu1 %v2070_v56 }
 0x104   :  { %1955 = vmatprep.subr.bf16.mxu1 %v2180_v0 }
 0x105   :  { %778 = vmatpush1.bf16.msra.mxu0 %v2345_v26 }
 0x106   :  { %779 = vmatprep.subr.bf16.mxu0 %v2354_v27 }
 0x107   :  { %1956 = vmatpush3.bf16.msra.mxu1 %v2071_v57 }
 0x108   :  { %1957 = vmatprep.subr.bf16.mxu1 %v2180_v0 }
 0x109   :  { %780 = vmatpush1.bf16.msra.mxu0 %v2369_v30 }
 0x10a   :  { %781 = vmatprep.subr.bf16.mxu0 %v2374_v31 }
 0x10b   :  { %1958 = vmatpush3.bf16.msra.mxu1 %v2072_v58 }
 0x10c   :  { %1959 = vmatprep.subr.bf16.mxu1 %v2180_v0 }
 0x10d   :  { %782 = vmatpush1.bf16.msra.mxu0 %v2393_v34 }
 0x10e   :  { %783 = vmatprep.subr.bf16.mxu0 %v2400_v35 }
 0x10f   :  { %1960 = vmatpush3.bf16.msra.mxu1 %v2073_v59 }
 0x110   :  { %1961 = vmatprep.subr.bf16.mxu1 %v2180_v0 }
 0x111   :  { %784 = vmatpush1.bf16.msra.mxu0 %v2419_v39 }
 0x112   :  { %785 = vmatprep.subr.bf16.mxu0 %v2426_v40 }
 0x113   :  { %1962 = vmatpush3.bf16.msra.mxu1 %v2074_v60 }
 0x114   :  { %1963 = vmatprep.subr.bf16.mxu1 %v2180_v0 }
 0x115   :  { %786 = vmatpush1.bf16.msra.mxu0 %v2443_v43 }
 0x116   :  { %1969 = vmatprep.subr.bf16.mxu0 %v2180_v0 }
 0x117   :  { %1964 = vmatpush3.bf16.msra.mxu1 %v2075_v61 }
 0x118   :  { %812 = vmatprep.subr.bf16.mxu1 %v2287_v15 }
 0x1b8   :  { %v383_v11 = vpop.f32.mrf.mxu1  ;;  %v424_v12 = vpop.f32.mrf.mxu0 }
 0x1b9   :  { %v425_v17 = vadd.f32 %v424_v12, %v180_v5  ;;  %v384_v56 = vadd.f32 %v383_v11, %v172_v53 }
 0x1ba   :  { %v385_v13 = vpop.f32.mrf.mxu1  ;;  %v426_v14 = vpop.f32.mrf.mxu0 }
 0x1bb   :  { %v427_v44 = vadd.f32 %v426_v14, %v184_v8  ;;  %v386_v57 = vadd.f32 %v385_v13, %v176_v54 }
 0x1bc   :  { %v387_v45 = vpop.f32.mrf.mxu1  ;;  %v428_v46 = vpop.f32.mrf.mxu0 }
 0x1bd   :  { %v433_v47 = vadd.f32 %v427_v44, %v425_v17 }
 0x1be   :  { %v388_v48 = vpop.f32.mrf.mxu1  ;;  %v429_v49 = vpop.f32.mrf.mxu0 }
 0x1bf   :  { %v1763_v50 = vmul.f32 -1.442695, %v433_v47 }
 0x1c1   :  { %2142 = vpow2.f32 %v1763_v50 }
 0x1ce   :  { %v2143_v55 = vpop.eup %2142 }
 0x1cf   :  { %v437_v58 = vadd.f32 1.0, %v2143_v55 }
 0x1d1   :  { %2144 = vrcp.f32 %v437_v58 }
 0x1d2   :  { %2146 = vtanh.f32 %v384_v56 }
 0x1d3   :  { %2148 = vtanh.f32 %v386_v57 }
 0x1de   :  { %v2145_v59 = vpop.eup %2144 }
 0x1df   :  { %v2147_v60 = vpop.eup %2146  ;;  %v440_v61 = vsub.f32 1.0, %v2145_v59 }
 0x1e0   :  { %v2149_v62 = vpop.eup %2148 }
 0x1e1   :  { %v441_v5 = vmul.f32 %v2147_v60, %v440_v61  ;;  %v442_v8 = vmul.f32 %v2149_v62, %v2145_v59 }
 0x1e3   :  { %v443_v12 = vadd.f32 %v442_v8, %v441_v5 }
 0x1e5   :  { %444 = vst [vmem:[%s2785_s5] sm:$0xff] %v443_v12  ;;  %v447_v63 = vpack.c.bf16 %v443_v12, %v443_v12 }
 0x1e7   :  { %1966 = vmatmul.mubr.bf16.vlgmr.msra.gmra.mxu1 %v447_v63 }
 0x1e8   :  { %813 = vmatpush1.bf16.msra.mxu1 %v2293_v16  ;;  %844 = vmatprep.mubr.bf16.mxu1 %v2182_v37 }
 0x1e9   :  { %814 = vmatprep.subr.bf16.mxu1 %v2298_v18 }
 0x1ec   :  { %815 = vmatpush1.bf16.msra.mxu1 %v2304_v19 }
 0x1ed   :  { %816 = vmatprep.subr.bf16.mxu1 %v2309_v20 }
 0x1f0   :  { %817 = vmatpush1.bf16.msra.mxu1 %v2316_v21 }
 0x1f1   :  { %818 = vmatprep.subr.bf16.mxu1 %v2335_v24 }
 0x1f4   :  { %819 = vmatpush1.bf16.msra.mxu1 %v2340_v25 }
 0x1f5   :  { %820 = vmatprep.subr.bf16.mxu1 %v2359_v28 }
 0x1f8   :  { %821 = vmatpush1.bf16.msra.mxu1 %v2364_v29 }
 0x1f9   :  { %822 = vmatprep.subr.bf16.mxu1 %v2381_v32 }
 0x1fc   :  { %823 = vmatpush1.bf16.msra.mxu1 %v2388_v33 }
 0x1fd   :  { %824 = vmatprep.subr.bf16.mxu1 %v2405_v36 }
 0x200   :  { %825 = vmatpush1.bf16.msra.mxu1 %v2414_v38 }
 0x201   :  { %826 = vmatprep.subr.bf16.mxu1 %v2431_v41 }
 0x204   :  { %827 = vmatpush1.bf16.msra.mxu1 %v2438_v42 }
 0x205   :  { %1194 = vmatprep.subr.bf16.mxu1 %v2235_v4  ;;  %v2076_v4 = vld [vmem:[%s2780_s2 + $0x38] sm:$0xff]  }
 0x2a7   :  { %v546_v11 = vpop.f32.mrf.mxu1 }
 0x2a8   :  { %v552_v13 = vadd.f32 %v1764_v3, %v546_v11 }
 0x2a9   :  { %v1967_v14 = vpop.f32.mrf.mxu1 }
 0x2aa   :  { %v553_v17 = vmul.f32 0.666, %v552_v13 }
 0x2ab   :  { %v549_v44 = vpop.f32.mrf.mxu1 }
 0x2ac   :  { %2150 = vtanh.f32 %v553_v17  ;;  %v2089_v17 = vld [vmem:[%s2780_s2 + $0x10] sm:$0xff]   ;;  %v2090_v44 = vld [vmem:[%s2780_s2 + $0x8] sm:$0xff]  }
 0x2ad   :  { %v1968_v45 = vpop.f32.mrf.mxu1 }
 0x2ae   :  { %v2091_v45 = vld [vmem:[%s2780_s2] sm:$0xff]  }
 0x2b9   :  { %v2151_v46 = vpop.eup %2150 }
 0x2ba   :  { %v555_v47 = vmul.f32 1.7159, %v2151_v46  ;;  %v2092_v46 = vld [vmem:[%s2781_s3 + $0xe0] ss:$16 sps:$4 sm:$0xff]  }
 0x2bc   :  { %v556_v48 = vpack.c.bf16 %v555_v47, %v555_v47  ;;  %v2094_v47 = vld [vmem:[%s2781_s3 + $0xe4] ss:$16 sps:$4 sm:$0xff]  }
 0x2be   :  { %804 = vmatmul.mubr.bf16.vlgmr.msra.gmra.mxu0 %v556_v48  ;;  %845 = vmatmul.mubr.bf16.vlgmr.msra.gmra.mxu1 %v556_v48  ;;  %v2097_v48 = vld [vmem:[%s2781_s3 + $0xec] ss:$16 sps:$4 sm:$0xff]  }
 0x2bf   :  { %1985 = vmatprep.mubr.msk.bf16.mxu0 %vm2181_vm0, %v2180_v0  ;;  %1195 = vmatpush1.bf16.msra.mxu1 %v2243_v6  ;;  %v2077_v6 = vld [vmem:[%s2780_s2 + $0x30] sm:$0xff]  }
 0x2c0   :  { %1196 = vmatprep.subr.bf16.mxu1 %v2250_v7  ;;  %1226 = vmatprep.mubr.bf16.mxu1 %v2182_v37  ;;  %v2078_v7 = vld [vmem:[%s2780_s2 + $0x28] sm:$0xff]  }
 0x2c1   :  { %1970 = vmatpush3.bf16.msra.mxu0 %v2076_v4  ;;  %v2100_v4 = vld [vmem:[%s2781_s3 + $0xc4] ss:$16 sps:$4 sm:$0xff]  }
 0x2c2   :  { %1971 = vmatprep.subr.bf16.mxu0 %v2180_v0 }
 0x2c3   :  { %1197 = vmatpush1.bf16.msra.mxu1 %v2260_v9  ;;  %v2079_v9 = vld [vmem:[%s2780_s2 + $0x20] sm:$0xff]  }
 0x2c4   :  { %1198 = vmatprep.subr.bf16.mxu1 %v2265_v10  ;;  %v2080_v10 = vld [vmem:[%s2780_s2 + $0x18] sm:$0xff]  }
 0x2c5   :  { %1972 = vmatpush3.bf16.msra.mxu0 %v2077_v6  ;;  %v2106_v6 = vld [vmem:[%s2781_s3 + $0xa4] ss:$16 sps:$4 sm:$0xff]  }
 0x2c6   :  { %1973 = vmatprep.subr.bf16.mxu0 %v2180_v0 }
 0x2c7   :  { %1199 = vmatpush1.bf16.msra.mxu1 %v2324_v22  ;;  %v2081_v22 = vld [vmem:[%s2780_s2 + $0x10] sm:$0xff]  }
 0x2c8   :  { %1200 = vmatprep.subr.bf16.mxu1 %v2330_v23  ;;  %v2082_v23 = vld [vmem:[%s2780_s2 + $0x8] sm:$0xff]  }
 0x2c9   :  { %1974 = vmatpush3.bf16.msra.mxu0 %v2078_v7  ;;  %v2104_v7 = vld [vmem:[%s2781_s3 + $0xa0] ss:$16 sps:$4 sm:$0xff]  }
 0x2ca   :  { %1975 = vmatprep.subr.bf16.mxu0 %v2180_v0 }
 0x2cb   :  { %1201 = vmatpush1.bf16.msra.mxu1 %v2345_v26  ;;  %v2083_v26 = vld [vmem:[%s2780_s2] sm:$0xff]  }
 0x2cc   :  { %1202 = vmatprep.subr.bf16.mxu1 %v2354_v27  ;;  %v589_v27 = vld [vmem:[%s2784_s4] sm:$0xf] }
 0x2cd   :  { %1976 = vmatpush3.bf16.msra.mxu0 %v2079_v9  ;;  %v594_v57 = vrot.slane %v589_v27, %v2514_v51  ;;  %v598_v58 = vrot.slane %v589_v27, %v2516_v52  ;;  %v1012_v9 = vld [vmem:[%s2784_s4] sm:$0xf] }
 0x2ce   :  { %1977 = vmatprep.subr.bf16.mxu0 %v2180_v0 }
 0x2cf   :  { %1203 = vmatpush1.bf16.msra.mxu1 %v2369_v30  ;;  %v602_v30 = vrot.slane %v589_v27, %v2505_v1 }
 0x2d0   :  { %1204 = vmatprep.subr.bf16.mxu1 %v2374_v31  ;;  %v606_v31 = vrot.slane %v589_v27, %v2507_v2 }
 0x2d1   :  { %1978 = vmatpush3.bf16.msra.mxu0 %v2080_v10  ;;  %v1025_v10 = vrot.slane %v1012_v9, %v2505_v1 }
 0x2d2   :  { %1979 = vmatprep.subr.bf16.mxu0 %v2180_v0 }
 0x2d3   :  { %1205 = vmatpush1.bf16.msra.mxu1 %v2393_v34 }
 0x2d4   :  { %1206 = vmatprep.subr.bf16.mxu1 %v2400_v35 }
 0x2d5   :  { %1980 = vmatpush3.bf16.msra.mxu0 %v2081_v22  ;;  %v1029_v22 = vrot.slane %v1012_v9, %v2507_v2 }
 0x2d6   :  { %1981 = vmatprep.subr.bf16.mxu0 %v2180_v0 }
 0x2d7   :  { %1207 = vmatpush1.bf16.msra.mxu1 %v2419_v39 }
 0x2d8   :  { %1208 = vmatprep.subr.bf16.mxu1 %v2426_v40 }
 0x2d9   :  { %1982 = vmatpush3.bf16.msra.mxu0 %v2082_v23 }
 0x2da   :  { %1983 = vmatprep.subr.bf16.mxu0 %v2180_v0 }
 0x2db   :  { %1209 = vmatpush1.bf16.msra.mxu1 %v2443_v43 }
 0x2dc   :  { %1989 = vmatprep.subr.bf16.mxu1 %v2180_v0 }
 0x2dd   :  { %1984 = vmatpush3.bf16.msra.mxu0 %v2083_v26 }
 0x2de   :  { %1235 = vmatprep.subr.bf16.mxu0 %v2287_v15 }
 0x37e   :  { %v805_v34 = vpop.f32.mrf.mxu0  ;;  %v846_v35 = vpop.f32.mrf.mxu1 }
 0x37f   :  { %v847_v43 = vadd.f32 %v846_v35, %v602_v30  ;;  %v806_v60 = vadd.f32 %v805_v34, %v594_v57 }
 0x380   :  { %v807_v39 = vpop.f32.mrf.mxu0  ;;  %v848_v40 = vpop.f32.mrf.mxu1 }
 0x381   :  { %v849_v49 = vadd.f32 %v848_v40, %v606_v31  ;;  %v808_v61 = vadd.f32 %v807_v39, %v598_v58 }
 0x382   :  { %v809_v50 = vpop.f32.mrf.mxu0  ;;  %v850_v53 = vpop.f32.mrf.mxu1 }
 0x383   :  { %v855_v54 = vadd.f32 %v849_v49, %v847_v43  ;;  %v1017_v53 = vrot.slane %v1012_v9, %v2514_v51 }
 0x384   :  { %v810_v55 = vpop.f32.mrf.mxu0  ;;  %v851_v56 = vpop.f32.mrf.mxu1 }
 0x385   :  { %v1805_v15 = vmul.f32 -1.442695, %v855_v54  ;;  %v1021_v54 = vrot.slane %v1012_v9, %v2516_v52 }
 0x387   :  { %2152 = vpow2.f32 %v1805_v15 }
 0x394   :  { %v2153_v59 = vpop.eup %2152 }
 0x395   :  { %v859_v62 = vadd.f32 1.0, %v2153_v59 }
 0x397   :  { %2154 = vrcp.f32 %v859_v62 }
 0x398   :  { %2156 = vtanh.f32 %v806_v60 }
 0x399   :  { %2158 = vtanh.f32 %v808_v61 }
 0x3a4   :  { %v2155_v5 = vpop.eup %2154 }
 0x3a5   :  { %v2157_v8 = vpop.eup %2156  ;;  %v862_v12 = vsub.f32 1.0, %v2155_v5 }
 0x3a6   :  { %v2159_v63 = vpop.eup %2158 }
 0x3a7   :  { %v863_v3 = vmul.f32 %v2157_v8, %v862_v12  ;;  %v864_v11 = vmul.f32 %v2159_v63, %v2155_v5  ;;  %v2095_v12 = vld [vmem:[%s2781_s3 + $0xe8] ss:$16 sps:$4 sm:$0xff]  }
 0x3a9   :  { %v865_v13 = vadd.f32 %v864_v11, %v863_v3  ;;  %v2103_v3 = vld [vmem:[%s2781_s3 + $0xcc] ss:$16 sps:$4 sm:$0xff]   ;;  %v2101_v11 = vld [vmem:[%s2781_s3 + $0xc8] ss:$16 sps:$4 sm:$0xff]  }
 0x3ab   :  { %1806 = vst [vmem:[%s2785_s5 + $0x8] sm:$0xff] %v865_v13  ;;  %v870_v14 = vpack.c.bf16 %v865_v13, %v865_v13  ;;  %v2109_v13 = vld [vmem:[%s2781_s3 + $0xac] ss:$16 sps:$4 sm:$0xff]  }
 0x3ad   :  { %1986 = vmatmul.mubr.bf16.vlgmr.msra.gmra.mxu0 %v870_v14  ;;  %v2107_v14 = vld [vmem:[%s2781_s3 + $0xa8] ss:$16 sps:$4 sm:$0xff]  }
 0x3ae   :  { %1236 = vmatpush1.bf16.msra.mxu0 %v2293_v16  ;;  %1267 = vmatprep.mubr.bf16.mxu0 %v2182_v37  ;;  %v1807_v16 = vld [vmem:[%s2783_s0 + $0x10] sm:$0xff] }
 0x3af   :  { %1237 = vmatprep.subr.bf16.mxu0 %v2298_v18 }
 0x3b2   :  { %1238 = vmatpush1.bf16.msra.mxu0 %v2304_v19 }
 0x3b3   :  { %1239 = vmatprep.subr.bf16.mxu0 %v2309_v20 }
 0x3b6   :  { %1240 = vmatpush1.bf16.msra.mxu0 %v2316_v21 }
 0x3b7   :  { %1241 = vmatprep.subr.bf16.mxu0 %v2335_v24 }
 0x3ba   :  { %1242 = vmatpush1.bf16.msra.mxu0 %v2340_v25 }
 0x3bb   :  { %1243 = vmatprep.subr.bf16.mxu0 %v2359_v28 }
 0x3be   :  { %1244 = vmatpush1.bf16.msra.mxu0 %v2364_v29 }
 0x3bf   :  { %1245 = vmatprep.subr.bf16.mxu0 %v2381_v32 }
 0x3c2   :  { %1246 = vmatpush1.bf16.msra.mxu0 %v2388_v33  ;;  %v2084_v33 = vld [vmem:[%s2780_s2 + $0x38] sm:$0xff]  }
 0x3c3   :  { %1247 = vmatprep.subr.bf16.mxu0 %v2405_v36  ;;  %v2085_v36 = vld [vmem:[%s2780_s2 + $0x30] sm:$0xff]  }
 0x3c6   :  { %1248 = vmatpush1.bf16.msra.mxu0 %v2414_v38  ;;  %v2086_v38 = vld [vmem:[%s2780_s2 + $0x28] sm:$0xff]  }
 0x3c7   :  { %1249 = vmatprep.subr.bf16.mxu0 %v2431_v41  ;;  %v2087_v41 = vld [vmem:[%s2780_s2 + $0x20] sm:$0xff]  }
 0x3ca   :  { %1250 = vmatpush1.bf16.msra.mxu0 %v2438_v42  ;;  %v2088_v42 = vld [vmem:[%s2780_s2 + $0x18] sm:$0xff]  }
 0x3cb   :  { %1617 = vmatprep.subr.bf16.mxu0 %v2094_v47  ;;  %v1850_v47 = vld [vmem:[%s2783_s0 + $0x18] sm:$0xff] }
 0x46d   :  { %v969_v18 = vpop.f32.mrf.mxu0 }
 0x46e   :  { %v975_v19 = vadd.f32 %v1807_v16, %v969_v18  ;;  %v2112_v16 = vld [vmem:[%s2781_s3 + $0x84] ss:$16 sps:$4 sm:$0xff]   ;;  %v2110_v18 = vld [vmem:[%s2781_s3 + $0x80] ss:$16 sps:$4 sm:$0xff]  }
 0x46f   :  { %v1987_v20 = vpop.f32.mrf.mxu0 }
 0x470   :  { %v976_v21 = vmul.f32 0.666, %v975_v19  ;;  %v2113_v19 = vld [vmem:[%s2781_s3 + $0x88] ss:$16 sps:$4 sm:$0xff]   ;;  %v2118_v20 = vld [vmem:[%s2781_s3 + $0x64] ss:$16 sps:$4 sm:$0xff]  }
 0x471   :  { %v972_v24 = vpop.f32.mrf.mxu0 }
 0x472   :  { %2160 = vtanh.f32 %v976_v21  ;;  %v2121_v21 = vld [vmem:[%s2781_s3 + $0x6c] ss:$16 sps:$4 sm:$0xff]   ;;  %v2116_v24 = vld [vmem:[%s2781_s3 + $0x60] ss:$16 sps:$4 sm:$0xff]  }
 0x473   :  { %v1988_v25 = vpop.f32.mrf.mxu0 }
 0x474   :  { %v2119_v25 = vld [vmem:[%s2781_s3 + $0x68] ss:$16 sps:$4 sm:$0xff]  }
 0x47f   :  { %v2161_v28 = vpop.eup %2160 }
 0x480   :  { %v978_v29 = vmul.f32 1.7159, %v2161_v28  ;;  %v2124_v28 = vld [vmem:[%s2781_s3 + $0x44] ss:$16 sps:$4 sm:$0xff]  }
 0x482   :  { %v979_v32 = vpack.c.bf16 %v978_v29, %v978_v29  ;;  %v2127_v29 = vld [vmem:[%s2781_s3 + $0x4c] ss:$16 sps:$4 sm:$0xff]  }
 0x484   :  { %1227 = vmatmul.mubr.bf16.vlgmr.msra.gmra.mxu1 %v979_v32  ;;  %1268 = vmatmul.mubr.bf16.vlgmr.msra.gmra.mxu0 %v979_v32  ;;  %v2122_v32 = vld [vmem:[%s2781_s3 + $0x40] ss:$16 sps:$4 sm:$0xff]  }
 0x485   :  { %2005 = vmatprep.mubr.msk.bf16.mxu1 %vm2181_vm0, %v2180_v0  ;;  %1649 = vmatprep.mubr.bf16.mxu0 %v2182_v37 }
 0x486   :  { %1990 = vmatpush3.bf16.msra.mxu1 %v2084_v33  ;;  %1618 = vmatpush1.bf16.msra.mxu0 %v2092_v46  ;;  %v2125_v33 = vld [vmem:[%s2781_s3 + $0x48] ss:$16 sps:$4 sm:$0xff]  }
 0x487   :  { %1991 = vmatprep.subr.bf16.mxu1 %v2180_v0  ;;  %1619 = vmatprep.subr.bf16.mxu0 %v2100_v4  ;;  %v2137_v46 = vld [vmem:[%s2781_s3 + $0x8] ss:$16 sps:$4 sm:$0xff]  }
 0x48a   :  { %1992 = vmatpush3.bf16.msra.mxu1 %v2085_v36  ;;  %v2130_v36 = vld [vmem:[%s2781_s3 + $0x24] ss:$16 sps:$4 sm:$0xff]  }
 0x48b   :  { %1993 = vmatprep.subr.bf16.mxu1 %v2180_v0 }
 0x48e   :  { %1994 = vmatpush3.bf16.msra.mxu1 %v2086_v38  ;;  %v2133_v38 = vld [vmem:[%s2781_s3 + $0x2c] ss:$16 sps:$4 sm:$0xff]  }
 0x48f   :  { %1995 = vmatprep.subr.bf16.mxu1 %v2180_v0 }
 0x492   :  { %1996 = vmatpush3.bf16.msra.mxu1 %v2087_v41  ;;  %v2128_v41 = vld [vmem:[%s2781_s3 + $0x20] ss:$16 sps:$4 sm:$0xff]  }
 0x493   :  { %1997 = vmatprep.subr.bf16.mxu1 %v2180_v0 }
 0x496   :  { %1998 = vmatpush3.bf16.msra.mxu1 %v2088_v42  ;;  %v2131_v42 = vld [vmem:[%s2781_s3 + $0x28] ss:$16 sps:$4 sm:$0xff]  }
 0x497   :  { %1999 = vmatprep.subr.bf16.mxu1 %v2180_v0 }
 0x49a   :  { %2000 = vmatpush3.bf16.msra.mxu1 %v2089_v17  ;;  %v2136_v17 = vld [vmem:[%s2781_s3 + $0x4] ss:$16 sps:$4 sm:$0xff]  }
 0x49b   :  { %2001 = vmatprep.subr.bf16.mxu1 %v2180_v0 }
 0x49e   :  { %2002 = vmatpush3.bf16.msra.mxu1 %v2090_v44  ;;  %v2139_v44 = vld [vmem:[%s2781_s3 + $0xc] ss:$16 sps:$4 sm:$0xff]  }
 0x49f   :  { %2003 = vmatprep.subr.bf16.mxu1 %v2180_v0  ;;  %v2098_v0 = vld [vmem:[%s2781_s3 + $0xc0] ss:$16 sps:$4 sm:$0xff]  }
 0x4a0   :  { %1620 = vmatpush1.bf16.msra.mxu0 %v2098_v0 }
 0x4a1   :  { %1621 = vmatprep.subr.bf16.mxu0 %v2106_v6 }
 0x4a2   :  { %2004 = vmatpush3.bf16.msra.mxu1 %v2091_v45  ;;  %v2134_v45 = vld [vmem:[%s2781_s3] ss:$16 sps:$4 sm:$0xff]  }
 0x4a3   :  { %1658 = vmatprep.subr.bf16.mxu1 %v2097_v48 }
 0x4a4   :  { %1622 = vmatpush1.bf16.msra.mxu0 %v2104_v7 }
 0x4a5   :  { %1623 = vmatprep.subr.bf16.mxu0 %v2112_v16 }
 0x4a8   :  { %1624 = vmatpush1.bf16.msra.mxu0 %v2110_v18 }
 0x4a9   :  { %1625 = vmatprep.subr.bf16.mxu0 %v2118_v20 }
 0x4ac   :  { %1626 = vmatpush1.bf16.msra.mxu0 %v2116_v24 }
 0x4ad   :  { %1627 = vmatprep.subr.bf16.mxu0 %v2124_v28 }
 0x4b0   :  { %1628 = vmatpush1.bf16.msra.mxu0 %v2122_v32 }
 0x4b1   :  { %1629 = vmatprep.subr.bf16.mxu0 %v2130_v36 }
 0x4b4   :  { %1630 = vmatpush1.bf16.msra.mxu0 %v2128_v41 }
 0x4b5   :  { %1631 = vmatprep.subr.bf16.mxu0 %v2136_v17 }
 0x4b8   :  { %1632 = vmatpush1.bf16.msra.mxu0 %v2134_v45 }
 0x544   :  { %v1228_v23 = vpop.f32.mrf.mxu1  ;;  %v1269_v26 = vpop.f32.mrf.mxu0 }
 0x545   :  { %v1270_v31 = vadd.f32 %v1269_v26, %v1025_v10  ;;  %v1229_v56 = vadd.f32 %v1228_v23, %v1017_v53  ;;  %v1435_v26 = vld [vmem:[%s2784_s4] sm:$0xf] }
 0x546   :  { %v1230_v27 = vpop.f32.mrf.mxu1  ;;  %v1271_v30 = vpop.f32.mrf.mxu0 }
 0x547   :  { %v1272_v34 = vadd.f32 %v1271_v30, %v1029_v22  ;;  %v1231_v15 = vadd.f32 %v1230_v27, %v1021_v54  ;;  %v1448_v27 = vrot.slane %v1435_v26, %v2505_v1  ;;  %v1452_v30 = vrot.slane %v1435_v26, %v2507_v2 }
 0x548   :  { %v1232_v35 = vpop.f32.mrf.mxu1  ;;  %v1273_v39 = vpop.f32.mrf.mxu0 }
 0x549   :  { %v1278_v40 = vadd.f32 %v1272_v34, %v1270_v31 }
 0x54a   :  { %v1233_v43 = vpop.f32.mrf.mxu1  ;;  %v1274_v49 = vpop.f32.mrf.mxu0 }
 0x54b   :  { %v1848_v50 = vmul.f32 -1.442695, %v1278_v40 }
 0x54d   :  { %2162 = vpow2.f32 %v1848_v50 }
 0x55a   :  { %v2163_v55 = vpop.eup %2162 }
 0x55b   :  { %v1282_v57 = vadd.f32 1.0, %v2163_v55 }
 0x55d   :  { %2164 = vrcp.f32 %v1282_v57  ;;  %v1444_v57 = vrot.slane %v1435_v26, %v2516_v52 }
 0x55e   :  { %2166 = vtanh.f32 %v1229_v56 }
 0x55f   :  { %2168 = vtanh.f32 %v1231_v15  ;;  %v1440_v15 = vrot.slane %v1435_v26, %v2514_v51 }
 0x56a   :  { %v2165_v58 = vpop.eup %2164 }
 0x56b   :  { %v2167_v59 = vpop.eup %2166  ;;  %v1285_v60 = vsub.f32 1.0, %v2165_v58 }
 0x56c   :  { %v2169_v61 = vpop.eup %2168 }
 0x56d   :  { %v1286_v62 = vmul.f32 %v2167_v59, %v1285_v60  ;;  %v1287_v5 = vmul.f32 %v2169_v61, %v2165_v58 }
 0x56f   :  { %v1288_v8 = vadd.f32 %v1287_v5, %v1286_v62 }
 0x571   :  { %1849 = vst [vmem:[%s2785_s5 + $0x10] sm:$0xff] %v1288_v8  ;;  %v1293_v63 = vpack.c.bf16 %v1288_v8, %v1288_v8 }
 0x573   :  { %2006 = vmatmul.mubr.bf16.vlgmr.msra.gmra.mxu1 %v1293_v63 }
 0x574   :  { %1659 = vmatpush1.bf16.msra.mxu1 %v2095_v12  ;;  %1690 = vmatprep.mubr.bf16.mxu1 %v2182_v37  ;;  %v2115_v37 = vld [vmem:[%s2781_s3 + $0x8c] ss:$16 sps:$4 sm:$0xff]  }
 0x575   :  { %1660 = vmatprep.subr.bf16.mxu1 %v2103_v3 }
 0x578   :  { %1661 = vmatpush1.bf16.msra.mxu1 %v2101_v11 }
 0x579   :  { %1662 = vmatprep.subr.bf16.mxu1 %v2109_v13 }
 0x57c   :  { %1663 = vmatpush1.bf16.msra.mxu1 %v2107_v14 }
 0x57d   :  { %1664 = vmatprep.subr.bf16.mxu1 %v2115_v37 }
 0x580   :  { %1665 = vmatpush1.bf16.msra.mxu1 %v2113_v19 }
 0x581   :  { %1666 = vmatprep.subr.bf16.mxu1 %v2121_v21 }
 0x584   :  { %1667 = vmatpush1.bf16.msra.mxu1 %v2119_v25 }
 0x585   :  { %1668 = vmatprep.subr.bf16.mxu1 %v2127_v29 }
 0x588   :  { %1669 = vmatpush1.bf16.msra.mxu1 %v2125_v33 }
 0x589   :  { %1670 = vmatprep.subr.bf16.mxu1 %v2133_v38 }
 0x58c   :  { %1671 = vmatpush1.bf16.msra.mxu1 %v2131_v42 }
 0x58d   :  { %1672 = vmatprep.subr.bf16.mxu1 %v2139_v44 }
 0x590   :  { %1673 = vmatpush1.bf16.msra.mxu1 %v2137_v46 }
 0x633   :  { %v1392_v48 = vpop.f32.mrf.mxu1 }
 0x634   :  { %v1398_v4 = vadd.f32 %v1850_v47, %v1392_v48 }
 0x635   :  { %v2007_v0 = vpop.f32.mrf.mxu1 }
 0x636   :  { %v1399_v6 = vmul.f32 0.666, %v1398_v4 }
 0x637   :  { %v1395_v7 = vpop.f32.mrf.mxu1 }
 0x638   :  { %2170 = vtanh.f32 %v1399_v6 }
 0x639   :  { %v2008_v9 = vpop.f32.mrf.mxu1 }
 0x645   :  { %v2171_v10 = vpop.eup %2170 }
 0x646   :  { %v1401_v22 = vmul.f32 1.7159, %v2171_v10 }
 0x648   :  { %v1402_v23 = vpack.c.bf16 %v1401_v22, %v1401_v22 }
 0x64a   :  { %1650 = vmatmul.mubr.bf16.vlgmr.msra.gmra.mxu0 %v1402_v23  ;;  %1691 = vmatmul.mubr.bf16.vlgmr.msra.gmra.mxu1 %v1402_v23 }
 0x70a   :  { %v1651_v31 = vpop.f32.mrf.mxu0  ;;  %v1692_v34 = vpop.f32.mrf.mxu1 }
 0x70b   :  { %v1693_v40 = vadd.f32 %v1692_v34, %v1448_v27  ;;  %v1652_v58 = vadd.f32 %v1651_v31, %v1440_v15 }
 0x70c   :  { %v1653_v35 = vpop.f32.mrf.mxu0  ;;  %v1694_v39 = vpop.f32.mrf.mxu1 }
 0x70d   :  { %v1695_v43 = vadd.f32 %v1694_v39, %v1452_v30  ;;  %v1654_v2 = vadd.f32 %v1653_v35, %v1444_v57 }
 0x70e   :  { %v1655_v49 = vpop.f32.mrf.mxu0  ;;  %v1696_v50 = vpop.f32.mrf.mxu1 }
 0x70f   :  { %v1701_v53 = vadd.f32 %v1695_v43, %v1693_v40 }
 0x710   :  { %v1656_v54 = vpop.f32.mrf.mxu0  ;;  %v1697_v55 = vpop.f32.mrf.mxu1 }
 0x711   :  { %v1891_v56 = vmul.f32 -1.442695, %v1701_v53 }
 0x713   :  { %2172 = vpow2.f32 %v1891_v56 }
 0x720   :  { %v2173_v1 = vpop.eup %2172 }
 0x721   :  { %v1705_v59 = vadd.f32 1.0, %v2173_v1 }
 0x723   :  { %2174 = vrcp.f32 %v1705_v59 }
 0x724   :  { %2176 = vtanh.f32 %v1652_v58 }
 0x725   :  { %2178 = vtanh.f32 %v1654_v2 }
 0x730   :  { %v2175_v60 = vpop.eup %2174 }
 0x731   :  { %v2177_v61 = vpop.eup %2176  ;;  %v1708_v62 = vsub.f32 1.0, %v2175_v60 }
 0x732   :  { %v2179_v5 = vpop.eup %2178 }
 0x733   :  { %v1709_v8 = vmul.f32 %v2177_v61, %v1708_v62  ;;  %v1710_v12 = vmul.f32 %v2179_v5, %v2175_v60 }
 0x735   :  { %v1711_v63 = vadd.f32 %v1710_v12, %v1709_v8 }
 0x737   :  { %1892 = vst [vmem:[%s2785_s5 + $0x18] sm:$0xff] %v1711_v63  ;;  %1714 = vst [vmem:[%s2786_s6] sm:$0xff] %v1711_v63 }

// kernel: conv_cfc_forward.8
= control target key start
LH: loop header
LB: loop body
LE: loop exit
PB: predicated region body
PF: predicated region fallthrough
CT: control target
= control target key end

     0   :  { %s5749_s15 = smov 0   ;;  %s5751_s16 = smov 0   ;;  %s7154_s0 = inlined_call_operand.vmem [shape: bf16[32,3200], index: 0, kind: input, shape index: {}]   ;;  %s7155_s1 = inlined_call_operand.vmem [shape: bf16[3200,256], index: 1, kind: input, shape index: {}]   ;;  %s7156_s2 = inlined_call_operand.vmem [shape: f32[1,256], index: 2, kind: input, shape index: {}]   ;;  %s7157_s3 = inlined_call_operand.vmem [shape: f32[1,256], index: 3, kind: input, shape index: {}]   ;;  %s7158_s4 = inlined_call_operand.vmem [shape: bf16[32,256], index: 4, kind: output, shape index: {}]  }
   0x1   :  { %s5753_s17 = smov 0   ;;  %s5755_s18 = smov 0  }
   0x2   :  { %s5757_s19 = smov 0  }
   0x3 LB: > { %s29_s20 = sadd.s32 1, %s5718_s18  ;;  %s4719_s21 = sadd.s32 4294967295, %s5722_s19   ;;  %s5722_s19 = sphi %s5757_s19, %s14_s19   ;;  %s5718_s18 = sphi %s5755_s18, %s7191_s18   ;;  %s5714_s17 = sphi %s5753_s17, %s7190_s17   ;;  %s5710_s16 = sphi %s5751_s16, %s7189_s16   ;;  %s5706_s15 = sphi %s5749_s15, %s7188_s15  }
   0x4   : > { %p31_p0 = scmp.ge.s32.totalorder %s29_s20, 2  ;;  %p77_p1 = scmp.ne.s32.totalorder %s5710_s16, %s5706_s15 }
   0x5   : > { %p78_p2 = scmp.eq.s32.totalorder %s5722_s19, 0  ;;  %p161_p4 = scmp.eq.s32.totalorder %s4719_s21, 1 }
   0x6   : > { %s7193_s20 = smov (%p31_p0, %s29_s20), 0  ;;  %s70_s23 = sadd.s32 1, %s5710_s16 }
   0x7   : > { %p79_p3 = por %p78_p2, %p77_p1  ;;  %s66_s22 = ssub.s32 %s5718_s18, %s7193_s20 }
   0x8   : > { %p68_p5 = scmp.eq.s32.totalorder %s66_s22, 0  ;;  %p5784_p6 = por %p161_p4, %p77_p1 }
   0x9   : > { %p4723_p7 = scmp.ge.s32.totalorder %s5722_s19, 2 }
   0xa   : > { %s5789_s25 = scalar_select %p68_p5, %s5710_s16, %s70_s23  }
   0xb   : > { %198 = sbr.rel (%p4723_p7) target bundleno = 287 (0x11f), region = 20 }
  0x10   : > { %201 = sbr.rel (!%p79_p3) target bundleno = 287 (0x11f), region = 24  ;;  %s203_s26 = sand.u32 (%p79_p3), 1, %s5710_s16  }
  0x11   : > { %s4724_s27 = sshll.u32 (%p79_p3), %s5718_s18, 2  ;;  %s5368_s28 = smul.u32 (%p79_p3), 1600, %s203_s26 }
  0x12   : > { %s5797_s5 = scalar_lea.vmem (%p79_p3), %s7155_s1, %s4724_s27 }
  0x13   : > { %v227_v0 = vld [vmem:[%s5797_s5] sm:$0xf] (%p79_p3)  ;;  %v229_v1 = vld [vmem:[%s5797_s5 + $0x8] sm:$0xf] (%p79_p3)  ;;  %v231_v2 = vld [vmem:[%s5797_s5 + $0x10] sm:$0xf] (%p79_p3) }
  0x14   : > { %v233_v3 = vld [vmem:[%s5797_s5 + $0x18] sm:$0xf] (%p79_p3)  ;;  %v235_v4 = vld [vmem:[%s5797_s5 + $0x20] sm:$0xf] (%p79_p3)  ;;  %s5804_s6 = scalar_lea.vmem (%p79_p3), [#allocation3], %s5368_s28 }
  0x15   : > { %228 = vst [vmem:[%s5804_s6] sm:$0xf] %v227_v0  ;;  %230 = vst [vmem:[%s5804_s6 + $0x4] sm:$0xf] %v229_v1  ;;  %v237_v5 = vld [vmem:[%s5797_s5 + $0x28] sm:$0xf] }
  0x16   : > { %232 = vst [vmem:[%s5804_s6 + $0x8] sm:$0xf] %v231_v2  ;;  %234 = vst [vmem:[%s5804_s6 + $0xc] sm:$0xf] %v233_v3  ;;  %v239_v6 = vld [vmem:[%s5797_s5 + $0x30] sm:$0xf] }
  0x17   : > { %236 = vst [vmem:[%s5804_s6 + $0x10] sm:$0xf] %v235_v4  ;;  %v241_v7 = vld [vmem:[%s5797_s5 + $0x38] sm:$0xf]  ;;  %238 = vst [vmem:[%s5804_s6 + $0x14] sm:$0xf] %v237_v5 }
  0x18   : > { %240 = vst [vmem:[%s5804_s6 + $0x18] sm:$0xf] %v239_v6  ;;  %242 = vst [vmem:[%s5804_s6 + $0x1c] sm:$0xf] %v241_v7  ;;  %v243_v8 = vld [vmem:[%s5797_s5 + $0x40] sm:$0xf] }
  0x19   : > { %v245_v9 = vld [vmem:[%s5797_s5 + $0x48] sm:$0xf]  ;;  %v247_v10 = vld [vmem:[%s5797_s5 + $0x50] sm:$0xf]  ;;  %244 = vst [vmem:[%s5804_s6 + $0x20] sm:$0xf] %v243_v8 }
  0x1a   : > { %246 = vst [vmem:[%s5804_s6 + $0x24] sm:$0xf] %v245_v9  ;;  %248 = vst [vmem:[%s5804_s6 + $0x28] sm:$0xf] %v247_v10  ;;  %v249_v11 = vld [vmem:[%s5797_s5 + $0x58] sm:$0xf] }
  0x1b   : > { %v251_v12 = vld [vmem:[%s5797_s5 + $0x60] sm:$0xf]  ;;  %v253_v13 = vld [vmem:[%s5797_s5 + $0x68] sm:$0xf]  ;;  %250 = vst [vmem:[%s5804_s6 + $0x2c] sm:$0xf] %v249_v11 }
  0x1c   : > { %252 = vst [vmem:[%s5804_s6 + $0x30] sm:$0xf] %v251_v12  ;;  %254 = vst [vmem:[%s5804_s6 + $0x34] sm:$0xf] %v253_v13  ;;  %v255_v14 = vld [vmem:[%s5797_s5 + $0x70] sm:$0xf] }
  0x1d   : > { %v257_v15 = vld [vmem:[%s5797_s5 + $0x78] sm:$0xf]  ;;  %v259_v16 = vld [vmem:[%s5797_s5 + $0x80] sm:$0xf]  ;;  %256 = vst [vmem:[%s5804_s6 + $0x38] sm:$0xf] %v255_v14 }
  0x1e   : > { %258 = vst [vmem:[%s5804_s6 + $0x3c] sm:$0xf] %v257_v15  ;;  %260 = vst [vmem:[%s5804_s6 + $0x40] sm:$0xf] %v259_v16  ;;  %v261_v17 = vld [vmem:[%s5797_s5 + $0x88] sm:$0xf] }
  0x1f   : > { %v263_v18 = vld [vmem:[%s5797_s5 + $0x90] sm:$0xf]  ;;  %v265_v19 = vld [vmem:[%s5797_s5 + $0x98] sm:$0xf]  ;;  %262 = vst [vmem:[%s5804_s6 + $0x44] sm:$0xf] %v261_v17 }
  0x20   : > { %264 = vst [vmem:[%s5804_s6 + $0x48] sm:$0xf] %v263_v18  ;;  %266 = vst [vmem:[%s5804_s6 + $0x4c] sm:$0xf] %v265_v19  ;;  %v267_v20 = vld [vmem:[%s5797_s5 + $0xa0] sm:$0xf] }
  0x21   : > { %v269_v21 = vld [vmem:[%s5797_s5 + $0xa8] sm:$0xf]  ;;  %v271_v22 = vld [vmem:[%s5797_s5 + $0xb0] sm:$0xf]  ;;  %268 = vst [vmem:[%s5804_s6 + $0x50] sm:$0xf] %v267_v20 }
  0x22   : > { %270 = vst [vmem:[%s5804_s6 + $0x54] sm:$0xf] %v269_v21  ;;  %272 = vst [vmem:[%s5804_s6 + $0x58] sm:$0xf] %v271_v22  ;;  %v273_v23 = vld [vmem:[%s5797_s5 + $0xb8] sm:$0xf] }
  0x23   : > { %v275_v24 = vld [vmem:[%s5797_s5 + $0xc0] sm:$0xf]  ;;  %v277_v25 = vld [vmem:[%s5797_s5 + $0xc8] sm:$0xf]  ;;  %274 = vst [vmem:[%s5804_s6 + $0x5c] sm:$0xf] %v273_v23 }
  0x24   : > { %276 = vst [vmem:[%s5804_s6 + $0x60] sm:$0xf] %v275_v24  ;;  %278 = vst [vmem:[%s5804_s6 + $0x64] sm:$0xf] %v277_v25  ;;  %v279_v26 = vld [vmem:[%s5797_s5 + $0xd0] sm:$0xf] }
  0x25   : > { %v281_v27 = vld [vmem:[%s5797_s5 + $0xd8] sm:$0xf]  ;;  %v283_v28 = vld [vmem:[%s5797_s5 + $0xe0] sm:$0xf]  ;;  %280 = vst [vmem:[%s5804_s6 + $0x68] sm:$0xf] %v279_v26 }
  0x26   : > { %282 = vst [vmem:[%s5804_s6 + $0x6c] sm:$0xf] %v281_v27  ;;  %284 = vst [vmem:[%s5804_s6 + $0x70] sm:$0xf] %v283_v28  ;;  %v285_v29 = vld [vmem:[%s5797_s5 + $0xe8] sm:$0xf] }
  0x27   : > { %v287_v30 = vld [vmem:[%s5797_s5 + $0xf0] sm:$0xf]  ;;  %v289_v31 = vld [vmem:[%s5797_s5 + $0xf8] sm:$0xf]  ;;  %286 = vst [vmem:[%s5804_s6 + $0x74] sm:$0xf] %v285_v29 }
  0x28   : > { %288 = vst [vmem:[%s5804_s6 + $0x78] sm:$0xf] %v287_v30  ;;  %290 = vst [vmem:[%s5804_s6 + $0x7c] sm:$0xf] %v289_v31  ;;  %v291_v32 = vld [vmem:[%s5797_s5 + $0x100] sm:$0xf] }
  0x29   : > { %v293_v33 = vld [vmem:[%s5797_s5 + $0x108] sm:$0xf]  ;;  %v295_v34 = vld [vmem:[%s5797_s5 + $0x110] sm:$0xf]  ;;  %292 = vst [vmem:[%s5804_s6 + $0x80] sm:$0xf] %v291_v32 }
  0x2a   : > { %294 = vst [vmem:[%s5804_s6 + $0x84] sm:$0xf] %v293_v33  ;;  %296 = vst [vmem:[%s5804_s6 + $0x88] sm:$0xf] %v295_v34  ;;  %v297_v35 = vld [vmem:[%s5797_s5 + $0x118] sm:$0xf] }
  0x2b   : > { %v299_v36 = vld [vmem:[%s5797_s5 + $0x120] sm:$0xf]  ;;  %v301_v37 = vld [vmem:[%s5797_s5 + $0x128] sm:$0xf]  ;;  %298 = vst [vmem:[%s5804_s6 + $0x8c] sm:$0xf] %v297_v35 }
  0x2c   : > { %300 = vst [vmem:[%s5804_s6 + $0x90] sm:$0xf] %v299_v36  ;;  %302 = vst [vmem:[%s5804_s6 + $0x94] sm:$0xf] %v301_v37  ;;  %v303_v38 = vld [vmem:[%s5797_s5 + $0x130] sm:$0xf] }
  0x2d   : > { %v305_v39 = vld [vmem:[%s5797_s5 + $0x138] sm:$0xf]  ;;  %v307_v40 = vld [vmem:[%s5797_s5 + $0x140] sm:$0xf]  ;;  %304 = vst [vmem:[%s5804_s6 + $0x98] sm:$0xf] %v303_v38 }
  0x2e   : > { %306 = vst [vmem:[%s5804_s6 + $0x9c] sm:$0xf] %v305_v39  ;;  %308 = vst [vmem:[%s5804_s6 + $0xa0] sm:$0xf] %v307_v40  ;;  %v309_v41 = vld [vmem:[%s5797_s5 + $0x148] sm:$0xf] }
  0x2f   : > { %v311_v42 = vld [vmem:[%s5797_s5 + $0x150] sm:$0xf]  ;;  %v313_v43 = vld [vmem:[%s5797_s5 + $0x158] sm:$0xf]  ;;  %310 = vst [vmem:[%s5804_s6 + $0xa4] sm:$0xf] %v309_v41 }
  0x30   : > { %312 = vst [vmem:[%s5804_s6 + $0xa8] sm:$0xf] %v311_v42  ;;  %314 = vst [vmem:[%s5804_s6 + $0xac] sm:$0xf] %v313_v43  ;;  %v315_v44 = vld [vmem:[%s5797_s5 + $0x160] sm:$0xf] }
  0x31   : > { %v317_v45 = vld [vmem:[%s5797_s5 + $0x168] sm:$0xf]  ;;  %v319_v46 = vld [vmem:[%s5797_s5 + $0x170] sm:$0xf]  ;;  %316 = vst [vmem:[%s5804_s6 + $0xb0] sm:$0xf] %v315_v44 }
  0x32   : > { %318 = vst [vmem:[%s5804_s6 + $0xb4] sm:$0xf] %v317_v45  ;;  %320 = vst [vmem:[%s5804_s6 + $0xb8] sm:$0xf] %v319_v46  ;;  %v321_v47 = vld [vmem:[%s5797_s5 + $0x178] sm:$0xf] }
  0x33   : > { %v323_v48 = vld [vmem:[%s5797_s5 + $0x180] sm:$0xf]  ;;  %v325_v49 = vld [vmem:[%s5797_s5 + $0x188] sm:$0xf]  ;;  %322 = vst [vmem:[%s5804_s6 + $0xbc] sm:$0xf] %v321_v47 }
  0x34   : > { %324 = vst [vmem:[%s5804_s6 + $0xc0] sm:$0xf] %v323_v48  ;;  %326 = vst [vmem:[%s5804_s6 + $0xc4] sm:$0xf] %v325_v49  ;;  %v327_v50 = vld [vmem:[%s5797_s5 + $0x190] sm:$0xf] }
  0x35   : > { %v329_v51 = vld [vmem:[%s5797_s5 + $0x198] sm:$0xf]  ;;  %v331_v52 = vld [vmem:[%s5797_s5 + $0x1a0] sm:$0xf]  ;;  %328 = vst [vmem:[%s5804_s6 + $0xc8] sm:$0xf] %v327_v50 }
  0x36   : > { %330 = vst [vmem:[%s5804_s6 + $0xcc] sm:$0xf] %v329_v51  ;;  %332 = vst [vmem:[%s5804_s6 + $0xd0] sm:$0xf] %v331_v52  ;;  %v333_v53 = vld [vmem:[%s5797_s5 + $0x1a8] sm:$0xf] }
  0x37   : > { %v335_v54 = vld [vmem:[%s5797_s5 + $0x1b0] sm:$0xf]  ;;  %v337_v55 = vld [vmem:[%s5797_s5 + $0x1b8] sm:$0xf]  ;;  %334 = vst [vmem:[%s5804_s6 + $0xd4] sm:$0xf] %v333_v53 }
  0x38   : > { %336 = vst [vmem:[%s5804_s6 + $0xd8] sm:$0xf] %v335_v54  ;;  %338 = vst [vmem:[%s5804_s6 + $0xdc] sm:$0xf] %v337_v55  ;;  %v339_v56 = vld [vmem:[%s5797_s5 + $0x1c0] sm:$0xf] }
  0x39   : > { %v341_v57 = vld [vmem:[%s5797_s5 + $0x1c8] sm:$0xf]  ;;  %v343_v58 = vld [vmem:[%s5797_s5 + $0x1d0] sm:$0xf]  ;;  %340 = vst [vmem:[%s5804_s6 + $0xe0] sm:$0xf] %v339_v56 }
  0x3a   : > { %342 = vst [vmem:[%s5804_s6 + $0xe4] sm:$0xf] %v341_v57  ;;  %344 = vst [vmem:[%s5804_s6 + $0xe8] sm:$0xf] %v343_v58  ;;  %v345_v59 = vld [vmem:[%s5797_s5 + $0x1d8] sm:$0xf] }
  0x3b   : > { %v347_v60 = vld [vmem:[%s5797_s5 + $0x1e0] sm:$0xf]  ;;  %v349_v61 = vld [vmem:[%s5797_s5 + $0x1e8] sm:$0xf]  ;;  %346 = vst [vmem:[%s5804_s6 + $0xec] sm:$0xf] %v345_v59 }
  0x3c   : > { %348 = vst [vmem:[%s5804_s6 + $0xf0] sm:$0xf] %v347_v60  ;;  %350 = vst [vmem:[%s5804_s6 + $0xf4] sm:$0xf] %v349_v61  ;;  %v351_v62 = vld [vmem:[%s5797_s5 + $0x1f0] sm:$0xf] }
  0x3d   : > { %v353_v63 = vld [vmem:[%s5797_s5 + $0x1f8] sm:$0xf]  ;;  %v355_v0 = vld [vmem:[%s5797_s5 + $0x200] sm:$0xf]  ;;  %352 = vst [vmem:[%s5804_s6 + $0xf8] sm:$0xf] %v351_v62 }
  0x3e   : > { %354 = vst [vmem:[%s5804_s6 + $0xfc] sm:$0xf] %v353_v63  ;;  %356 = vst [vmem:[%s5804_s6 + $0x100] sm:$0xf] %v355_v0  ;;  %v357_v1 = vld [vmem:[%s5797_s5 + $0x208] sm:$0xf] }
  0x3f   : > { %v359_v2 = vld [vmem:[%s5797_s5 + $0x210] sm:$0xf]  ;;  %v361_v3 = vld [vmem:[%s5797_s5 + $0x218] sm:$0xf]  ;;  %358 = vst [vmem:[%s5804_s6 + $0x104] sm:$0xf] %v357_v1 }
  0x40   : > { %360 = vst [vmem:[%s5804_s6 + $0x108] sm:$0xf] %v359_v2  ;;  %362 = vst [vmem:[%s5804_s6 + $0x10c] sm:$0xf] %v361_v3  ;;  %v363_v4 = vld [vmem:[%s5797_s5 + $0x220] sm:$0xf] }
  0x41   : > { %v365_v5 = vld [vmem:[%s5797_s5 + $0x228] sm:$0xf]  ;;  %v367_v6 = vld [vmem:[%s5797_s5 + $0x230] sm:$0xf]  ;;  %364 = vst [vmem:[%s5804_s6 + $0x110] sm:$0xf] %v363_v4 }
  0x42   : > { %366 = vst [vmem:[%s5804_s6 + $0x114] sm:$0xf] %v365_v5  ;;  %368 = vst [vmem:[%s5804_s6 + $0x118] sm:$0xf] %v367_v6  ;;  %v369_v7 = vld [vmem:[%s5797_s5 + $0x238] sm:$0xf] }
  0x43   : > { %v371_v8 = vld [vmem:[%s5797_s5 + $0x240] sm:$0xf]  ;;  %v373_v9 = vld [vmem:[%s5797_s5 + $0x248] sm:$0xf]  ;;  %370 = vst [vmem:[%s5804_s6 + $0x11c] sm:$0xf] %v369_v7 }
  0x44   : > { %372 = vst [vmem:[%s5804_s6 + $0x120] sm:$0xf] %v371_v8  ;;  %374 = vst [vmem:[%s5804_s6 + $0x124] sm:$0xf] %v373_v9  ;;  %v375_v10 = vld [vmem:[%s5797_s5 + $0x250] sm:$0xf] }
  0x45   : > { %v377_v11 = vld [vmem:[%s5797_s5 + $0x258] sm:$0xf]  ;;  %v379_v12 = vld [vmem:[%s5797_s5 + $0x260] sm:$0xf]  ;;  %376 = vst [vmem:[%s5804_s6 + $0x128] sm:$0xf] %v375_v10 }
  0x46   : > { %378 = vst [vmem:[%s5804_s6 + $0x12c] sm:$0xf] %v377_v11  ;;  %380 = vst [vmem:[%s5804_s6 + $0x130] sm:$0xf] %v379_v12  ;;  %v381_v13 = vld [vmem:[%s5797_s5 + $0x268] sm:$0xf] }
  0x47   : > { %v383_v14 = vld [vmem:[%s5797_s5 + $0x270] sm:$0xf]  ;;  %v385_v15 = vld [vmem:[%s5797_s5 + $0x278] sm:$0xf]  ;;  %382 = vst [vmem:[%s5804_s6 + $0x134] sm:$0xf] %v381_v13 }
  0x48   : > { %384 = vst [vmem:[%s5804_s6 + $0x138] sm:$0xf] %v383_v14  ;;  %386 = vst [vmem:[%s5804_s6 + $0x13c] sm:$0xf] %v385_v15  ;;  %v387_v16 = vld [vmem:[%s5797_s5 + $0x280] sm:$0xf] }
  0x49   : > { %v389_v17 = vld [vmem:[%s5797_s5 + $0x288] sm:$0xf]  ;;  %v391_v18 = vld [vmem:[%s5797_s5 + $0x290] sm:$0xf]  ;;  %388 = vst [vmem:[%s5804_s6 + $0x140] sm:$0xf] %v387_v16 }
  0x4a   : > { %390 = vst [vmem:[%s5804_s6 + $0x144] sm:$0xf] %v389_v17  ;;  %392 = vst [vmem:[%s5804_s6 + $0x148] sm:$0xf] %v391_v18  ;;  %v393_v19 = vld [vmem:[%s5797_s5 + $0x298] sm:$0xf] }
  0x4b   : > { %v395_v20 = vld [vmem:[%s5797_s5 + $0x2a0] sm:$0xf]  ;;  %v397_v21 = vld [vmem:[%s5797_s5 + $0x2a8] sm:$0xf]  ;;  %394 = vst [vmem:[%s5804_s6 + $0x14c] sm:$0xf] %v393_v19 }
  0x4c   : > { %396 = vst [vmem:[%s5804_s6 + $0x150] sm:$0xf] %v395_v20  ;;  %398 = vst [vmem:[%s5804_s6 + $0x154] sm:$0xf] %v397_v21  ;;  %v399_v22 = vld [vmem:[%s5797_s5 + $0x2b0] sm:$0xf] }
  0x4d   : > { %v401_v23 = vld [vmem:[%s5797_s5 + $0x2b8] sm:$0xf]  ;;  %v403_v24 = vld [vmem:[%s5797_s5 + $0x2c0] sm:$0xf]  ;;  %400 = vst [vmem:[%s5804_s6 + $0x158] sm:$0xf] %v399_v22 }
  0x4e   : > { %402 = vst [vmem:[%s5804_s6 + $0x15c] sm:$0xf] %v401_v23  ;;  %404 = vst [vmem:[%s5804_s6 + $0x160] sm:$0xf] %v403_v24  ;;  %v405_v25 = vld [vmem:[%s5797_s5 + $0x2c8] sm:$0xf] }
  0x4f   : > { %v407_v26 = vld [vmem:[%s5797_s5 + $0x2d0] sm:$0xf]  ;;  %v409_v27 = vld [vmem:[%s5797_s5 + $0x2d8] sm:$0xf]  ;;  %406 = vst [vmem:[%s5804_s6 + $0x164] sm:$0xf] %v405_v25 }
  0x50   : > { %408 = vst [vmem:[%s5804_s6 + $0x168] sm:$0xf] %v407_v26  ;;  %410 = vst [vmem:[%s5804_s6 + $0x16c] sm:$0xf] %v409_v27  ;;  %v411_v28 = vld [vmem:[%s5797_s5 + $0x2e0] sm:$0xf] }
  0x51   : > { %v413_v29 = vld [vmem:[%s5797_s5 + $0x2e8] sm:$0xf]  ;;  %v415_v30 = vld [vmem:[%s5797_s5 + $0x2f0] sm:$0xf]  ;;  %412 = vst [vmem:[%s5804_s6 + $0x170] sm:$0xf] %v411_v28 }
  0x52   : > { %414 = vst [vmem:[%s5804_s6 + $0x174] sm:$0xf] %v413_v29  ;;  %416 = vst [vmem:[%s5804_s6 + $0x178] sm:$0xf] %v415_v30  ;;  %v417_v31 = vld [vmem:[%s5797_s5 + $0x2f8] sm:$0xf] }
  0x53   : > { %v419_v32 = vld [vmem:[%s5797_s5 + $0x300] sm:$0xf]  ;;  %v421_v33 = vld [vmem:[%s5797_s5 + $0x308] sm:$0xf]  ;;  %418 = vst [vmem:[%s5804_s6 + $0x17c] sm:$0xf] %v417_v31 }
  0x54   : > { %420 = vst [vmem:[%s5804_s6 + $0x180] sm:$0xf] %v419_v32  ;;  %422 = vst [vmem:[%s5804_s6 + $0x184] sm:$0xf] %v421_v33  ;;  %v423_v34 = vld [vmem:[%s5797_s5 + $0x310] sm:$0xf] }
  0x55   : > { %v425_v35 = vld [vmem:[%s5797_s5 + $0x318] sm:$0xf]  ;;  %v427_v36 = vld [vmem:[%s5797_s5 + $0x320] sm:$0xf]  ;;  %424 = vst [vmem:[%s5804_s6 + $0x188] sm:$0xf] %v423_v34 }
  0x56   : > { %426 = vst [vmem:[%s5804_s6 + $0x18c] sm:$0xf] %v425_v35  ;;  %428 = vst [vmem:[%s5804_s6 + $0x190] sm:$0xf] %v427_v36  ;;  %v429_v37 = vld [vmem:[%s5797_s5 + $0x328] sm:$0xf] }
  0x57   : > { %v431_v38 = vld [vmem:[%s5797_s5 + $0x330] sm:$0xf]  ;;  %v433_v39 = vld [vmem:[%s5797_s5 + $0x338] sm:$0xf]  ;;  %430 = vst [vmem:[%s5804_s6 + $0x194] sm:$0xf] %v429_v37 }
  0x58   : > { %432 = vst [vmem:[%s5804_s6 + $0x198] sm:$0xf] %v431_v38  ;;  %434 = vst [vmem:[%s5804_s6 + $0x19c] sm:$0xf] %v433_v39  ;;  %v435_v40 = vld [vmem:[%s5797_s5 + $0x340] sm:$0xf] }
  0x59   : > { %v437_v41 = vld [vmem:[%s5797_s5 + $0x348] sm:$0xf]  ;;  %v439_v42 = vld [vmem:[%s5797_s5 + $0x350] sm:$0xf]  ;;  %436 = vst [vmem:[%s5804_s6 + $0x1a0] sm:$0xf] %v435_v40 }
  0x5a   : > { %438 = vst [vmem:[%s5804_s6 + $0x1a4] sm:$0xf] %v437_v41  ;;  %440 = vst [vmem:[%s5804_s6 + $0x1a8] sm:$0xf] %v439_v42  ;;  %v441_v43 = vld [vmem:[%s5797_s5 + $0x358] sm:$0xf] }
  0x5b   : > { %v443_v44 = vld [vmem:[%s5797_s5 + $0x360] sm:$0xf]  ;;  %v445_v45 = vld [vmem:[%s5797_s5 + $0x368] sm:$0xf]  ;;  %442 = vst [vmem:[%s5804_s6 + $0x1ac] sm:$0xf] %v441_v43 }
  0x5c   : > { %444 = vst [vmem:[%s5804_s6 + $0x1b0] sm:$0xf] %v443_v44  ;;  %446 = vst [vmem:[%s5804_s6 + $0x1b4] sm:$0xf] %v445_v45  ;;  %v447_v46 = vld [vmem:[%s5797_s5 + $0x370] sm:$0xf] }
  0x5d   : > { %v449_v47 = vld [vmem:[%s5797_s5 + $0x378] sm:$0xf]  ;;  %v451_v48 = vld [vmem:[%s5797_s5 + $0x380] sm:$0xf]  ;;  %448 = vst [vmem:[%s5804_s6 + $0x1b8] sm:$0xf] %v447_v46 }
  0x5e   : > { %450 = vst [vmem:[%s5804_s6 + $0x1bc] sm:$0xf] %v449_v47  ;;  %452 = vst [vmem:[%s5804_s6 + $0x1c0] sm:$0xf] %v451_v48  ;;  %v453_v49 = vld [vmem:[%s5797_s5 + $0x388] sm:$0xf] }
  0x5f   : > { %v455_v50 = vld [vmem:[%s5797_s5 + $0x390] sm:$0xf]  ;;  %v457_v51 = vld [vmem:[%s5797_s5 + $0x398] sm:$0xf]  ;;  %454 = vst [vmem:[%s5804_s6 + $0x1c4] sm:$0xf] %v453_v49 }
  0x60   : > { %456 = vst [vmem:[%s5804_s6 + $0x1c8] sm:$0xf] %v455_v50  ;;  %458 = vst [vmem:[%s5804_s6 + $0x1cc] sm:$0xf] %v457_v51  ;;  %v459_v52 = vld [vmem:[%s5797_s5 + $0x3a0] sm:$0xf] }
  0x61   : > { %v461_v53 = vld [vmem:[%s5797_s5 + $0x3a8] sm:$0xf]  ;;  %v463_v54 = vld [vmem:[%s5797_s5 + $0x3b0] sm:$0xf]  ;;  %460 = vst [vmem:[%s5804_s6 + $0x1d0] sm:$0xf] %v459_v52 }
  0x62   : > { %462 = vst [vmem:[%s5804_s6 + $0x1d4] sm:$0xf] %v461_v53  ;;  %464 = vst [vmem:[%s5804_s6 + $0x1d8] sm:$0xf] %v463_v54  ;;  %v465_v55 = vld [vmem:[%s5797_s5 + $0x3b8] sm:$0xf] }
  0x63   : > { %v467_v56 = vld [vmem:[%s5797_s5 + $0x3c0] sm:$0xf]  ;;  %v469_v57 = vld [vmem:[%s5797_s5 + $0x3c8] sm:$0xf]  ;;  %466 = vst [vmem:[%s5804_s6 + $0x1dc] sm:$0xf] %v465_v55 }
  0x64   : > { %468 = vst [vmem:[%s5804_s6 + $0x1e0] sm:$0xf] %v467_v56  ;;  %470 = vst [vmem:[%s5804_s6 + $0x1e4] sm:$0xf] %v469_v57  ;;  %v471_v58 = vld [vmem:[%s5797_s5 + $0x3d0] sm:$0xf] }
  0x65   : > { %v473_v59 = vld [vmem:[%s5797_s5 + $0x3d8] sm:$0xf]  ;;  %v475_v60 = vld [vmem:[%s5797_s5 + $0x3e0] sm:$0xf]  ;;  %472 = vst [vmem:[%s5804_s6 + $0x1e8] sm:$0xf] %v471_v58 }
  0x66   : > { %474 = vst [vmem:[%s5804_s6 + $0x1ec] sm:$0xf] %v473_v59  ;;  %476 = vst [vmem:[%s5804_s6 + $0x1f0] sm:$0xf] %v475_v60  ;;  %v477_v61 = vld [vmem:[%s5797_s5 + $0x3e8] sm:$0xf] }
  0x67   : > { %v479_v62 = vld [vmem:[%s5797_s5 + $0x3f0] sm:$0xf]  ;;  %v481_v63 = vld [vmem:[%s5797_s5 + $0x3f8] sm:$0xf]  ;;  %478 = vst [vmem:[%s5804_s6 + $0x1f4] sm:$0xf] %v477_v61 }
  0x68   : > { %480 = vst [vmem:[%s5804_s6 + $0x1f8] sm:$0xf] %v479_v62  ;;  %482 = vst [vmem:[%s5804_s6 + $0x1fc] sm:$0xf] %v481_v63  ;;  %v483_v0 = vld [vmem:[%s5797_s5 + $0x400] sm:$0xf] }
  0x69   : > { %v485_v1 = vld [vmem:[%s5797_s5 + $0x408] sm:$0xf]  ;;  %v487_v2 = vld [vmem:[%s5797_s5 + $0x410] sm:$0xf]  ;;  %484 = vst [vmem:[%s5804_s6 + $0x200] sm:$0xf] %v483_v0 }
  0x6a   : > { %486 = vst [vmem:[%s5804_s6 + $0x204] sm:$0xf] %v485_v1  ;;  %488 = vst [vmem:[%s5804_s6 + $0x208] sm:$0xf] %v487_v2  ;;  %v489_v3 = vld [vmem:[%s5797_s5 + $0x418] sm:$0xf] }
  0x6b   : > { %v491_v4 = vld [vmem:[%s5797_s5 + $0x420] sm:$0xf]  ;;  %v493_v5 = vld [vmem:[%s5797_s5 + $0x428] sm:$0xf]  ;;  %490 = vst [vmem:[%s5804_s6 + $0x20c] sm:$0xf] %v489_v3 }
  0x6c   : > { %492 = vst [vmem:[%s5804_s6 + $0x210] sm:$0xf] %v491_v4  ;;  %494 = vst [vmem:[%s5804_s6 + $0x214] sm:$0xf] %v493_v5  ;;  %v495_v6 = vld [vmem:[%s5797_s5 + $0x430] sm:$0xf] }
  0x6d   : > { %v497_v7 = vld [vmem:[%s5797_s5 + $0x438] sm:$0xf]  ;;  %v499_v8 = vld [vmem:[%s5797_s5 + $0x440] sm:$0xf]  ;;  %496 = vst [vmem:[%s5804_s6 + $0x218] sm:$0xf] %v495_v6 }
  0x6e   : > { %498 = vst [vmem:[%s5804_s6 + $0x21c] sm:$0xf] %v497_v7  ;;  %500 = vst [vmem:[%s5804_s6 + $0x220] sm:$0xf] %v499_v8  ;;  %v501_v9 = vld [vmem:[%s5797_s5 + $0x448] sm:$0xf] }
  0x6f   : > { %v503_v10 = vld [vmem:[%s5797_s5 + $0x450] sm:$0xf]  ;;  %v505_v11 = vld [vmem:[%s5797_s5 + $0x458] sm:$0xf]  ;;  %502 = vst [vmem:[%s5804_s6 + $0x224] sm:$0xf] %v501_v9 }
  0x70   : > { %504 = vst [vmem:[%s5804_s6 + $0x228] sm:$0xf] %v503_v10  ;;  %506 = vst [vmem:[%s5804_s6 + $0x22c] sm:$0xf] %v505_v11  ;;  %v507_v12 = vld [vmem:[%s5797_s5 + $0x460] sm:$0xf] }
  0x71   : > { %v509_v13 = vld [vmem:[%s5797_s5 + $0x468] sm:$0xf]  ;;  %v511_v14 = vld [vmem:[%s5797_s5 + $0x470] sm:$0xf]  ;;  %508 = vst [vmem:[%s5804_s6 + $0x230] sm:$0xf] %v507_v12 }
  0x72   : > { %510 = vst [vmem:[%s5804_s6 + $0x234] sm:$0xf] %v509_v13  ;;  %512 = vst [vmem:[%s5804_s6 + $0x238] sm:$0xf] %v511_v14  ;;  %v513_v15 = vld [vmem:[%s5797_s5 + $0x478] sm:$0xf] }
  0x73   : > { %v515_v16 = vld [vmem:[%s5797_s5 + $0x480] sm:$0xf]  ;;  %v517_v17 = vld [vmem:[%s5797_s5 + $0x488] sm:$0xf]  ;;  %514 = vst [vmem:[%s5804_s6 + $0x23c] sm:$0xf] %v513_v15 }
  0x74   : > { %516 = vst [vmem:[%s5804_s6 + $0x240] sm:$0xf] %v515_v16  ;;  %518 = vst [vmem:[%s5804_s6 + $0x244] sm:$0xf] %v517_v17  ;;  %v519_v18 = vld [vmem:[%s5797_s5 + $0x490] sm:$0xf] }
  0x75   : > { %v521_v19 = vld [vmem:[%s5797_s5 + $0x498] sm:$0xf]  ;;  %v523_v20 = vld [vmem:[%s5797_s5 + $0x4a0] sm:$0xf]  ;;  %520 = vst [vmem:[%s5804_s6 + $0x248] sm:$0xf] %v519_v18 }
  0x76   : > { %522 = vst [vmem:[%s5804_s6 + $0x24c] sm:$0xf] %v521_v19  ;;  %524 = vst [vmem:[%s5804_s6 + $0x250] sm:$0xf] %v523_v20  ;;  %v525_v21 = vld [vmem:[%s5797_s5 + $0x4a8] sm:$0xf] }
  0x77   : > { %v527_v22 = vld [vmem:[%s5797_s5 + $0x4b0] sm:$0xf]  ;;  %v529_v23 = vld [vmem:[%s5797_s5 + $0x4b8] sm:$0xf]  ;;  %526 = vst [vmem:[%s5804_s6 + $0x254] sm:$0xf] %v525_v21 }
  0x78   : > { %528 = vst [vmem:[%s5804_s6 + $0x258] sm:$0xf] %v527_v22  ;;  %530 = vst [vmem:[%s5804_s6 + $0x25c] sm:$0xf] %v529_v23  ;;  %v531_v24 = vld [vmem:[%s5797_s5 + $0x4c0] sm:$0xf] }
  0x79   : > { %v533_v25 = vld [vmem:[%s5797_s5 + $0x4c8] sm:$0xf]  ;;  %v535_v26 = vld [vmem:[%s5797_s5 + $0x4d0] sm:$0xf]  ;;  %532 = vst [vmem:[%s5804_s6 + $0x260] sm:$0xf] %v531_v24 }
  0x7a   : > { %534 = vst [vmem:[%s5804_s6 + $0x264] sm:$0xf] %v533_v25  ;;  %536 = vst [vmem:[%s5804_s6 + $0x268] sm:$0xf] %v535_v26  ;;  %v537_v27 = vld [vmem:[%s5797_s5 + $0x4d8] sm:$0xf] }
  0x7b   : > { %v539_v28 = vld [vmem:[%s5797_s5 + $0x4e0] sm:$0xf]  ;;  %v541_v29 = vld [vmem:[%s5797_s5 + $0x4e8] sm:$0xf]  ;;  %538 = vst [vmem:[%s5804_s6 + $0x26c] sm:$0xf] %v537_v27 }
  0x7c   : > { %540 = vst [vmem:[%s5804_s6 + $0x270] sm:$0xf] %v539_v28  ;;  %542 = vst [vmem:[%s5804_s6 + $0x274] sm:$0xf] %v541_v29  ;;  %v543_v30 = vld [vmem:[%s5797_s5 + $0x4f0] sm:$0xf] }
  0x7d   : > { %v545_v31 = vld [vmem:[%s5797_s5 + $0x4f8] sm:$0xf]  ;;  %v547_v32 = vld [vmem:[%s5797_s5 + $0x500] sm:$0xf]  ;;  %544 = vst [vmem:[%s5804_s6 + $0x278] sm:$0xf] %v543_v30 }
  0x7e   : > { %546 = vst [vmem:[%s5804_s6 + $0x27c] sm:$0xf] %v545_v31  ;;  %548 = vst [vmem:[%s5804_s6 + $0x280] sm:$0xf] %v547_v32  ;;  %v549_v33 = vld [vmem:[%s5797_s5 + $0x508] sm:$0xf] }
  0x7f   : > { %v551_v34 = vld [vmem:[%s5797_s5 + $0x510] sm:$0xf]  ;;  %v553_v35 = vld [vmem:[%s5797_s5 + $0x518] sm:$0xf]  ;;  %550 = vst [vmem:[%s5804_s6 + $0x284] sm:$0xf] %v549_v33 }
  0x80   : > { %552 = vst [vmem:[%s5804_s6 + $0x288] sm:$0xf] %v551_v34  ;;  %554 = vst [vmem:[%s5804_s6 + $0x28c] sm:$0xf] %v553_v35  ;;  %v555_v36 = vld [vmem:[%s5797_s5 + $0x520] sm:$0xf] }
  0x81   : > { %v557_v37 = vld [vmem:[%s5797_s5 + $0x528] sm:$0xf]  ;;  %v559_v38 = vld [vmem:[%s5797_s5 + $0x530] sm:$0xf]  ;;  %556 = vst [vmem:[%s5804_s6 + $0x290] sm:$0xf] %v555_v36 }
  0x82   : > { %558 = vst [vmem:[%s5804_s6 + $0x294] sm:$0xf] %v557_v37  ;;  %560 = vst [vmem:[%s5804_s6 + $0x298] sm:$0xf] %v559_v38  ;;  %v561_v39 = vld [vmem:[%s5797_s5 + $0x538] sm:$0xf] }
  0x83   : > { %v563_v40 = vld [vmem:[%s5797_s5 + $0x540] sm:$0xf]  ;;  %v565_v41 = vld [vmem:[%s5797_s5 + $0x548] sm:$0xf]  ;;  %562 = vst [vmem:[%s5804_s6 + $0x29c] sm:$0xf] %v561_v39 }
  0x84   : > { %564 = vst [vmem:[%s5804_s6 + $0x2a0] sm:$0xf] %v563_v40  ;;  %566 = vst [vmem:[%s5804_s6 + $0x2a4] sm:$0xf] %v565_v41  ;;  %v567_v42 = vld [vmem:[%s5797_s5 + $0x550] sm:$0xf] }
  0x85   : > { %v569_v43 = vld [vmem:[%s5797_s5 + $0x558] sm:$0xf]  ;;  %v571_v44 = vld [vmem:[%s5797_s5 + $0x560] sm:$0xf]  ;;  %568 = vst [vmem:[%s5804_s6 + $0x2a8] sm:$0xf] %v567_v42 }
  0x86   : > { %570 = vst [vmem:[%s5804_s6 + $0x2ac] sm:$0xf] %v569_v43  ;;  %572 = vst [vmem:[%s5804_s6 + $0x2b0] sm:$0xf] %v571_v44  ;;  %v573_v45 = vld [vmem:[%s5797_s5 + $0x568] sm:$0xf] }
  0x87   : > { %v575_v46 = vld [vmem:[%s5797_s5 + $0x570] sm:$0xf]  ;;  %v577_v47 = vld [vmem:[%s5797_s5 + $0x578] sm:$0xf]  ;;  %574 = vst [vmem:[%s5804_s6 + $0x2b4] sm:$0xf] %v573_v45 }
  0x88   : > { %576 = vst [vmem:[%s5804_s6 + $0x2b8] sm:$0xf] %v575_v46  ;;  %578 = vst [vmem:[%s5804_s6 + $0x2bc] sm:$0xf] %v577_v47  ;;  %v579_v48 = vld [vmem:[%s5797_s5 + $0x580] sm:$0xf] }
  0x89   : > { %v581_v49 = vld [vmem:[%s5797_s5 + $0x588] sm:$0xf]  ;;  %v583_v50 = vld [vmem:[%s5797_s5 + $0x590] sm:$0xf]  ;;  %580 = vst [vmem:[%s5804_s6 + $0x2c0] sm:$0xf] %v579_v48 }
  0x8a   : > { %582 = vst [vmem:[%s5804_s6 + $0x2c4] sm:$0xf] %v581_v49  ;;  %584 = vst [vmem:[%s5804_s6 + $0x2c8] sm:$0xf] %v583_v50  ;;  %v585_v51 = vld [vmem:[%s5797_s5 + $0x598] sm:$0xf] }
  0x8b   : > { %v587_v52 = vld [vmem:[%s5797_s5 + $0x5a0] sm:$0xf]  ;;  %v589_v53 = vld [vmem:[%s5797_s5 + $0x5a8] sm:$0xf]  ;;  %586 = vst [vmem:[%s5804_s6 + $0x2cc] sm:$0xf] %v585_v51 }
  0x8c   : > { %588 = vst [vmem:[%s5804_s6 + $0x2d0] sm:$0xf] %v587_v52  ;;  %590 = vst [vmem:[%s5804_s6 + $0x2d4] sm:$0xf] %v589_v53  ;;  %v591_v54 = vld [vmem:[%s5797_s5 + $0x5b0] sm:$0xf] }
  0x8d   : > { %v593_v55 = vld [vmem:[%s5797_s5 + $0x5b8] sm:$0xf]  ;;  %v595_v56 = vld [vmem:[%s5797_s5 + $0x5c0] sm:$0xf]  ;;  %592 = vst [vmem:[%s5804_s6 + $0x2d8] sm:$0xf] %v591_v54 }
  0x8e   : > { %594 = vst [vmem:[%s5804_s6 + $0x2dc] sm:$0xf] %v593_v55  ;;  %596 = vst [vmem:[%s5804_s6 + $0x2e0] sm:$0xf] %v595_v56  ;;  %v597_v57 = vld [vmem:[%s5797_s5 + $0x5c8] sm:$0xf] }
  0x8f   : > { %v599_v58 = vld [vmem:[%s5797_s5 + $0x5d0] sm:$0xf]  ;;  %v601_v59 = vld [vmem:[%s5797_s5 + $0x5d8] sm:$0xf]  ;;  %598 = vst [vmem:[%s5804_s6 + $0x2e4] sm:$0xf] %v597_v57 }
  0x90   : > { %600 = vst [vmem:[%s5804_s6 + $0x2e8] sm:$0xf] %v599_v58  ;;  %602 = vst [vmem:[%s5804_s6 + $0x2ec] sm:$0xf] %v601_v59  ;;  %v603_v60 = vld [vmem:[%s5797_s5 + $0x5e0] sm:$0xf] }
  0x91   : > { %v605_v61 = vld [vmem:[%s5797_s5 + $0x5e8] sm:$0xf]  ;;  %v607_v62 = vld [vmem:[%s5797_s5 + $0x5f0] sm:$0xf]  ;;  %604 = vst [vmem:[%s5804_s6 + $0x2f0] sm:$0xf] %v603_v60 }
  0x92   : > { %606 = vst [vmem:[%s5804_s6 + $0x2f4] sm:$0xf] %v605_v61  ;;  %608 = vst [vmem:[%s5804_s6 + $0x2f8] sm:$0xf] %v607_v62  ;;  %v609_v63 = vld [vmem:[%s5797_s5 + $0x5f8] sm:$0xf] }
  0x93   : > { %v611_v0 = vld [vmem:[%s5797_s5 + $0x600] sm:$0xf]  ;;  %v613_v1 = vld [vmem:[%s5797_s5 + $0x608] sm:$0xf]  ;;  %610 = vst [vmem:[%s5804_s6 + $0x2fc] sm:$0xf] %v609_v63 }
  0x94   : > { %612 = vst [vmem:[%s5804_s6 + $0x300] sm:$0xf] %v611_v0  ;;  %614 = vst [vmem:[%s5804_s6 + $0x304] sm:$0xf] %v613_v1  ;;  %v615_v2 = vld [vmem:[%s5797_s5 + $0x610] sm:$0xf] }
  0x95   : > { %v617_v3 = vld [vmem:[%s5797_s5 + $0x618] sm:$0xf]  ;;  %v619_v4 = vld [vmem:[%s5797_s5 + $0x620] sm:$0xf]  ;;  %616 = vst [vmem:[%s5804_s6 + $0x308] sm:$0xf] %v615_v2 }
  0x96   : > { %618 = vst [vmem:[%s5804_s6 + $0x30c] sm:$0xf] %v617_v3  ;;  %620 = vst [vmem:[%s5804_s6 + $0x310] sm:$0xf] %v619_v4  ;;  %v621_v5 = vld [vmem:[%s5797_s5 + $0x628] sm:$0xf] }
  0x97   : > { %v623_v6 = vld [vmem:[%s5797_s5 + $0x630] sm:$0xf]  ;;  %v625_v7 = vld [vmem:[%s5797_s5 + $0x638] sm:$0xf]  ;;  %622 = vst [vmem:[%s5804_s6 + $0x314] sm:$0xf] %v621_v5 }
  0x98   : > { %624 = vst [vmem:[%s5804_s6 + $0x318] sm:$0xf] %v623_v6  ;;  %626 = vst [vmem:[%s5804_s6 + $0x31c] sm:$0xf] %v625_v7  ;;  %v627_v8 = vld [vmem:[%s5797_s5 + $0x640] sm:$0xf] }
  0x99   : > { %v629_v9 = vld [vmem:[%s5797_s5 + $0x648] sm:$0xf]  ;;  %v631_v10 = vld [vmem:[%s5797_s5 + $0x650] sm:$0xf]  ;;  %628 = vst [vmem:[%s5804_s6 + $0x320] sm:$0xf] %v627_v8 }
  0x9a   : > { %630 = vst [vmem:[%s5804_s6 + $0x324] sm:$0xf] %v629_v9  ;;  %632 = vst [vmem:[%s5804_s6 + $0x328] sm:$0xf] %v631_v10  ;;  %v633_v11 = vld [vmem:[%s5797_s5 + $0x658] sm:$0xf] }
  0x9b   : > { %v635_v12 = vld [vmem:[%s5797_s5 + $0x660] sm:$0xf]  ;;  %v637_v13 = vld [vmem:[%s5797_s5 + $0x668] sm:$0xf]  ;;  %634 = vst [vmem:[%s5804_s6 + $0x32c] sm:$0xf] %v633_v11 }
  0x9c   : > { %636 = vst [vmem:[%s5804_s6 + $0x330] sm:$0xf] %v635_v12  ;;  %638 = vst [vmem:[%s5804_s6 + $0x334] sm:$0xf] %v637_v13  ;;  %v639_v14 = vld [vmem:[%s5797_s5 + $0x670] sm:$0xf] }
  0x9d   : > { %v641_v15 = vld [vmem:[%s5797_s5 + $0x678] sm:$0xf]  ;;  %v643_v16 = vld [vmem:[%s5797_s5 + $0x680] sm:$0xf]  ;;  %640 = vst [vmem:[%s5804_s6 + $0x338] sm:$0xf] %v639_v14 }
  0x9e   : > { %642 = vst [vmem:[%s5804_s6 + $0x33c] sm:$0xf] %v641_v15  ;;  %644 = vst [vmem:[%s5804_s6 + $0x340] sm:$0xf] %v643_v16  ;;  %v645_v17 = vld [vmem:[%s5797_s5 + $0x688] sm:$0xf] }
  0x9f   : > { %v647_v18 = vld [vmem:[%s5797_s5 + $0x690] sm:$0xf]  ;;  %v649_v19 = vld [vmem:[%s5797_s5 + $0x698] sm:$0xf]  ;;  %646 = vst [vmem:[%s5804_s6 + $0x344] sm:$0xf] %v645_v17 }
  0xa0   : > { %648 = vst [vmem:[%s5804_s6 + $0x348] sm:$0xf] %v647_v18  ;;  %650 = vst [vmem:[%s5804_s6 + $0x34c] sm:$0xf] %v649_v19  ;;  %v651_v20 = vld [vmem:[%s5797_s5 + $0x6a0] sm:$0xf] }
  0xa1   : > { %v653_v21 = vld [vmem:[%s5797_s5 + $0x6a8] sm:$0xf]  ;;  %v655_v22 = vld [vmem:[%s5797_s5 + $0x6b0] sm:$0xf]  ;;  %652 = vst [vmem:[%s5804_s6 + $0x350] sm:$0xf] %v651_v20 }
  0xa2   : > { %654 = vst [vmem:[%s5804_s6 + $0x354] sm:$0xf] %v653_v21  ;;  %656 = vst [vmem:[%s5804_s6 + $0x358] sm:$0xf] %v655_v22  ;;  %v657_v23 = vld [vmem:[%s5797_s5 + $0x6b8] sm:$0xf] }
  0xa3   : > { %v659_v24 = vld [vmem:[%s5797_s5 + $0x6c0] sm:$0xf]  ;;  %v661_v25 = vld [vmem:[%s5797_s5 + $0x6c8] sm:$0xf]  ;;  %658 = vst [vmem:[%s5804_s6 + $0x35c] sm:$0xf] %v657_v23 }
  0xa4   : > { %660 = vst [vmem:[%s5804_s6 + $0x360] sm:$0xf] %v659_v24  ;;  %662 = vst [vmem:[%s5804_s6 + $0x364] sm:$0xf] %v661_v25  ;;  %v663_v26 = vld [vmem:[%s5797_s5 + $0x6d0] sm:$0xf] }
  0xa5   : > { %v665_v27 = vld [vmem:[%s5797_s5 + $0x6d8] sm:$0xf]  ;;  %v667_v28 = vld [vmem:[%s5797_s5 + $0x6e0] sm:$0xf]  ;;  %664 = vst [vmem:[%s5804_s6 + $0x368] sm:$0xf] %v663_v26 }
  0xa6   : > { %666 = vst [vmem:[%s5804_s6 + $0x36c] sm:$0xf] %v665_v27  ;;  %668 = vst [vmem:[%s5804_s6 + $0x370] sm:$0xf] %v667_v28  ;;  %v669_v29 = vld [vmem:[%s5797_s5 + $0x6e8] sm:$0xf] }
  0xa7   : > { %v671_v30 = vld [vmem:[%s5797_s5 + $0x6f0] sm:$0xf]  ;;  %v673_v31 = vld [vmem:[%s5797_s5 + $0x6f8] sm:$0xf]  ;;  %670 = vst [vmem:[%s5804_s6 + $0x374] sm:$0xf] %v669_v29 }
  0xa8   : > { %672 = vst [vmem:[%s5804_s6 + $0x378] sm:$0xf] %v671_v30  ;;  %674 = vst [vmem:[%s5804_s6 + $0x37c] sm:$0xf] %v673_v31  ;;  %v675_v32 = vld [vmem:[%s5797_s5 + $0x700] sm:$0xf] }
  0xa9   : > { %v677_v33 = vld [vmem:[%s5797_s5 + $0x708] sm:$0xf]  ;;  %v679_v34 = vld [vmem:[%s5797_s5 + $0x710] sm:$0xf]  ;;  %676 = vst [vmem:[%s5804_s6 + $0x380] sm:$0xf] %v675_v32 }
  0xaa   : > { %678 = vst [vmem:[%s5804_s6 + $0x384] sm:$0xf] %v677_v33  ;;  %680 = vst [vmem:[%s5804_s6 + $0x388] sm:$0xf] %v679_v34  ;;  %v681_v35 = vld [vmem:[%s5797_s5 + $0x718] sm:$0xf] }
  0xab   : > { %v683_v36 = vld [vmem:[%s5797_s5 + $0x720] sm:$0xf]  ;;  %v685_v37 = vld [vmem:[%s5797_s5 + $0x728] sm:$0xf]  ;;  %682 = vst [vmem:[%s5804_s6 + $0x38c] sm:$0xf] %v681_v35 }
  0xac   : > { %684 = vst [vmem:[%s5804_s6 + $0x390] sm:$0xf] %v683_v36  ;;  %686 = vst [vmem:[%s5804_s6 + $0x394] sm:$0xf] %v685_v37  ;;  %v687_v38 = vld [vmem:[%s5797_s5 + $0x730] sm:$0xf] }
  0xad   : > { %v689_v39 = vld [vmem:[%s5797_s5 + $0x738] sm:$0xf]  ;;  %v691_v40 = vld [vmem:[%s5797_s5 + $0x740] sm:$0xf]  ;;  %688 = vst [vmem:[%s5804_s6 + $0x398] sm:$0xf] %v687_v38 }
  0xae   : > { %690 = vst [vmem:[%s5804_s6 + $0x39c] sm:$0xf] %v689_v39  ;;  %692 = vst [vmem:[%s5804_s6 + $0x3a0] sm:$0xf] %v691_v40  ;;  %v693_v41 = vld [vmem:[%s5797_s5 + $0x748] sm:$0xf] }
  0xaf   : > { %v695_v42 = vld [vmem:[%s5797_s5 + $0x750] sm:$0xf]  ;;  %v697_v43 = vld [vmem:[%s5797_s5 + $0x758] sm:$0xf]  ;;  %694 = vst [vmem:[%s5804_s6 + $0x3a4] sm:$0xf] %v693_v41 }
  0xb0   : > { %696 = vst [vmem:[%s5804_s6 + $0x3a8] sm:$0xf] %v695_v42  ;;  %698 = vst [vmem:[%s5804_s6 + $0x3ac] sm:$0xf] %v697_v43  ;;  %v699_v44 = vld [vmem:[%s5797_s5 + $0x760] sm:$0xf] }
  0xb1   : > { %v701_v45 = vld [vmem:[%s5797_s5 + $0x768] sm:$0xf]  ;;  %v703_v46 = vld [vmem:[%s5797_s5 + $0x770] sm:$0xf]  ;;  %700 = vst [vmem:[%s5804_s6 + $0x3b0] sm:$0xf] %v699_v44 }
  0xb2   : > { %702 = vst [vmem:[%s5804_s6 + $0x3b4] sm:$0xf] %v701_v45  ;;  %704 = vst [vmem:[%s5804_s6 + $0x3b8] sm:$0xf] %v703_v46  ;;  %v705_v47 = vld [vmem:[%s5797_s5 + $0x778] sm:$0xf] }
  0xb3   : > { %v707_v48 = vld [vmem:[%s5797_s5 + $0x780] sm:$0xf]  ;;  %v709_v49 = vld [vmem:[%s5797_s5 + $0x788] sm:$0xf]  ;;  %706 = vst [vmem:[%s5804_s6 + $0x3bc] sm:$0xf] %v705_v47 }
  0xb4   : > { %708 = vst [vmem:[%s5804_s6 + $0x3c0] sm:$0xf] %v707_v48  ;;  %710 = vst [vmem:[%s5804_s6 + $0x3c4] sm:$0xf] %v709_v49  ;;  %v711_v50 = vld [vmem:[%s5797_s5 + $0x790] sm:$0xf] }
  0xb5   : > { %v713_v51 = vld [vmem:[%s5797_s5 + $0x798] sm:$0xf]  ;;  %v715_v52 = vld [vmem:[%s5797_s5 + $0x7a0] sm:$0xf]  ;;  %712 = vst [vmem:[%s5804_s6 + $0x3c8] sm:$0xf] %v711_v50 }
  0xb6   : > { %714 = vst [vmem:[%s5804_s6 + $0x3cc] sm:$0xf] %v713_v51  ;;  %716 = vst [vmem:[%s5804_s6 + $0x3d0] sm:$0xf] %v715_v52  ;;  %v717_v53 = vld [vmem:[%s5797_s5 + $0x7a8] sm:$0xf] }
  0xb7   : > { %v719_v54 = vld [vmem:[%s5797_s5 + $0x7b0] sm:$0xf]  ;;  %v721_v55 = vld [vmem:[%s5797_s5 + $0x7b8] sm:$0xf]  ;;  %718 = vst [vmem:[%s5804_s6 + $0x3d4] sm:$0xf] %v717_v53 }
  0xb8   : > { %720 = vst [vmem:[%s5804_s6 + $0x3d8] sm:$0xf] %v719_v54  ;;  %722 = vst [vmem:[%s5804_s6 + $0x3dc] sm:$0xf] %v721_v55  ;;  %v723_v56 = vld [vmem:[%s5797_s5 + $0x7c0] sm:$0xf] }
  0xb9   : > { %v725_v57 = vld [vmem:[%s5797_s5 + $0x7c8] sm:$0xf]  ;;  %v727_v58 = vld [vmem:[%s5797_s5 + $0x7d0] sm:$0xf]  ;;  %724 = vst [vmem:[%s5804_s6 + $0x3e0] sm:$0xf] %v723_v56 }
  0xba   : > { %726 = vst [vmem:[%s5804_s6 + $0x3e4] sm:$0xf] %v725_v57  ;;  %728 = vst [vmem:[%s5804_s6 + $0x3e8] sm:$0xf] %v727_v58  ;;  %v729_v59 = vld [vmem:[%s5797_s5 + $0x7d8] sm:$0xf] }
  0xbb   : > { %v731_v60 = vld [vmem:[%s5797_s5 + $0x7e0] sm:$0xf]  ;;  %v733_v61 = vld [vmem:[%s5797_s5 + $0x7e8] sm:$0xf]  ;;  %730 = vst [vmem:[%s5804_s6 + $0x3ec] sm:$0xf] %v729_v59 }
  0xbc   : > { %732 = vst [vmem:[%s5804_s6 + $0x3f0] sm:$0xf] %v731_v60  ;;  %734 = vst [vmem:[%s5804_s6 + $0x3f4] sm:$0xf] %v733_v61  ;;  %v735_v62 = vld [vmem:[%s5797_s5 + $0x7f0] sm:$0xf] }
  0xbd   : > { %v737_v63 = vld [vmem:[%s5797_s5 + $0x7f8] sm:$0xf]  ;;  %v739_v0 = vld [vmem:[%s5797_s5 + $0x800] sm:$0xf]  ;;  %736 = vst [vmem:[%s5804_s6 + $0x3f8] sm:$0xf] %v735_v62 }
  0xbe   : > { %738 = vst [vmem:[%s5804_s6 + $0x3fc] sm:$0xf] %v737_v63  ;;  %740 = vst [vmem:[%s5804_s6 + $0x400] sm:$0xf] %v739_v0  ;;  %v741_v1 = vld [vmem:[%s5797_s5 + $0x808] sm:$0xf] }
  0xbf   : > { %v743_v2 = vld [vmem:[%s5797_s5 + $0x810] sm:$0xf]  ;;  %v745_v3 = vld [vmem:[%s5797_s5 + $0x818] sm:$0xf]  ;;  %742 = vst [vmem:[%s5804_s6 + $0x404] sm:$0xf] %v741_v1 }
  0xc0   : > { %744 = vst [vmem:[%s5804_s6 + $0x408] sm:$0xf] %v743_v2  ;;  %746 = vst [vmem:[%s5804_s6 + $0x40c] sm:$0xf] %v745_v3  ;;  %v747_v4 = vld [vmem:[%s5797_s5 + $0x820] sm:$0xf] }
  0xc1   : > { %v749_v5 = vld [vmem:[%s5797_s5 + $0x828] sm:$0xf]  ;;  %v751_v6 = vld [vmem:[%s5797_s5 + $0x830] sm:$0xf]  ;;  %748 = vst [vmem:[%s5804_s6 + $0x410] sm:$0xf] %v747_v4 }
  0xc2   : > { %750 = vst [vmem:[%s5804_s6 + $0x414] sm:$0xf] %v749_v5  ;;  %752 = vst [vmem:[%s5804_s6 + $0x418] sm:$0xf] %v751_v6  ;;  %v753_v7 = vld [vmem:[%s5797_s5 + $0x838] sm:$0xf] }
  0xc3   : > { %v755_v8 = vld [vmem:[%s5797_s5 + $0x840] sm:$0xf]  ;;  %v757_v9 = vld [vmem:[%s5797_s5 + $0x848] sm:$0xf]  ;;  %754 = vst [vmem:[%s5804_s6 + $0x41c] sm:$0xf] %v753_v7 }
  0xc4   : > { %756 = vst [vmem:[%s5804_s6 + $0x420] sm:$0xf] %v755_v8  ;;  %758 = vst [vmem:[%s5804_s6 + $0x424] sm:$0xf] %v757_v9  ;;  %v759_v10 = vld [vmem:[%s5797_s5 + $0x850] sm:$0xf] }
  0xc5   : > { %v761_v11 = vld [vmem:[%s5797_s5 + $0x858] sm:$0xf]  ;;  %v763_v12 = vld [vmem:[%s5797_s5 + $0x860] sm:$0xf]  ;;  %760 = vst [vmem:[%s5804_s6 + $0x428] sm:$0xf] %v759_v10 }
  0xc6   : > { %762 = vst [vmem:[%s5804_s6 + $0x42c] sm:$0xf] %v761_v11  ;;  %764 = vst [vmem:[%s5804_s6 + $0x430] sm:$0xf] %v763_v12  ;;  %v765_v13 = vld [vmem:[%s5797_s5 + $0x868] sm:$0xf] }
  0xc7   : > { %v767_v14 = vld [vmem:[%s5797_s5 + $0x870] sm:$0xf]  ;;  %v769_v15 = vld [vmem:[%s5797_s5 + $0x878] sm:$0xf]  ;;  %766 = vst [vmem:[%s5804_s6 + $0x434] sm:$0xf] %v765_v13 }
  0xc8   : > { %768 = vst [vmem:[%s5804_s6 + $0x438] sm:$0xf] %v767_v14  ;;  %770 = vst [vmem:[%s5804_s6 + $0x43c] sm:$0xf] %v769_v15  ;;  %v771_v16 = vld [vmem:[%s5797_s5 + $0x880] sm:$0xf] }
  0xc9   : > { %v773_v17 = vld [vmem:[%s5797_s5 + $0x888] sm:$0xf]  ;;  %v775_v18 = vld [vmem:[%s5797_s5 + $0x890] sm:$0xf]  ;;  %772 = vst [vmem:[%s5804_s6 + $0x440] sm:$0xf] %v771_v16 }
  0xca   : > { %774 = vst [vmem:[%s5804_s6 + $0x444] sm:$0xf] %v773_v17  ;;  %776 = vst [vmem:[%s5804_s6 + $0x448] sm:$0xf] %v775_v18  ;;  %v777_v19 = vld [vmem:[%s5797_s5 + $0x898] sm:$0xf] }
  0xcb   : > { %v779_v20 = vld [vmem:[%s5797_s5 + $0x8a0] sm:$0xf]  ;;  %v781_v21 = vld [vmem:[%s5797_s5 + $0x8a8] sm:$0xf]  ;;  %778 = vst [vmem:[%s5804_s6 + $0x44c] sm:$0xf] %v777_v19 }
  0xcc   : > { %780 = vst [vmem:[%s5804_s6 + $0x450] sm:$0xf] %v779_v20  ;;  %782 = vst [vmem:[%s5804_s6 + $0x454] sm:$0xf] %v781_v21  ;;  %v783_v22 = vld [vmem:[%s5797_s5 + $0x8b0] sm:$0xf] }
  0xcd   : > { %v785_v23 = vld [vmem:[%s5797_s5 + $0x8b8] sm:$0xf]  ;;  %v787_v24 = vld [vmem:[%s5797_s5 + $0x8c0] sm:$0xf]  ;;  %784 = vst [vmem:[%s5804_s6 + $0x458] sm:$0xf] %v783_v22 }
  0xce   : > { %786 = vst [vmem:[%s5804_s6 + $0x45c] sm:$0xf] %v785_v23  ;;  %788 = vst [vmem:[%s5804_s6 + $0x460] sm:$0xf] %v787_v24  ;;  %v789_v25 = vld [vmem:[%s5797_s5 + $0x8c8] sm:$0xf] }
  0xcf   : > { %v791_v26 = vld [vmem:[%s5797_s5 + $0x8d0] sm:$0xf]  ;;  %v793_v27 = vld [vmem:[%s5797_s5 + $0x8d8] sm:$0xf]  ;;  %790 = vst [vmem:[%s5804_s6 + $0x464] sm:$0xf] %v789_v25 }
  0xd0   : > { %792 = vst [vmem:[%s5804_s6 + $0x468] sm:$0xf] %v791_v26  ;;  %794 = vst [vmem:[%s5804_s6 + $0x46c] sm:$0xf] %v793_v27  ;;  %v795_v28 = vld [vmem:[%s5797_s5 + $0x8e0] sm:$0xf] }
  0xd1   : > { %v797_v29 = vld [vmem:[%s5797_s5 + $0x8e8] sm:$0xf]  ;;  %v799_v30 = vld [vmem:[%s5797_s5 + $0x8f0] sm:$0xf]  ;;  %796 = vst [vmem:[%s5804_s6 + $0x470] sm:$0xf] %v795_v28 }
  0xd2   : > { %798 = vst [vmem:[%s5804_s6 + $0x474] sm:$0xf] %v797_v29  ;;  %800 = vst [vmem:[%s5804_s6 + $0x478] sm:$0xf] %v799_v30  ;;  %v801_v31 = vld [vmem:[%s5797_s5 + $0x8f8] sm:$0xf] }
  0xd3   : > { %v803_v32 = vld [vmem:[%s5797_s5 + $0x900] sm:$0xf]  ;;  %v805_v33 = vld [vmem:[%s5797_s5 + $0x908] sm:$0xf]  ;;  %802 = vst [vmem:[%s5804_s6 + $0x47c] sm:$0xf] %v801_v31 }
  0xd4   : > { %804 = vst [vmem:[%s5804_s6 + $0x480] sm:$0xf] %v803_v32  ;;  %806 = vst [vmem:[%s5804_s6 + $0x484] sm:$0xf] %v805_v33  ;;  %v807_v34 = vld [vmem:[%s5797_s5 + $0x910] sm:$0xf] }
  0xd5   : > { %v809_v35 = vld [vmem:[%s5797_s5 + $0x918] sm:$0xf]  ;;  %v811_v36 = vld [vmem:[%s5797_s5 + $0x920] sm:$0xf]  ;;  %808 = vst [vmem:[%s5804_s6 + $0x488] sm:$0xf] %v807_v34 }
  0xd6   : > { %810 = vst [vmem:[%s5804_s6 + $0x48c] sm:$0xf] %v809_v35  ;;  %812 = vst [vmem:[%s5804_s6 + $0x490] sm:$0xf] %v811_v36  ;;  %v813_v37 = vld [vmem:[%s5797_s5 + $0x928] sm:$0xf] }
  0xd7   : > { %v815_v38 = vld [vmem:[%s5797_s5 + $0x930] sm:$0xf]  ;;  %v817_v39 = vld [vmem:[%s5797_s5 + $0x938] sm:$0xf]  ;;  %814 = vst [vmem:[%s5804_s6 + $0x494] sm:$0xf] %v813_v37 }
  0xd8   : > { %816 = vst [vmem:[%s5804_s6 + $0x498] sm:$0xf] %v815_v38  ;;  %818 = vst [vmem:[%s5804_s6 + $0x49c] sm:$0xf] %v817_v39  ;;  %v819_v40 = vld [vmem:[%s5797_s5 + $0x940] sm:$0xf] }
  0xd9   : > { %v821_v41 = vld [vmem:[%s5797_s5 + $0x948] sm:$0xf]  ;;  %v823_v42 = vld [vmem:[%s5797_s5 + $0x950] sm:$0xf]  ;;  %820 = vst [vmem:[%s5804_s6 + $0x4a0] sm:$0xf] %v819_v40 }
  0xda   : > { %822 = vst [vmem:[%s5804_s6 + $0x4a4] sm:$0xf] %v821_v41  ;;  %824 = vst [vmem:[%s5804_s6 + $0x4a8] sm:$0xf] %v823_v42  ;;  %v825_v43 = vld [vmem:[%s5797_s5 + $0x958] sm:$0xf] }
  0xdb   : > { %v827_v44 = vld [vmem:[%s5797_s5 + $0x960] sm:$0xf]  ;;  %v829_v45 = vld [vmem:[%s5797_s5 + $0x968] sm:$0xf]  ;;  %826 = vst [vmem:[%s5804_s6 + $0x4ac] sm:$0xf] %v825_v43 }
  0xdc   : > { %828 = vst [vmem:[%s5804_s6 + $0x4b0] sm:$0xf] %v827_v44  ;;  %830 = vst [vmem:[%s5804_s6 + $0x4b4] sm:$0xf] %v829_v45  ;;  %v831_v46 = vld [vmem:[%s5797_s5 + $0x970] sm:$0xf] }
  0xdd   : > { %v833_v47 = vld [vmem:[%s5797_s5 + $0x978] sm:$0xf]  ;;  %v835_v48 = vld [vmem:[%s5797_s5 + $0x980] sm:$0xf]  ;;  %832 = vst [vmem:[%s5804_s6 + $0x4b8] sm:$0xf] %v831_v46 }
  0xde   : > { %834 = vst [vmem:[%s5804_s6 + $0x4bc] sm:$0xf] %v833_v47  ;;  %836 = vst [vmem:[%s5804_s6 + $0x4c0] sm:$0xf] %v835_v48  ;;  %v837_v49 = vld [vmem:[%s5797_s5 + $0x988] sm:$0xf] }
  0xdf   : > { %v839_v50 = vld [vmem:[%s5797_s5 + $0x990] sm:$0xf]  ;;  %v841_v51 = vld [vmem:[%s5797_s5 + $0x998] sm:$0xf]  ;;  %838 = vst [vmem:[%s5804_s6 + $0x4c4] sm:$0xf] %v837_v49 }
  0xe0   : > { %840 = vst [vmem:[%s5804_s6 + $0x4c8] sm:$0xf] %v839_v50  ;;  %842 = vst [vmem:[%s5804_s6 + $0x4cc] sm:$0xf] %v841_v51  ;;  %v843_v52 = vld [vmem:[%s5797_s5 + $0x9a0] sm:$0xf] }
  0xe1   : > { %v845_v53 = vld [vmem:[%s5797_s5 + $0x9a8] sm:$0xf]  ;;  %v847_v54 = vld [vmem:[%s5797_s5 + $0x9b0] sm:$0xf]  ;;  %844 = vst [vmem:[%s5804_s6 + $0x4d0] sm:$0xf] %v843_v52 }
  0xe2   : > { %846 = vst [vmem:[%s5804_s6 + $0x4d4] sm:$0xf] %v845_v53  ;;  %848 = vst [vmem:[%s5804_s6 + $0x4d8] sm:$0xf] %v847_v54  ;;  %v849_v55 = vld [vmem:[%s5797_s5 + $0x9b8] sm:$0xf] }
  0xe3   : > { %v851_v56 = vld [vmem:[%s5797_s5 + $0x9c0] sm:$0xf]  ;;  %v853_v57 = vld [vmem:[%s5797_s5 + $0x9c8] sm:$0xf]  ;;  %850 = vst [vmem:[%s5804_s6 + $0x4dc] sm:$0xf] %v849_v55 }
  0xe4   : > { %852 = vst [vmem:[%s5804_s6 + $0x4e0] sm:$0xf] %v851_v56  ;;  %854 = vst [vmem:[%s5804_s6 + $0x4e4] sm:$0xf] %v853_v57  ;;  %v855_v58 = vld [vmem:[%s5797_s5 + $0x9d0] sm:$0xf] }
  0xe5   : > { %v857_v59 = vld [vmem:[%s5797_s5 + $0x9d8] sm:$0xf]  ;;  %v859_v60 = vld [vmem:[%s5797_s5 + $0x9e0] sm:$0xf]  ;;  %856 = vst [vmem:[%s5804_s6 + $0x4e8] sm:$0xf] %v855_v58 }
  0xe6   : > { %858 = vst [vmem:[%s5804_s6 + $0x4ec] sm:$0xf] %v857_v59  ;;  %860 = vst [vmem:[%s5804_s6 + $0x4f0] sm:$0xf] %v859_v60  ;;  %v861_v61 = vld [vmem:[%s5797_s5 + $0x9e8] sm:$0xf] }
  0xe7   : > { %v863_v62 = vld [vmem:[%s5797_s5 + $0x9f0] sm:$0xf]  ;;  %v865_v63 = vld [vmem:[%s5797_s5 + $0x9f8] sm:$0xf]  ;;  %862 = vst [vmem:[%s5804_s6 + $0x4f4] sm:$0xf] %v861_v61 }
  0xe8   : > { %864 = vst [vmem:[%s5804_s6 + $0x4f8] sm:$0xf] %v863_v62  ;;  %866 = vst [vmem:[%s5804_s6 + $0x4fc] sm:$0xf] %v865_v63  ;;  %v867_v0 = vld [vmem:[%s5797_s5 + $0xa00] sm:$0xf] }
  0xe9   : > { %v869_v1 = vld [vmem:[%s5797_s5 + $0xa08] sm:$0xf]  ;;  %v871_v2 = vld [vmem:[%s5797_s5 + $0xa10] sm:$0xf]  ;;  %868 = vst [vmem:[%s5804_s6 + $0x500] sm:$0xf] %v867_v0 }
  0xea   : > { %870 = vst [vmem:[%s5804_s6 + $0x504] sm:$0xf] %v869_v1  ;;  %872 = vst [vmem:[%s5804_s6 + $0x508] sm:$0xf] %v871_v2  ;;  %v873_v3 = vld [vmem:[%s5797_s5 + $0xa18] sm:$0xf] }
  0xeb   : > { %v875_v4 = vld [vmem:[%s5797_s5 + $0xa20] sm:$0xf]  ;;  %v877_v5 = vld [vmem:[%s5797_s5 + $0xa28] sm:$0xf]  ;;  %874 = vst [vmem:[%s5804_s6 + $0x50c] sm:$0xf] %v873_v3 }
  0xec   : > { %876 = vst [vmem:[%s5804_s6 + $0x510] sm:$0xf] %v875_v4  ;;  %878 = vst [vmem:[%s5804_s6 + $0x514] sm:$0xf] %v877_v5  ;;  %v879_v6 = vld [vmem:[%s5797_s5 + $0xa30] sm:$0xf] }
  0xed   : > { %v881_v7 = vld [vmem:[%s5797_s5 + $0xa38] sm:$0xf]  ;;  %v883_v8 = vld [vmem:[%s5797_s5 + $0xa40] sm:$0xf]  ;;  %880 = vst [vmem:[%s5804_s6 + $0x518] sm:$0xf] %v879_v6 }
  0xee   : > { %882 = vst [vmem:[%s5804_s6 + $0x51c] sm:$0xf] %v881_v7  ;;  %884 = vst [vmem:[%s5804_s6 + $0x520] sm:$0xf] %v883_v8  ;;  %v885_v9 = vld [vmem:[%s5797_s5 + $0xa48] sm:$0xf] }
  0xef   : > { %v887_v10 = vld [vmem:[%s5797_s5 + $0xa50] sm:$0xf]  ;;  %v889_v11 = vld [vmem:[%s5797_s5 + $0xa58] sm:$0xf]  ;;  %886 = vst [vmem:[%s5804_s6 + $0x524] sm:$0xf] %v885_v9 }
  0xf0   : > { %888 = vst [vmem:[%s5804_s6 + $0x528] sm:$0xf] %v887_v10  ;;  %890 = vst [vmem:[%s5804_s6 + $0x52c] sm:$0xf] %v889_v11  ;;  %v891_v12 = vld [vmem:[%s5797_s5 + $0xa60] sm:$0xf] }
  0xf1   : > { %v893_v13 = vld [vmem:[%s5797_s5 + $0xa68] sm:$0xf]  ;;  %v895_v14 = vld [vmem:[%s5797_s5 + $0xa70] sm:$0xf]  ;;  %892 = vst [vmem:[%s5804_s6 + $0x530] sm:$0xf] %v891_v12 }
  0xf2   : > { %894 = vst [vmem:[%s5804_s6 + $0x534] sm:$0xf] %v893_v13  ;;  %896 = vst [vmem:[%s5804_s6 + $0x538] sm:$0xf] %v895_v14  ;;  %v897_v15 = vld [vmem:[%s5797_s5 + $0xa78] sm:$0xf] }
  0xf3   : > { %v899_v16 = vld [vmem:[%s5797_s5 + $0xa80] sm:$0xf]  ;;  %v901_v17 = vld [vmem:[%s5797_s5 + $0xa88] sm:$0xf]  ;;  %898 = vst [vmem:[%s5804_s6 + $0x53c] sm:$0xf] %v897_v15 }
  0xf4   : > { %900 = vst [vmem:[%s5804_s6 + $0x540] sm:$0xf] %v899_v16  ;;  %902 = vst [vmem:[%s5804_s6 + $0x544] sm:$0xf] %v901_v17  ;;  %v903_v18 = vld [vmem:[%s5797_s5 + $0xa90] sm:$0xf] }
  0xf5   : > { %v905_v19 = vld [vmem:[%s5797_s5 + $0xa98] sm:$0xf]  ;;  %v907_v20 = vld [vmem:[%s5797_s5 + $0xaa0] sm:$0xf]  ;;  %904 = vst [vmem:[%s5804_s6 + $0x548] sm:$0xf] %v903_v18 }
  0xf6   : > { %906 = vst [vmem:[%s5804_s6 + $0x54c] sm:$0xf] %v905_v19  ;;  %908 = vst [vmem:[%s5804_s6 + $0x550] sm:$0xf] %v907_v20  ;;  %v909_v21 = vld [vmem:[%s5797_s5 + $0xaa8] sm:$0xf] }
  0xf7   : > { %v911_v22 = vld [vmem:[%s5797_s5 + $0xab0] sm:$0xf]  ;;  %v913_v23 = vld [vmem:[%s5797_s5 + $0xab8] sm:$0xf]  ;;  %910 = vst [vmem:[%s5804_s6 + $0x554] sm:$0xf] %v909_v21 }
  0xf8   : > { %912 = vst [vmem:[%s5804_s6 + $0x558] sm:$0xf] %v911_v22  ;;  %914 = vst [vmem:[%s5804_s6 + $0x55c] sm:$0xf] %v913_v23  ;;  %v915_v24 = vld [vmem:[%s5797_s5 + $0xac0] sm:$0xf] }
  0xf9   : > { %v917_v25 = vld [vmem:[%s5797_s5 + $0xac8] sm:$0xf]  ;;  %v919_v26 = vld [vmem:[%s5797_s5 + $0xad0] sm:$0xf]  ;;  %916 = vst [vmem:[%s5804_s6 + $0x560] sm:$0xf] %v915_v24 }
  0xfa   : > { %918 = vst [vmem:[%s5804_s6 + $0x564] sm:$0xf] %v917_v25  ;;  %920 = vst [vmem:[%s5804_s6 + $0x568] sm:$0xf] %v919_v26  ;;  %v921_v27 = vld [vmem:[%s5797_s5 + $0xad8] sm:$0xf] }
  0xfb   : > { %v923_v28 = vld [vmem:[%s5797_s5 + $0xae0] sm:$0xf]  ;;  %v925_v29 = vld [vmem:[%s5797_s5 + $0xae8] sm:$0xf]  ;;  %922 = vst [vmem:[%s5804_s6 + $0x56c] sm:$0xf] %v921_v27 }
  0xfc   : > { %924 = vst [vmem:[%s5804_s6 + $0x570] sm:$0xf] %v923_v28  ;;  %926 = vst [vmem:[%s5804_s6 + $0x574] sm:$0xf] %v925_v29  ;;  %v927_v30 = vld [vmem:[%s5797_s5 + $0xaf0] sm:$0xf] }
  0xfd   : > { %v929_v31 = vld [vmem:[%s5797_s5 + $0xaf8] sm:$0xf]  ;;  %v931_v32 = vld [vmem:[%s5797_s5 + $0xb00] sm:$0xf]  ;;  %928 = vst [vmem:[%s5804_s6 + $0x578] sm:$0xf] %v927_v30 }
  0xfe   : > { %930 = vst [vmem:[%s5804_s6 + $0x57c] sm:$0xf] %v929_v31  ;;  %932 = vst [vmem:[%s5804_s6 + $0x580] sm:$0xf] %v931_v32  ;;  %v933_v33 = vld [vmem:[%s5797_s5 + $0xb08] sm:$0xf] }
  0xff   : > { %v935_v34 = vld [vmem:[%s5797_s5 + $0xb10] sm:$0xf]  ;;  %v937_v35 = vld [vmem:[%s5797_s5 + $0xb18] sm:$0xf]  ;;  %934 = vst [vmem:[%s5804_s6 + $0x584] sm:$0xf] %v933_v33 }
 0x100   : > { %936 = vst [vmem:[%s5804_s6 + $0x588] sm:$0xf] %v935_v34  ;;  %938 = vst [vmem:[%s5804_s6 + $0x58c] sm:$0xf] %v937_v35  ;;  %v939_v36 = vld [vmem:[%s5797_s5 + $0xb20] sm:$0xf] }
 0x101   : > { %v941_v37 = vld [vmem:[%s5797_s5 + $0xb28] sm:$0xf]  ;;  %v943_v38 = vld [vmem:[%s5797_s5 + $0xb30] sm:$0xf]  ;;  %940 = vst [vmem:[%s5804_s6 + $0x590] sm:$0xf] %v939_v36 }
 0x102   : > { %942 = vst [vmem:[%s5804_s6 + $0x594] sm:$0xf] %v941_v37  ;;  %944 = vst [vmem:[%s5804_s6 + $0x598] sm:$0xf] %v943_v38  ;;  %v945_v39 = vld [vmem:[%s5797_s5 + $0xb38] sm:$0xf] }
 0x103   : > { %v947_v40 = vld [vmem:[%s5797_s5 + $0xb40] sm:$0xf]  ;;  %v949_v41 = vld [vmem:[%s5797_s5 + $0xb48] sm:$0xf]  ;;  %946 = vst [vmem:[%s5804_s6 + $0x59c] sm:$0xf] %v945_v39 }
 0x104   : > { %948 = vst [vmem:[%s5804_s6 + $0x5a0] sm:$0xf] %v947_v40  ;;  %950 = vst [vmem:[%s5804_s6 + $0x5a4] sm:$0xf] %v949_v41  ;;  %v951_v42 = vld [vmem:[%s5797_s5 + $0xb50] sm:$0xf] }
 0x105   : > { %v953_v43 = vld [vmem:[%s5797_s5 + $0xb58] sm:$0xf]  ;;  %v955_v44 = vld [vmem:[%s5797_s5 + $0xb60] sm:$0xf]  ;;  %952 = vst [vmem:[%s5804_s6 + $0x5a8] sm:$0xf] %v951_v42 }
 0x106   : > { %954 = vst [vmem:[%s5804_s6 + $0x5ac] sm:$0xf] %v953_v43  ;;  %956 = vst [vmem:[%s5804_s6 + $0x5b0] sm:$0xf] %v955_v44  ;;  %v957_v45 = vld [vmem:[%s5797_s5 + $0xb68] sm:$0xf] }
 0x107   : > { %v959_v46 = vld [vmem:[%s5797_s5 + $0xb70] sm:$0xf]  ;;  %v961_v47 = vld [vmem:[%s5797_s5 + $0xb78] sm:$0xf]  ;;  %958 = vst [vmem:[%s5804_s6 + $0x5b4] sm:$0xf] %v957_v45 }
 0x108   : > { %960 = vst [vmem:[%s5804_s6 + $0x5b8] sm:$0xf] %v959_v46  ;;  %962 = vst [vmem:[%s5804_s6 + $0x5bc] sm:$0xf] %v961_v47  ;;  %v963_v48 = vld [vmem:[%s5797_s5 + $0xb80] sm:$0xf] }
 0x109   : > { %v965_v49 = vld [vmem:[%s5797_s5 + $0xb88] sm:$0xf]  ;;  %v967_v50 = vld [vmem:[%s5797_s5 + $0xb90] sm:$0xf]  ;;  %964 = vst [vmem:[%s5804_s6 + $0x5c0] sm:$0xf] %v963_v48 }
 0x10a   : > { %966 = vst [vmem:[%s5804_s6 + $0x5c4] sm:$0xf] %v965_v49  ;;  %968 = vst [vmem:[%s5804_s6 + $0x5c8] sm:$0xf] %v967_v50  ;;  %v969_v51 = vld [vmem:[%s5797_s5 + $0xb98] sm:$0xf] }
 0x10b   : > { %v971_v52 = vld [vmem:[%s5797_s5 + $0xba0] sm:$0xf]  ;;  %v973_v53 = vld [vmem:[%s5797_s5 + $0xba8] sm:$0xf]  ;;  %970 = vst [vmem:[%s5804_s6 + $0x5cc] sm:$0xf] %v969_v51 }
 0x10c   : > { %972 = vst [vmem:[%s5804_s6 + $0x5d0] sm:$0xf] %v971_v52  ;;  %974 = vst [vmem:[%s5804_s6 + $0x5d4] sm:$0xf] %v973_v53  ;;  %v975_v54 = vld [vmem:[%s5797_s5 + $0xbb0] sm:$0xf] }
 0x10d   : > { %v977_v55 = vld [vmem:[%s5797_s5 + $0xbb8] sm:$0xf]  ;;  %v979_v56 = vld [vmem:[%s5797_s5 + $0xbc0] sm:$0xf]  ;;  %976 = vst [vmem:[%s5804_s6 + $0x5d8] sm:$0xf] %v975_v54 }
 0x10e   : > { %978 = vst [vmem:[%s5804_s6 + $0x5dc] sm:$0xf] %v977_v55  ;;  %980 = vst [vmem:[%s5804_s6 + $0x5e0] sm:$0xf] %v979_v56  ;;  %v981_v57 = vld [vmem:[%s5797_s5 + $0xbc8] sm:$0xf] }
 0x10f   : > { %v983_v58 = vld [vmem:[%s5797_s5 + $0xbd0] sm:$0xf]  ;;  %v985_v59 = vld [vmem:[%s5797_s5 + $0xbd8] sm:$0xf]  ;;  %982 = vst [vmem:[%s5804_s6 + $0x5e4] sm:$0xf] %v981_v57 }
 0x110   : > { %984 = vst [vmem:[%s5804_s6 + $0x5e8] sm:$0xf] %v983_v58  ;;  %986 = vst [vmem:[%s5804_s6 + $0x5ec] sm:$0xf] %v985_v59  ;;  %v987_v60 = vld [vmem:[%s5797_s5 + $0xbe0] sm:$0xf] }
 0x111   : > { %v989_v61 = vld [vmem:[%s5797_s5 + $0xbe8] sm:$0xf]  ;;  %v991_v62 = vld [vmem:[%s5797_s5 + $0xbf0] sm:$0xf]  ;;  %988 = vst [vmem:[%s5804_s6 + $0x5f0] sm:$0xf] %v987_v60 }
 0x112   : > { %990 = vst [vmem:[%s5804_s6 + $0x5f4] sm:$0xf] %v989_v61  ;;  %992 = vst [vmem:[%s5804_s6 + $0x5f8] sm:$0xf] %v991_v62  ;;  %v993_v63 = vld [vmem:[%s5797_s5 + $0xbf8] sm:$0xf] }
 0x113   : > { %v995_v0 = vld [vmem:[%s5797_s5 + $0xc00] sm:$0xf]  ;;  %v997_v1 = vld [vmem:[%s5797_s5 + $0xc08] sm:$0xf]  ;;  %994 = vst [vmem:[%s5804_s6 + $0x5fc] sm:$0xf] %v993_v63 }
 0x114   : > { %996 = vst [vmem:[%s5804_s6 + $0x600] sm:$0xf] %v995_v0  ;;  %998 = vst [vmem:[%s5804_s6 + $0x604] sm:$0xf] %v997_v1  ;;  %v999_v2 = vld [vmem:[%s5797_s5 + $0xc10] sm:$0xf] }
 0x115   : > { %v1001_v3 = vld [vmem:[%s5797_s5 + $0xc18] sm:$0xf]  ;;  %v1003_v4 = vld [vmem:[%s5797_s5 + $0xc20] sm:$0xf]  ;;  %1000 = vst [vmem:[%s5804_s6 + $0x608] sm:$0xf] %v999_v2 }
 0x116   : > { %1002 = vst [vmem:[%s5804_s6 + $0x60c] sm:$0xf] %v1001_v3  ;;  %1004 = vst [vmem:[%s5804_s6 + $0x610] sm:$0xf] %v1003_v4  ;;  %v1005_v5 = vld [vmem:[%s5797_s5 + $0xc28] sm:$0xf] }
 0x117   : > { %v1007_v6 = vld [vmem:[%s5797_s5 + $0xc30] sm:$0xf]  ;;  %v1009_v7 = vld [vmem:[%s5797_s5 + $0xc38] sm:$0xf]  ;;  %1006 = vst [vmem:[%s5804_s6 + $0x614] sm:$0xf] %v1005_v5 }
 0x118   : > { %1008 = vst [vmem:[%s5804_s6 + $0x618] sm:$0xf] %v1007_v6  ;;  %1010 = vst [vmem:[%s5804_s6 + $0x61c] sm:$0xf] %v1009_v7  ;;  %v1011_v8 = vld [vmem:[%s5797_s5 + $0xc40] sm:$0xf] }
 0x119   : > { %v1013_v9 = vld [vmem:[%s5797_s5 + $0xc48] sm:$0xf]  ;;  %v1015_v10 = vld [vmem:[%s5797_s5 + $0xc50] sm:$0xf]  ;;  %1012 = vst [vmem:[%s5804_s6 + $0x620] sm:$0xf] %v1011_v8 }
 0x11a   : > { %1014 = vst [vmem:[%s5804_s6 + $0x624] sm:$0xf] %v1013_v9  ;;  %1016 = vst [vmem:[%s5804_s6 + $0x628] sm:$0xf] %v1015_v10  ;;  %v1017_v11 = vld [vmem:[%s5797_s5 + $0xc58] sm:$0xf] }
 0x11b   : > { %v1019_v12 = vld [vmem:[%s5797_s5 + $0xc60] sm:$0xf]  ;;  %v1021_v13 = vld [vmem:[%s5797_s5 + $0xc68] sm:$0xf]  ;;  %1018 = vst [vmem:[%s5804_s6 + $0x62c] sm:$0xf] %v1017_v11 }
 0x11c   : > { %1020 = vst [vmem:[%s5804_s6 + $0x630] sm:$0xf] %v1019_v12  ;;  %1022 = vst [vmem:[%s5804_s6 + $0x634] sm:$0xf] %v1021_v13  ;;  %v1023_v14 = vld [vmem:[%s5797_s5 + $0xc70] sm:$0xf] }
 0x11d   : > { %v1025_v15 = vld [vmem:[%s5797_s5 + $0xc78] sm:$0xf]  ;;  %1024 = vst [vmem:[%s5804_s6 + $0x638] sm:$0xf] %v1023_v14 }
 0x11e   : > { %1026 = vst [vmem:[%s5804_s6 + $0x63c] sm:$0xf] %v1025_v15 }
 0x11f PF: > { %p4725_p8 = scmp.ge.s32.totalorder %s5722_s19, 1  ;;  %p1861_p9 = scmp.lt.s32.totalorder %s5722_s19, 3 }
 0x121   : > { %p1862_p10 = pnand %p4725_p8, %p1861_p9 }
 0x123   : > { %1865 = sbr.rel (%p1862_p10) target bundleno = 744 (0x2e8), region = 73 }
 0x128   : > { %s1868_s7 = sand.u32 1, %s5706_s15   ;;  %v5444_v16 = vld [vmem:[%s7154_s0 + $0x4] ss:$100 sps:$4 sm:$0xff]   ;;  %v5447_v17 = vld [vmem:[%s7154_s0 + $0xc] ss:$100 sps:$4 sm:$0xff]   ;;  %p1921_p11 = scmp.lt.s32.totalorder %s5714_s17, 1 }
 0x129   : > { %s5369_s8 = smul.u32 1600, %s1868_s7  ;;  %3877 = vmatprep.mubr.bf16.mxu0 %v5444_v16  ;;  %3926 = vmatprep.mubr.bf16.mxu1 %v5447_v17  ;;  %v5442_v48 = vld [vmem:[%s7154_s0] ss:$100 sps:$4 sm:$0xff]   ;;  %v5445_v50 = vld [vmem:[%s7154_s0 + $0x8] ss:$100 sps:$4 sm:$0xff]   ;;  %s4726_s28 = sshll.u32 %s1868_s7, 4 }
 0x12a   : > { %v5466_v52 = vld [vmem:[%s7154_s0 + $0xcc] ss:$100 sps:$4 sm:$0xff]   ;;  %v5468_v7 = vld [vmem:[%s7154_s0 + $0xd4] ss:$100 sps:$4 sm:$0xff]   ;;  %s1907_s29 = scalar_lea.vmem [#allocation4], %s4726_s28  ;;  %s4984_s30 = sshll.u32 (%p5784_p6), %s5714_s17, 2 }
 0x12b   : > { %s6612_s13 = scalar_lea.vmem [#allocation3], %s5369_s8  ;;  %v5471_v9 = vld [vmem:[%s7154_s0 + $0xc8] ss:$100 sps:$4 sm:$0xff]   ;;  %v5472_v10 = vld [vmem:[%s7154_s0 + $0xd0] ss:$100 sps:$4 sm:$0xff]   ;;  %s4554_s5 = scalar_lea.vmem (%p5784_p6), %s7158_s4, %s4984_s30 }
 0x12c   : > { %v5410_v18 = vld [vmem:[%s6612_s13 + $0x78] sm:$0xff]   ;;  %v5414_v22 = vld [vmem:[%s6612_s13 + $0x70] sm:$0xff]   ;;  %v5418_v26 = vld [vmem:[%s6612_s13 + $0x68] sm:$0xff]  }
 0x12d   : > { %v5411_v19 = vld [vmem:[%s6612_s13 + $0xf8] sm:$0xff]   ;;  %5002 = vmatprep.subr.bf16.mxu0 %v5410_v18  ;;  %v5415_v23 = vld [vmem:[%s6612_s13 + $0xf0] sm:$0xff]   ;;  %v5419_v27 = vld [vmem:[%s6612_s13 + $0xe8] sm:$0xff]  }
 0x12e   : > { %v5412_v20 = vld [vmem:[%s6612_s13 + $0x38] sm:$0xff]   ;;  %5030 = vmatprep.subr.bf16.mxu1 %v5411_v19  ;;  %v5416_v24 = vld [vmem:[%s6612_s13 + $0x30] sm:$0xff]   ;;  %v5420_v28 = vld [vmem:[%s6612_s13 + $0x28] sm:$0xff]  }
 0x12f   : > { %v5413_v21 = vld [vmem:[%s6612_s13 + $0xb8] sm:$0xff]   ;;  %5003 = vmatpush3.bf16.msra.mxu0 %v5412_v20  ;;  %v5417_v25 = vld [vmem:[%s6612_s13 + $0xb0] sm:$0xff]   ;;  %v5421_v29 = vld [vmem:[%s6612_s13 + $0xa8] sm:$0xff]  }
 0x130   : > { %5031 = vmatpush3.bf16.msra.mxu1 %v5413_v21  ;;  %5004 = vmatprep.subr.bf16.mxu0 %v5414_v22  ;;  %v5422_v30 = vld [vmem:[%s6612_s13 + $0x60] sm:$0xff]   ;;  %v5426_v34 = vld [vmem:[%s6612_s13 + $0x58] sm:$0xff]   ;;  %v5430_v38 = vld [vmem:[%s6612_s13 + $0x50] sm:$0xff]  }
 0x131   : > { %5032 = vmatprep.subr.bf16.mxu1 %v5415_v23  ;;  %v5423_v31 = vld [vmem:[%s6612_s13 + $0xe0] sm:$0xff]   ;;  %v5427_v35 = vld [vmem:[%s6612_s13 + $0xd8] sm:$0xff]   ;;  %v5431_v39 = vld [vmem:[%s6612_s13 + $0xd0] sm:$0xff]  }
 0x132   : > { %v5424_v32 = vld [vmem:[%s6612_s13 + $0x20] sm:$0xff]   ;;  %v5428_v36 = vld [vmem:[%s6612_s13 + $0x18] sm:$0xff]   ;;  %v5432_v40 = vld [vmem:[%s6612_s13 + $0x10] sm:$0xff]  }
 0x133   : > { %5005 = vmatpush3.bf16.msra.mxu0 %v5416_v24  ;;  %v5425_v33 = vld [vmem:[%s6612_s13 + $0xa0] sm:$0xff]   ;;  %v5429_v37 = vld [vmem:[%s6612_s13 + $0x98] sm:$0xff]   ;;  %v5433_v41 = vld [vmem:[%s6612_s13 + $0x90] sm:$0xff]  }
 0x134   : > { %5033 = vmatpush3.bf16.msra.mxu1 %v5417_v25  ;;  %5006 = vmatprep.subr.bf16.mxu0 %v5418_v26  ;;  %v5434_v42 = vld [vmem:[%s6612_s13 + $0x48] sm:$0xff]   ;;  %v5438_v46 = vld [vmem:[%s6612_s13 + $0x40] sm:$0xff]   ;;  %v5448_v53 = vld [vmem:[%s6612_s13 + $0x178] sm:$0xff]  }
 0x135   : > { %5034 = vmatprep.subr.bf16.mxu1 %v5419_v27  ;;  %v5435_v43 = vld [vmem:[%s6612_s13 + $0xc8] sm:$0xff]   ;;  %v5439_v47 = vld [vmem:[%s6612_s13 + $0xc0] sm:$0xff]   ;;  %v5449_v54 = vld [vmem:[%s6612_s13 + $0x138] sm:$0xff]  }
 0x136   : > { %v5436_v44 = vld [vmem:[%s6612_s13 + $0x8] sm:$0xff]   ;;  %v5440_v49 = vld [vmem:[%s6612_s13] sm:$0xff]   ;;  %v5450_v55 = vld [vmem:[%s6612_s13 + $0x1f8] sm:$0xff]  }
 0x137   : > { %5007 = vmatpush3.bf16.msra.mxu0 %v5420_v28  ;;  %v5437_v45 = vld [vmem:[%s6612_s13 + $0x88] sm:$0xff]   ;;  %v5441_v51 = vld [vmem:[%s6612_s13 + $0x80] sm:$0xff]   ;;  %v5451_v56 = vld [vmem:[%s6612_s13 + $0x1b8] sm:$0xff]  }
 0x138   : > { %5035 = vmatpush3.bf16.msra.mxu1 %v5421_v29  ;;  %5008 = vmatprep.subr.bf16.mxu0 %v5422_v30  ;;  %v5452_v57 = vld [vmem:[%s6612_s13 + $0x170] sm:$0xff]   ;;  %v5456_v61 = vld [vmem:[%s6612_s13 + $0x168] sm:$0xff]   ;;  %v5460_v1 = vld [vmem:[%s6612_s13 + $0x160] sm:$0xff]  }
 0x139   : > { %5036 = vmatprep.subr.bf16.mxu1 %v5423_v31  ;;  %v5453_v58 = vld [vmem:[%s6612_s13 + $0x130] sm:$0xff]   ;;  %v5457_v62 = vld [vmem:[%s6612_s13 + $0x128] sm:$0xff]   ;;  %v5461_v2 = vld [vmem:[%s6612_s13 + $0x120] sm:$0xff]  }
 0x13a   : > { %v5454_v59 = vld [vmem:[%s6612_s13 + $0x1f0] sm:$0xff]   ;;  %v5458_v63 = vld [vmem:[%s6612_s13 + $0x1e8] sm:$0xff]   ;;  %v5462_v3 = vld [vmem:[%s6612_s13 + $0x1e0] sm:$0xff]  }
 0x13b   : > { %5009 = vmatpush3.bf16.msra.mxu0 %v5424_v32  ;;  %v5455_v60 = vld [vmem:[%s6612_s13 + $0x1b0] sm:$0xff]   ;;  %v5459_v0 = vld [vmem:[%s6612_s13 + $0x1a8] sm:$0xff]   ;;  %v5463_v4 = vld [vmem:[%s6612_s13 + $0x1a0] sm:$0xff]  }
 0x13c   : > { %5037 = vmatpush3.bf16.msra.mxu1 %v5425_v33  ;;  %5010 = vmatprep.subr.bf16.mxu0 %v5426_v34  ;;  %v5464_v5 = vld [vmem:[%s6612_s13 + $0x158] sm:$0xff]   ;;  %v5474_v12 = vld [vmem:[%s6612_s13 + $0x150] sm:$0xff]   ;;  %v5478_v16 = vld [vmem:[%s6612_s13 + $0x148] sm:$0xff]  }
 0x13d   : > { %5038 = vmatprep.subr.bf16.mxu1 %v5427_v35  ;;  %v5465_v6 = vld [vmem:[%s6612_s13 + $0x118] sm:$0xff]   ;;  %v5475_v13 = vld [vmem:[%s6612_s13 + $0x110] sm:$0xff]   ;;  %v5479_v17 = vld [vmem:[%s6612_s13 + $0x108] sm:$0xff]  }
 0x13e   : > { %v5470_v8 = vld [vmem:[%s6612_s13 + $0x1d8] sm:$0xff]   ;;  %v5476_v14 = vld [vmem:[%s6612_s13 + $0x1d0] sm:$0xff]   ;;  %v5480_v18 = vld [vmem:[%s6612_s13 + $0x1c8] sm:$0xff]  }
 0x13f   : > { %5011 = vmatpush3.bf16.msra.mxu0 %v5428_v36  ;;  %v5473_v11 = vld [vmem:[%s6612_s13 + $0x198] sm:$0xff]   ;;  %v5477_v15 = vld [vmem:[%s6612_s13 + $0x190] sm:$0xff]   ;;  %v5481_v19 = vld [vmem:[%s6612_s13 + $0x188] sm:$0xff]  }
 0x140   : > { %5039 = vmatpush3.bf16.msra.mxu1 %v5429_v37  ;;  %5012 = vmatprep.subr.bf16.mxu0 %v5430_v38  ;;  %v5482_v20 = vld [vmem:[%s6612_s13 + $0x140] sm:$0xff]   ;;  %v5485_v23 = vld [vmem:[%s7154_s0 + $0x10] ss:$100 sps:$4 sm:$0xff]   ;;  %v5489_v26 = vld [vmem:[%s6612_s13 + $0x278] sm:$0xff]  }
 0x141   : > { %5040 = vmatprep.subr.bf16.mxu1 %v5431_v39  ;;  %v5483_v21 = vld [vmem:[%s6612_s13 + $0x100] sm:$0xff]   ;;  %v5487_v24 = vld [vmem:[%s7154_s0 + $0x14] ss:$100 sps:$4 sm:$0xff]   ;;  %v5503_v38 = vld [vmem:[%s6612_s13 + $0x268] sm:$0xff]  }
 0x142   : > { %v5484_v22 = vld [vmem:[%s6612_s13 + $0x1c0] sm:$0xff]   ;;  %v5490_v27 = vld [vmem:[%s7154_s0 + $0x18] ss:$100 sps:$4 sm:$0xff]   ;;  %v5496_v32 = vld [vmem:[%s6612_s13 + $0x270] sm:$0xff]  }
 0x143   : > { %5013 = vmatpush3.bf16.msra.mxu0 %v5432_v40  ;;  %v5488_v25 = vld [vmem:[%s6612_s13 + $0x180] sm:$0xff]   ;;  %v5493_v29 = vld [vmem:[%s6612_s13 + $0x238] sm:$0xff]   ;;  %v5497_v33 = vld [vmem:[%s6612_s13 + $0x230] sm:$0xff]  }
 0x144   : > { %5041 = vmatpush3.bf16.msra.mxu1 %v5433_v41  ;;  %5014 = vmatprep.subr.bf16.mxu0 %v5434_v42  ;;  %v5492_v28 = vld [vmem:[%s7154_s0 + $0x1c] ss:$100 sps:$4 sm:$0xff]   ;;  %v5498_v34 = vld [vmem:[%s6612_s13 + $0x2f0] sm:$0xff]   ;;  %v5504_v39 = vld [vmem:[%s7154_s0 + $0xe4] ss:$100 sps:$4 sm:$0xff]  }
 0x145   : > { %5042 = vmatprep.subr.bf16.mxu1 %v5435_v43  ;;  %v5494_v30 = vld [vmem:[%s6612_s13 + $0x2f8] sm:$0xff]   ;;  %v5501_v36 = vld [vmem:[%s6612_s13 + $0x2b0] sm:$0xff]   ;;  %v5506_v40 = vld [vmem:[%s6612_s13 + $0x228] sm:$0xff]  }
 0x146   : > { %v5495_v31 = vld [vmem:[%s6612_s13 + $0x2b8] sm:$0xff]   ;;  %v5507_v41 = vld [vmem:[%s7154_s0 + $0xe0] ss:$100 sps:$4 sm:$0xff]   ;;  %v5508_v42 = vld [vmem:[%s6612_s13 + $0x2e8] sm:$0xff]  }
 0x147   : > { %5015 = vmatpush3.bf16.msra.mxu0 %v5436_v44  ;;  %v5499_v35 = vld [vmem:[%s7154_s0 + $0xdc] ss:$100 sps:$4 sm:$0xff]   ;;  %v5509_v43 = vld [vmem:[%s6612_s13 + $0x2a8] sm:$0xff]  }
 0x148   : > { %5043 = vmatpush3.bf16.msra.mxu1 %v5437_v45  ;;  %5016 = vmatprep.subr.bf16.mxu0 %v5438_v46  ;;  %v5502_v37 = vld [vmem:[%s7154_s0 + $0xd8] ss:$100 sps:$4 sm:$0xff]   ;;  %v5510_v44 = vld [vmem:[%s6612_s13 + $0x260] sm:$0xff]  }
 0x149   : > { %5044 = vmatprep.subr.bf16.mxu1 %v5439_v47  ;;  %v5511_v45 = vld [vmem:[%s6612_s13 + $0x220] sm:$0xff]  }
 0x14a   : > { %v5512_v46 = vld [vmem:[%s6612_s13 + $0x2e0] sm:$0xff]  }
 0x14b   : > { %5017 = vmatpush3.bf16.msra.mxu0 %v5440_v49  ;;  %v5513_v47 = vld [vmem:[%s6612_s13 + $0x2a0] sm:$0xff]   ;;  %v5515_v49 = vld [vmem:[%s6612_s13 + $0x218] sm:$0xff]  }
 0x14c   : > { %5045 = vmatpush3.bf16.msra.mxu1 %v5441_v51  ;;  %5058 = vmatprep.subr.bf16.mxu0 %v5448_v53  ;;  %v5517_v51 = vld [vmem:[%s6612_s13 + $0x298] sm:$0xff]   ;;  %v5519_v53 = vld [vmem:[%s6612_s13 + $0x210] sm:$0xff]  }
 0x14d   : > { %5086 = vmatprep.subr.bf16.mxu1 %v5450_v55  ;;  %v5521_v55 = vld [vmem:[%s6612_s13 + $0x290] sm:$0xff]  }
 0x14e   : > { %3878 = vmatmul.mubr.bf16.vlgmr.msra.gmra.mxu0 %v5442_v48  ;;  %v5514_v48 = vld [vmem:[%s6612_s13 + $0x258] sm:$0xff]  }
 0x14f   : > { %3927 = vmatmul.mubr.bf16.vlgmr.msra.gmra.mxu1 %v5445_v50  ;;  %5059 = vmatpush3.bf16.msra.mxu0 %v5449_v54  ;;  %v5516_v50 = vld [vmem:[%s6612_s13 + $0x2d8] sm:$0xff]   ;;  %v5520_v54 = vld [vmem:[%s6612_s13 + $0x2d0] sm:$0xff]  }
 0x150   : > { %3885 = vmatprep.mubr.bf16.mxu0 %v5466_v52  ;;  %5087 = vmatpush3.bf16.msra.mxu1 %v5451_v56  ;;  %v5518_v52 = vld [vmem:[%s6612_s13 + $0x250] sm:$0xff]   ;;  %v5522_v56 = vld [vmem:[%s6612_s13 + $0x248] sm:$0xff]  }
 0x151   : > { %5060 = vmatprep.subr.bf16.mxu0 %v5452_v57  ;;  %5088 = vmatprep.subr.bf16.mxu1 %v5454_v59  ;;  %v5523_v57 = vld [vmem:[%s6612_s13 + $0x208] sm:$0xff]  }
 0x152   : > { %3934 = vmatprep.mubr.bf16.mxu1 %v5468_v7  ;;  %v5525_v59 = vld [vmem:[%s6612_s13 + $0x288] sm:$0xff]   ;;  %v5539_v7 = vld [vmem:[%s6612_s13 + $0x3b8] sm:$0xff]  }
 0x153   : > { %5061 = vmatpush3.bf16.msra.mxu0 %v5453_v58  ;;  %v5524_v58 = vld [vmem:[%s6612_s13 + $0x2c8] sm:$0xff]  }
 0x154   : > { %5089 = vmatpush3.bf16.msra.mxu1 %v5455_v60  ;;  %5062 = vmatprep.subr.bf16.mxu0 %v5456_v61  ;;  %v5526_v60 = vld [vmem:[%s6612_s13 + $0x240] sm:$0xff]  }
 0x155   : > { %5090 = vmatprep.subr.bf16.mxu1 %v5458_v63  ;;  %v5527_v61 = vld [vmem:[%s6612_s13 + $0x200] sm:$0xff]  }
 0x156   : > { %3886 = vmatmul.mubr.bf16.gmra.mxu0 %v5471_v9  ;;  %v5529_v63 = vld [vmem:[%s7154_s0 + $0x20] ss:$100 sps:$4 sm:$0xff]   ;;  %v5541_v9 = vld [vmem:[%s6612_s13 + $0x330] sm:$0xff]  }
 0x157   : > { %5063 = vmatpush3.bf16.msra.mxu0 %v5457_v62  ;;  %3935 = vmatmul.mubr.bf16.gmra.mxu1 %v5472_v10  ;;  %v5528_v62 = vld [vmem:[%s6612_s13 + $0x2c0] sm:$0xff]   ;;  %v5542_v10 = vld [vmem:[%s6612_s13 + $0x3f0] sm:$0xff]  }
 0x158   : > { %5091 = vmatpush3.bf16.msra.mxu1 %v5459_v0  ;;  %5064 = vmatprep.subr.bf16.mxu0 %v5460_v1  ;;  %v5531_v0 = vld [vmem:[%s7154_s0 + $0x24] ss:$100 sps:$4 sm:$0xff]  }
 0x159   : > { %5092 = vmatprep.subr.bf16.mxu1 %v5462_v3  ;;  %3975 = vmatprep.mubr.bf16.mxu0 %v5487_v24  ;;  %v5532_v1 = vld [vmem:[%s6612_s13 + $0x280] sm:$0xff]   ;;  %v5534_v3 = vld [vmem:[%s7154_s0 + $0x28] ss:$100 sps:$4 sm:$0xff]   ;;  %v5558_v24 = vld [vmem:[%s6612_s13 + $0x358] sm:$0xff]  }
 0x15a   : > { %4024 = vmatprep.mubr.bf16.mxu1 %v5492_v28  ;;  %v5562_v28 = vld [vmem:[%s6612_s13 + $0x350] sm:$0xff]  }
 0x15b   : > { %5065 = vmatpush3.bf16.msra.mxu0 %v5461_v2  ;;  %v5533_v2 = vld [vmem:[%s6612_s13 + $0x378] sm:$0xff]  }
 0x15c   : > { %5093 = vmatpush3.bf16.msra.mxu1 %v5463_v4  ;;  %5066 = vmatprep.subr.bf16.mxu0 %v5464_v5  ;;  %v5536_v4 = vld [vmem:[%s7154_s0 + $0x2c] ss:$100 sps:$4 sm:$0xff]   ;;  %v5537_v5 = vld [vmem:[%s6612_s13 + $0x338] sm:$0xff]  }
 0x15d   : > { %5094 = vmatprep.subr.bf16.mxu1 %v5470_v8  ;;  %v5540_v8 = vld [vmem:[%s6612_s13 + $0x370] sm:$0xff]  }
 0x15f   : > { %5067 = vmatpush3.bf16.msra.mxu0 %v5465_v6  ;;  %v5538_v6 = vld [vmem:[%s6612_s13 + $0x3f8] sm:$0xff]  }
 0x160   : > { %5095 = vmatpush3.bf16.msra.mxu1 %v5473_v11  ;;  %5068 = vmatprep.subr.bf16.mxu0 %v5474_v12  ;;  %v5543_v11 = vld [vmem:[%s7154_s0 + $0xec] ss:$100 sps:$4 sm:$0xff]  }
 0x161   : > { %5096 = vmatprep.subr.bf16.mxu1 %v5476_v14  ;;  %v5545_v12 = vld [vmem:[%s6612_s13 + $0x3b0] sm:$0xff]   ;;  %v5547_v14 = vld [vmem:[%s6612_s13 + $0x368] sm:$0xff]  }
 0x163   : > { %5069 = vmatpush3.bf16.msra.mxu0 %v5475_v13  ;;  %v5546_v13 = vld [vmem:[%s7154_s0 + $0xe8] ss:$100 sps:$4 sm:$0xff]  }
 0x164   : > { %5097 = vmatpush3.bf16.msra.mxu1 %v5477_v15  ;;  %5070 = vmatprep.subr.bf16.mxu0 %v5478_v16  ;;  %v5548_v15 = vld [vmem:[%s7154_s0 + $0xf4] ss:$100 sps:$4 sm:$0xff]   ;;  %v5550_v16 = vld [vmem:[%s6612_s13 + $0x328] sm:$0xff]  }
 0x165   : > { %5098 = vmatprep.subr.bf16.mxu1 %v5480_v18  ;;  %v5552_v18 = vld [vmem:[%s6612_s13 + $0x3e8] sm:$0xff]  }
 0x167   : > { %5071 = vmatpush3.bf16.msra.mxu0 %v5479_v17  ;;  %v5551_v17 = vld [vmem:[%s7154_s0 + $0xf0] ss:$100 sps:$4 sm:$0xff]  }
 0x168   : > { %5099 = vmatpush3.bf16.msra.mxu1 %v5481_v19  ;;  %5072 = vmatprep.subr.bf16.mxu0 %v5482_v20  ;;  %v5553_v19 = vld [vmem:[%s6612_s13 + $0x3a8] sm:$0xff]   ;;  %v5554_v20 = vld [vmem:[%s6612_s13 + $0x360] sm:$0xff]  }
 0x169   : > { %5100 = vmatprep.subr.bf16.mxu1 %v5484_v22  ;;  %v5556_v22 = vld [vmem:[%s6612_s13 + $0x3e0] sm:$0xff]  }
 0x16b   : > { %5073 = vmatpush3.bf16.msra.mxu0 %v5483_v21  ;;  %v5555_v21 = vld [vmem:[%s6612_s13 + $0x320] sm:$0xff]  }
 0x16c   : > { %5101 = vmatpush3.bf16.msra.mxu1 %v5488_v25  ;;  %5114 = vmatprep.subr.bf16.mxu0 %v5489_v26  ;;  %v5559_v25 = vld [vmem:[%s6612_s13 + $0x318] sm:$0xff]  }
 0x16d   : > { %5142 = vmatprep.subr.bf16.mxu1 %v5494_v30  ;;  %v5560_v26 = vld [vmem:[%s6612_s13 + $0x3d8] sm:$0xff]   ;;  %v5564_v30 = vld [vmem:[%s6612_s13 + $0x3d0] sm:$0xff]  }
 0x16e   : > { %3976 = vmatmul.mubr.bf16.vlgmr.msra.gmra.mxu0 %v5485_v23  ;;  %v5557_v23 = vld [vmem:[%s6612_s13 + $0x3a0] sm:$0xff]  }
 0x16f   : > { %5115 = vmatpush3.bf16.msra.mxu0 %v5493_v29  ;;  %4025 = vmatmul.mubr.bf16.vlgmr.msra.gmra.mxu1 %v5490_v27  ;;  %v5561_v27 = vld [vmem:[%s6612_s13 + $0x398] sm:$0xff]   ;;  %v5563_v29 = vld [vmem:[%s6612_s13 + $0x310] sm:$0xff]  }
 0x170   : > { %5143 = vmatpush3.bf16.msra.mxu1 %v5495_v31  ;;  %5116 = vmatprep.subr.bf16.mxu0 %v5496_v32  ;;  %v5565_v31 = vld [vmem:[%s6612_s13 + $0x390] sm:$0xff]   ;;  %v5566_v32 = vld [vmem:[%s6612_s13 + $0x348] sm:$0xff]  }
 0x171   : > { %5144 = vmatprep.subr.bf16.mxu1 %v5498_v34  ;;  %3983 = vmatprep.mubr.bf16.mxu0 %v5499_v35  ;;  %v5568_v34 = vld [vmem:[%s6612_s13 + $0x3c8] sm:$0xff]  }
 0x172   : > { %4032 = vmatprep.mubr.bf16.mxu1 %v5504_v39  ;;  %v5569_v35 = vld [vmem:[%s6612_s13 + $0x388] sm:$0xff]   ;;  %v5573_v39 = vld [vmem:[%s7154_s0 + $0x30] ss:$100 sps:$4 sm:$0xff]  }
 0x173   : > { %5117 = vmatpush3.bf16.msra.mxu0 %v5497_v33  ;;  %v5567_v33 = vld [vmem:[%s6612_s13 + $0x308] sm:$0xff]  }
 0x174   : > { %5145 = vmatpush3.bf16.msra.mxu1 %v5501_v36  ;;  %5118 = vmatprep.subr.bf16.mxu0 %v5503_v38  ;;  %v5570_v36 = vld [vmem:[%s6612_s13 + $0x340] sm:$0xff]  }
 0x175   : > { %5146 = vmatprep.subr.bf16.mxu1 %v5508_v42  ;;  %v5572_v38 = vld [vmem:[%s6612_s13 + $0x3c0] sm:$0xff]   ;;  %v5577_v42 = vld [vmem:[%s6612_s13 + $0x478] sm:$0xff]  }
 0x176   : > { %3984 = vmatmul.mubr.bf16.gmra.mxu0 %v5502_v37  ;;  %v5571_v37 = vld [vmem:[%s6612_s13 + $0x300] sm:$0xff]  }
 0x177   : > { %5119 = vmatpush3.bf16.msra.mxu0 %v5506_v40  ;;  %4033 = vmatmul.mubr.bf16.gmra.mxu1 %v5507_v41  ;;  %v5575_v40 = vld [vmem:[%s7154_s0 + $0x34] ss:$100 sps:$4 sm:$0xff]   ;;  %v5576_v41 = vld [vmem:[%s6612_s13 + $0x380] sm:$0xff]  }
 0x178   : > { %5147 = vmatpush3.bf16.msra.mxu1 %v5509_v43  ;;  %5120 = vmatprep.subr.bf16.mxu0 %v5510_v44  ;;  %v5578_v43 = vld [vmem:[%s7154_s0 + $0x38] ss:$100 sps:$4 sm:$0xff]  }
 0x179   : > { %5148 = vmatprep.subr.bf16.mxu1 %v5512_v46  ;;  %4073 = vmatprep.mubr.bf16.mxu0 %v5531_v0  ;;  %v5580_v44 = vld [vmem:[%s7154_s0 + $0x3c] ss:$100 sps:$4 sm:$0xff]  }
 0x17a   : > { %4122 = vmatprep.mubr.bf16.mxu1 %v5536_v4  ;;  %v5582_v46 = vld [vmem:[%s6612_s13 + $0x4f8] sm:$0xff]   ;;  %v5606_v4 = vld [vmem:[%s6612_s13 + $0x450] sm:$0xff]  }
 0x17b   : > { %5121 = vmatpush3.bf16.msra.mxu0 %v5511_v45  ;;  %v5581_v45 = vld [vmem:[%s6612_s13 + $0x438] sm:$0xff]  }
 0x17c   : > { %5149 = vmatpush3.bf16.msra.mxu1 %v5513_v47  ;;  %5122 = vmatprep.subr.bf16.mxu0 %v5514_v48  ;;  %v5583_v47 = vld [vmem:[%s6612_s13 + $0x4b8] sm:$0xff]   ;;  %v5584_v48 = vld [vmem:[%s6612_s13 + $0x470] sm:$0xff]  }
 0x17d   : > { %5150 = vmatprep.subr.bf16.mxu1 %v5516_v50  ;;  %v5586_v50 = vld [vmem:[%s6612_s13 + $0x4f0] sm:$0xff]   ;;  %v5602_v0 = vld [vmem:[%s6612_s13 + $0x458] sm:$0xff]  }
 0x17f   : > { %5123 = vmatpush3.bf16.msra.mxu0 %v5515_v49  ;;  %v5585_v49 = vld [vmem:[%s6612_s13 + $0x430] sm:$0xff]  }
 0x180   : > { %5151 = vmatpush3.bf16.msra.mxu1 %v5517_v51  ;;  %5124 = vmatprep.subr.bf16.mxu0 %v5518_v52  ;;  %v5587_v51 = vld [vmem:[%s7154_s0 + $0xfc] ss:$100 sps:$4 sm:$0xff]   ;;  %v5589_v52 = vld [vmem:[%s6612_s13 + $0x4b0] sm:$0xff]  }
 0x181   : > { %5152 = vmatprep.subr.bf16.mxu1 %v5520_v54  ;;  %v5591_v54 = vld [vmem:[%s6612_s13 + $0x468] sm:$0xff]  }
 0x183   : > { %5125 = vmatpush3.bf16.msra.mxu0 %v5519_v53  ;;  %v5590_v53 = vld [vmem:[%s7154_s0 + $0xf8] ss:$100 sps:$4 sm:$0xff]  }
 0x184   : > { %5153 = vmatpush3.bf16.msra.mxu1 %v5521_v55  ;;  %5126 = vmatprep.subr.bf16.mxu0 %v5522_v56  ;;  %v5592_v55 = vld [vmem:[%s7154_s0 + $0x104] ss:$100 sps:$4 sm:$0xff]  }
 0x185   : > { %5154 = vmatprep.subr.bf16.mxu1 %v5524_v58  ;;  %v5594_v56 = vld [vmem:[%s6612_s13 + $0x428] sm:$0xff]  }
 0x186   : > { %v5596_v58 = vld [vmem:[%s6612_s13 + $0x4e8] sm:$0xff]  }
 0x187   : > { %5127 = vmatpush3.bf16.msra.mxu0 %v5523_v57  ;;  %v5595_v57 = vld [vmem:[%s7154_s0 + $0x100] ss:$100 sps:$4 sm:$0xff]  }
 0x188   : > { %5155 = vmatpush3.bf16.msra.mxu1 %v5525_v59  ;;  %5128 = vmatprep.subr.bf16.mxu0 %v5526_v60  ;;  %v5597_v59 = vld [vmem:[%s6612_s13 + $0x4a8] sm:$0xff]   ;;  %v5598_v60 = vld [vmem:[%s6612_s13 + $0x460] sm:$0xff]  }
 0x189   : > { %5156 = vmatprep.subr.bf16.mxu1 %v5528_v62  ;;  %v5600_v62 = vld [vmem:[%s6612_s13 + $0x4e0] sm:$0xff]  }
 0x18b   : > { %5129 = vmatpush3.bf16.msra.mxu0 %v5527_v61  ;;  %v5599_v61 = vld [vmem:[%s6612_s13 + $0x420] sm:$0xff]  }
 0x18c   : > { %5157 = vmatpush3.bf16.msra.mxu1 %v5532_v1  ;;  %5170 = vmatprep.subr.bf16.mxu0 %v5533_v2  ;;  %v5603_v1 = vld [vmem:[%s6612_s13 + $0x418] sm:$0xff]  }
 0x18d   : > { %5198 = vmatprep.subr.bf16.mxu1 %v5538_v6  ;;  %v5604_v2 = vld [vmem:[%s6612_s13 + $0x4d8] sm:$0xff]   ;;  %v5608_v6 = vld [vmem:[%s6612_s13 + $0x4d0] sm:$0xff]  }
 0x18e   : > { %4074 = vmatmul.mubr.bf16.vlgmr.msra.gmra.mxu0 %v5529_v63  ;;  %v5601_v63 = vld [vmem:[%s6612_s13 + $0x4a0] sm:$0xff]  }
 0x18f   : > { %5171 = vmatpush3.bf16.msra.mxu0 %v5537_v5  ;;  %4123 = vmatmul.mubr.bf16.vlgmr.msra.gmra.mxu1 %v5534_v3  ;;  %v5605_v3 = vld [vmem:[%s6612_s13 + $0x498] sm:$0xff]   ;;  %v5607_v5 = vld [vmem:[%s6612_s13 + $0x410] sm:$0xff]  }
 0x190   : > { %5199 = vmatpush3.bf16.msra.mxu1 %v5539_v7  ;;  %5172 = vmatprep.subr.bf16.mxu0 %v5540_v8  ;;  %v5609_v7 = vld [vmem:[%s6612_s13 + $0x490] sm:$0xff]   ;;  %v5610_v8 = vld [vmem:[%s6612_s13 + $0x448] sm:$0xff]  }
 0x191   : > { %5200 = vmatprep.subr.bf16.mxu1 %v5542_v10  ;;  %4081 = vmatprep.mubr.bf16.mxu0 %v5543_v11  ;;  %v5612_v10 = vld [vmem:[%s6612_s13 + $0x4c8] sm:$0xff]  }
 0x192   : > { %4130 = vmatprep.mubr.bf16.mxu1 %v5548_v15  ;;  %v5613_v11 = vld [vmem:[%s6612_s13 + $0x488] sm:$0xff]   ;;  %v5617_v15 = vld [vmem:[%s7154_s0 + $0x40] ss:$100 sps:$4 sm:$0xff]  }
 0x193   : > { %5173 = vmatpush3.bf16.msra.mxu0 %v5541_v9  ;;  %v5611_v9 = vld [vmem:[%s6612_s13 + $0x408] sm:$0xff]  }
 0x194   : > { %5201 = vmatpush3.bf16.msra.mxu1 %v5545_v12  ;;  %5174 = vmatprep.subr.bf16.mxu0 %v5547_v14  ;;  %v5614_v12 = vld [vmem:[%s6612_s13 + $0x440] sm:$0xff]  }
 0x195   : > { %5202 = vmatprep.subr.bf16.mxu1 %v5552_v18  ;;  %v5616_v14 = vld [vmem:[%s6612_s13 + $0x4c0] sm:$0xff]   ;;  %v5621_v18 = vld [vmem:[%s6612_s13 + $0x578] sm:$0xff]  }
 0x196   : > { %4082 = vmatmul.mubr.bf16.gmra.mxu0 %v5546_v13  ;;  %v5615_v13 = vld [vmem:[%s6612_s13 + $0x400] sm:$0xff]  }
 0x197   : > { %5175 = vmatpush3.bf16.msra.mxu0 %v5550_v16  ;;  %4131 = vmatmul.mubr.bf16.gmra.mxu1 %v5551_v17  ;;  %v5619_v16 = vld [vmem:[%s7154_s0 + $0x44] ss:$100 sps:$4 sm:$0xff]  }
 0x198   : > { %5203 = vmatpush3.bf16.msra.mxu1 %v5553_v19  ;;  %5176 = vmatprep.subr.bf16.mxu0 %v5554_v20  ;;  %v5620_v17 = vld [vmem:[%s6612_s13 + $0x480] sm:$0xff]   ;;  %v5622_v19 = vld [vmem:[%s7154_s0 + $0x48] ss:$100 sps:$4 sm:$0xff]  }
 0x199   : > { %5204 = vmatprep.subr.bf16.mxu1 %v5556_v22  ;;  %4171 = vmatprep.mubr.bf16.mxu0 %v5575_v40  ;;  %v5624_v20 = vld [vmem:[%s7154_s0 + $0x4c] ss:$100 sps:$4 sm:$0xff]   ;;  %v5626_v22 = vld [vmem:[%s6612_s13 + $0x5f8] sm:$0xff]  }
 0x19a   : > { %4220 = vmatprep.mubr.bf16.mxu1 %v5580_v44  ;;  %v5646_v40 = vld [vmem:[%s6612_s13 + $0x558] sm:$0xff]   ;;  %v5650_v44 = vld [vmem:[%s6612_s13 + $0x550] sm:$0xff]  }
 0x19b   : > { %5177 = vmatpush3.bf16.msra.mxu0 %v5555_v21  ;;  %v5625_v21 = vld [vmem:[%s6612_s13 + $0x538] sm:$0xff]  }
 0x19c   : > { %5205 = vmatpush3.bf16.msra.mxu1 %v5557_v23  ;;  %5178 = vmatprep.subr.bf16.mxu0 %v5558_v24  ;;  %v5627_v23 = vld [vmem:[%s6612_s13 + $0x5b8] sm:$0xff]   ;;  %v5628_v24 = vld [vmem:[%s6612_s13 + $0x570] sm:$0xff]  }
 0x19d   : > { %5206 = vmatprep.subr.bf16.mxu1 %v5560_v26  ;;  %v5630_v26 = vld [vmem:[%s6612_s13 + $0x5f0] sm:$0xff]  }
 0x19f   : > { %5179 = vmatpush3.bf16.msra.mxu0 %v5559_v25  ;;  %v5629_v25 = vld [vmem:[%s6612_s13 + $0x530] sm:$0xff]  }
 0x1a0   : > { %5207 = vmatpush3.bf16.msra.mxu1 %v5561_v27  ;;  %5180 = vmatprep.subr.bf16.mxu0 %v5562_v28  ;;  %v5631_v27 = vld [vmem:[%s7154_s0 + $0x10c] ss:$100 sps:$4 sm:$0xff]  }
 0x1a1   : > { %5208 = vmatprep.subr.bf16.mxu1 %v5564_v30  ;;  %v5633_v28 = vld [vmem:[%s6612_s13 + $0x5b0] sm:$0xff]   ;;  %v5635_v30 = vld [vmem:[%s6612_s13 + $0x568] sm:$0xff]  }
 0x1a3   : > { %5181 = vmatpush3.bf16.msra.mxu0 %v5563_v29  ;;  %v5634_v29 = vld [vmem:[%s7154_s0 + $0x108] ss:$100 sps:$4 sm:$0xff]  }
 0x1a4   : > { %5209 = vmatpush3.bf16.msra.mxu1 %v5565_v31  ;;  %5182 = vmatprep.subr.bf16.mxu0 %v5566_v32  ;;  %v5636_v31 = vld [vmem:[%s7154_s0 + $0x114] ss:$100 sps:$4 sm:$0xff]   ;;  %v5638_v32 = vld [vmem:[%s6612_s13 + $0x528] sm:$0xff]  }
 0x1a5   : > { %5210 = vmatprep.subr.bf16.mxu1 %v5568_v34  ;;  %v5640_v34 = vld [vmem:[%s6612_s13 + $0x5e8] sm:$0xff]  }
 0x1a7   : > { %5183 = vmatpush3.bf16.msra.mxu0 %v5567_v33  ;;  %v5639_v33 = vld [vmem:[%s7154_s0 + $0x110] ss:$100 sps:$4 sm:$0xff]  }
 0x1a8   : > { %5211 = vmatpush3.bf16.msra.mxu1 %v5569_v35  ;;  %5184 = vmatprep.subr.bf16.mxu0 %v5570_v36  ;;  %v5641_v35 = vld [vmem:[%s6612_s13 + $0x5a8] sm:$0xff]   ;;  %v5642_v36 = vld [vmem:[%s6612_s13 + $0x560] sm:$0xff]  }
 0x1a9   : > { %5212 = vmatprep.subr.bf16.mxu1 %v5572_v38  ;;  %v5644_v38 = vld [vmem:[%s6612_s13 + $0x5e0] sm:$0xff]  }
 0x1ab   : > { %5185 = vmatpush3.bf16.msra.mxu0 %v5571_v37  ;;  %v5643_v37 = vld [vmem:[%s6612_s13 + $0x520] sm:$0xff]  }
 0x1ac   : > { %5213 = vmatpush3.bf16.msra.mxu1 %v5576_v41  ;;  %5226 = vmatprep.subr.bf16.mxu0 %v5577_v42  ;;  %v5647_v41 = vld [vmem:[%s6612_s13 + $0x518] sm:$0xff]  }
 0x1ad   : > { %5254 = vmatprep.subr.bf16.mxu1 %v5582_v46  ;;  %v5648_v42 = vld [vmem:[%s6612_s13 + $0x5d8] sm:$0xff]   ;;  %v5652_v46 = vld [vmem:[%s6612_s13 + $0x5d0] sm:$0xff]  }
 0x1ae   : > { %4172 = vmatmul.mubr.bf16.vlgmr.msra.gmra.mxu0 %v5573_v39  ;;  %v5645_v39 = vld [vmem:[%s6612_s13 + $0x5a0] sm:$0xff]  }
 0x1af   : > { %5227 = vmatpush3.bf16.msra.mxu0 %v5581_v45  ;;  %4221 = vmatmul.mubr.bf16.vlgmr.msra.gmra.mxu1 %v5578_v43  ;;  %v5649_v43 = vld [vmem:[%s6612_s13 + $0x598] sm:$0xff]   ;;  %v5651_v45 = vld [vmem:[%s6612_s13 + $0x510] sm:$0xff]  }
 0x1b0   : > { %5255 = vmatpush3.bf16.msra.mxu1 %v5583_v47  ;;  %5228 = vmatprep.subr.bf16.mxu0 %v5584_v48  ;;  %v5653_v47 = vld [vmem:[%s6612_s13 + $0x590] sm:$0xff]   ;;  %v5654_v48 = vld [vmem:[%s6612_s13 + $0x548] sm:$0xff]  }
 0x1b1   : > { %5256 = vmatprep.subr.bf16.mxu1 %v5586_v50  ;;  %4179 = vmatprep.mubr.bf16.mxu0 %v5587_v51  ;;  %v5656_v50 = vld [vmem:[%s6612_s13 + $0x5c8] sm:$0xff]  }
 0x1b2   : > { %4228 = vmatprep.mubr.bf16.mxu1 %v5592_v55  ;;  %v5657_v51 = vld [vmem:[%s6612_s13 + $0x588] sm:$0xff]   ;;  %v5661_v55 = vld [vmem:[%s7154_s0 + $0x50] ss:$100 sps:$4 sm:$0xff]  }
 0x1b3   : > { %5229 = vmatpush3.bf16.msra.mxu0 %v5585_v49  ;;  %v5655_v49 = vld [vmem:[%s6612_s13 + $0x508] sm:$0xff]  }
 0x1b4   : > { %5257 = vmatpush3.bf16.msra.mxu1 %v5589_v52  ;;  %5230 = vmatprep.subr.bf16.mxu0 %v5591_v54  ;;  %v5658_v52 = vld [vmem:[%s6612_s13 + $0x540] sm:$0xff]  }
 0x1b5   : > { %5258 = vmatprep.subr.bf16.mxu1 %v5596_v58  ;;  %v5660_v54 = vld [vmem:[%s6612_s13 + $0x5c0] sm:$0xff]   ;;  %v5665_v58 = vld [vmem:[%s6612_s13 + $0x638] sm:$0xff]  }
 0x1b6   : > { %4180 = vmatmul.mubr.bf16.gmra.mxu0 %v5590_v53  ;;  %v5659_v53 = vld [vmem:[%s6612_s13 + $0x500] sm:$0xff]  }
 0x1b7   : > { %5231 = vmatpush3.bf16.msra.mxu0 %v5594_v56  ;;  %4229 = vmatmul.mubr.bf16.gmra.mxu1 %v5595_v57  ;;  %v5663_v56 = vld [vmem:[%s7154_s0 + $0x54] ss:$100 sps:$4 sm:$0xff]   ;;  %v5664_v57 = vld [vmem:[%s6612_s13 + $0x580] sm:$0xff]  }
 0x1b8   : > { %5259 = vmatpush3.bf16.msra.mxu1 %v5597_v59  ;;  %5232 = vmatprep.subr.bf16.mxu0 %v5598_v60  ;;  %v5666_v59 = vld [vmem:[%s7154_s0 + $0x58] ss:$100 sps:$4 sm:$0xff]  }
 0x1b9   : > { %5260 = vmatprep.subr.bf16.mxu1 %v5600_v62  ;;  %4269 = vmatprep.mubr.bf16.mxu0 %v5619_v16  ;;  %v5668_v60 = vld [vmem:[%s7154_s0 + $0x5c] ss:$100 sps:$4 sm:$0xff]  }
 0x1ba   : > { %4318 = vmatprep.mubr.bf16.mxu1 %v5624_v20  ;;  %v5670_v62 = vld [vmem:[%s7154_s0 + $0x11c] ss:$100 sps:$4 sm:$0xff]   ;;  %v5680_v20 = vld [vmem:[%s6612_s13 + $0x608] sm:$0xff]  }
 0x1bb   : > { %5233 = vmatpush3.bf16.msra.mxu0 %v5599_v61  ;;  %v5669_v61 = vld [vmem:[%s6612_s13 + $0x630] sm:$0xff]  }
 0x1bc   : > { %5261 = vmatpush3.bf16.msra.mxu1 %v5601_v63  ;;  %5234 = vmatprep.subr.bf16.mxu0 %v5602_v0  ;;  %v5672_v63 = vld [vmem:[%s7154_s0 + $0x118] ss:$100 sps:$4 sm:$0xff]   ;;  %v5673_v0 = vld [vmem:[%s6612_s13 + $0x628] sm:$0xff]  }
 0x1bd   : > { %5262 = vmatprep.subr.bf16.mxu1 %v5604_v2  ;;  %v5677_v2 = vld [vmem:[%s6612_s13 + $0x620] sm:$0xff]  }
 0x1bf   : > { %5235 = vmatpush3.bf16.msra.mxu0 %v5603_v1  ;;  %v5674_v1 = vld [vmem:[%s7154_s0 + $0x124] ss:$100 sps:$4 sm:$0xff]  }
 0x1c0   : > { %5263 = vmatpush3.bf16.msra.mxu1 %v5605_v3  ;;  %5236 = vmatprep.subr.bf16.mxu0 %v5606_v4  ;;  %v5676_v3 = vld [vmem:[%s7154_s0 + $0x120] ss:$100 sps:$4 sm:$0xff]   ;;  %v5678_v4 = vld [vmem:[%s6612_s13 + $0x618] sm:$0xff]  }
 0x1c1   : > { %5264 = vmatprep.subr.bf16.mxu1 %v5608_v6  ;;  %v5682_v6 = vld [vmem:[%s7154_s0 + $0x60] ss:$100 sps:$4 sm:$0xff]  }
 0x1c3   : > { %5237 = vmatpush3.bf16.msra.mxu0 %v5607_v5 }
 0x1c4   : > { %5265 = vmatpush3.bf16.msra.mxu1 %v5609_v7  ;;  %5238 = vmatprep.subr.bf16.mxu0 %v5610_v8 }
 0x1c5   : > { %5266 = vmatprep.subr.bf16.mxu1 %v5612_v10 }
 0x1c7   : > { %5239 = vmatpush3.bf16.msra.mxu0 %v5611_v9 }
 0x1c8   : > { %5267 = vmatpush3.bf16.msra.mxu1 %v5613_v11  ;;  %5240 = vmatprep.subr.bf16.mxu0 %v5614_v12 }
 0x1c9   : > { %5268 = vmatprep.subr.bf16.mxu1 %v5616_v14 }
 0x1cb   : > { %5241 = vmatpush3.bf16.msra.mxu0 %v5615_v13  ;;  %v5679_v13 = vld [vmem:[%s6612_s13 + $0x610] sm:$0xff]  }
 0x1cc   : > { %5269 = vmatpush3.bf16.msra.mxu1 %v5620_v17  ;;  %5282 = vmatprep.subr.bf16.mxu0 %v5621_v18 }
 0x1cd   : > { %5310 = vmatprep.subr.bf16.mxu1 %v5626_v22  ;;  %v5681_v22 = vld [vmem:[%s6612_s13 + $0x600] sm:$0xff]   ;;  %s1922_s13 = scalar_select %p1921_p11, %s5714_s17, 1 }
 0x1ce   : > { %4270 = vmatmul.mubr.bf16.vlgmr.msra.gmra.mxu0 %v5617_v15 }
 0x1cf   : > { %5283 = vmatpush3.bf16.msra.mxu0 %v5625_v21  ;;  %4319 = vmatmul.mubr.bf16.vlgmr.msra.gmra.mxu1 %v5622_v19  ;;  %s1923_s22 = scalar_lea.vmem %s7156_s2, %s1922_s13  ;;  %s1926_s27 = scalar_lea.vmem %s7157_s3, %s1922_s13 }
 0x1d0   : > { %5311 = vmatpush3.bf16.msra.mxu1 %v5627_v23  ;;  %5284 = vmatprep.subr.bf16.mxu0 %v5628_v24  ;;  %v5683_v24 = vld [vmem:[%s7154_s0 + $0x128] ss:$100 sps:$4 sm:$0xff]  }
 0x1d1   : > { %5312 = vmatprep.subr.bf16.mxu1 %v5630_v26  ;;  %4277 = vmatprep.mubr.bf16.mxu0 %v5631_v27 }
 0x1d2   : > { %4326 = vmatprep.mubr.bf16.mxu1 %v5636_v31 }
 0x1d3   : > { %5285 = vmatpush3.bf16.msra.mxu0 %v5629_v25 }
 0x1d4   : > { %5313 = vmatpush3.bf16.msra.mxu1 %v5633_v28  ;;  %5286 = vmatprep.subr.bf16.mxu0 %v5635_v30 }
 0x1d5   : > { %5314 = vmatprep.subr.bf16.mxu1 %v5640_v34 }
 0x1d6   : > { %4278 = vmatmul.mubr.bf16.gmra.mxu0 %v5634_v29 }
 0x1d7   : > { %5287 = vmatpush3.bf16.msra.mxu0 %v5638_v32  ;;  %4327 = vmatmul.mubr.bf16.gmra.mxu1 %v5639_v33 }
 0x1d8   : > { %5315 = vmatpush3.bf16.msra.mxu1 %v5641_v35  ;;  %5288 = vmatprep.subr.bf16.mxu0 %v5642_v36 }
 0x1d9   : > { %5316 = vmatprep.subr.bf16.mxu1 %v5644_v38  ;;  %4367 = vmatprep.mubr.bf16.mxu0 %v5663_v56 }
 0x1da   : > { %4416 = vmatprep.mubr.bf16.mxu1 %v5668_v60 }
 0x1db   : > { %5289 = vmatpush3.bf16.msra.mxu0 %v5643_v37 }
 0x1dc   : > { %5317 = vmatpush3.bf16.msra.mxu1 %v5645_v39  ;;  %5290 = vmatprep.subr.bf16.mxu0 %v5646_v40 }
 0x1dd   : > { %5318 = vmatprep.subr.bf16.mxu1 %v5648_v42 }
 0x1df   : > { %5291 = vmatpush3.bf16.msra.mxu0 %v5647_v41 }
 0x1e0   : > { %5319 = vmatpush3.bf16.msra.mxu1 %v5649_v43  ;;  %5292 = vmatprep.subr.bf16.mxu0 %v5650_v44 }
 0x1e1   : > { %5320 = vmatprep.subr.bf16.mxu1 %v5652_v46 }
 0x1e3   : > { %5293 = vmatpush3.bf16.msra.mxu0 %v5651_v45 }
 0x1e4   : > { %5321 = vmatpush3.bf16.msra.mxu1 %v5653_v47  ;;  %5294 = vmatprep.subr.bf16.mxu0 %v5654_v48 }
 0x1e5   : > { %5322 = vmatprep.subr.bf16.mxu1 %v5656_v50 }
 0x1e7   : > { %5295 = vmatpush3.bf16.msra.mxu0 %v5655_v49 }
 0x1e8   : > { %5323 = vmatpush3.bf16.msra.mxu1 %v5657_v51  ;;  %5296 = vmatprep.subr.bf16.mxu0 %v5658_v52 }
 0x1e9   : > { %5324 = vmatprep.subr.bf16.mxu1 %v5660_v54 }
 0x1eb   : > { %5297 = vmatpush3.bf16.msra.mxu0 %v5659_v53 }
 0x1ec   : > { %5325 = vmatpush3.bf16.msra.mxu1 %v5664_v57  ;;  %5348 = vmatprep.subr.bf16.mxu0 %v5665_v58 }
 0x1ee   : > { %4368 = vmatmul.mubr.bf16.vlgmr.msra.gmra.mxu0 %v5661_v55 }
 0x1ef   : > { %5349 = vmatpush3.bf16.msra.mxu0 %v5665_v58  ;;  %4417 = vmatmul.mubr.bf16.vlgmr.msra.gmra.mxu1 %v5666_v59 }
 0x1f0   : > { %5350 = vmatprep.subr.bf16.mxu0 %v5669_v61  ;;  %4375 = vmatprep.mubr.bf16.mxu0 %v5670_v62 }
 0x1f1   : > { %4424 = vmatprep.mubr.bf16.mxu1 %v5674_v1 }
 0x1f3   : > { %5351 = vmatpush3.bf16.msra.mxu0 %v5669_v61 }
 0x1f4   : > { %5352 = vmatprep.subr.bf16.mxu0 %v5673_v0 }
 0x1f6   : > { %4376 = vmatmul.mubr.bf16.gmra.mxu0 %v5672_v63 }
 0x1f7   : > { %5353 = vmatpush3.bf16.msra.mxu0 %v5673_v0  ;;  %4425 = vmatmul.mubr.bf16.gmra.mxu1 %v5676_v3 }
 0x1f8   : > { %5354 = vmatprep.subr.bf16.mxu0 %v5677_v2  ;;  %5364 = vmatprep.mubr.bf16.mxu0 %v5682_v6 }
 0x1fb   : > { %5355 = vmatpush3.bf16.msra.mxu0 %v5677_v2 }
 0x1fc   : > { %5356 = vmatprep.subr.bf16.mxu0 %v5678_v4 }
 0x1ff   : > { %5357 = vmatpush3.bf16.msra.mxu0 %v5678_v4 }
 0x200   : > { %5358 = vmatprep.subr.bf16.mxu0 %v5679_v13 }
 0x203   : > { %5359 = vmatpush3.bf16.msra.mxu0 %v5679_v13 }
 0x204   : > { %5360 = vmatprep.subr.bf16.mxu0 %v5680_v20 }
 0x207   : > { %5361 = vmatpush3.bf16.msra.mxu0 %v5680_v20 }
 0x208   : > { %5362 = vmatprep.subr.bf16.mxu0 %v5681_v22 }
 0x20b   : > { %5363 = vmatpush3.bf16.msra.mxu0 %v5681_v22 }
 0x20e   : > { %v5018_v5 = vpop.f32.mrf.mxu0  ;;  %5365 = vmatmul.mubr.bf16.vlgmr.msra.gmra.mxu0 %v5683_v24 }
 0x20f   : > { %v5046_v7 = vpop.f32.mrf.mxu1 }
 0x210   : > { %v5019_v8 = vpop.f32.mrf.mxu0 }
 0x211   : > { %v5020_v9 = vadd.f32 %v5019_v8, %v5018_v5  ;;  %v5047_v10 = vpop.f32.mrf.mxu1 }
 0x212   : > { %v5048_v11 = vadd.f32 %v5047_v10, %v5046_v7  ;;  %v5021_v12 = vpop.f32.mrf.mxu0 }
 0x213   : > { %v5049_v14 = vpop.f32.mrf.mxu1 }
 0x214   : > { %v3929_v15 = vadd.f32 %v5048_v11, %v5020_v9  ;;  %v5022_v16 = vpop.f32.mrf.mxu0 }
 0x215   : > { %v5023_v17 = vadd.f32 %v5022_v16, %v5021_v12  ;;  %v5050_v18 = vpop.f32.mrf.mxu1 }
 0x216   : > { %v5051_v19 = vadd.f32 %v5050_v18, %v5049_v14  ;;  %v5024_v23 = vpop.f32.mrf.mxu0 }
 0x217   : > { %v5052_v25 = vpop.f32.mrf.mxu1 }
 0x218   : > { %v6954_v21 = vadd.f32 %v5051_v19, %v5023_v17  ;;  %v5025_v26 = vpop.f32.mrf.mxu0 }
 0x219   : > { %v5026_v27 = vadd.f32 %v5025_v26, %v5024_v23  ;;  %v5053_v28 = vpop.f32.mrf.mxu1 }
 0x21a   : > { %v5054_v29 = vadd.f32 %v5053_v28, %v5052_v25  ;;  %v6962_v31 = vpop.f32.mrf.mxu0 }
 0x21b   : > { %v6964_v32 = vpop.f32.mrf.mxu1 }
 0x21c   : > { %v6960_v30 = vadd.f32 %v5054_v29, %v5026_v27  ;;  %v6966_v33 = vpop.f32.mrf.mxu0 }
 0x21d   : > { %v6968_v35 = vpop.f32.mrf.mxu1 }
 0x22e   : > { %v5074_v34 = vpop.f32.mrf.mxu0 }
 0x22f   : > { %v5102_v38 = vpop.f32.mrf.mxu1 }
 0x230   : > { %v5075_v36 = vpop.f32.mrf.mxu0 }
 0x231   : > { %v5076_v37 = vadd.f32 %v5075_v36, %v5074_v34  ;;  %v5103_v40 = vpop.f32.mrf.mxu1 }
 0x232   : > { %v5104_v41 = vadd.f32 %v5103_v40, %v5102_v38  ;;  %v6972_v43 = vpop.f32.mrf.mxu0 }
 0x233   : > { %v3978_v39 = vadd.f32 %v5076_v37, %v3929_v15  ;;  %v6976_v45 = vpop.f32.mrf.mxu1 }
 0x234   : > { %v6974_v44 = vpop.f32.mrf.mxu0 }
 0x235   : > { %v6970_v42 = vadd.f32 %v5104_v41, %v3978_v39  ;;  %v6978_v47 = vpop.f32.mrf.mxu1 }
 0x236   : > { %v5080_v46 = vpop.f32.mrf.mxu0 }
 0x237   : > { %v5108_v49 = vpop.f32.mrf.mxu1 }
 0x238   : > { %v5081_v48 = vpop.f32.mrf.mxu0 }
 0x239   : > { %v5109_v51 = vpop.f32.mrf.mxu1 }
 0x23a   : > { %v5083_v50 = vpop.f32.mrf.mxu0 }
 0x23b   : > { %v6980_v53 = vpop.f32.mrf.mxu1 }
 0x23c   : > { %v5084_v52 = vpop.f32.mrf.mxu0 }
 0x23d   : > { %v6984_v55 = vpop.f32.mrf.mxu1 }
 0x24e   : > { %v6982_v54 = vpop.f32.mrf.mxu0 }
 0x24f   : > { %v6986_v57 = vpop.f32.mrf.mxu1 }
 0x250   : > { %v5131_v56 = vpop.f32.mrf.mxu0 }
 0x251   : > { %v6990_v59 = vpop.f32.mrf.mxu1 }
 0x252   : > { %v6988_v58 = vpop.f32.mrf.mxu0 }
 0x253   : > { %v6994_v61 = vpop.f32.mrf.mxu1 }
 0x254   : > { %v6992_v60 = vpop.f32.mrf.mxu0 }
 0x255   : > { %v6996_v63 = vpop.f32.mrf.mxu1 }
 0x256   : > { %v5136_v62 = vpop.f32.mrf.mxu0 }
 0x257   : > { %v5164_v1 = vpop.f32.mrf.mxu1 }
 0x258   : > { %v5137_v0 = vpop.f32.mrf.mxu0 }
 0x259   : > { %v5165_v3 = vpop.f32.mrf.mxu1 }
 0x25a   : > { %v5139_v2 = vpop.f32.mrf.mxu0 }
 0x25b   : > { %v6998_v5 = vpop.f32.mrf.mxu1 }
 0x25c   : > { %v5140_v4 = vpop.f32.mrf.mxu0 }
 0x25d   : > { %v7002_v7 = vpop.f32.mrf.mxu1 }
 0x26e   : > { %v7000_v6 = vpop.f32.mrf.mxu0 }
 0x26f   : > { %v7004_v9 = vpop.f32.mrf.mxu1 }
 0x270   : > { %v5187_v8 = vpop.f32.mrf.mxu0 }
 0x271   : > { %v7008_v11 = vpop.f32.mrf.mxu1 }
 0x272   : > { %v7006_v10 = vpop.f32.mrf.mxu0 }
 0x273   : > { %v7012_v13 = vpop.f32.mrf.mxu1 }
 0x274   : > { %v7010_v12 = vpop.f32.mrf.mxu0  ;;  %7160 = vst [vmem:[#allocation5_spill] sm:$0xff] %v7012_v13  ;;  %v5085_v13 = vadd.f32 %v5084_v52, %v5083_v50  ;;  %v5107_v50 = vadd.f32 %v6978_v47, %v6976_v45  ;;  %v5166_v52 = vadd.f32 %v5165_v3, %v5164_v1  ;;  %v5188_v45 = vadd.f32 %v5187_v8, %v7000_v6 }
 0x275   : > { %v7014_v15 = vpop.f32.mrf.mxu1  ;;  %v5169_v1 = vadd.f32 %v7002_v7, %v6998_v5  ;;  %v5191_v6 = vadd.f32 %v7010_v12, %v7006_v10 }
 0x276   : > { %v5192_v14 = vpop.f32.mrf.mxu0  ;;  %7161 = vst [vmem:[#allocation6_spill] sm:$0xff] %v7014_v15 }
 0x277   : > { %v7016_v17 = vpop.f32.mrf.mxu1 }
 0x278   : > { %v5193_v16 = vpop.f32.mrf.mxu0 }
 0x279   : > { %v5221_v19 = vpop.f32.mrf.mxu1 }
 0x27a   : > { %v7018_v18 = vpop.f32.mrf.mxu0 }
 0x27b   : > { %v7020_v22 = vpop.f32.mrf.mxu1 }
 0x27c   : > { %v5196_v20 = vpop.f32.mrf.mxu0 }
 0x27d   : > { %v7024_v24 = vpop.f32.mrf.mxu1 }
 0x28e   : > { %v7022_v23 = vpop.f32.mrf.mxu0 }
 0x28f   : > { %v7028_v26 = vpop.f32.mrf.mxu1 }
 0x290   : > { %v7026_v25 = vpop.f32.mrf.mxu0  ;;  %7162 = vst [vmem:[#allocation7_spill] sm:$0xff] %v7028_v26 }
 0x291   : > { %v7032_v28 = vpop.f32.mrf.mxu1 }
 0x292   : > { %v7030_v27 = vpop.f32.mrf.mxu0  ;;  %7164 = vst [vmem:[#allocation9_spill] sm:$0xff] %v7032_v28 }
 0x293   : > { %7163 = vst [vmem:[#allocation8_spill] sm:$0xff] %v7030_v27  ;;  %v7036_v34 = vpop.f32.mrf.mxu1  ;;  %v5082_v27 = vadd.f32 %v5081_v48, %v5080_v46  ;;  %v5079_v46 = vadd.f32 %v6974_v44, %v6972_v43 }
 0x294   : > { %v7034_v29 = vpop.f32.mrf.mxu0  ;;  %7166 = vst [vmem:[#allocation11_spill] sm:$0xff] %v7036_v34  ;;  %v5029_v34 = vadd.f32 %v6966_v33, %v6962_v31  ;;  %v5138_v31 = vadd.f32 %v5137_v0, %v5136_v62  ;;  %v5141_v62 = vadd.f32 %v5140_v4, %v5139_v2  ;;  %v5216_v4 = vadd.f32 %v7008_v11, %v7004_v9  ;;  %v7174_v9 = vld [vmem:[#allocation5_spill] sm:$0xff]  ;;  %v7175_v11 = vld [vmem:[#allocation6_spill] sm:$0xff] }
 0x295   : > { %7165 = vst [vmem:[#allocation10_spill] sm:$0xff] %v7034_v29  ;;  %v7038_v37 = vpop.f32.mrf.mxu1 }
 0x296   : > { %v5248_v36 = vpop.f32.mrf.mxu0  ;;  %7167 = vst [vmem:[#allocation12_spill] sm:$0xff] %v7038_v37  ;;  %v5057_v37 = vadd.f32 %v6968_v35, %v6964_v32  ;;  %v5132_v32 = vadd.f32 %v5131_v56, %v6982_v54  ;;  %v5160_v54 = vadd.f32 %v6990_v59, %v6986_v57  ;;  %v5163_v57 = vadd.f32 %v6996_v63, %v6994_v61 }
 0x297   : > { %v7040_v39 = vpop.f32.mrf.mxu1  ;;  %v5244_v61 = vadd.f32 %v7026_v25, %v7022_v23 }
 0x298   : > { %v5249_v38 = vpop.f32.mrf.mxu0  ;;  %7168 = vst [vmem:[#allocation13_spill] sm:$0xff] %v7040_v39  ;;  %v4076_v0 = vadd.f32 %v5132_v32, %v6970_v42 }
 0x299   : > { %v7044_v41 = vpop.f32.mrf.mxu1  ;;  %v5250_v7 = vadd.f32 %v5249_v38, %v5248_v36 }
 0x29a   : > { %v7042_v40 = vpop.f32.mrf.mxu0  ;;  %7170 = vst [vmem:[#allocation15_spill] sm:$0xff] %v7044_v41  ;;  %v5110_v41 = vadd.f32 %v5109_v51, %v5108_v49  ;;  %v3981_v49 = vadd.f32 %v5079_v46, %v6954_v21  ;;  %v5194_v21 = vadd.f32 %v5193_v16, %v5192_v14  ;;  %v4125_v42 = vadd.f32 %v5160_v54, %v4076_v0  ;;  %v7180_v46 = vld [vmem:[#allocation7_spill] sm:$0xff] }
 0x29b   : > { %7169 = vst [vmem:[#allocation14_spill] sm:$0xff] %v7042_v40  ;;  %v7048_v26 = vpop.f32.mrf.mxu1  ;;  %v3986_v40 = vadd.f32 %v5082_v27, %v6960_v30  ;;  %v5113_v30 = vadd.f32 %v6984_v55, %v6980_v53  ;;  %v5135_v53 = vadd.f32 %v6992_v60, %v6988_v58  ;;  %v5222_v58 = vadd.f32 %v5221_v19, %v7016_v17 }
 0x29c   : > { %v7046_v15 = vpop.f32.mrf.mxu0  ;;  %v4030_v56 = vadd.f32 %v5107_v50, %v3981_v49  ;;  %v5197_v60 = vadd.f32 %v5196_v20, %v7018_v18  ;;  %v4174_v3 = vadd.f32 %v5188_v45, %v4125_v42  ;;  %v5225_v18 = vadd.f32 %v7024_v24, %v7020_v22  ;;  %v7182_v24 = vld [vmem:[#allocation8_spill] sm:$0xff]  ;;  %v7183_v32 = vld [vmem:[#allocation10_spill] sm:$0xff] }
 0x29d   : > { %7171 = vst [vmem:[#allocation16_spill] sm:$0xff] %v7046_v15  ;;  %v7056_v29 = vpop.f32.mrf.mxu1  ;;  %v4035_v35 = vadd.f32 %v5110_v41, %v3986_v40 }
 0x29e   : > { %7173 = vst [vmem:[#allocation18_spill] sm:$0xff] %v7056_v29  ;;  %v4079_v2 = vadd.f32 %v5135_v53, %v4030_v56  ;;  %v4223_v19 = vadd.f32 %v5216_v4, %v4174_v3 }
 0x29f   : > { %v4084_v44 = vadd.f32 %v5138_v31, %v4035_v35  ;;  %v7181_v31 = vld [vmem:[#allocation9_spill] sm:$0xff]  ;;  %v5247_v35 = vadd.f32 %v7183_v32, %v7182_v24 }
 0x2a0   : > { %v4128_v16 = vadd.f32 %v5163_v57, %v4079_v2  ;;  %v4272_v25 = vadd.f32 %v5244_v61, %v4223_v19  ;;  %v5272_v22 = vadd.f32 %v7181_v31, %v7180_v46 }
 0x2a1   : > { %v4133_v27 = vadd.f32 %v5166_v52, %v4084_v44  ;;  %v7177_v40 = vld [vmem:[#allocation15_spill] sm:$0xff] }
 0x2a2   : > { %v4177_v20 = vadd.f32 %v5191_v6, %v4128_v16  ;;  %v7178_v38 = vld [vmem:[#allocation14_spill] sm:$0xff]  ;;  %v4321_v56 = vadd.f32 %v5272_v22, %v4272_v25 }
 0x2a3   : > { %v4182_v59 = vadd.f32 %v5194_v21, %v4133_v27  ;;  %v7186_v27 = vld [vmem:[#allocation11_spill] sm:$0xff] }
 0x2a4   : > { %v7179_v41 = vld [vmem:[#allocation16_spill] sm:$0xff] }
 0x2a5   : > { %v4231_v63 = vadd.f32 %v5222_v58, %v4182_v59  ;;  %v5253_v23 = vadd.f32 %v7179_v41, %v7178_v38  ;;  %v7184_v54 = vld [vmem:[#allocation18_spill] sm:$0xff] }
 0x2a6   : > { %v5281_v53 = vadd.f32 %v7184_v54, %v7048_v26 }
 0x2ae   : > { %v7050_v28 = vpop.f32.mrf.mxu0 }
 0x2af   : > { %7172 = vst [vmem:[#allocation17_spill] sm:$0xff] %v7050_v28  ;;  %v7061_v15 = vpop.f32.mrf.mxu1  ;;  %v3940_v28 = vadd.f32 %v5057_v37, %v5029_v34  ;;  %v4280_v34 = vadd.f32 %v5250_v7, %v4231_v63  ;;  %v7176_v37 = vld [vmem:[#allocation13_spill] sm:$0xff] }
 0x2b0   : > { %v7058_v39 = vpop.f32.mrf.mxu0  ;;  %v5278_v36 = vadd.f32 %v7177_v40, %v7176_v37  ;;  %v4978_v63 = vld [vmem:[%s1926_s27] ss:$0 sm:$0xff] }
 0x2b1   : > { %v7067_v33 = vpop.f32.mrf.mxu1  ;;  %v3989_v29 = vadd.f32 %v5085_v13, %v3940_v28 }
 0x2b2   : > { %v7065_v48 = vpop.f32.mrf.mxu0 }
 0x2b3   : > { %v7077_v43 = vpop.f32.mrf.mxu1  ;;  %v4038_v55 = vadd.f32 %v5113_v30, %v3989_v29  ;;  %v5219_v29 = vadd.f32 %v7175_v11, %v7174_v9 }
 0x2b4   : > { %v7075_v51 = vpop.f32.mrf.mxu0 }
 0x2b5   : > { %v7085_v13 = vpop.f32.mrf.mxu1  ;;  %v4087_v28 = vadd.f32 %v5141_v62, %v4038_v55  ;;  %v4226_v50 = vadd.f32 %v5219_v29, %v4177_v20  ;;  %v4329_v62 = vadd.f32 %v5278_v36, %v4280_v34  ;;  %v5303_v26 = vadd.f32 %v7075_v51, %v7065_v48 }
 0x2b6   : > { %v5304_v47 = vpop.f32.mrf.mxu0  ;;  %v7185_v55 = vld [vmem:[#allocation17_spill] sm:$0xff]  ;;  %v5331_v7 = vadd.f32 %v7085_v13, %v7077_v43 }
 0x2b7   : > { %v5332_v14 = vpop.f32.mrf.mxu1  ;;  %v4136_v5 = vadd.f32 %v5169_v1, %v4087_v28  ;;  %v5300_v21 = vadd.f32 %v7058_v39, %v7185_v55  ;;  %v4275_v45 = vadd.f32 %v5247_v35, %v4226_v50  ;;  %v7187_v28 = vld [vmem:[#allocation12_spill] sm:$0xff] }
 0x2b8   : > { %v5305_v8 = vpop.f32.mrf.mxu0  ;;  %v5275_v1 = vadd.f32 %v7187_v28, %v7186_v27 }
 0x2b9   : > { %v4185_v17 = vadd.f32 %v5197_v60, %v4136_v5  ;;  %v5333_v12 = vpop.f32.mrf.mxu1  ;;  %v5306_v49 = vadd.f32 %v5305_v8, %v5304_v47  ;;  %v4370_v58 = vadd.f32 %v5300_v21, %v4321_v56  ;;  %v5328_v60 = vadd.f32 %v7067_v33, %v7061_v15 }
 0x2ba   : > { %v5307_v10 = vpop.f32.mrf.mxu0  ;;  %v5334_v2 = vadd.f32 %v5333_v12, %v5332_v14  ;;  %v4324_v39 = vadd.f32 %v5275_v1, %v4275_v45  ;;  %v4977_v14 = vld [vmem:[%s1923_s22] ss:$0 sm:$0xff] }
 0x2bb   : > { %v4234_v30 = vadd.f32 %v5225_v18, %v4185_v17  ;;  %v5335_v52 = vpop.f32.mrf.mxu1  ;;  %v4378_v42 = vadd.f32 %v5306_v49, %v4329_v62  ;;  %v4419_v48 = vadd.f32 %v5328_v60, %v4370_v58 }
 0x2bc   : > { %v5308_v44 = vpop.f32.mrf.mxu0  ;;  %v4373_v5 = vadd.f32 %v5303_v26, %v4324_v39 }
 0x2bd   : > { %v4283_v0 = vadd.f32 %v5253_v23, %v4234_v30  ;;  %v5309_v47 = vadd.f32 %v5308_v44, %v5307_v10  ;;  %v5336_v57 = vpop.f32.mrf.mxu1  ;;  %v4427_v6 = vadd.f32 %v5334_v2, %v4378_v42 }
 0x2be   : > { %v5337_v4 = vadd.f32 %v5336_v57, %v5335_v52  ;;  %v4422_v20 = vadd.f32 %v5331_v7, %v4373_v5 }
 0x2bf   : > { %v4332_v59 = vadd.f32 %v5281_v53, %v4283_v0 }
 0x2c1   : > { %v4381_v3 = vadd.f32 %v5309_v47, %v4332_v59 }
 0x2c3   : > { %v4430_v61 = vadd.f32 %v5337_v4, %v4381_v3 }
 0x2ce   : > { %v5366_v8 = vpop.f32.mrf.mxu0 }
 0x2cf   : > { %v4476_v15 = vadd.f32 %v5366_v8, %v4427_v6 }
 0x2d0   : > { %v4467_v33 = vpop.f32.mrf.mxu0 }
 0x2d1   : > { %v4506_v51 = vmul.f32 %v4977_v14, %v4476_v15  ;;  %v4468_v16 = vadd.f32 %v4467_v33, %v4419_v48 }
 0x2d2   : > { %v5367_v17 = vpop.f32.mrf.mxu0 }
 0x2d3   : > { %v4504_v18 = vmul.f32 %v4977_v14, %v4468_v16  ;;  %v4479_v19 = vadd.f32 %v5367_v17, %v4430_v61  ;;  %v4517_v11 = vadd.f32 %v4978_v63, %v4506_v51 }
 0x2d4   : > { %v4470_v9 = vpop.f32.mrf.mxu0 }
 0x2d5   : > { %v4507_v29 = vmul.f32 %v4977_v14, %v4479_v19  ;;  %v4471_v43 = vadd.f32 %v4470_v9, %v4422_v20  ;;  %v4515_v13 = vadd.f32 %v4978_v63, %v4504_v18  ;;  %v4521_v34 = vmax.f32 %v4517_v11, 0.0 }
 0x2d7   : > { %v4518_v10 = vadd.f32 %v4978_v63, %v4507_v29  ;;  %v4505_v12 = vmul.f32 %v4977_v14, %v4471_v43  ;;  %v4519_v36 = vmax.f32 %v4515_v13, 0.0 }
 0x2d9   : > { %v4522_v37 = vmax.f32 %v4518_v10, 0.0  ;;  %v4516_v40 = vadd.f32 %v4978_v63, %v4505_v12 }
 0x2db   : > { %v4999_v38 = vpack.c.bf16 %v4522_v37, %v4521_v34  ;;  %v4520_v41 = vmax.f32 %v4516_v40, 0.0  ;;  %4549 = sbr.rel (!%p5784_p6) target bundleno = 744 (0x2e8), region = 89 }
 0x2dd   : > { %5001 = vst [vmem:[%s1907_s29 + $0x8] sm:$0xff] %v4999_v38   ;;  %v4994_v23 = vpack.c.bf16 %v4520_v41, %v4519_v36 }
 0x2df   : > { %4995 = vst [vmem:[%s1907_s29] sm:$0xff] %v4994_v23  }
 0x2e4   : > { %v4575_v31 = vld [vmem:[%s1907_s29 + $0x8] sm:$0xf]  ;;  %v4577_v22 = vld [vmem:[%s1907_s29 + $0xc] sm:$0xf] }
 0x2e5   : > { %4576 = vst [vmem:[%s4554_s5 + $0x10] sm:$0xf] %v4575_v31  ;;  %4578 = vst [vmem:[%s4554_s5 + $0x18] sm:$0xf] %v4577_v22 }
 0x2e6   : > { %v4571_v25 = vld [vmem:[%s1907_s29] sm:$0xf]  ;;  %v4573_v46 = vld [vmem:[%s1907_s29 + $0x4] sm:$0xf] }
 0x2e7   : > { %4572 = vst [vmem:[%s4554_s5] sm:$0xf] %v4571_v25  ;;  %4574 = vst [vmem:[%s4554_s5 + $0x8] sm:$0xf] %v4573_v46 }
 0x2e8 PF: > { %s14_s19 = sadd.s32 1, %s5722_s19   ;;  %s7188_s15 = smov %s5710_s16 }
 0x2e9   : > { %p11_p12 = scmp.ge.s32.totalorder %s14_s19, 4   ;;  %s7189_s16 = smov %s5789_s25 }
 0x2ea   : > { %s7190_s17 = smov %s5718_s18  ;;  %s7191_s18 = smov %s7193_s20 }
 0x2eb   :  { %13 = sbr.rel (!%p11_p12) target bundleno = 3 (0x3), region = 170 }

</bundles_post_ra>
